<compile_context>
chip_gen: v6e
topology: v6e:2x2x1
jax: 0.10.0
libtpu: 0.0.40
codegen_flags: <defaults>
</compile_context>

<pallas_src>
import math
import functools
import numpy as np

import jax
import jax.numpy as jnp
from jax.experimental import pallas as pl
from jax.experimental.pallas import tpu as pltpu


def _round_up(x, m):
    return ((x + m - 1) // m) * m


# ----------------------------------------------------------------------------
# Kernel 1: tiled matmul + bias + optional LeakyReLU  (1x1 conv rows, final FC)
# ----------------------------------------------------------------------------
def _matmul_kernel(x_ref, w_ref, b_ref, o_ref, *, negative_slope):
    acc = jnp.dot(x_ref[...], w_ref[...], preferred_element_type=jnp.float32)
    acc = acc + b_ref[...]
    if negative_slope is not None:
        acc = jnp.where(acc >= 0.0, acc, acc * negative_slope)
    o_ref[...] = acc.astype(o_ref.dtype)


def matmul_bias_act(x, w, b, negative_slope=None, out_dtype=jnp.float32,
                    tm=2048):
    """x: (M, K) bf16, w: (K, N) bf16, b: (N,) f32 -> (M, N) out_dtype.

    M is tiled over a 1-D 'parallel' grid; K and N stay whole (they are small
    for every layer of this critic).  tm=2048 keeps per-step overhead and DMA
    count low for large M while the per-block VMEM stays in the tens of KB.
    """
    M, K = x.shape
    Kw, N = w.shape
    assert K == Kw
    mt = min(tm, _round_up(M, 8))
    Mp = _round_up(M, mt)
    if Mp != M:                            # only the tiny final-FC pads here
        x = jnp.pad(x, ((0, Mp - M), (0, 0)))
    b2 = b.reshape(1, N).astype(jnp.float32)
    out = pl.pallas_call(
        functools.partial(_matmul_kernel, negative_slope=negative_slope),
        out_shape=jax.ShapeDtypeStruct((Mp, N), out_dtype),
        grid=(Mp // mt,),
        in_specs=[
            pl.BlockSpec((mt, K), lambda i: (i, 0)),
            pl.BlockSpec((K, N), lambda i: (0, 0)),
            pl.BlockSpec((1, N), lambda i: (0, 0)),
        ],
        out_specs=pl.BlockSpec((mt, N), lambda i: (i, 0)),
        compiler_params=pltpu.CompilerParams(dimension_semantics=("parallel",)),
    )(x, w, b2)
    return out[:M]


def equalized_conv1x1_rowdense(x, weight, bias, negative_slope=None,
                               out_dtype=jnp.bfloat16):
    """1x1 EqualizedConv2d as a lane-dense row matmul.

    x: (B,H,W,Cin) NHWC.  weight: (O, Cin, 1, 1) torch layout (unscaled).
    The per-pixel (Cin -> O) matmul is lifted to a per-row (W*Cin -> W*O)
    matmul (Kronecker with I_W) so the output store is lane-dense
    (W*O >= 128 lanes) and K grows from Cin to W*Cin.
    """
    B, H, W, Cin = x.shape
    O = weight.shape[0]
    c = 1.0 / math.sqrt(Cin)
    w2 = weight[:, :, 0, 0].T * c                                   # (Cin, O)
    eye_w = jnp.asarray(np.eye(W, dtype=np.float32))
    kron = jnp.einsum('wv,io->wivo', eye_w, w2).reshape(W * Cin, W * O)
    b_t = jnp.tile(bias.astype(jnp.float32), (W,))                  # (W*O,)
    out = matmul_bias_act(x.reshape(B * H, W * Cin).astype(jnp.bfloat16),
                          kron.astype(jnp.bfloat16), b_t,
                          negative_slope=negative_slope, out_dtype=out_dtype)
    return out.reshape(B, H, W, O)


# ----------------------------------------------------------------------------
# Kernel 2: fused 3x3 "same" EqualizedConv2d (+ bias + optional LeakyReLU)
# ----------------------------------------------------------------------------
def _conv3x3_body(x_ref, m_ref, b_ref, e_ref, o_ref, negative_slope):
    x2 = x_ref[0]                                   # (H, W*Cin) bf16
    H = x2.shape[0]
    # 0/1 row-shift matrices: handle the dy = 0 / 2 kernel rows and the
    # implicit zero padding at the top / bottom image rows.
    row = jax.lax.broadcasted_iota(jnp.int32, (H, H), 0)
    col = jax.lax.broadcasted_iota(jnp.int32, (H, H), 1)
    s_m1 = (row == col + 1).astype(jnp.bfloat16)    # out row y <- in row y-1
    s_p1 = (col == row + 1).astype(jnp.bfloat16)    # out row y <- in row y+1
    x_m1 = jnp.dot(s_m1, x2, preferred_element_type=jnp.float32
                   ).astype(jnp.bfloat16)
    x_p1 = jnp.dot(s_p1, x2, preferred_element_type=jnp.float32
                   ).astype(jnp.bfloat16)
    # One K = W*Cin matmul per kernel row dy (dx taps + channel mixing are
    # folded into the banded matrices m_ref[dy]); accumulate in f32.
    acc = jnp.dot(x2, m_ref[1], preferred_element_type=jnp.float32)
    acc = acc + jnp.dot(x_m1, m_ref[0], preferred_element_type=jnp.float32)
    acc = acc + jnp.dot(x_p1, m_ref[2], preferred_element_type=jnp.float32)
    acc = acc + b_ref[...]
    if e_ref is not None:
        acc = acc + e_ref[...]
    if negative_slope is not None:
        acc = jnp.where(acc >= 0.0, acc, acc * negative_slope)
    o_ref[0] = acc.astype(o_ref.dtype)              # lane-dense (H, W*Cout)


def _conv3x3_kernel(x_ref, m_ref, b_ref, o_ref, *, negative_slope):
    _conv3x3_body(x_ref, m_ref, b_ref, None, o_ref, negative_slope)


def _conv3x3_extra_kernel(x_ref, m_ref, b_ref, e_ref, o_ref, *, negative_slope):
    _conv3x3_body(x_ref, m_ref, b_ref, e_ref, o_ref, negative_slope)


def equalized_conv3x3(x, weight, bias, negative_slope=None, extra=None,
                      fan_in=None, out_dtype=jnp.bfloat16):
    """3x3 "same" EqualizedConv2d, fused bias + optional LeakyReLU.

    x: (B,H,W,Cin) NHWC.  weight: (O, Cin, 3, 3) torch layout (unscaled).
    extra: optional (H, W*O) f32 additive term (used to fold the constant
           minibatch-std channel of the final conv).
    fan_in: fan-in for the equalized-lr scale (defaults to Cin).
    """
    B, H, W, Cin = x.shape
    O = weight.shape[0]
    assert weight.shape[1] == Cin
    fan = Cin if fan_in is None else fan_in
    c = 1.0 / math.sqrt(fan * 9)                                   # equalized scale
    wt = jnp.transpose(weight, (2, 3, 1, 0)) * c                   # (3,3,Cin,O)
    # sel[dx, xin, xout] = 1  iff  xin == xout + dx - 1 (inside the image);
    # missing border taps simply have no row -> implicit zero padding along W.
    sel = np.zeros((3, W, W), np.float32)
    for dx in range(3):
        for xo in range(W):
            xi = xo + dx - 1
            if 0 <= xi < W:
                sel[dx, xi, xo] = 1.0
    m = jnp.einsum('dax,edio->eaixo', jnp.asarray(sel), wt)        # (3,W,Cin,W,O)
    m = m.reshape(3, W * Cin, W * O).astype(jnp.bfloat16)
    b_t = jnp.tile(bias.astype(jnp.float32), (W,)).reshape(1, W * O)
    x_rows = x.reshape(B, H, W * Cin).astype(jnp.bfloat16)         # free reshape

    in_specs = [
        pl.BlockSpec((1, H, W * Cin), lambda b: (b, 0, 0)),
        pl.BlockSpec((3, W * Cin, W * O), lambda b: (0, 0, 0)),
        pl.BlockSpec((1, W * O), lambda b: (0, 0)),
    ]
    args = [x_rows, m, b_t]
    if extra is None:
        kernel = functools.partial(_conv3x3_kernel,
                                   negative_slope=negative_slope)
    else:
        kernel = functools.partial(_conv3x3_extra_kernel,
                                   negative_slope=negative_slope)
        in_specs.append(pl.BlockSpec((H, W * O), lambda b: (0, 0)))
        args.append(extra.astype(jnp.float32))

    # TODO(synk): for resolutions >= 64 add an H-tile grid axis (halo handled
    # by the same shift-matrix trick) to bound VMEM on v7x (64 MiB) and feed
    # both of its TensorCores from one image; at <=16x16 per-image blocks are
    # tiny and grid=(B,) already fills the cores for B>=2.
    out = pl.pallas_call(
        kernel,
        out_shape=jax.ShapeDtypeStruct((B, H, W * O), out_dtype),
        grid=(B,),
        in_specs=in_specs,
        out_specs=pl.BlockSpec((1, H, W * O), lambda b: (b, 0, 0)),
        compiler_params=pltpu.CompilerParams(dimension_semantics=("parallel",)),
    )(*args)
    return out.reshape(B, H, W, O)


# ----------------------------------------------------------------------------
# Kernel 3: fused CriticBlock tail
#   out = ( downsample(h) + conv1x1(downsample(x)) + b_res ) * 1/sqrt(2)
# ----------------------------------------------------------------------------
def _downsample_1d(n):
    """1-D smooth-downsample operator (n//2, n): replication-pad-1 +
    [1,2,1]/4 blur + bilinear 0.5x (== average of each output's 2 samples)."""
    A = np.zeros((n // 2, n), np.float64)
    for o in range(n // 2):
        for a in range(2):
            p = 2 * o + a
            for d, kv in ((-1, 1.0), (0, 2.0), (1, 1.0)):
                src = min(max(p + d, 0), n - 1)
                A[o, src] += 0.5 * kv / 4.0
    return A


def _block_tail_kernel(h_ref, x_ref, ah_ref, mh_ref, mr_ref, b_ref, o_ref, *,
                       scale):
    # W-direction downsample of the main path + (W-downsample o 1x1 conv) of
    # the residual path: two lane-dense bf16 matmuls with K = W*C.
    t = jnp.dot(h_ref[0], mh_ref[...], preferred_element_type=jnp.float32)
    t = t + jnp.dot(x_ref[0], mr_ref[...], preferred_element_type=jnp.float32)
    # H-direction downsample, bias, 1/sqrt(2); one lane-dense store.
    out = jnp.dot(ah_ref[...], t.astype(jnp.bfloat16),
                  preferred_element_type=jnp.float32)
    o_ref[0] = ((out + b_ref[...]) * scale).astype(o_ref.dtype)


def critic_block_tail(h, x, res_w, res_b, out_dtype=jnp.bfloat16):
    B, H, W, Cin = x.shape
    Cout = h.shape[-1]
    Ho, Wo = H // 2, W // 2
    A_h = jnp.asarray(_downsample_1d(H), jnp.float32)               # (Ho, H)
    A_w = jnp.asarray(_downsample_1d(W), jnp.float32)               # (Wo, W)
    c = 1.0 / math.sqrt(Cin)                                        # 1x1 conv scale
    wres = res_w[:, :, 0, 0].T * c                                  # (Cin, Cout)
    eye_c = jnp.asarray(np.eye(Cout, dtype=np.float32))
    # Kron(A_w^T, I_Cout): (W*Cout, Wo*Cout) -- main-path W downsample
    m_h = jnp.einsum('vw,cd->wcvd', A_w, eye_c).reshape(W * Cout, Wo * Cout)
    # Kron(A_w^T, Wres):   (W*Cin, Wo*Cout)  -- residual W downsample + 1x1 conv
    m_r = jnp.einsum('vw,io->wivo', A_w, wres).reshape(W * Cin, Wo * Cout)
    b_t = jnp.tile(res_b.astype(jnp.float32), (Wo,)).reshape(1, Wo * Cout)
    out = pl.pallas_call(
        functools.partial(_block_tail_kernel, scale=1.0 / math.sqrt(2.0)),
        out_shape=jax.ShapeDtypeStruct((B, Ho, Wo * Cout), out_dtype),
        grid=(B,),
        in_specs=[
            pl.BlockSpec((1, H, W * Cout), lambda b: (b, 0, 0)),
            pl.BlockSpec((1, H, W * Cin), lambda b: (b, 0, 0)),
            pl.BlockSpec((Ho, H), lambda b: (0, 0)),
            pl.BlockSpec((W * Cout, Wo * Cout), lambda b: (0, 0)),
            pl.BlockSpec((W * Cin, Wo * Cout), lambda b: (0, 0)),
            pl.BlockSpec((1, Wo * Cout), lambda b: (0, 0)),
        ],
        out_specs=pl.BlockSpec((1, Ho, Wo * Cout), lambda b: (b, 0, 0)),
        compiler_params=pltpu.CompilerParams(dimension_semantics=("parallel",)),
    )(h.reshape(B, H, W * Cout).astype(jnp.bfloat16),
      x.reshape(B, H, W * Cin).astype(jnp.bfloat16),
      A_h.astype(jnp.bfloat16),
      m_h.astype(jnp.bfloat16),
      m_r.astype(jnp.bfloat16),
      b_t)
    return out.reshape(B, Ho, Wo, Cout)


# ----------------------------------------------------------------------------
# Kernel 4: minibatch std -> single SMEM scalar
# ----------------------------------------------------------------------------
def _mbstd_kernel(x_ref, o_ref):
    x = x_ref[...].astype(jnp.float32)                 # (B, F)
    n = x.shape[0]
    denom = float(n - 1) if n > 1 else 1.0             # torch std: ddof=1
    mean = jnp.mean(x, axis=0, keepdims=True)
    var = jnp.sum((x - mean) ** 2, axis=0, keepdims=True) / denom
    o_ref[0, 0] = jnp.mean(jnp.sqrt(var))


def minibatch_std_scalar(x_nhwc):
    B = x_nhwc.shape[0]
    x2d = x_nhwc.reshape(B, -1)
    out = pl.pallas_call(
        _mbstd_kernel,
        out_shape=jax.ShapeDtypeStruct((1, 1), jnp.float32),
        in_specs=[pl.BlockSpec(memory_space=pltpu.MemorySpace.VMEM)],
        out_specs=pl.BlockSpec(memory_space=pltpu.MemorySpace.SMEM),
    )(x2d)
    return out[0, 0]


# ----------------------------------------------------------------------------
# Critic: parameters + forward
# ----------------------------------------------------------------------------
def init_critic_params(key, log_resolution, n_feature=16, max_feature=64,
                       height=16, width=16):
    features = [min(max_feature, n_feature * 2 ** i)
                for i in range(log_resolution - 1)]
    keys = iter(jax.random.split(key, 64))

    def conv_params(i, o, k):
        return {"w": jax.random.normal(next(keys), (o, i, k, k), jnp.float32),
                "b": jnp.ones((o,), jnp.float32)}

    params = {"from_rgb": conv_params(3, features[0], 1)}
    blocks = []
    for i in range(len(features) - 1):
        blocks.append({
            "res":   conv_params(features[i], features[i + 1], 1),
            "conv1": conv_params(features[i], features[i], 3),
            "conv2": conv_params(features[i], features[i + 1], 3),
        })
    params["blocks"] = blocks

    final_feature = features[-1] + 1
    params["conv"] = conv_params(final_feature, final_feature, 3)

    n_blocks = len(features) - 1
    fh, fw = height // (2 ** n_blocks), width // (2 ** n_blocks)
    in_f = final_feature * fh * fw
    # EqualizedLinear weight generated in torch (NCHW-flatten) layout; permute
    # its columns ONCE to NHWC-flatten order so the forward pass never
    # transposes the activation before the final flatten.
    w_nchw = jax.random.normal(next(keys), (1, in_f), jnp.float32)
    perm = np.arange(in_f).reshape(final_feature, fh, fw).transpose(1, 2, 0).reshape(-1)
    params["final"] = {"w": w_nchw[:, perm],
                       "b": jnp.zeros((1,), jnp.float32)}
    return params, features


def critic_forward(params, x_nchw):
    # NCHW (PyTorch convention) -> NHWC; channels go on the 128-lane axis.
    x = jnp.transpose(x_nchw, (0, 2, 3, 1)).astype(jnp.bfloat16)
    B = x.shape[0]

    # from_rgb: 1x1 EqualizedConv2d + LeakyReLU(0.2), lane-dense row matmul.
    x = equalized_conv1x1_rowdense(x, params["from_rgb"]["w"],
                                   params["from_rgb"]["b"], negative_slope=0.2)

    for bp in params["blocks"]:
        # main path: two fused 3x3 EqualizedConv2d + LeakyReLU kernels
        h = equalized_conv3x3(x, bp["conv1"]["w"], bp["conv1"]["b"],
                              negative_slope=0.2)
        h = equalized_conv3x3(h, bp["conv2"]["w"], bp["conv2"]["b"],
                              negative_slope=0.2)
        # fused tail: downsample(h), downsample(x)->1x1 conv, (+)*1/sqrt(2)
        x = critic_block_tail(h, x, bp["res"]["w"], bp["res"]["b"])

    _, Hc, Wc, C = x.shape
    # minibatch-std scalar (std over batch, ddof=1, mean over C,H,W)
    s = minibatch_std_scalar(x)

    # Final 3x3 EqualizedConv2d.  The extra input channel is the constant s
    # everywhere, so its contribution is s * T with T a fixed per-position
    # tap-sum tensor of that channel's weights -- folding it avoids the
    # full-activation channel concatenate in HBM.
    w_full = params["conv"]["w"]                       # (C+1, C+1, 3, 3)
    b_full = params["conv"]["b"]
    O_f, Cin_f = w_full.shape[0], w_full.shape[1]
    c_f = 1.0 / math.sqrt(Cin_f * 9)
    vy = np.zeros((3, Hc), np.float32)
    vx = np.zeros((3, Wc), np.float32)
    for d in range(3):
        for yy in range(Hc):
            if 0 <= yy + d - 1 < Hc:
                vy[d, yy] = 1.0
        for xx in range(Wc):
            if 0 <= xx + d - 1 < Wc:
                vx[d, xx] = 1.0
    w_std = w_full[:, Cin_f - 1, :, :] * c_f           # (O, 3, 3)
    T = jnp.einsum('ay,bx,oab->yxo', jnp.asarray(vy), jnp.asarray(vx), w_std)
    extra = (s * T).reshape(Hc, Wc * O_f)              # (H, W*O) f32
    x = equalized_conv3x3(x, w_full[:, :Cin_f - 1], b_full,
                          negative_slope=None, extra=extra, fan_in=Cin_f)

    # flatten in NHWC order (final weight columns were pre-permuted to match
    # torch's NCHW reshape(B, -1)), then EqualizedLinear.
    x_flat = x.reshape(B, -1)
    wf = params["final"]["w"]                          # (1, in_f)
    c = 1.0 / math.sqrt(wf.shape[1])
    out = matmul_bias_act(x_flat.astype(jnp.bfloat16),
                          (wf.T * c).astype(jnp.bfloat16),
                          params["final"]["b"], negative_slope=None,
                          out_dtype=jnp.float32)
    return out                                         # (B, 1)


if __name__ == "__main__":
    key = jax.random.PRNGKey(0)
    pkey, xkey = jax.random.split(key)

    log_resolution = 4                 # features = [16, 32, 64], 2 critic blocks
    B = 2
    H = W = 2 ** log_resolution        # 16x16 input

    params, features = init_critic_params(
        pkey, log_resolution, n_feature=16, max_feature=64, height=H, width=W)
    x = jax.random.normal(xkey, (B, 3, H, W), jnp.float32)

    fwd = jax.jit(critic_forward)
    out = jax.block_until_ready(fwd(params, x))
    assert out.shape == (B, 1), out.shape
    assert bool(jnp.all(jnp.isfinite(out)))
    print("KERNEL_OK")
</pallas_src>

<mosaic_0001>
module attributes {stable_mosaic.version = 11 : i64} {
  func.func @_matmul_kernel(%arg0: i32, %arg1: memref<32x48xbf16, #tpu.memory_space<vmem>>, %arg2: memref<48x256xbf16, #tpu.memory_space<vmem>>, %arg3: memref<1x256xf32, #tpu.memory_space<vmem>>, %arg4: memref<32x256xbf16, #tpu.memory_space<vmem>>) attributes {dimension_semantics = [#tpu.dimension_semantics<parallel>], iteration_bounds = array<i64: 1>, scalar_prefetch = 0 : i64, scratch_operands = 0 : i64, tpu.core_type = #tpu.core_type<tc>, window_params = [{transform_indices = @transform_0, window_bounds = array<i64: 32, 48>}, {pipeline_mode = #tpu.pipeline_mode<synchronous>, transform_indices = @transform_1, window_bounds = array<i64: 48, 256>}, {pipeline_mode = #tpu.pipeline_mode<synchronous>, transform_indices = @transform_2, window_bounds = array<i64: 1, 256>}, {transform_indices = @transform_3, window_bounds = array<i64: 32, 256>}]} {
    %c0 = arith.constant 0 : index
    %c0_0 = arith.constant 0 : index
    %0 = vector.load %arg1[%c0, %c0_0] : memref<32x48xbf16, #tpu.memory_space<vmem>>, vector<32x48xbf16>
    %c0_1 = arith.constant 0 : index
    %c0_2 = arith.constant 0 : index
    %1 = vector.load %arg2[%c0_1, %c0_2] : memref<48x256xbf16, #tpu.memory_space<vmem>>, vector<48x256xbf16>
    %cst = arith.constant dense<0.000000e+00> : vector<32x256xf32>
    %2 = tpu.matmul %0, %1, %cst {dimension_numbers = #tpu.dot_dimension_numbers<[1], [0], [0], [1], [0, 0, 1, 1], [], []>} : vector<32x48xbf16>, vector<48x256xbf16>, vector<32x256xf32> -> vector<32x256xf32>
    %c0_3 = arith.constant 0 : index
    %c0_4 = arith.constant 0 : index
    %3 = vector.load %arg3[%c0_3, %c0_4] : memref<1x256xf32, #tpu.memory_space<vmem>>, vector<1x256xf32>
    %4 = vector.broadcast %3 : vector<1x256xf32> to vector<32x256xf32>
    %5 = arith.addf %2, %4 : vector<32x256xf32>
    %cst_5 = arith.constant 0.000000e+00 : f32
    %6 = vector.broadcast %cst_5 : f32 to vector<32x256xf32>
    %7 = arith.cmpf oge, %5, %6 : vector<32x256xf32>
    %cst_6 = arith.constant 2.000000e-01 : f32
    %8 = vector.broadcast %cst_6 : f32 to vector<32x256xf32>
    %9 = arith.mulf %5, %8 : vector<32x256xf32>
    %10 = arith.select %7, %5, %9 : vector<32x256xi1>, vector<32x256xf32>
    %11 = arith.truncf %10 : vector<32x256xf32> to vector<32x256xbf16>
    %c0_7 = arith.constant 0 : index
    %c0_8 = arith.constant 0 : index
    %12 = vector.load %arg4[%c0_7, %c0_8] : memref<32x256xbf16, #tpu.memory_space<vmem>>, vector<32x256xbf16>
    tpu.vector_store %arg4[%c0_7, %c0_8], %11 {strides = array<i32>} : memref<32x256xbf16, #tpu.memory_space<vmem>>, vector<32x256xbf16>,
    return
  }
  func.func @transform_0(%arg0: i32) -> (i32, i32) {
    %c0_i32 = arith.constant 0 : i32
    %c0_i32_0 = arith.constant 0 : i32
    return %arg0, %c0_i32 : i32, i32
  }
  func.func @transform_1(%arg0: i32) -> (i32, i32) {
    %c0_i32 = arith.constant 0 : i32
    %c0_i32_0 = arith.constant 0 : i32
    %c0_i32_1 = arith.constant 0 : i32
    return %c0_i32, %c0_i32_0 : i32, i32
  }
  func.func @transform_2(%arg0: i32) -> (i32, i32) {
    %c0_i32 = arith.constant 0 : i32
    %c0_i32_0 = arith.constant 0 : i32
    %c0_i32_1 = arith.constant 0 : i32
    return %c0_i32, %c0_i32_0 : i32, i32
  }
  func.func @transform_3(%arg0: i32) -> (i32, i32) {
    %c0_i32 = arith.constant 0 : i32
    %c0_i32_0 = arith.constant 0 : i32
    return %arg0, %c0_i32 : i32, i32
  }
}

module attributes {stable_mosaic.version = 11 : i64} {
  func.func @_conv3x3_kernel(%arg0: i32, %arg1: memref<1x16x256xbf16, #tpu.memory_space<vmem>>, %arg2: memref<3x256x256xbf16, #tpu.memory_space<vmem>>, %arg3: memref<1x256xf32, #tpu.memory_space<vmem>>, %arg4: memref<1x16x256xbf16, #tpu.memory_space<vmem>>) attributes {dimension_semantics = [#tpu.dimension_semantics<parallel>], iteration_bounds = array<i64: 2>, scalar_prefetch = 0 : i64, scratch_operands = 0 : i64, tpu.core_type = #tpu.core_type<tc>, window_params = [{transform_indices = @transform_0, window_bounds = array<i64: 1, 16, 256>}, {pipeline_mode = #tpu.pipeline_mode<synchronous>, transform_indices = @transform_1, window_bounds = array<i64: 3, 256, 256>}, {pipeline_mode = #tpu.pipeline_mode<synchronous>, transform_indices = @transform_2, window_bounds = array<i64: 1, 256>}, {transform_indices = @transform_3, window_bounds = array<i64: 1, 16, 256>}]} {
    %c0 = arith.constant 0 : index
    %c0_0 = arith.constant 0 : index
    %c0_1 = arith.constant 0 : index
    %0 = vector.load %arg1[%c0, %c0_0, %c0_1] : memref<1x16x256xbf16, #tpu.memory_space<vmem>>, vector<1x16x256xbf16>
    %1 = vector.shape_cast %0 : vector<1x16x256xbf16> to vector<16x256xbf16>
    %2 = tpu.iota {dimensions = array<i32: 0>} : vector<16x16xi32>
    %3 = tpu.iota {dimensions = array<i32: 1>} : vector<16x16xi32>
    %c1_i32 = arith.constant 1 : i32
    %4 = vector.broadcast %c1_i32 : i32 to vector<16x16xi32>
    %5 = arith.addi %3, %4 : vector<16x16xi32>
    %6 = arith.cmpi eq, %2, %5 : vector<16x16xi32>
    %7 = arith.extui %6 : vector<16x16xi1> to vector<16x16xi32>
    %8 = arith.sitofp %7 : vector<16x16xi32> to vector<16x16xf32>
    %9 = arith.truncf %8 : vector<16x16xf32> to vector<16x16xbf16>
    %c1_i32_2 = arith.constant 1 : i32
    %10 = vector.broadcast %c1_i32_2 : i32 to vector<16x16xi32>
    %11 = arith.addi %2, %10 : vector<16x16xi32>
    %12 = arith.cmpi eq, %3, %11 : vector<16x16xi32>
    %13 = arith.extui %12 : vector<16x16xi1> to vector<16x16xi32>
    %14 = arith.sitofp %13 : vector<16x16xi32> to vector<16x16xf32>
    %15 = arith.truncf %14 : vector<16x16xf32> to vector<16x16xbf16>
    %cst = arith.constant dense<0.000000e+00> : vector<16x256xf32>
    %16 = tpu.matmul %9, %1, %cst {dimension_numbers = #tpu.dot_dimension_numbers<[1], [0], [0], [1], [0, 0, 1, 1], [], []>} : vector<16x16xbf16>, vector<16x256xbf16>, vector<16x256xf32> -> vector<16x256xf32>
    %17 = arith.truncf %16 : vector<16x256xf32> to vector<16x256xbf16>
    %cst_3 = arith.constant dense<0.000000e+00> : vector<16x256xf32>
    %18 = tpu.matmul %15, %1, %cst_3 {dimension_numbers = #tpu.dot_dimension_numbers<[1], [0], [0], [1], [0, 0, 1, 1], [], []>} : vector<16x16xbf16>, vector<16x256xbf16>, vector<16x256xf32> -> vector<16x256xf32>
    %19 = arith.truncf %18 : vector<16x256xf32> to vector<16x256xbf16>
    %c1 = arith.constant 1 : index
    %c0_4 = arith.constant 0 : index
    %c0_5 = arith.constant 0 : index
    %20 = vector.load %arg2[%c1, %c0_4, %c0_5] : memref<3x256x256xbf16, #tpu.memory_space<vmem>>, vector<1x256x256xbf16>
    %21 = vector.shape_cast %20 : vector<1x256x256xbf16> to vector<256x256xbf16>
    %cst_6 = arith.constant dense<0.000000e+00> : vector<16x256xf32>
    %22 = tpu.matmul %1, %21, %cst_6 {dimension_numbers = #tpu.dot_dimension_numbers<[1], [0], [0], [1], [0, 0, 1, 1], [], []>} : vector<16x256xbf16>, vector<256x256xbf16>, vector<16x256xf32> -> vector<16x256xf32>
    %c0_7 = arith.constant 0 : index
    %c0_8 = arith.constant 0 : index
    %c0_9 = arith.constant 0 : index
    %23 = vector.load %arg2[%c0_7, %c0_8, %c0_9] : memref<3x256x256xbf16, #tpu.memory_space<vmem>>, vector<1x256x256xbf16>
    %24 = vector.shape_cast %23 : vector<1x256x256xbf16> to vector<256x256xbf16>
    %cst_10 = arith.constant dense<0.000000e+00> : vector<16x256xf32>
    %25 = tpu.matmul %17, %24, %cst_10 {dimension_numbers = #tpu.dot_dimension_numbers<[1], [0], [0], [1], [0, 0, 1, 1], [], []>} : vector<16x256xbf16>, vector<256x256xbf16>, vector<16x256xf32> -> vector<16x256xf32>
    %26 = arith.addf %22, %25 : vector<16x256xf32>
    %c2 = arith.constant 2 : index
    %c0_11 = arith.constant 0 : index
    %c0_12 = arith.constant 0 : index
    %27 = vector.load %arg2[%c2, %c0_11, %c0_12] : memref<3x256x256xbf16, #tpu.memory_space<vmem>>, vector<1x256x256xbf16>
    %28 = vector.shape_cast %27 : vector<1x256x256xbf16> to vector<256x256xbf16>
    %cst_13 = arith.constant dense<0.000000e+00> : vector<16x256xf32>
    %29 = tpu.matmul %19, %28, %cst_13 {dimension_numbers = #tpu.dot_dimension_numbers<[1], [0], [0], [1], [0, 0, 1, 1], [], []>} : vector<16x256xbf16>, vector<256x256xbf16>, vector<16x256xf32> -> vector<16x256xf32>
    %30 = arith.addf %26, %29 : vector<16x256xf32>
    %c0_14 = arith.constant 0 : index
    %c0_15 = arith.constant 0 : index
    %31 = vector.load %arg3[%c0_14, %c0_15] : memref<1x256xf32, #tpu.memory_space<vmem>>, vector<1x256xf32>
    %32 = vector.broadcast %31 : vector<1x256xf32> to vector<16x256xf32>
    %33 = arith.addf %30, %32 : vector<16x256xf32>
    %cst_16 = arith.constant 0.000000e+00 : f32
    %34 = vector.broadcast %cst_16 : f32 to vector<16x256xf32>
    %35 = arith.cmpf oge, %33, %34 : vector<16x256xf32>
    %cst_17 = arith.constant 2.000000e-01 : f32
    %36 = vector.broadcast %cst_17 : f32 to vector<16x256xf32>
    %37 = arith.mulf %33, %36 : vector<16x256xf32>
    %38 = arith.select %35, %33, %37 : vector<16x256xi1>, vector<16x256xf32>
    %39 = arith.truncf %38 : vector<16x256xf32> to vector<16x256xbf16>
    %c0_18 = arith.constant 0 : index
    %c0_19 = arith.constant 0 : index
    %c0_20 = arith.constant 0 : index
    %40 = vector.load %arg4[%c0_18, %c0_19, %c0_20] : memref<1x16x256xbf16, #tpu.memory_space<vmem>>, vector<1x16x256xbf16>
    %41 = vector.shape_cast %40 : vector<1x16x256xbf16> to vector<16x256xbf16>
    %42 = vector.shape_cast %39 : vector<16x256xbf16> to vector<1x16x256xbf16>
    tpu.vector_store %arg4[%c0_18, %c0_19, %c0_20], %42 {strides = array<i32>} : memref<1x16x256xbf16, #tpu.memory_space<vmem>>, vector<1x16x256xbf16>,
    return
  }
  func.func @transform_0(%arg0: i32) -> (i32, i32, i32) {
    %c0_i32 = arith.constant 0 : i32
    %c0_i32_0 = arith.constant 0 : i32
    %c0_i32_1 = arith.constant 0 : i32
    return %arg0, %c0_i32, %c0_i32_0 : i32, i32, i32
  }
  func.func @transform_1(%arg0: i32) -> (i32, i32, i32) {
    %c0_i32 = arith.constant 0 : i32
    %c0_i32_0 = arith.constant 0 : i32
    %c0_i32_1 = arith.constant 0 : i32
    %c0_i32_2 = arith.constant 0 : i32
    return %c0_i32, %c0_i32_0, %c0_i32_1 : i32, i32, i32
  }
  func.func @transform_2(%arg0: i32) -> (i32, i32) {
    %c0_i32 = arith.constant 0 : i32
    %c0_i32_0 = arith.constant 0 : i32
    %c0_i32_1 = arith.constant 0 : i32
    return %c0_i32, %c0_i32_0 : i32, i32
  }
  func.func @transform_3(%arg0: i32) -> (i32, i32, i32) {
    %c0_i32 = arith.constant 0 : i32
    %c0_i32_0 = arith.constant 0 : i32
    %c0_i32_1 = arith.constant 0 : i32
    return %arg0, %c0_i32, %c0_i32_0 : i32, i32, i32
  }
}

module attributes {stable_mosaic.version = 11 : i64} {
  func.func @_conv3x3_kernel(%arg0: i32, %arg1: memref<1x16x256xbf16, #tpu.memory_space<vmem>>, %arg2: memref<3x256x512xbf16, #tpu.memory_space<vmem>>, %arg3: memref<1x512xf32, #tpu.memory_space<vmem>>, %arg4: memref<1x16x512xbf16, #tpu.memory_space<vmem>>) attributes {dimension_semantics = [#tpu.dimension_semantics<parallel>], iteration_bounds = array<i64: 2>, scalar_prefetch = 0 : i64, scratch_operands = 0 : i64, tpu.core_type = #tpu.core_type<tc>, window_params = [{transform_indices = @transform_0, window_bounds = array<i64: 1, 16, 256>}, {pipeline_mode = #tpu.pipeline_mode<synchronous>, transform_indices = @transform_1, window_bounds = array<i64: 3, 256, 512>}, {pipeline_mode = #tpu.pipeline_mode<synchronous>, transform_indices = @transform_2, window_bounds = array<i64: 1, 512>}, {transform_indices = @transform_3, window_bounds = array<i64: 1, 16, 512>}]} {
    %c0 = arith.constant 0 : index
    %c0_0 = arith.constant 0 : index
    %c0_1 = arith.constant 0 : index
    %0 = vector.load %arg1[%c0, %c0_0, %c0_1] : memref<1x16x256xbf16, #tpu.memory_space<vmem>>, vector<1x16x256xbf16>
    %1 = vector.shape_cast %0 : vector<1x16x256xbf16> to vector<16x256xbf16>
    %2 = tpu.iota {dimensions = array<i32: 0>} : vector<16x16xi32>
    %3 = tpu.iota {dimensions = array<i32: 1>} : vector<16x16xi32>
    %c1_i32 = arith.constant 1 : i32
    %4 = vector.broadcast %c1_i32 : i32 to vector<16x16xi32>
    %5 = arith.addi %3, %4 : vector<16x16xi32>
    %6 = arith.cmpi eq, %2, %5 : vector<16x16xi32>
    %7 = arith.extui %6 : vector<16x16xi1> to vector<16x16xi32>
    %8 = arith.sitofp %7 : vector<16x16xi32> to vector<16x16xf32>
    %9 = arith.truncf %8 : vector<16x16xf32> to vector<16x16xbf16>
    %c1_i32_2 = arith.constant 1 : i32
    %10 = vector.broadcast %c1_i32_2 : i32 to vector<16x16xi32>
    %11 = arith.addi %2, %10 : vector<16x16xi32>
    %12 = arith.cmpi eq, %3, %11 : vector<16x16xi32>
    %13 = arith.extui %12 : vector<16x16xi1> to vector<16x16xi32>
    %14 = arith.sitofp %13 : vector<16x16xi32> to vector<16x16xf32>
    %15 = arith.truncf %14 : vector<16x16xf32> to vector<16x16xbf16>
    %cst = arith.constant dense<0.000000e+00> : vector<16x256xf32>
    %16 = tpu.matmul %9, %1, %cst {dimension_numbers = #tpu.dot_dimension_numbers<[1], [0], [0], [1], [0, 0, 1, 1], [], []>} : vector<16x16xbf16>, vector<16x256xbf16>, vector<16x256xf32> -> vector<16x256xf32>
    %17 = arith.truncf %16 : vector<16x256xf32> to vector<16x256xbf16>
    %cst_3 = arith.constant dense<0.000000e+00> : vector<16x256xf32>
    %18 = tpu.matmul %15, %1, %cst_3 {dimension_numbers = #tpu.dot_dimension_numbers<[1], [0], [0], [1], [0, 0, 1, 1], [], []>} : vector<16x16xbf16>, vector<16x256xbf16>, vector<16x256xf32> -> vector<16x256xf32>
    %19 = arith.truncf %18 : vector<16x256xf32> to vector<16x256xbf16>
    %c1 = arith.constant 1 : index
    %c0_4 = arith.constant 0 : index
    %c0_5 = arith.constant 0 : index
    %20 = vector.load %arg2[%c1, %c0_4, %c0_5] : memref<3x256x512xbf16, #tpu.memory_space<vmem>>, vector<1x256x512xbf16>
    %21 = vector.shape_cast %20 : vector<1x256x512xbf16> to vector<256x512xbf16>
    %cst_6 = arith.constant dense<0.000000e+00> : vector<16x512xf32>
    %22 = tpu.matmul %1, %21, %cst_6 {dimension_numbers = #tpu.dot_dimension_numbers<[1], [0], [0], [1], [0, 0, 1, 1], [], []>} : vector<16x256xbf16>, vector<256x512xbf16>, vector<16x512xf32> -> vector<16x512xf32>
    %c0_7 = arith.constant 0 : index
    %c0_8 = arith.constant 0 : index
    %c0_9 = arith.constant 0 : index
    %23 = vector.load %arg2[%c0_7, %c0_8, %c0_9] : memref<3x256x512xbf16, #tpu.memory_space<vmem>>, vector<1x256x512xbf16>
    %24 = vector.shape_cast %23 : vector<1x256x512xbf16> to vector<256x512xbf16>
    %cst_10 = arith.constant dense<0.000000e+00> : vector<16x512xf32>
    %25 = tpu.matmul %17, %24, %cst_10 {dimension_numbers = #tpu.dot_dimension_numbers<[1], [0], [0], [1], [0, 0, 1, 1], [], []>} : vector<16x256xbf16>, vector<256x512xbf16>, vector<16x512xf32> -> vector<16x512xf32>
    %26 = arith.addf %22, %25 : vector<16x512xf32>
    %c2 = arith.constant 2 : index
    %c0_11 = arith.constant 0 : index
    %c0_12 = arith.constant 0 : index
    %27 = vector.load %arg2[%c2, %c0_11, %c0_12] : memref<3x256x512xbf16, #tpu.memory_space<vmem>>, vector<1x256x512xbf16>
    %28 = vector.shape_cast %27 : vector<1x256x512xbf16> to vector<256x512xbf16>
    %cst_13 = arith.constant dense<0.000000e+00> : vector<16x512xf32>
    %29 = tpu.matmul %19, %28, %cst_13 {dimension_numbers = #tpu.dot_dimension_numbers<[1], [0], [0], [1], [0, 0, 1, 1], [], []>} : vector<16x256xbf16>, vector<256x512xbf16>, vector<16x512xf32> -> vector<16x512xf32>
    %30 = arith.addf %26, %29 : vector<16x512xf32>
    %c0_14 = arith.constant 0 : index
    %c0_15 = arith.constant 0 : index
    %31 = vector.load %arg3[%c0_14, %c0_15] : memref<1x512xf32, #tpu.memory_space<vmem>>, vector<1x512xf32>
    %32 = vector.broadcast %31 : vector<1x512xf32> to vector<16x512xf32>
    %33 = arith.addf %30, %32 : vector<16x512xf32>
    %cst_16 = arith.constant 0.000000e+00 : f32
    %34 = vector.broadcast %cst_16 : f32 to vector<16x512xf32>
    %35 = arith.cmpf oge, %33, %34 : vector<16x512xf32>
    %cst_17 = arith.constant 2.000000e-01 : f32
    %36 = vector.broadcast %cst_17 : f32 to vector<16x512xf32>
    %37 = arith.mulf %33, %36 : vector<16x512xf32>
    %38 = arith.select %35, %33, %37 : vector<16x512xi1>, vector<16x512xf32>
    %39 = arith.truncf %38 : vector<16x512xf32> to vector<16x512xbf16>
    %c0_18 = arith.constant 0 : index
    %c0_19 = arith.constant 0 : index
    %c0_20 = arith.constant 0 : index
    %40 = vector.load %arg4[%c0_18, %c0_19, %c0_20] : memref<1x16x512xbf16, #tpu.memory_space<vmem>>, vector<1x16x512xbf16>
    %41 = vector.shape_cast %40 : vector<1x16x512xbf16> to vector<16x512xbf16>
    %42 = vector.shape_cast %39 : vector<16x512xbf16> to vector<1x16x512xbf16>
    tpu.vector_store %arg4[%c0_18, %c0_19, %c0_20], %42 {strides = array<i32>} : memref<1x16x512xbf16, #tpu.memory_space<vmem>>, vector<1x16x512xbf16>,
    return
  }
  func.func @transform_0(%arg0: i32) -> (i32, i32, i32) {
    %c0_i32 = arith.constant 0 : i32
    %c0_i32_0 = arith.constant 0 : i32
    %c0_i32_1 = arith.constant 0 : i32
    return %arg0, %c0_i32, %c0_i32_0 : i32, i32, i32
  }
  func.func @transform_1(%arg0: i32) -> (i32, i32, i32) {
    %c0_i32 = arith.constant 0 : i32
    %c0_i32_0 = arith.constant 0 : i32
    %c0_i32_1 = arith.constant 0 : i32
    %c0_i32_2 = arith.constant 0 : i32
    return %c0_i32, %c0_i32_0, %c0_i32_1 : i32, i32, i32
  }
  func.func @transform_2(%arg0: i32) -> (i32, i32) {
    %c0_i32 = arith.constant 0 : i32
    %c0_i32_0 = arith.constant 0 : i32
    %c0_i32_1 = arith.constant 0 : i32
    return %c0_i32, %c0_i32_0 : i32, i32
  }
  func.func @transform_3(%arg0: i32) -> (i32, i32, i32) {
    %c0_i32 = arith.constant 0 : i32
    %c0_i32_0 = arith.constant 0 : i32
    %c0_i32_1 = arith.constant 0 : i32
    return %arg0, %c0_i32, %c0_i32_0 : i32, i32, i32
  }
}

module attributes {stable_mosaic.version = 11 : i64} {
  func.func @_block_tail_kernel(%arg0: i32, %arg1: memref<1x16x512xbf16, #tpu.memory_space<vmem>>, %arg2: memref<1x16x256xbf16, #tpu.memory_space<vmem>>, %arg3: memref<8x16xbf16, #tpu.memory_space<vmem>>, %arg4: memref<512x256xbf16, #tpu.memory_space<vmem>>, %arg5: memref<256x256xbf16, #tpu.memory_space<vmem>>, %arg6: memref<1x256xf32, #tpu.memory_space<vmem>>, %arg7: memref<1x8x256xbf16, #tpu.memory_space<vmem>>) attributes {dimension_semantics = [#tpu.dimension_semantics<parallel>], iteration_bounds = array<i64: 2>, scalar_prefetch = 0 : i64, scratch_operands = 0 : i64, tpu.core_type = #tpu.core_type<tc>, window_params = [{transform_indices = @transform_0, window_bounds = array<i64: 1, 16, 512>}, {transform_indices = @transform_1, window_bounds = array<i64: 1, 16, 256>}, {pipeline_mode = #tpu.pipeline_mode<synchronous>, transform_indices = @transform_2, window_bounds = array<i64: 8, 16>}, {pipeline_mode = #tpu.pipeline_mode<synchronous>, transform_indices = @transform_3, window_bounds = array<i64: 512, 256>}, {pipeline_mode = #tpu.pipeline_mode<synchronous>, transform_indices = @transform_4, window_bounds = array<i64: 256, 256>}, {pipeline_mode = #tpu.pipeline_mode<synchronous>, transform_indices = @transform_5, window_bounds = array<i64: 1, 256>}, {transform_indices = @transform_6, window_bounds = array<i64: 1, 8, 256>}]} {
    %c0 = arith.constant 0 : index
    %c0_0 = arith.constant 0 : index
    %c0_1 = arith.constant 0 : index
    %0 = vector.load %arg1[%c0, %c0_0, %c0_1] : memref<1x16x512xbf16, #tpu.memory_space<vmem>>, vector<1x16x512xbf16>
    %1 = vector.shape_cast %0 : vector<1x16x512xbf16> to vector<16x512xbf16>
    %c0_2 = arith.constant 0 : index
    %c0_3 = arith.constant 0 : index
    %2 = vector.load %arg4[%c0_2, %c0_3] : memref<512x256xbf16, #tpu.memory_space<vmem>>, vector<512x256xbf16>
    %cst = arith.constant dense<0.000000e+00> : vector<16x256xf32>
    %3 = tpu.matmul %1, %2, %cst {dimension_numbers = #tpu.dot_dimension_numbers<[1], [0], [0], [1], [0, 0, 1, 1], [], []>} : vector<16x512xbf16>, vector<512x256xbf16>, vector<16x256xf32> -> vector<16x256xf32>
    %c0_4 = arith.constant 0 : index
    %c0_5 = arith.constant 0 : index
    %c0_6 = arith.constant 0 : index
    %4 = vector.load %arg2[%c0_4, %c0_5, %c0_6] : memref<1x16x256xbf16, #tpu.memory_space<vmem>>, vector<1x16x256xbf16>
    %5 = vector.shape_cast %4 : vector<1x16x256xbf16> to vector<16x256xbf16>
    %c0_7 = arith.constant 0 : index
    %c0_8 = arith.constant 0 : index
    %6 = vector.load %arg5[%c0_7, %c0_8] : memref<256x256xbf16, #tpu.memory_space<vmem>>, vector<256x256xbf16>
    %cst_9 = arith.constant dense<0.000000e+00> : vector<16x256xf32>
    %7 = tpu.matmul %5, %6, %cst_9 {dimension_numbers = #tpu.dot_dimension_numbers<[1], [0], [0], [1], [0, 0, 1, 1], [], []>} : vector<16x256xbf16>, vector<256x256xbf16>, vector<16x256xf32> -> vector<16x256xf32>
    %8 = arith.addf %3, %7 : vector<16x256xf32>
    %c0_10 = arith.constant 0 : index
    %c0_11 = arith.constant 0 : index
    %9 = vector.load %arg3[%c0_10, %c0_11] : memref<8x16xbf16, #tpu.memory_space<vmem>>, vector<8x16xbf16>
    %10 = arith.truncf %8 : vector<16x256xf32> to vector<16x256xbf16>
    %cst_12 = arith.constant dense<0.000000e+00> : vector<8x256xf32>
    %11 = tpu.matmul %9, %10, %cst_12 {dimension_numbers = #tpu.dot_dimension_numbers<[1], [0], [0], [1], [0, 0, 1, 1], [], []>} : vector<8x16xbf16>, vector<16x256xbf16>, vector<8x256xf32> -> vector<8x256xf32>
    %c0_13 = arith.constant 0 : index
    %c0_14 = arith.constant 0 : index
    %12 = vector.load %arg6[%c0_13, %c0_14] : memref<1x256xf32, #tpu.memory_space<vmem>>, vector<1x256xf32>
    %13 = vector.broadcast %12 : vector<1x256xf32> to vector<8x256xf32>
    %14 = arith.addf %11, %13 : vector<8x256xf32>
    %cst_15 = arith.constant 0.707106769 : f32
    %15 = vector.broadcast %cst_15 : f32 to vector<8x256xf32>
    %16 = arith.mulf %14, %15 : vector<8x256xf32>
    %17 = arith.truncf %16 : vector<8x256xf32> to vector<8x256xbf16>
    %c0_16 = arith.constant 0 : index
    %c0_17 = arith.constant 0 : index
    %c0_18 = arith.constant 0 : index
    %18 = vector.load %arg7[%c0_16, %c0_17, %c0_18] : memref<1x8x256xbf16, #tpu.memory_space<vmem>>, vector<1x8x256xbf16>
    %19 = vector.shape_cast %18 : vector<1x8x256xbf16> to vector<8x256xbf16>
    %20 = vector.shape_cast %17 : vector<8x256xbf16> to vector<1x8x256xbf16>
    tpu.vector_store %arg7[%c0_16, %c0_17, %c0_18], %20 {strides = array<i32>} : memref<1x8x256xbf16, #tpu.memory_space<vmem>>, vector<1x8x256xbf16>,
    return
  }
  func.func @transform_0(%arg0: i32) -> (i32, i32, i32) {
    %c0_i32 = arith.constant 0 : i32
    %c0_i32_0 = arith.constant 0 : i32
    %c0_i32_1 = arith.constant 0 : i32
    return %arg0, %c0_i32, %c0_i32_0 : i32, i32, i32
  }
  func.func @transform_1(%arg0: i32) -> (i32, i32, i32) {
    %c0_i32 = arith.constant 0 : i32
    %c0_i32_0 = arith.constant 0 : i32
    %c0_i32_1 = arith.constant 0 : i32
    return %arg0, %c0_i32, %c0_i32_0 : i32, i32, i32
  }
  func.func @transform_2(%arg0: i32) -> (i32, i32) {
    %c0_i32 = arith.constant 0 : i32
    %c0_i32_0 = arith.constant 0 : i32
    %c0_i32_1 = arith.constant 0 : i32
    return %c0_i32, %c0_i32_0 : i32, i32
  }
  func.func @transform_3(%arg0: i32) -> (i32, i32) {
    %c0_i32 = arith.constant 0 : i32
    %c0_i32_0 = arith.constant 0 : i32
    %c0_i32_1 = arith.constant 0 : i32
    return %c0_i32, %c0_i32_0 : i32, i32
  }
  func.func @transform_4(%arg0: i32) -> (i32, i32) {
    %c0_i32 = arith.constant 0 : i32
    %c0_i32_0 = arith.constant 0 : i32
    %c0_i32_1 = arith.constant 0 : i32
    return %c0_i32, %c0_i32_0 : i32, i32
  }
  func.func @transform_5(%arg0: i32) -> (i32, i32) {
    %c0_i32 = arith.constant 0 : i32
    %c0_i32_0 = arith.constant 0 : i32
    %c0_i32_1 = arith.constant 0 : i32
    return %c0_i32, %c0_i32_0 : i32, i32
  }
  func.func @transform_6(%arg0: i32) -> (i32, i32, i32) {
    %c0_i32 = arith.constant 0 : i32
    %c0_i32_0 = arith.constant 0 : i32
    %c0_i32_1 = arith.constant 0 : i32
    return %arg0, %c0_i32, %c0_i32_0 : i32, i32, i32
  }
}

module attributes {stable_mosaic.version = 11 : i64} {
  func.func @_conv3x3_kernel(%arg0: i32, %arg1: memref<1x8x256xbf16, #tpu.memory_space<vmem>>, %arg2: memref<3x256x256xbf16, #tpu.memory_space<vmem>>, %arg3: memref<1x256xf32, #tpu.memory_space<vmem>>, %arg4: memref<1x8x256xbf16, #tpu.memory_space<vmem>>) attributes {dimension_semantics = [#tpu.dimension_semantics<parallel>], iteration_bounds = array<i64: 2>, scalar_prefetch = 0 : i64, scratch_operands = 0 : i64, tpu.core_type = #tpu.core_type<tc>, window_params = [{transform_indices = @transform_0, window_bounds = array<i64: 1, 8, 256>}, {pipeline_mode = #tpu.pipeline_mode<synchronous>, transform_indices = @transform_1, window_bounds = array<i64: 3, 256, 256>}, {pipeline_mode = #tpu.pipeline_mode<synchronous>, transform_indices = @transform_2, window_bounds = array<i64: 1, 256>}, {transform_indices = @transform_3, window_bounds = array<i64: 1, 8, 256>}]} {
    %c0 = arith.constant 0 : index
    %c0_0 = arith.constant 0 : index
    %c0_1 = arith.constant 0 : index
    %0 = vector.load %arg1[%c0, %c0_0, %c0_1] : memref<1x8x256xbf16, #tpu.memory_space<vmem>>, vector<1x8x256xbf16>
    %1 = vector.shape_cast %0 : vector<1x8x256xbf16> to vector<8x256xbf16>
    %2 = tpu.iota {dimensions = array<i32: 0>} : vector<8x8xi32>
    %3 = tpu.iota {dimensions = array<i32: 1>} : vector<8x8xi32>
    %c1_i32 = arith.constant 1 : i32
    %4 = vector.broadcast %c1_i32 : i32 to vector<8x8xi32>
    %5 = arith.addi %3, %4 : vector<8x8xi32>
    %6 = arith.cmpi eq, %2, %5 : vector<8x8xi32>
    %7 = arith.extui %6 : vector<8x8xi1> to vector<8x8xi32>
    %8 = arith.sitofp %7 : vector<8x8xi32> to vector<8x8xf32>
    %9 = arith.truncf %8 : vector<8x8xf32> to vector<8x8xbf16>
    %c1_i32_2 = arith.constant 1 : i32
    %10 = vector.broadcast %c1_i32_2 : i32 to vector<8x8xi32>
    %11 = arith.addi %2, %10 : vector<8x8xi32>
    %12 = arith.cmpi eq, %3, %11 : vector<8x8xi32>
    %13 = arith.extui %12 : vector<8x8xi1> to vector<8x8xi32>
    %14 = arith.sitofp %13 : vector<8x8xi32> to vector<8x8xf32>
    %15 = arith.truncf %14 : vector<8x8xf32> to vector<8x8xbf16>
    %cst = arith.constant dense<0.000000e+00> : vector<8x256xf32>
    %16 = tpu.matmul %9, %1, %cst {dimension_numbers = #tpu.dot_dimension_numbers<[1], [0], [0], [1], [0, 0, 1, 1], [], []>} : vector<8x8xbf16>, vector<8x256xbf16>, vector<8x256xf32> -> vector<8x256xf32>
    %17 = arith.truncf %16 : vector<8x256xf32> to vector<8x256xbf16>
    %cst_3 = arith.constant dense<0.000000e+00> : vector<8x256xf32>
    %18 = tpu.matmul %15, %1, %cst_3 {dimension_numbers = #tpu.dot_dimension_numbers<[1], [0], [0], [1], [0, 0, 1, 1], [], []>} : vector<8x8xbf16>, vector<8x256xbf16>, vector<8x256xf32> -> vector<8x256xf32>
    %19 = arith.truncf %18 : vector<8x256xf32> to vector<8x256xbf16>
    %c1 = arith.constant 1 : index
    %c0_4 = arith.constant 0 : index
    %c0_5 = arith.constant 0 : index
    %20 = vector.load %arg2[%c1, %c0_4, %c0_5] : memref<3x256x256xbf16, #tpu.memory_space<vmem>>, vector<1x256x256xbf16>
    %21 = vector.shape_cast %20 : vector<1x256x256xbf16> to vector<256x256xbf16>
    %cst_6 = arith.constant dense<0.000000e+00> : vector<8x256xf32>
    %22 = tpu.matmul %1, %21, %cst_6 {dimension_numbers = #tpu.dot_dimension_numbers<[1], [0], [0], [1], [0, 0, 1, 1], [], []>} : vector<8x256xbf16>, vector<256x256xbf16>, vector<8x256xf32> -> vector<8x256xf32>
    %c0_7 = arith.constant 0 : index
    %c0_8 = arith.constant 0 : index
    %c0_9 = arith.constant 0 : index
    %23 = vector.load %arg2[%c0_7, %c0_8, %c0_9] : memref<3x256x256xbf16, #tpu.memory_space<vmem>>, vector<1x256x256xbf16>
    %24 = vector.shape_cast %23 : vector<1x256x256xbf16> to vector<256x256xbf16>
    %cst_10 = arith.constant dense<0.000000e+00> : vector<8x256xf32>
    %25 = tpu.matmul %17, %24, %cst_10 {dimension_numbers = #tpu.dot_dimension_numbers<[1], [0], [0], [1], [0, 0, 1, 1], [], []>} : vector<8x256xbf16>, vector<256x256xbf16>, vector<8x256xf32> -> vector<8x256xf32>
    %26 = arith.addf %22, %25 : vector<8x256xf32>
    %c2 = arith.constant 2 : index
    %c0_11 = arith.constant 0 : index
    %c0_12 = arith.constant 0 : index
    %27 = vector.load %arg2[%c2, %c0_11, %c0_12] : memref<3x256x256xbf16, #tpu.memory_space<vmem>>, vector<1x256x256xbf16>
    %28 = vector.shape_cast %27 : vector<1x256x256xbf16> to vector<256x256xbf16>
    %cst_13 = arith.constant dense<0.000000e+00> : vector<8x256xf32>
    %29 = tpu.matmul %19, %28, %cst_13 {dimension_numbers = #tpu.dot_dimension_numbers<[1], [0], [0], [1], [0, 0, 1, 1], [], []>} : vector<8x256xbf16>, vector<256x256xbf16>, vector<8x256xf32> -> vector<8x256xf32>
    %30 = arith.addf %26, %29 : vector<8x256xf32>
    %c0_14 = arith.constant 0 : index
    %c0_15 = arith.constant 0 : index
    %31 = vector.load %arg3[%c0_14, %c0_15] : memref<1x256xf32, #tpu.memory_space<vmem>>, vector<1x256xf32>
    %32 = vector.broadcast %31 : vector<1x256xf32> to vector<8x256xf32>
    %33 = arith.addf %30, %32 : vector<8x256xf32>
    %cst_16 = arith.constant 0.000000e+00 : f32
    %34 = vector.broadcast %cst_16 : f32 to vector<8x256xf32>
    %35 = arith.cmpf oge, %33, %34 : vector<8x256xf32>
    %cst_17 = arith.constant 2.000000e-01 : f32
    %36 = vector.broadcast %cst_17 : f32 to vector<8x256xf32>
    %37 = arith.mulf %33, %36 : vector<8x256xf32>
    %38 = arith.select %35, %33, %37 : vector<8x256xi1>, vector<8x256xf32>
    %39 = arith.truncf %38 : vector<8x256xf32> to vector<8x256xbf16>
    %c0_18 = arith.constant 0 : index
    %c0_19 = arith.constant 0 : index
    %c0_20 = arith.constant 0 : index
    %40 = vector.load %arg4[%c0_18, %c0_19, %c0_20] : memref<1x8x256xbf16, #tpu.memory_space<vmem>>, vector<1x8x256xbf16>
    %41 = vector.shape_cast %40 : vector<1x8x256xbf16> to vector<8x256xbf16>
    %42 = vector.shape_cast %39 : vector<8x256xbf16> to vector<1x8x256xbf16>
    tpu.vector_store %arg4[%c0_18, %c0_19, %c0_20], %42 {strides = array<i32>} : memref<1x8x256xbf16, #tpu.memory_space<vmem>>, vector<1x8x256xbf16>,
    return
  }
  func.func @transform_0(%arg0: i32) -> (i32, i32, i32) {
    %c0_i32 = arith.constant 0 : i32
    %c0_i32_0 = arith.constant 0 : i32
    %c0_i32_1 = arith.constant 0 : i32
    return %arg0, %c0_i32, %c0_i32_0 : i32, i32, i32
  }
  func.func @transform_1(%arg0: i32) -> (i32, i32, i32) {
    %c0_i32 = arith.constant 0 : i32
    %c0_i32_0 = arith.constant 0 : i32
    %c0_i32_1 = arith.constant 0 : i32
    %c0_i32_2 = arith.constant 0 : i32
    return %c0_i32, %c0_i32_0, %c0_i32_1 : i32, i32, i32
  }
  func.func @transform_2(%arg0: i32) -> (i32, i32) {
    %c0_i32 = arith.constant 0 : i32
    %c0_i32_0 = arith.constant 0 : i32
    %c0_i32_1 = arith.constant 0 : i32
    return %c0_i32, %c0_i32_0 : i32, i32
  }
  func.func @transform_3(%arg0: i32) -> (i32, i32, i32) {
    %c0_i32 = arith.constant 0 : i32
    %c0_i32_0 = arith.constant 0 : i32
    %c0_i32_1 = arith.constant 0 : i32
    return %arg0, %c0_i32, %c0_i32_0 : i32, i32, i32
  }
}

module attributes {stable_mosaic.version = 11 : i64} {
  func.func @_conv3x3_kernel(%arg0: i32, %arg1: memref<1x8x256xbf16, #tpu.memory_space<vmem>>, %arg2: memref<3x256x512xbf16, #tpu.memory_space<vmem>>, %arg3: memref<1x512xf32, #tpu.memory_space<vmem>>, %arg4: memref<1x8x512xbf16, #tpu.memory_space<vmem>>) attributes {dimension_semantics = [#tpu.dimension_semantics<parallel>], iteration_bounds = array<i64: 2>, scalar_prefetch = 0 : i64, scratch_operands = 0 : i64, tpu.core_type = #tpu.core_type<tc>, window_params = [{transform_indices = @transform_0, window_bounds = array<i64: 1, 8, 256>}, {pipeline_mode = #tpu.pipeline_mode<synchronous>, transform_indices = @transform_1, window_bounds = array<i64: 3, 256, 512>}, {pipeline_mode = #tpu.pipeline_mode<synchronous>, transform_indices = @transform_2, window_bounds = array<i64: 1, 512>}, {transform_indices = @transform_3, window_bounds = array<i64: 1, 8, 512>}]} {
    %c0 = arith.constant 0 : index
    %c0_0 = arith.constant 0 : index
    %c0_1 = arith.constant 0 : index
    %0 = vector.load %arg1[%c0, %c0_0, %c0_1] : memref<1x8x256xbf16, #tpu.memory_space<vmem>>, vector<1x8x256xbf16>
    %1 = vector.shape_cast %0 : vector<1x8x256xbf16> to vector<8x256xbf16>
    %2 = tpu.iota {dimensions = array<i32: 0>} : vector<8x8xi32>
    %3 = tpu.iota {dimensions = array<i32: 1>} : vector<8x8xi32>
    %c1_i32 = arith.constant 1 : i32
    %4 = vector.broadcast %c1_i32 : i32 to vector<8x8xi32>
    %5 = arith.addi %3, %4 : vector<8x8xi32>
    %6 = arith.cmpi eq, %2, %5 : vector<8x8xi32>
    %7 = arith.extui %6 : vector<8x8xi1> to vector<8x8xi32>
    %8 = arith.sitofp %7 : vector<8x8xi32> to vector<8x8xf32>
    %9 = arith.truncf %8 : vector<8x8xf32> to vector<8x8xbf16>
    %c1_i32_2 = arith.constant 1 : i32
    %10 = vector.broadcast %c1_i32_2 : i32 to vector<8x8xi32>
    %11 = arith.addi %2, %10 : vector<8x8xi32>
    %12 = arith.cmpi eq, %3, %11 : vector<8x8xi32>
    %13 = arith.extui %12 : vector<8x8xi1> to vector<8x8xi32>
    %14 = arith.sitofp %13 : vector<8x8xi32> to vector<8x8xf32>
    %15 = arith.truncf %14 : vector<8x8xf32> to vector<8x8xbf16>
    %cst = arith.constant dense<0.000000e+00> : vector<8x256xf32>
    %16 = tpu.matmul %9, %1, %cst {dimension_numbers = #tpu.dot_dimension_numbers<[1], [0], [0], [1], [0, 0, 1, 1], [], []>} : vector<8x8xbf16>, vector<8x256xbf16>, vector<8x256xf32> -> vector<8x256xf32>
    %17 = arith.truncf %16 : vector<8x256xf32> to vector<8x256xbf16>
    %cst_3 = arith.constant dense<0.000000e+00> : vector<8x256xf32>
    %18 = tpu.matmul %15, %1, %cst_3 {dimension_numbers = #tpu.dot_dimension_numbers<[1], [0], [0], [1], [0, 0, 1, 1], [], []>} : vector<8x8xbf16>, vector<8x256xbf16>, vector<8x256xf32> -> vector<8x256xf32>
    %19 = arith.truncf %18 : vector<8x256xf32> to vector<8x256xbf16>
    %c1 = arith.constant 1 : index
    %c0_4 = arith.constant 0 : index
    %c0_5 = arith.constant 0 : index
    %20 = vector.load %arg2[%c1, %c0_4, %c0_5] : memref<3x256x512xbf16, #tpu.memory_space<vmem>>, vector<1x256x512xbf16>
    %21 = vector.shape_cast %20 : vector<1x256x512xbf16> to vector<256x512xbf16>
    %cst_6 = arith.constant dense<0.000000e+00> : vector<8x512xf32>
    %22 = tpu.matmul %1, %21, %cst_6 {dimension_numbers = #tpu.dot_dimension_numbers<[1], [0], [0], [1], [0, 0, 1, 1], [], []>} : vector<8x256xbf16>, vector<256x512xbf16>, vector<8x512xf32> -> vector<8x512xf32>
    %c0_7 = arith.constant 0 : index
    %c0_8 = arith.constant 0 : index
    %c0_9 = arith.constant 0 : index
    %23 = vector.load %arg2[%c0_7, %c0_8, %c0_9] : memref<3x256x512xbf16, #tpu.memory_space<vmem>>, vector<1x256x512xbf16>
    %24 = vector.shape_cast %23 : vector<1x256x512xbf16> to vector<256x512xbf16>
    %cst_10 = arith.constant dense<0.000000e+00> : vector<8x512xf32>
    %25 = tpu.matmul %17, %24, %cst_10 {dimension_numbers = #tpu.dot_dimension_numbers<[1], [0], [0], [1], [0, 0, 1, 1], [], []>} : vector<8x256xbf16>, vector<256x512xbf16>, vector<8x512xf32> -> vector<8x512xf32>
    %26 = arith.addf %22, %25 : vector<8x512xf32>
    %c2 = arith.constant 2 : index
    %c0_11 = arith.constant 0 : index
    %c0_12 = arith.constant 0 : index
    %27 = vector.load %arg2[%c2, %c0_11, %c0_12] : memref<3x256x512xbf16, #tpu.memory_space<vmem>>, vector<1x256x512xbf16>
    %28 = vector.shape_cast %27 : vector<1x256x512xbf16> to vector<256x512xbf16>
    %cst_13 = arith.constant dense<0.000000e+00> : vector<8x512xf32>
    %29 = tpu.matmul %19, %28, %cst_13 {dimension_numbers = #tpu.dot_dimension_numbers<[1], [0], [0], [1], [0, 0, 1, 1], [], []>} : vector<8x256xbf16>, vector<256x512xbf16>, vector<8x512xf32> -> vector<8x512xf32>
    %30 = arith.addf %26, %29 : vector<8x512xf32>
    %c0_14 = arith.constant 0 : index
    %c0_15 = arith.constant 0 : index
    %31 = vector.load %arg3[%c0_14, %c0_15] : memref<1x512xf32, #tpu.memory_space<vmem>>, vector<1x512xf32>
    %32 = vector.broadcast %31 : vector<1x512xf32> to vector<8x512xf32>
    %33 = arith.addf %30, %32 : vector<8x512xf32>
    %cst_16 = arith.constant 0.000000e+00 : f32
    %34 = vector.broadcast %cst_16 : f32 to vector<8x512xf32>
    %35 = arith.cmpf oge, %33, %34 : vector<8x512xf32>
    %cst_17 = arith.constant 2.000000e-01 : f32
    %36 = vector.broadcast %cst_17 : f32 to vector<8x512xf32>
    %37 = arith.mulf %33, %36 : vector<8x512xf32>
    %38 = arith.select %35, %33, %37 : vector<8x512xi1>, vector<8x512xf32>
    %39 = arith.truncf %38 : vector<8x512xf32> to vector<8x512xbf16>
    %c0_18 = arith.constant 0 : index
    %c0_19 = arith.constant 0 : index
    %c0_20 = arith.constant 0 : index
    %40 = vector.load %arg4[%c0_18, %c0_19, %c0_20] : memref<1x8x512xbf16, #tpu.memory_space<vmem>>, vector<1x8x512xbf16>
    %41 = vector.shape_cast %40 : vector<1x8x512xbf16> to vector<8x512xbf16>
    %42 = vector.shape_cast %39 : vector<8x512xbf16> to vector<1x8x512xbf16>
    tpu.vector_store %arg4[%c0_18, %c0_19, %c0_20], %42 {strides = array<i32>} : memref<1x8x512xbf16, #tpu.memory_space<vmem>>, vector<1x8x512xbf16>,
    return
  }
  func.func @transform_0(%arg0: i32) -> (i32, i32, i32) {
    %c0_i32 = arith.constant 0 : i32
    %c0_i32_0 = arith.constant 0 : i32
    %c0_i32_1 = arith.constant 0 : i32
    return %arg0, %c0_i32, %c0_i32_0 : i32, i32, i32
  }
  func.func @transform_1(%arg0: i32) -> (i32, i32, i32) {
    %c0_i32 = arith.constant 0 : i32
    %c0_i32_0 = arith.constant 0 : i32
    %c0_i32_1 = arith.constant 0 : i32
    %c0_i32_2 = arith.constant 0 : i32
    return %c0_i32, %c0_i32_0, %c0_i32_1 : i32, i32, i32
  }
  func.func @transform_2(%arg0: i32) -> (i32, i32) {
    %c0_i32 = arith.constant 0 : i32
    %c0_i32_0 = arith.constant 0 : i32
    %c0_i32_1 = arith.constant 0 : i32
    return %c0_i32, %c0_i32_0 : i32, i32
  }
  func.func @transform_3(%arg0: i32) -> (i32, i32, i32) {
    %c0_i32 = arith.constant 0 : i32
    %c0_i32_0 = arith.constant 0 : i32
    %c0_i32_1 = arith.constant 0 : i32
    return %arg0, %c0_i32, %c0_i32_0 : i32, i32, i32
  }
}

module attributes {stable_mosaic.version = 11 : i64} {
  func.func @_block_tail_kernel(%arg0: i32, %arg1: memref<1x8x512xbf16, #tpu.memory_space<vmem>>, %arg2: memref<1x8x256xbf16, #tpu.memory_space<vmem>>, %arg3: memref<4x8xbf16, #tpu.memory_space<vmem>>, %arg4: memref<512x256xbf16, #tpu.memory_space<vmem>>, %arg5: memref<256x256xbf16, #tpu.memory_space<vmem>>, %arg6: memref<1x256xf32, #tpu.memory_space<vmem>>, %arg7: memref<1x4x256xbf16, #tpu.memory_space<vmem>>) attributes {dimension_semantics = [#tpu.dimension_semantics<parallel>], iteration_bounds = array<i64: 2>, scalar_prefetch = 0 : i64, scratch_operands = 0 : i64, tpu.core_type = #tpu.core_type<tc>, window_params = [{transform_indices = @transform_0, window_bounds = array<i64: 1, 8, 512>}, {transform_indices = @transform_1, window_bounds = array<i64: 1, 8, 256>}, {pipeline_mode = #tpu.pipeline_mode<synchronous>, transform_indices = @transform_2, window_bounds = array<i64: 4, 8>}, {pipeline_mode = #tpu.pipeline_mode<synchronous>, transform_indices = @transform_3, window_bounds = array<i64: 512, 256>}, {pipeline_mode = #tpu.pipeline_mode<synchronous>, transform_indices = @transform_4, window_bounds = array<i64: 256, 256>}, {pipeline_mode = #tpu.pipeline_mode<synchronous>, transform_indices = @transform_5, window_bounds = array<i64: 1, 256>}, {transform_indices = @transform_6, window_bounds = array<i64: 1, 4, 256>}]} {
    %c0 = arith.constant 0 : index
    %c0_0 = arith.constant 0 : index
    %c0_1 = arith.constant 0 : index
    %0 = vector.load %arg1[%c0, %c0_0, %c0_1] : memref<1x8x512xbf16, #tpu.memory_space<vmem>>, vector<1x8x512xbf16>
    %1 = vector.shape_cast %0 : vector<1x8x512xbf16> to vector<8x512xbf16>
    %c0_2 = arith.constant 0 : index
    %c0_3 = arith.constant 0 : index
    %2 = vector.load %arg4[%c0_2, %c0_3] : memref<512x256xbf16, #tpu.memory_space<vmem>>, vector<512x256xbf16>
    %cst = arith.constant dense<0.000000e+00> : vector<8x256xf32>
    %3 = tpu.matmul %1, %2, %cst {dimension_numbers = #tpu.dot_dimension_numbers<[1], [0], [0], [1], [0, 0, 1, 1], [], []>} : vector<8x512xbf16>, vector<512x256xbf16>, vector<8x256xf32> -> vector<8x256xf32>
    %c0_4 = arith.constant 0 : index
    %c0_5 = arith.constant 0 : index
    %c0_6 = arith.constant 0 : index
    %4 = vector.load %arg2[%c0_4, %c0_5, %c0_6] : memref<1x8x256xbf16, #tpu.memory_space<vmem>>, vector<1x8x256xbf16>
    %5 = vector.shape_cast %4 : vector<1x8x256xbf16> to vector<8x256xbf16>
    %c0_7 = arith.constant 0 : index
    %c0_8 = arith.constant 0 : index
    %6 = vector.load %arg5[%c0_7, %c0_8] : memref<256x256xbf16, #tpu.memory_space<vmem>>, vector<256x256xbf16>
    %cst_9 = arith.constant dense<0.000000e+00> : vector<8x256xf32>
    %7 = tpu.matmul %5, %6, %cst_9 {dimension_numbers = #tpu.dot_dimension_numbers<[1], [0], [0], [1], [0, 0, 1, 1], [], []>} : vector<8x256xbf16>, vector<256x256xbf16>, vector<8x256xf32> -> vector<8x256xf32>
    %8 = arith.addf %3, %7 : vector<8x256xf32>
    %c0_10 = arith.constant 0 : index
    %c0_11 = arith.constant 0 : index
    %9 = vector.load %arg3[%c0_10, %c0_11] : memref<4x8xbf16, #tpu.memory_space<vmem>>, vector<4x8xbf16>
    %10 = arith.truncf %8 : vector<8x256xf32> to vector<8x256xbf16>
    %cst_12 = arith.constant dense<0.000000e+00> : vector<4x256xf32>
    %11 = tpu.matmul %9, %10, %cst_12 {dimension_numbers = #tpu.dot_dimension_numbers<[1], [0], [0], [1], [0, 0, 1, 1], [], []>} : vector<4x8xbf16>, vector<8x256xbf16>, vector<4x256xf32> -> vector<4x256xf32>
    %c0_13 = arith.constant 0 : index
    %c0_14 = arith.constant 0 : index
    %12 = vector.load %arg6[%c0_13, %c0_14] : memref<1x256xf32, #tpu.memory_space<vmem>>, vector<1x256xf32>
    %13 = vector.broadcast %12 : vector<1x256xf32> to vector<4x256xf32>
    %14 = arith.addf %11, %13 : vector<4x256xf32>
    %cst_15 = arith.constant 0.707106769 : f32
    %15 = vector.broadcast %cst_15 : f32 to vector<4x256xf32>
    %16 = arith.mulf %14, %15 : vector<4x256xf32>
    %17 = arith.truncf %16 : vector<4x256xf32> to vector<4x256xbf16>
    %c0_16 = arith.constant 0 : index
    %c0_17 = arith.constant 0 : index
    %c0_18 = arith.constant 0 : index
    %18 = vector.load %arg7[%c0_16, %c0_17, %c0_18] : memref<1x4x256xbf16, #tpu.memory_space<vmem>>, vector<1x4x256xbf16>
    %19 = vector.shape_cast %18 : vector<1x4x256xbf16> to vector<4x256xbf16>
    %20 = vector.shape_cast %17 : vector<4x256xbf16> to vector<1x4x256xbf16>
    tpu.vector_store %arg7[%c0_16, %c0_17, %c0_18], %20 {strides = array<i32>} : memref<1x4x256xbf16, #tpu.memory_space<vmem>>, vector<1x4x256xbf16>,
    return
  }
  func.func @transform_0(%arg0: i32) -> (i32, i32, i32) {
    %c0_i32 = arith.constant 0 : i32
    %c0_i32_0 = arith.constant 0 : i32
    %c0_i32_1 = arith.constant 0 : i32
    return %arg0, %c0_i32, %c0_i32_0 : i32, i32, i32
  }
  func.func @transform_1(%arg0: i32) -> (i32, i32, i32) {
    %c0_i32 = arith.constant 0 : i32
    %c0_i32_0 = arith.constant 0 : i32
    %c0_i32_1 = arith.constant 0 : i32
    return %arg0, %c0_i32, %c0_i32_0 : i32, i32, i32
  }
  func.func @transform_2(%arg0: i32) -> (i32, i32) {
    %c0_i32 = arith.constant 0 : i32
    %c0_i32_0 = arith.constant 0 : i32
    %c0_i32_1 = arith.constant 0 : i32
    return %c0_i32, %c0_i32_0 : i32, i32
  }
  func.func @transform_3(%arg0: i32) -> (i32, i32) {
    %c0_i32 = arith.constant 0 : i32
    %c0_i32_0 = arith.constant 0 : i32
    %c0_i32_1 = arith.constant 0 : i32
    return %c0_i32, %c0_i32_0 : i32, i32
  }
  func.func @transform_4(%arg0: i32) -> (i32, i32) {
    %c0_i32 = arith.constant 0 : i32
    %c0_i32_0 = arith.constant 0 : i32
    %c0_i32_1 = arith.constant 0 : i32
    return %c0_i32, %c0_i32_0 : i32, i32
  }
  func.func @transform_5(%arg0: i32) -> (i32, i32) {
    %c0_i32 = arith.constant 0 : i32
    %c0_i32_0 = arith.constant 0 : i32
    %c0_i32_1 = arith.constant 0 : i32
    return %c0_i32, %c0_i32_0 : i32, i32
  }
  func.func @transform_6(%arg0: i32) -> (i32, i32, i32) {
    %c0_i32 = arith.constant 0 : i32
    %c0_i32_0 = arith.constant 0 : i32
    %c0_i32_1 = arith.constant 0 : i32
    return %arg0, %c0_i32, %c0_i32_0 : i32, i32, i32
  }
}

module attributes {stable_mosaic.version = 11 : i64} {
  func.func @_mbstd_kernel(%arg0: memref<2x1024xbf16, #tpu.memory_space<vmem>>, %arg1: memref<1x1xf32, #tpu.memory_space<smem>>) attributes {dimension_semantics = [], scalar_prefetch = 0 : i64, scratch_operands = 0 : i64, tpu.core_type = #tpu.core_type<tc>} {
    %c0 = arith.constant 0 : index
    %c0_0 = arith.constant 0 : index
    %0 = vector.load %arg0[%c0, %c0_0] : memref<2x1024xbf16, #tpu.memory_space<vmem>>, vector<2x1024xbf16>
    %1 = arith.extf %0 : vector<2x1024xbf16> to vector<2x1024xf32>
    %cst = arith.constant dense<0.000000e+00> : vector<1024xf32>
    %2 = vector.multi_reduction <add>, %1, %cst [0] : vector<2x1024xf32> to vector<1024xf32>
    %3 = vector.shape_cast %2 : vector<1024xf32> to vector<1x1024xf32>
    %cst_1 = arith.constant 2.000000e+00 : f32
    %4 = vector.broadcast %cst_1 : f32 to vector<1x1024xf32>
    %5 = arith.divf %3, %4 : vector<1x1024xf32>
    %6 = vector.broadcast %5 : vector<1x1024xf32> to vector<2x1024xf32>
    %7 = arith.subf %1, %6 : vector<2x1024xf32>
    %8 = arith.mulf %7, %7 : vector<2x1024xf32>
    %cst_2 = arith.constant dense<0.000000e+00> : vector<1024xf32>
    %9 = vector.multi_reduction <add>, %8, %cst_2 [0] : vector<2x1024xf32> to vector<1024xf32>
    %10 = vector.shape_cast %9 : vector<1024xf32> to vector<1x1024xf32>
    %cst_3 = arith.constant 1.000000e+00 : f32
    %11 = vector.broadcast %cst_3 : f32 to vector<1x1024xf32>
    %12 = arith.divf %10, %11 : vector<1x1024xf32>
    %13 = math.sqrt %12 : vector<1x1024xf32>
    %14 = vector.shape_cast %13 : vector<1x1024xf32> to vector<1x1x1024xf32>
    %cst_4 = arith.constant dense<0.000000e+00> : vector<1xf32>
    %15 = vector.multi_reduction <add>, %14, %cst_4 [1, 2] : vector<1x1x1024xf32> to vector<1xf32>
    %16 = vector.shape_cast %15 : vector<1xf32> to vector<1x1x1xf32>
    %17 = vector.extract %16[0, 0, 0] : f32 from vector<1x1x1xf32>
    %cst_5 = arith.constant 1.024000e+03 : f32
    %18 = arith.divf %17, %cst_5 : f32
    %c0_6 = arith.constant 0 : index
    %c0_7 = arith.constant 0 : index
    %19 = memref.load %arg1[%c0_6, %c0_7] : memref<1x1xf32, #tpu.memory_space<smem>>
    memref.store %18, %arg1[%c0_6, %c0_7] : memref<1x1xf32, #tpu.memory_space<smem>>
    return
  }
}

module attributes {stable_mosaic.version = 11 : i64} {
  func.func @_conv3x3_extra_kernel(%arg0: i32, %arg1: memref<1x4x256xbf16, #tpu.memory_space<vmem>>, %arg2: memref<3x256x260xbf16, #tpu.memory_space<vmem>>, %arg3: memref<1x260xf32, #tpu.memory_space<vmem>>, %arg4: memref<4x260xf32, #tpu.memory_space<vmem>>, %arg5: memref<1x4x260xbf16, #tpu.memory_space<vmem>>) attributes {dimension_semantics = [#tpu.dimension_semantics<parallel>], iteration_bounds = array<i64: 2>, scalar_prefetch = 0 : i64, scratch_operands = 0 : i64, tpu.core_type = #tpu.core_type<tc>, window_params = [{transform_indices = @transform_0, window_bounds = array<i64: 1, 4, 256>}, {pipeline_mode = #tpu.pipeline_mode<synchronous>, transform_indices = @transform_1, window_bounds = array<i64: 3, 256, 260>}, {pipeline_mode = #tpu.pipeline_mode<synchronous>, transform_indices = @transform_2, window_bounds = array<i64: 1, 260>}, {pipeline_mode = #tpu.pipeline_mode<synchronous>, transform_indices = @transform_3, window_bounds = array<i64: 4, 260>}, {transform_indices = @transform_4, window_bounds = array<i64: 1, 4, 260>}]} {
    %c0 = arith.constant 0 : index
    %c0_0 = arith.constant 0 : index
    %c0_1 = arith.constant 0 : index
    %0 = vector.load %arg1[%c0, %c0_0, %c0_1] : memref<1x4x256xbf16, #tpu.memory_space<vmem>>, vector<1x4x256xbf16>
    %1 = vector.shape_cast %0 : vector<1x4x256xbf16> to vector<4x256xbf16>
    %2 = tpu.iota {dimensions = array<i32: 0>} : vector<4x4xi32>
    %3 = tpu.iota {dimensions = array<i32: 1>} : vector<4x4xi32>
    %c1_i32 = arith.constant 1 : i32
    %4 = vector.broadcast %c1_i32 : i32 to vector<4x4xi32>
    %5 = arith.addi %3, %4 : vector<4x4xi32>
    %6 = arith.cmpi eq, %2, %5 : vector<4x4xi32>
    %7 = arith.extui %6 : vector<4x4xi1> to vector<4x4xi32>
    %8 = arith.sitofp %7 : vector<4x4xi32> to vector<4x4xf32>
    %9 = arith.truncf %8 : vector<4x4xf32> to vector<4x4xbf16>
    %c1_i32_2 = arith.constant 1 : i32
    %10 = vector.broadcast %c1_i32_2 : i32 to vector<4x4xi32>
    %11 = arith.addi %2, %10 : vector<4x4xi32>
    %12 = arith.cmpi eq, %3, %11 : vector<4x4xi32>
    %13 = arith.extui %12 : vector<4x4xi1> to vector<4x4xi32>
    %14 = arith.sitofp %13 : vector<4x4xi32> to vector<4x4xf32>
    %15 = arith.truncf %14 : vector<4x4xf32> to vector<4x4xbf16>
    %cst = arith.constant dense<0.000000e+00> : vector<4x256xf32>
    %16 = tpu.matmul %9, %1, %cst {dimension_numbers = #tpu.dot_dimension_numbers<[1], [0], [0], [1], [0, 0, 1, 1], [], []>} : vector<4x4xbf16>, vector<4x256xbf16>, vector<4x256xf32> -> vector<4x256xf32>
    %17 = arith.truncf %16 : vector<4x256xf32> to vector<4x256xbf16>
    %cst_3 = arith.constant dense<0.000000e+00> : vector<4x256xf32>
    %18 = tpu.matmul %15, %1, %cst_3 {dimension_numbers = #tpu.dot_dimension_numbers<[1], [0], [0], [1], [0, 0, 1, 1], [], []>} : vector<4x4xbf16>, vector<4x256xbf16>, vector<4x256xf32> -> vector<4x256xf32>
    %19 = arith.truncf %18 : vector<4x256xf32> to vector<4x256xbf16>
    %c1 = arith.constant 1 : index
    %c0_4 = arith.constant 0 : index
    %c0_5 = arith.constant 0 : index
    %20 = vector.load %arg2[%c1, %c0_4, %c0_5] : memref<3x256x260xbf16, #tpu.memory_space<vmem>>, vector<1x256x260xbf16>
    %21 = vector.shape_cast %20 : vector<1x256x260xbf16> to vector<256x260xbf16>
    %cst_6 = arith.constant dense<0.000000e+00> : vector<4x260xf32>
    %22 = tpu.matmul %1, %21, %cst_6 {dimension_numbers = #tpu.dot_dimension_numbers<[1], [0], [0], [1], [0, 0, 1, 1], [], []>} : vector<4x256xbf16>, vector<256x260xbf16>, vector<4x260xf32> -> vector<4x260xf32>
    %c0_7 = arith.constant 0 : index
    %c0_8 = arith.constant 0 : index
    %c0_9 = arith.constant 0 : index
    %23 = vector.load %arg2[%c0_7, %c0_8, %c0_9] : memref<3x256x260xbf16, #tpu.memory_space<vmem>>, vector<1x256x260xbf16>
    %24 = vector.shape_cast %23 : vector<1x256x260xbf16> to vector<256x260xbf16>
    %cst_10 = arith.constant dense<0.000000e+00> : vector<4x260xf32>
    %25 = tpu.matmul %17, %24, %cst_10 {dimension_numbers = #tpu.dot_dimension_numbers<[1], [0], [0], [1], [0, 0, 1, 1], [], []>} : vector<4x256xbf16>, vector<256x260xbf16>, vector<4x260xf32> -> vector<4x260xf32>
    %26 = arith.addf %22, %25 : vector<4x260xf32>
    %c2 = arith.constant 2 : index
    %c0_11 = arith.constant 0 : index
    %c0_12 = arith.constant 0 : index
    %27 = vector.load %arg2[%c2, %c0_11, %c0_12] : memref<3x256x260xbf16, #tpu.memory_space<vmem>>, vector<1x256x260xbf16>
    %28 = vector.shape_cast %27 : vector<1x256x260xbf16> to vector<256x260xbf16>
    %cst_13 = arith.constant dense<0.000000e+00> : vector<4x260xf32>
    %29 = tpu.matmul %19, %28, %cst_13 {dimension_numbers = #tpu.dot_dimension_numbers<[1], [0], [0], [1], [0, 0, 1, 1], [], []>} : vector<4x256xbf16>, vector<256x260xbf16>, vector<4x260xf32> -> vector<4x260xf32>
    %30 = arith.addf %26, %29 : vector<4x260xf32>
    %c0_14 = arith.constant 0 : index
    %c0_15 = arith.constant 0 : index
    %31 = vector.load %arg3[%c0_14, %c0_15] : memref<1x260xf32, #tpu.memory_space<vmem>>, vector<1x260xf32>
    %32 = vector.broadcast %31 : vector<1x260xf32> to vector<4x260xf32>
    %33 = arith.addf %30, %32 : vector<4x260xf32>
    %c0_16 = arith.constant 0 : index
    %c0_17 = arith.constant 0 : index
    %34 = vector.load %arg4[%c0_16, %c0_17] : memref<4x260xf32, #tpu.memory_space<vmem>>, vector<4x260xf32>
    %35 = arith.addf %33, %34 : vector<4x260xf32>
    %36 = arith.truncf %35 : vector<4x260xf32> to vector<4x260xbf16>
    %c0_18 = arith.constant 0 : index
    %c0_19 = arith.constant 0 : index
    %c0_20 = arith.constant 0 : index
    %37 = vector.load %arg5[%c0_18, %c0_19, %c0_20] : memref<1x4x260xbf16, #tpu.memory_space<vmem>>, vector<1x4x260xbf16>
    %38 = vector.shape_cast %37 : vector<1x4x260xbf16> to vector<4x260xbf16>
    %39 = vector.shape_cast %36 : vector<4x260xbf16> to vector<1x4x260xbf16>
    tpu.vector_store %arg5[%c0_18, %c0_19, %c0_20], %39 {strides = array<i32>} : memref<1x4x260xbf16, #tpu.memory_space<vmem>>, vector<1x4x260xbf16>,
    return
  }
  func.func @transform_0(%arg0: i32) -> (i32, i32, i32) {
    %c0_i32 = arith.constant 0 : i32
    %c0_i32_0 = arith.constant 0 : i32
    %c0_i32_1 = arith.constant 0 : i32
    return %arg0, %c0_i32, %c0_i32_0 : i32, i32, i32
  }
  func.func @transform_1(%arg0: i32) -> (i32, i32, i32) {
    %c0_i32 = arith.constant 0 : i32
    %c0_i32_0 = arith.constant 0 : i32
    %c0_i32_1 = arith.constant 0 : i32
    %c0_i32_2 = arith.constant 0 : i32
    return %c0_i32, %c0_i32_0, %c0_i32_1 : i32, i32, i32
  }
  func.func @transform_2(%arg0: i32) -> (i32, i32) {
    %c0_i32 = arith.constant 0 : i32
    %c0_i32_0 = arith.constant 0 : i32
    %c0_i32_1 = arith.constant 0 : i32
    return %c0_i32, %c0_i32_0 : i32, i32
  }
  func.func @transform_3(%arg0: i32) -> (i32, i32) {
    %c0_i32 = arith.constant 0 : i32
    %c0_i32_0 = arith.constant 0 : i32
    %c0_i32_1 = arith.constant 0 : i32
    return %c0_i32, %c0_i32_0 : i32, i32
  }
  func.func @transform_4(%arg0: i32) -> (i32, i32, i32) {
    %c0_i32 = arith.constant 0 : i32
    %c0_i32_0 = arith.constant 0 : i32
    %c0_i32_1 = arith.constant 0 : i32
    return %arg0, %c0_i32, %c0_i32_0 : i32, i32, i32
  }
}

module attributes {stable_mosaic.version = 11 : i64} {
  func.func @_matmul_kernel(%arg0: i32, %arg1: memref<8x1040xbf16, #tpu.memory_space<vmem>>, %arg2: memref<1040x1xbf16, #tpu.memory_space<vmem>>, %arg3: memref<1x1xf32, #tpu.memory_space<vmem>>, %arg4: memref<8x1xf32, #tpu.memory_space<vmem>>) attributes {dimension_semantics = [#tpu.dimension_semantics<parallel>], iteration_bounds = array<i64: 1>, scalar_prefetch = 0 : i64, scratch_operands = 0 : i64, tpu.core_type = #tpu.core_type<tc>, window_params = [{transform_indices = @transform_0, window_bounds = array<i64: 8, 1040>}, {pipeline_mode = #tpu.pipeline_mode<synchronous>, transform_indices = @transform_1, window_bounds = array<i64: 1040, 1>}, {pipeline_mode = #tpu.pipeline_mode<synchronous>, transform_indices = @transform_2, window_bounds = array<i64: 1, 1>}, {transform_indices = @transform_3, window_bounds = array<i64: 8, 1>}]} {
    %c0 = arith.constant 0 : index
    %c0_0 = arith.constant 0 : index
    %0 = vector.load %arg1[%c0, %c0_0] : memref<8x1040xbf16, #tpu.memory_space<vmem>>, vector<8x1040xbf16>
    %c0_1 = arith.constant 0 : index
    %c0_2 = arith.constant 0 : index
    %1 = vector.load %arg2[%c0_1, %c0_2] : memref<1040x1xbf16, #tpu.memory_space<vmem>>, vector<1040x1xbf16>
    %cst = arith.constant dense<0.000000e+00> : vector<8x1xf32>
    %2 = tpu.matmul %0, %1, %cst {dimension_numbers = #tpu.dot_dimension_numbers<[1], [0], [0], [1], [0, 0, 1, 1], [], []>} : vector<8x1040xbf16>, vector<1040x1xbf16>, vector<8x1xf32> -> vector<8x1xf32>
    %c0_3 = arith.constant 0 : index
    %c0_4 = arith.constant 0 : index
    %3 = vector.load %arg3[%c0_3, %c0_4] : memref<1x1xf32, #tpu.memory_space<vmem>>, vector<1x1xf32>
    %4 = vector.broadcast %3 : vector<1x1xf32> to vector<8x1xf32>
    %5 = arith.addf %2, %4 : vector<8x1xf32>
    %c0_5 = arith.constant 0 : index
    %c0_6 = arith.constant 0 : index
    %6 = vector.load %arg4[%c0_5, %c0_6] : memref<8x1xf32, #tpu.memory_space<vmem>>, vector<8x1xf32>
    tpu.vector_store %arg4[%c0_5, %c0_6], %5 {strides = array<i32>} : memref<8x1xf32, #tpu.memory_space<vmem>>, vector<8x1xf32>,
    return
  }
  func.func @transform_0(%arg0: i32) -> (i32, i32) {
    %c0_i32 = arith.constant 0 : i32
    %c0_i32_0 = arith.constant 0 : i32
    return %arg0, %c0_i32 : i32, i32
  }
  func.func @transform_1(%arg0: i32) -> (i32, i32) {
    %c0_i32 = arith.constant 0 : i32
    %c0_i32_0 = arith.constant 0 : i32
    %c0_i32_1 = arith.constant 0 : i32
    return %c0_i32, %c0_i32_0 : i32, i32
  }
  func.func @transform_2(%arg0: i32) -> (i32, i32) {
    %c0_i32 = arith.constant 0 : i32
    %c0_i32_0 = arith.constant 0 : i32
    %c0_i32_1 = arith.constant 0 : i32
    return %c0_i32, %c0_i32_0 : i32, i32
  }
  func.func @transform_3(%arg0: i32) -> (i32, i32) {
    %c0_i32 = arith.constant 0 : i32
    %c0_i32_0 = arith.constant 0 : i32
    return %arg0, %c0_i32 : i32, i32
  }
}

</mosaic_0001>

<bundles_post_ra>
// kernel: tile.43
= control target key start
LH: loop header
LB: loop body
LE: loop exit
PB: predicated region body
PF: predicated region fallthrough
CT: control target
= control target key end

     0   :  { %2 = vsyncpa [#allocation1], 0  ;;  %s45_s6 = smov [#allocation0]   ;;  %s65_s0 = inlined_call_operand.hbm [shape: f32[16], index: 0, kind: input, shape index: {}]   ;;  %s66_s1 = inlined_call_operand.vmem [shape: f32[16,16], index: 1, kind: output, shape index: {}]  }
   0x1   :  { %s9_s7 = sshll.u32 %s45_s6, 4  ;;  %s10_s7 = int_to_ptr.vmem [resolvable:$true] %s9_s7 }
   0x2   :  { %s31_s8 = scalar_lea.vmem %s10_s7, 16  ;;  %s35_s9 = scalar_lea.vmem %s10_s7, 32 }
   0x3   :  { %p32_p0 = scmp.ne.s32.totalorder %s10_s7, %s31_s8  ;;  %p36_p1 = scmp.lt.s32.totalorder %s10_s7, %s10_s7 }
   0x4   :  { %p37_p2 = scmp.lt.s32.totalorder %s35_s9, %s31_s8 }
   0x6   :  { %p38_p3 = por %p37_p2, %p36_p1 }
   0x8   :  { %p39_p4 = pnand %p38_p3, %p32_p0 }
   0xa   :  { %42 = shalt.err (!%p39_p4)
}
   0xb   :  { %12 = dma.hbm_to_vmem [thread:$0]  %s65_s0, 16, %s10_s7, [#allocation1]  }
   0xc   :  { %43 = dma.done.wait [#allocation1], 16  }
   0xd   :  { %44 = vsyncadd [#allocation1], 4294967280  ;;  %v16_v0 = vld [vmem:[#allocation0] ss:$0 sm:$0xff] }
   0xe   :  { %17 = vst [vmem:[%s66_s1] sm:$0xff] %v16_v0  ;;  %21 = vst [vmem:[%s66_s1 + $0x8] sm:$0xff] %v16_v0 }
   0xf   :  { %20 = vsyncpa [#allocation1], 1 }

// kernel: tile.44
= control target key start
LH: loop header
LB: loop body
LE: loop exit
PB: predicated region body
PF: predicated region fallthrough
CT: control target
= control target key end

     0   :  { %s7_s6 = smov 3  ;;  %s21_s9 = smov 3  ;;  %vm4_vm0 = vcmask 130048   ;;  %vm11_vm1 = vcmask 1048448   ;;  %vm18_vm2 = vcmask 917248   ;;  %vm25_vm3 = vcmask 786048   ;;  %s131_s0 = inlined_call_operand.vmem [shape: f32[16,16], index: 0, kind: input, shape index: {}]   ;;  %s132_s1 = inlined_call_operand.vmem [shape: f32[1,256], index: 1, kind: output, shape index: {}]  }
   0x1   :  { %v69_v0 = vld [vmem:[%s131_s0 + $0x7] ss:$8 sm:%s7_s6]   ;;  %s84_s10 = smov 112   ;;  %v71_v1 = vld [vmem:[%s131_s0 + $0x5] ss:$8 sm:%s21_s9]   ;;  %s14_s13 = smov 3 }
   0x2   :  { %9 = vrot.lane.b32.xlu0 %v69_v0, %s84_s10  ;;  %s85_s14 = smov 80   ;;  %v70_v2 = vld [vmem:[%s131_s0 + $0x6] ss:$8 sm:%s14_s13]   ;;  %s28_s17 = smov 3  ;;  %vm32_vm4 = vcmask 654848   ;;  %vm39_vm5 = vcmask 523648  }
   0x3   :  { %23 = vrot.lane.b32.xlu1 %v71_v1, %s85_s14  ;;  %v72_v3 = vld [vmem:[%s131_s0 + $0x4] ss:$8 sm:%s28_s17]   ;;  %s35_s20 = smov 3  ;;  %s42_s21 = smov 3  ;;  %vm46_vm6 = vcmask 392448   ;;  %vm53_vm7 = vcmask 261248  }
   0x4   :  { %s86_s22 = smov 96   ;;  %s87_s23 = smov 64   ;;  %v73_v4 = vld [vmem:[%s131_s0 + $0x3] ss:$8 sm:%s35_s20]   ;;  %v74_v5 = vld [vmem:[%s131_s0 + $0x2] ss:$8 sm:%s42_s21]  }
   0x5   :  { %s2_s26 = smov 3  ;;  %s49_s29 = smov 3 }
   0x6   :  { %16 = vrot.lane.b32.xlu0 %v70_v2, %s86_s22  ;;  %v3_v6 = vld [vmem:[%s131_s0] ss:$8 sm:%s2_s26]   ;;  %s88_s3 = smov 48   ;;  %s89_s4 = smov 32  }
   0x7   :  { %30 = vrot.lane.b32.xlu1 %v72_v3, %s87_s23  ;;  %5 = vst.msk [vmem:[#allocation0] ss:$8 sm:$0x3] %vm4_vm0, %v3_v6   ;;  %v75_v7 = vld [vmem:[%s131_s0 + $0x1] ss:$8 sm:%s49_s29]   ;;  %s90_s0 = smov 16  }
   0xa   :  { %37 = vrot.lane.b32.xlu0 %v73_v4, %s88_s3 }
   0xb   :  { %44 = vrot.lane.b32.xlu1 %v74_v5, %s89_s4 }
   0xe   :  { %51 = vrot.lane.b32.xlu0 %v75_v7, %s90_s0 }
  0x74   :  { %v10_v8 = vpop.permute.xlu0 %9  }
  0x75   :  { %12 = vst.msk [vmem:[#allocation0] ss:$8 sm:$0x3] %vm11_vm1, %v10_v8   ;;  %v24_v9 = vpop.permute.xlu1 %23  }
  0x78   :  { %v17_v10 = vpop.permute.xlu0 %16  }
  0x79   :  { %19 = vst.msk [vmem:[#allocation0] ss:$8 sm:$0x3] %vm18_vm2, %v17_v10   ;;  %v31_v11 = vpop.permute.xlu1 %30  }
  0x7a   :  { %26 = vst.msk [vmem:[#allocation0] ss:$8 sm:$0x3] %vm25_vm3, %v24_v9  }
  0x7b   :  { %33 = vst.msk [vmem:[#allocation0] ss:$8 sm:$0x3] %vm32_vm4, %v31_v11  }
  0x7c   :  { %v38_v12 = vpop.permute.xlu0 %37  }
  0x7d   :  { %40 = vst.msk [vmem:[#allocation0] ss:$8 sm:$0x3] %vm39_vm5, %v38_v12   ;;  %v45_v13 = vpop.permute.xlu1 %44  }
  0x7e   :  { %47 = vst.msk [vmem:[#allocation0] ss:$8 sm:$0x3] %vm46_vm6, %v45_v13  }
  0x80   :  { %v52_v14 = vpop.permute.xlu0 %51  }
  0x81   :  { %54 = vst.msk [vmem:[#allocation0] ss:$8 sm:$0x3] %vm53_vm7, %v52_v14  }
  0x88   :  { %v59_v15 = vld [vmem:[#allocation0] sm:$0x1]  ;;  %v64_v16 = vld [vmem:[#allocation0 + $0x8] sm:$0x1] }
  0x89   :  { %62 = vst [vmem:[%s132_s1] sm:$0x1] %v59_v15  ;;  %76 = vst [vmem:[%s132_s1 + $0x1] sm:$0x1] %v64_v16 }

// kernel: critic_forward.10
= control target key start
LH: loop header
LB: loop body
LE: loop exit
PB: predicated region body
PF: predicated region fallthrough
CT: control target
= control target key end

     0   :  { %v229_v1 = vmov 0   ;;  %vm77_vm0 = vcmask 392192   ;;  %v27_v9 = vlaneseq  ;;  %s289_s1 = inlined_call_operand.vmem [shape: bf16[48,256], index: 1, kind: input, shape index: {}]   ;;  %s290_s0 = inlined_call_operand.vmem [shape: bf16[32,48], index: 0, kind: input, shape index: {}]   ;;  %s291_s2 = inlined_call_operand.vmem [shape: f32[1,256], index: 2, kind: input, shape index: {}]   ;;  %s292_s3 = inlined_call_operand.vmem [shape: bf16[32,256], index: 3, kind: output, shape index: {}]  }
   0x1   :  { %v218_v0 = vld [vmem:[%s289_s1 + $0x24] ss:$8 sps:$4 sm:$0xff]   ;;  %116 = vmatprep.mubr.bf16.mxu0 %v229_v1  ;;  %126 = vmatprep.mubr.bf16.mxu1 %v229_v1  ;;  %v220_v2 = vld [vmem:[%s289_s1 + $0x20] ss:$8 sps:$4 sm:$0xff]   ;;  %v221_v3 = vld [vmem:[%s289_s1 + $0x14] ss:$8 sps:$4 sm:$0xff]  }
   0x2   :  { %94 = vmatprep.subr.bf16.mxu0 %v218_v0  ;;  %211 = vmatprep.subr.bf16.mxu1 %v218_v0  ;;  %v223_v4 = vld [vmem:[%s289_s1 + $0x10] ss:$8 sps:$4 sm:$0xff]   ;;  %v224_v5 = vld [vmem:[%s289_s1 + $0x4] ss:$8 sps:$4 sm:$0xff]   ;;  %v226_v6 = vld [vmem:[%s289_s1] ss:$8 sps:$4 sm:$0xff]  }
   0x3   :  { %95 = vmatpush1.bf16.msra.mxu0 %v220_v2  ;;  %214 = vmatpush1.bf16.msra.mxu1 %v220_v2  ;;  %v227_v7 = vld [vmem:[%s290_s0] sm:$0xff]   ;;  %v228_v8 = vld [vmem:[%s290_s0 + $0x8] sm:$0xff]   ;;  %v28_v10 = vshrl.u32 %v27_v9, 7 }
   0x4   :  { %96 = vmatprep.subr.bf16.mxu0 %v221_v3  ;;  %212 = vmatprep.subr.bf16.mxu1 %v221_v3  ;;  %v25_v12 = vld [vmem:[%s291_s2] sm:$0x3] }
   0x5   :  { %v29_v11 = vsub.s32 0, %v28_v10  ;;  %v33_v13 = vsub.s32 1, %v28_v10 }
   0x7   :  { %97 = vmatpush1.bf16.msra.mxu0 %v223_v4  ;;  %215 = vmatpush1.bf16.msra.mxu1 %v223_v4  ;;  %v30_v14 = vrot.slane %v25_v12, %v29_v11  ;;  %v34_v17 = vrot.slane %v25_v12, %v33_v13 }
   0x8   :  { %98 = vmatprep.subr.bf16.mxu0 %v224_v5  ;;  %213 = vmatprep.subr.bf16.mxu1 %v224_v5 }
   0xb   :  { %99 = vmatpush1.bf16.msra.mxu0 %v226_v6  ;;  %216 = vmatpush1.bf16.msra.mxu1 %v226_v6 }
   0xe   :  { %201 = vmatmul.mubr.msk.bf16.vlgmr.msra.gmra.mxu0 %vm77_vm0, %v227_v7  ;;  %202 = vmatmul.mubr.msk.bf16.vlgmr.msra.gmra.mxu1 %vm77_vm0, %v228_v8 }
  0xce   :  { %v118_v15 = vpop.f32.mrf.mxu0  ;;  %v128_v16 = vpop.f32.mrf.mxu1 }
  0xcf   :  { %v119_v18 = vadd.f32 %v118_v15, %v30_v14  ;;  %v129_v19 = vadd.f32 %v128_v16, %v30_v14 }
  0xd0   :  { %v120_v20 = vpop.f32.mrf.mxu0  ;;  %v130_v21 = vpop.f32.mrf.mxu1 }
  0xd1   :  { %v145_v22 = vmul.f32 0.2, %v119_v18  ;;  %v149_v23 = vmul.f32 0.2, %v129_v19  ;;  %vm137_vm1 = vcmp.ge.f32.partialorder %v119_v18, 0.0  ;;  %vm141_vm2 = vcmp.ge.f32.partialorder %v129_v19, 0.0 }
  0xd2   :  { %v121_v24 = vadd.f32 %v120_v20, %v34_v17  ;;  %v131_v25 = vadd.f32 %v130_v21, %v34_v17  ;;  %v122_v26 = vpop.f32.mrf.mxu0  ;;  %v132_v27 = vpop.f32.mrf.mxu1 }
  0xd3   :  { %v123_v28 = vadd.f32 %v122_v26, %v30_v14  ;;  %v133_v29 = vadd.f32 %v132_v27, %v30_v14  ;;  %v153_v34 = vsel %vm137_vm1, %v119_v18, %v145_v22  ;;  %v157_v35 = vsel %vm141_vm2, %v129_v19, %v149_v23 }
  0xd4   :  { %vm138_vm3 = vcmp.ge.f32.partialorder %v121_v24, 0.0  ;;  %v146_v30 = vmul.f32 0.2, %v121_v24  ;;  %vm142_vm4 = vcmp.ge.f32.partialorder %v131_v25, 0.0  ;;  %v150_v31 = vmul.f32 0.2, %v131_v25  ;;  %v124_v32 = vpop.f32.mrf.mxu0  ;;  %v134_v33 = vpop.f32.mrf.mxu1 }
  0xd5   :  { %v147_v36 = vmul.f32 0.2, %v123_v28  ;;  %v151_v37 = vmul.f32 0.2, %v133_v29  ;;  %v125_v40 = vadd.f32 %v124_v32, %v34_v17  ;;  %v135_v41 = vadd.f32 %v134_v33, %v34_v17 }
  0xd6   :  { %v154_v38 = vsel %vm138_vm3, %v121_v24, %v146_v30  ;;  %v158_v39 = vsel %vm142_vm4, %v131_v25, %v150_v31  ;;  %vm139_vm5 = vcmp.ge.f32.partialorder %v123_v28, 0.0  ;;  %vm143_vm6 = vcmp.ge.f32.partialorder %v133_v29, 0.0 }
  0xd7   :  { %v207_v42 = vpack.c.bf16 %v154_v38, %v153_v34  ;;  %v209_v43 = vpack.c.bf16 %v158_v39, %v157_v35  ;;  %vm140_vm7 = vcmp.ge.f32.partialorder %v125_v40, 0.0  ;;  %v148_v44 = vmul.f32 0.2, %v125_v40 }
  0xd8   :  { %vm144_vm8 = vcmp.ge.f32.partialorder %v135_v41, 0.0  ;;  %v152_v45 = vmul.f32 0.2, %v135_v41  ;;  %v155_v46 = vsel %vm139_vm5, %v123_v28, %v147_v36  ;;  %v159_v47 = vsel %vm143_vm6, %v133_v29, %v151_v37 }
  0xd9   :  { %185 = vst [vmem:[%s292_s3] sm:$0xff] %v207_v42  ;;  %187 = vst [vmem:[%s292_s3 + $0x10] sm:$0xff] %v209_v43  ;;  %v156_v48 = vsel %vm140_vm7, %v125_v40, %v148_v44 }
  0xda   :  { %v160_v49 = vsel %vm144_vm8, %v135_v41, %v152_v45  ;;  %v208_v50 = vpack.c.bf16 %v156_v48, %v155_v46 }
  0xdb   :  { %v210_v51 = vpack.c.bf16 %v160_v49, %v159_v47 }
  0xdc   :  { %186 = vst [vmem:[%s292_s3 + $0x8] sm:$0xff] %v208_v50 }
  0xdd   :  { %188 = vst [vmem:[%s292_s3 + $0x18] sm:$0xff] %v210_v51 }

// kernel: tile.48
= control target key start
LH: loop header
LB: loop body
LE: loop exit
PB: predicated region body
PF: predicated region fallthrough
CT: control target
= control target key end

     0   :  { %s28_s0 = inlined_call_operand.vmem [shape: f32[16], index: 0, kind: input, shape index: {}]   ;;  %s29_s1 = inlined_call_operand.vmem [shape: f32[16,16], index: 1, kind: output, shape index: {}]  }
   0x1   :  { %v4_v0 = vld [vmem:[%s28_s0] ss:$0 sm:$0xff] }
   0x2   :  { %5 = vst [vmem:[%s29_s1] sm:$0xff] %v4_v0  ;;  %8 = vst [vmem:[%s29_s1 + $0x8] sm:$0xff] %v4_v0 }

// kernel: critic_forward.11
= control target key start
LH: loop header
LB: loop body
LE: loop exit
PB: predicated region body
PF: predicated region fallthrough
CT: control target
= control target key end

     0   :  { %s1483_s12 = smov 0   ;;  %s1815_s0 = inlined_call_operand.vmem [shape: bf16[2,16,256], index: 0, kind: input, shape index: {}]   ;;  %s1816_s1 = inlined_call_operand.vmem [shape: bf16[3,256,256], index: 1, kind: input, shape index: {}]   ;;  %s1817_s2 = inlined_call_operand.vmem [shape: f32[1,256], index: 2, kind: input, shape index: {}]   ;;  %s1818_s3 = inlined_call_operand.vmem [shape: bf16[2,16,256], index: 3, kind: output, shape index: {}]  }
   0x1 LB: > { %s1111_s13 = sadd.s32 4294967295, %s1459_s12   ;;  %p1115_p0 = scmp.ge.s32.totalorder %s1459_s12, 1  ;;  %s1459_s12 = sphi %s1483_s12, %s13_s12  }
   0x2   : > { %p137_p1 = scmp.lt.s32.totalorder %s1459_s12, 3 }
   0x4   : > { %p138_p2 = pnand %p1115_p0, %p137_p1 }
   0x5   : > { %p161_p3 = scmp.lt.s32.totalorder (!%p138_p2), %s1111_s13, 1 }
   0x6   : > { %141 = sbr.rel (%p138_p2) target bundleno = 496 (0x1f0), region = 32 }
   0xb   : > { %v174_v0 = vlaneseq  ;;  %v1461_v1 = vmov 0   ;;  %v1309_v2 = vld [vmem:[%s1816_s1 + $0x74] ss:$8 sps:$4 sm:$0xff]   ;;  %v1311_v3 = vld [vmem:[%s1816_s1 + $0x70] ss:$8 sps:$4 sm:$0xff]   ;;  %s1820_s13 = smov (!%p161_p3, %s1111_s13), 1 }
   0xc   : > { %242 = vmatprep.mubr.bf16.mxu1 %v1461_v1  ;;  %528 = vmatprep.subr.bf16.mxu0 %v1309_v2  ;;  %s1292_s18 = sshll.u32 %s1820_s13, 4  ;;  %v1315_v8 = vld [vmem:[%s1816_s1 + $0x64] ss:$8 sps:$4 sm:$0xff]   ;;  %v1317_v9 = vld [vmem:[%s1816_s1 + $0x60] ss:$8 sps:$4 sm:$0xff]   ;;  %v1462_v14 = vmov 0.0  }
   0xd   : > { %v1499_v4 = vshrl.u32 %v174_v0, 7  ;;  %v178_v5 = vand.u32 127, %v174_v0  ;;  %529 = vmatpush1.bf16.msra.mxu0 %v1311_v3  ;;  %s165_s23 = scalar_lea.vmem %s1815_s0, %s1292_s18  ;;  %vm206_vm2 = vcmask 130048   ;;  %v1321_v18 = vld [vmem:[%s1816_s1 + $0x54] ss:$8 sps:$4 sm:$0xff]   ;;  %s170_s22 = scalar_lea.vmem %s1818_s3, %s1292_s18 }
   0xe   : > { %v1306_v10 = vld [vmem:[%s165_s23 + $0x4] ss:$8 sps:$4 sm:$0xff]   ;;  %530 = vmatprep.subr.bf16.mxu0 %v1315_v8  ;;  %v1516_v13 = vld [vmem:[%s165_s23] ss:$8 sps:$4 sm:$0xff]   ;;  %v1323_v19 = vld [vmem:[%s1816_s1 + $0x50] ss:$8 sps:$4 sm:$0xff]  }
   0xf   : > { %v176_v6 = vadd.s32 8, %v1499_v4  ;;  %v179_v7 = vadd.s32 1, %v178_v5  ;;  %v187_v12 = vadd.s32 1, %v1499_v4  ;;  %224 = vmatprep.subr.bf16.mxu1 %v1306_v10  ;;  %v1314_v20 = vld [vmem:[%s1816_s1 + $0x174] ss:$8 sps:$4 sm:$0xff]  }
  0x10   : > { %225 = vmatpush1.bf16.msra.mxu1 %v1516_v13  ;;  %v1327_v21 = vld [vmem:[%s1816_s1 + $0x44] ss:$8 sps:$4 sm:$0xff]   ;;  %v1329_v22 = vld [vmem:[%s1816_s1 + $0x40] ss:$8 sps:$4 sm:$0xff]   ;;  %v1333_v25 = vld [vmem:[%s1816_s1 + $0x34] ss:$8 sps:$4 sm:$0xff]  }
  0x11   : > { %vm180_vm0 = vcmp.eq.s32.totalorder %v1499_v4, %v179_v7  ;;  %vm181_vm1 = vcmp.eq.s32.totalorder %v176_v6, %v179_v7  ;;  %v188_v11 = vadd.s32 1, %v176_v6  ;;  %531 = vmatpush1.bf16.msra.mxu0 %v1317_v9  ;;  %272 = vmatprep.subr.bf16.mxu1 %v1306_v10  ;;  %vm189_vm3 = vcmp.eq.s32.totalorder %v178_v5, %v187_v12  ;;  %v1335_v27 = vld [vmem:[%s1816_s1 + $0x30] ss:$8 sps:$4 sm:$0xff]   ;;  %v1339_v29 = vld [vmem:[%s1816_s1 + $0x24] ss:$8 sps:$4 sm:$0xff]  }
  0x12   : > { %v1120_v15 = vsel %vm180_vm0, 1.0, %v1462_v14  ;;  %v1121_v16 = vsel %vm181_vm1, 1.0, %v1462_v14  ;;  %532 = vmatprep.subr.bf16.mxu0 %v1321_v18  ;;  %v1122_v23 = vsel %vm189_vm3, 1.0, %v1462_v14  ;;  %v1312_v28 = vld [vmem:[%s1816_s1 + $0x170] ss:$8 sps:$4 sm:$0xff]  }
  0x13   : > { %v186_v17 = vpack.c.bf16 %v1121_v16, %v1120_v15  ;;  %vm190_vm4 = vcmp.eq.s32.totalorder %v178_v5, %v188_v11  ;;  %v1320_v30 = vld [vmem:[%s1816_s1 + $0x164] ss:$8 sps:$4 sm:$0xff]   ;;  %v1341_v31 = vld [vmem:[%s1816_s1 + $0x20] ss:$8 sps:$4 sm:$0xff]   ;;  %v1345_v33 = vld [vmem:[%s1816_s1 + $0x14] ss:$8 sps:$4 sm:$0xff]  }
  0x14   : > { %v1123_v24 = vsel %vm190_vm4, 1.0, %v1462_v14  ;;  %v1318_v32 = vld [vmem:[%s1816_s1 + $0x160] ss:$8 sps:$4 sm:$0xff]   ;;  %v1326_v34 = vld [vmem:[%s1816_s1 + $0x154] ss:$8 sps:$4 sm:$0xff]  }
  0x15   : > { %1126 = vmatmul.mubr.msk.bf16.vlgmr.msra.gmra.mxu1 %vm206_vm2, %v186_v17  ;;  %533 = vmatpush1.bf16.msra.mxu0 %v1323_v19  ;;  %v195_v26 = vpack.c.bf16 %v1123_v24, %v1122_v23  ;;  %v1347_v35 = vld [vmem:[%s1816_s1 + $0x10] ss:$8 sps:$4 sm:$0xff]   ;;  %v1351_v37 = vld [vmem:[%s1816_s1 + $0x4] ss:$8 sps:$4 sm:$0xff]   ;;  %v1353_v39 = vld [vmem:[%s1816_s1] ss:$8 sps:$4 sm:$0xff]  }
  0x16   : > { %273 = vmatpush1.bf16.msra.mxu1 %v1516_v13  ;;  %290 = vmatprep.mubr.bf16.mxu1 %v1461_v1  ;;  %v1324_v36 = vld [vmem:[%s1816_s1 + $0x150] ss:$8 sps:$4 sm:$0xff]   ;;  %v1332_v38 = vld [vmem:[%s1816_s1 + $0x144] ss:$8 sps:$4 sm:$0xff]   ;;  %v1330_v40 = vld [vmem:[%s1816_s1 + $0x140] ss:$8 sps:$4 sm:$0xff]  }
  0x17   : > { %731 = vmatprep.subr.bf16.mxu1 %v1314_v20  ;;  %534 = vmatprep.subr.bf16.mxu0 %v1327_v21  ;;  %v1357_v41 = vld [vmem:[%s1816_s1 + $0xf4] ss:$8 sps:$4 sm:$0xff]   ;;  %v1359_v43 = vld [vmem:[%s1816_s1 + $0xf0] ss:$8 sps:$4 sm:$0xff]   ;;  %v1363_v45 = vld [vmem:[%s1816_s1 + $0xe4] ss:$8 sps:$4 sm:$0xff]  }
  0x18   : > { %v1338_v42 = vld [vmem:[%s1816_s1 + $0x134] ss:$8 sps:$4 sm:$0xff]   ;;  %v1336_v44 = vld [vmem:[%s1816_s1 + $0x130] ss:$8 sps:$4 sm:$0xff]   ;;  %v1344_v46 = vld [vmem:[%s1816_s1 + $0x124] ss:$8 sps:$4 sm:$0xff]  }
  0x19   : > { %535 = vmatpush1.bf16.msra.mxu0 %v1329_v22  ;;  %v1365_v47 = vld [vmem:[%s1816_s1 + $0xe0] ss:$8 sps:$4 sm:$0xff]   ;;  %v1369_v49 = vld [vmem:[%s1816_s1 + $0xd4] ss:$8 sps:$4 sm:$0xff]   ;;  %v1348_v51 = vld [vmem:[%s1816_s1 + $0x110] ss:$8 sps:$4 sm:$0xff]  }
  0x1a   : > { %536 = vmatprep.subr.bf16.mxu0 %v1333_v25  ;;  %v1342_v48 = vld [vmem:[%s1816_s1 + $0x120] ss:$8 sps:$4 sm:$0xff]   ;;  %v1350_v50 = vld [vmem:[%s1816_s1 + $0x114] ss:$8 sps:$4 sm:$0xff]   ;;  %v1371_v52 = vld [vmem:[%s1816_s1 + $0xd0] ss:$8 sps:$4 sm:$0xff]  }
  0x1b   : > { %v1356_v53 = vld [vmem:[%s1816_s1 + $0x104] ss:$8 sps:$4 sm:$0xff]   ;;  %v1377_v55 = vld [vmem:[%s1816_s1 + $0xc0] ss:$8 sps:$4 sm:$0xff]   ;;  %v1381_v57 = vld [vmem:[%s1816_s1 + $0xb4] ss:$8 sps:$4 sm:$0xff]  }
  0x1c   : > { %v1375_v54 = vld [vmem:[%s1816_s1 + $0xc4] ss:$8 sps:$4 sm:$0xff]   ;;  %v1354_v56 = vld [vmem:[%s1816_s1 + $0x100] ss:$8 sps:$4 sm:$0xff]   ;;  %v1362_v58 = vld [vmem:[%s1816_s1 + $0x1f4] ss:$8 sps:$4 sm:$0xff]  }
  0x1d   : > { %1127 = vmatmul.mubr.msk.bf16.vlgmr.msra.gmra.mxu1 %vm206_vm2, %v195_v26  ;;  %537 = vmatpush1.bf16.msra.mxu0 %v1335_v27  ;;  %v1383_v59 = vld [vmem:[%s1816_s1 + $0xb0] ss:$8 sps:$4 sm:$0xff]   ;;  %v1387_v61 = vld [vmem:[%s1816_s1 + $0xa4] ss:$8 sps:$4 sm:$0xff]   ;;  %v1389_v63 = vld [vmem:[%s1816_s1 + $0xa0] ss:$8 sps:$4 sm:$0xff]  }
  0x1e   : > { %732 = vmatpush1.bf16.msra.mxu1 %v1312_v28  ;;  %538 = vmatprep.subr.bf16.mxu0 %v1339_v29  ;;  %v1360_v60 = vld [vmem:[%s1816_s1 + $0x1f0] ss:$8 sps:$4 sm:$0xff]   ;;  %v1368_v62 = vld [vmem:[%s1816_s1 + $0x1e4] ss:$8 sps:$4 sm:$0xff]   ;;  %v1366_v0 = vld [vmem:[%s1816_s1 + $0x1e0] ss:$8 sps:$4 sm:$0xff]  }
  0x1f   : > { %733 = vmatprep.subr.bf16.mxu1 %v1320_v30  ;;  %763 = vmatprep.mubr.bf16.mxu1 %v1306_v10  ;;  %v1374_v1 = vld [vmem:[%s1816_s1 + $0x1d4] ss:$8 sps:$4 sm:$0xff]   ;;  %v1372_v2 = vld [vmem:[%s1816_s1 + $0x1d0] ss:$8 sps:$4 sm:$0xff]   ;;  %v1380_v3 = vld [vmem:[%s1816_s1 + $0x1c4] ss:$8 sps:$4 sm:$0xff]  }
  0x20   : > { %v1378_v5 = vld [vmem:[%s1816_s1 + $0x1c0] ss:$8 sps:$4 sm:$0xff]   ;;  %v1386_v6 = vld [vmem:[%s1816_s1 + $0x1b4] ss:$8 sps:$4 sm:$0xff]   ;;  %v1384_v7 = vld [vmem:[%s1816_s1 + $0x1b0] ss:$8 sps:$4 sm:$0xff]  }
  0x21   : > { %539 = vmatpush1.bf16.msra.mxu0 %v1341_v31  ;;  %v1392_v8 = vld [vmem:[%s1816_s1 + $0x1a4] ss:$8 sps:$4 sm:$0xff]   ;;  %v1390_v9 = vld [vmem:[%s1816_s1 + $0x1a0] ss:$8 sps:$4 sm:$0xff]   ;;  %v1393_v10 = vld [vmem:[%s1816_s1 + $0x94] ss:$8 sps:$4 sm:$0xff]  }
  0x22   : > { %734 = vmatpush1.bf16.msra.mxu1 %v1318_v32  ;;  %540 = vmatprep.subr.bf16.mxu0 %v1345_v33  ;;  %v1395_v11 = vld [vmem:[%s1816_s1 + $0x90] ss:$8 sps:$4 sm:$0xff]   ;;  %v1398_v12 = vld [vmem:[%s1816_s1 + $0x194] ss:$8 sps:$4 sm:$0xff]   ;;  %v1399_v15 = vld [vmem:[%s1816_s1 + $0x84] ss:$8 sps:$4 sm:$0xff]  }
  0x23   : > { %735 = vmatprep.subr.bf16.mxu1 %v1326_v34  ;;  %v1396_v14 = vld [vmem:[%s1816_s1 + $0x190] ss:$8 sps:$4 sm:$0xff]   ;;  %v1401_v16 = vld [vmem:[%s1816_s1 + $0x80] ss:$8 sps:$4 sm:$0xff]   ;;  %v1404_v17 = vld [vmem:[%s1816_s1 + $0x184] ss:$8 sps:$4 sm:$0xff]  }
  0x24   : > { %v1402_v18 = vld [vmem:[%s1816_s1 + $0x180] ss:$8 sps:$4 sm:$0xff]   ;;  %v1407_v19 = vld [vmem:[%s1816_s1 + $0x274] ss:$8 sps:$4 sm:$0xff]   ;;  %v1405_v25 = vld [vmem:[%s1816_s1 + $0x270] ss:$8 sps:$4 sm:$0xff]  }
  0x25   : > { %541 = vmatpush1.bf16.msra.mxu0 %v1347_v35  ;;  %v1410_v27 = vld [vmem:[%s1816_s1 + $0x264] ss:$8 sps:$4 sm:$0xff]   ;;  %v1413_v30 = vld [vmem:[%s1816_s1 + $0x254] ss:$8 sps:$4 sm:$0xff]   ;;  %v1411_v33 = vld [vmem:[%s1816_s1 + $0x250] ss:$8 sps:$4 sm:$0xff]  }
  0x26   : > { %736 = vmatpush1.bf16.msra.mxu1 %v1324_v36  ;;  %542 = vmatprep.subr.bf16.mxu0 %v1351_v37  ;;  %v1416_v35 = vld [vmem:[%s1816_s1 + $0x244] ss:$8 sps:$4 sm:$0xff]   ;;  %v1414_v36 = vld [vmem:[%s1816_s1 + $0x240] ss:$8 sps:$4 sm:$0xff]   ;;  %v1419_v37 = vld [vmem:[%s1816_s1 + $0x234] ss:$8 sps:$4 sm:$0xff]  }
  0x27   : > { %737 = vmatprep.subr.bf16.mxu1 %v1332_v38  ;;  %v1417_v38 = vld [vmem:[%s1816_s1 + $0x230] ss:$8 sps:$4 sm:$0xff]  }
  0x29   : > { %543 = vmatpush1.bf16.msra.mxu0 %v1353_v39  ;;  %v1422_v39 = vld [vmem:[%s1816_s1 + $0x224] ss:$8 sps:$4 sm:$0xff]  }
  0x2a   : > { %738 = vmatpush1.bf16.msra.mxu1 %v1330_v40  ;;  %544 = vmatprep.subr.bf16.mxu0 %v1357_v41  ;;  %v1420_v40 = vld [vmem:[%s1816_s1 + $0x220] ss:$8 sps:$4 sm:$0xff]   ;;  %v1425_v41 = vld [vmem:[%s1816_s1 + $0x214] ss:$8 sps:$4 sm:$0xff]  }
  0x2b   : > { %739 = vmatprep.subr.bf16.mxu1 %v1338_v42  ;;  %v1423_v42 = vld [vmem:[%s1816_s1 + $0x210] ss:$8 sps:$4 sm:$0xff]  }
  0x2d   : > { %545 = vmatpush2.bf16.msra.mxu0 %v1359_v43  ;;  %v1428_v43 = vld [vmem:[%s1816_s1 + $0x204] ss:$8 sps:$4 sm:$0xff]  }
  0x2e   : > { %740 = vmatpush1.bf16.msra.mxu1 %v1336_v44  ;;  %546 = vmatprep.subr.bf16.mxu0 %v1363_v45  ;;  %v1426_v44 = vld [vmem:[%s1816_s1 + $0x200] ss:$8 sps:$4 sm:$0xff]   ;;  %v1431_v45 = vld [vmem:[%s1816_s1 + $0x2f4] ss:$8 sps:$4 sm:$0xff]  }
  0x2f   : > { %741 = vmatprep.subr.bf16.mxu1 %v1344_v46  ;;  %v1429_v46 = vld [vmem:[%s1816_s1 + $0x2f0] ss:$8 sps:$4 sm:$0xff]  }
  0x31   : > { %547 = vmatpush2.bf16.msra.mxu0 %v1365_v47  ;;  %v1434_v47 = vld [vmem:[%s1816_s1 + $0x2e4] ss:$8 sps:$4 sm:$0xff]  }
  0x32   : > { %742 = vmatpush1.bf16.msra.mxu1 %v1342_v48  ;;  %548 = vmatprep.subr.bf16.mxu0 %v1369_v49  ;;  %v1432_v48 = vld [vmem:[%s1816_s1 + $0x2e0] ss:$8 sps:$4 sm:$0xff]   ;;  %v1437_v49 = vld [vmem:[%s1816_s1 + $0x2d4] ss:$8 sps:$4 sm:$0xff]  }
  0x33   : > { %743 = vmatprep.subr.bf16.mxu1 %v1350_v50  ;;  %v1435_v50 = vld [vmem:[%s1816_s1 + $0x2d0] ss:$8 sps:$4 sm:$0xff]  }
  0x35   : > { %549 = vmatpush2.bf16.msra.mxu0 %v1371_v52  ;;  %v1438_v52 = vld [vmem:[%s1816_s1 + $0x2c0] ss:$8 sps:$4 sm:$0xff]  }
  0x36   : > { %744 = vmatpush1.bf16.msra.mxu1 %v1348_v51  ;;  %550 = vmatprep.subr.bf16.mxu0 %v1375_v54  ;;  %v1440_v51 = vld [vmem:[%s1816_s1 + $0x2c4] ss:$8 sps:$4 sm:$0xff]   ;;  %v1441_v54 = vld [vmem:[%s1816_s1 + $0x2b0] ss:$8 sps:$4 sm:$0xff]  }
  0x37   : > { %745 = vmatprep.subr.bf16.mxu1 %v1356_v53  ;;  %v1443_v53 = vld [vmem:[%s1816_s1 + $0x2b4] ss:$8 sps:$4 sm:$0xff]  }
  0x39   : > { %551 = vmatpush2.bf16.msra.mxu0 %v1377_v55  ;;  %v1446_v55 = vld [vmem:[%s1816_s1 + $0x2a4] ss:$8 sps:$4 sm:$0xff]  }
  0x3a   : > { %746 = vmatpush1.bf16.msra.mxu1 %v1354_v56  ;;  %552 = vmatprep.subr.bf16.mxu0 %v1381_v57  ;;  %v1444_v56 = vld [vmem:[%s1816_s1 + $0x2a0] ss:$8 sps:$4 sm:$0xff]   ;;  %v1449_v57 = vld [vmem:[%s1816_s1 + $0x294] ss:$8 sps:$4 sm:$0xff]  }
  0x3b   : > { %747 = vmatprep.subr.bf16.mxu1 %v1362_v58  ;;  %v1447_v58 = vld [vmem:[%s1816_s1 + $0x290] ss:$8 sps:$4 sm:$0xff]  }
  0x3d   : > { %553 = vmatpush2.bf16.msra.mxu0 %v1383_v59  ;;  %v1452_v59 = vld [vmem:[%s1816_s1 + $0x284] ss:$8 sps:$4 sm:$0xff]  }
  0x3e   : > { %748 = vmatpush2.bf16.msra.mxu1 %v1360_v60  ;;  %554 = vmatprep.subr.bf16.mxu0 %v1387_v61  ;;  %v1450_v60 = vld [vmem:[%s1816_s1 + $0x280] ss:$8 sps:$4 sm:$0xff]  }
  0x3f   : > { %749 = vmatprep.subr.bf16.mxu1 %v1368_v62 }
  0x41   : > { %555 = vmatpush2.bf16.msra.mxu0 %v1389_v63 }
  0x42   : > { %750 = vmatpush2.bf16.msra.mxu1 %v1366_v0  ;;  %556 = vmatprep.subr.bf16.mxu0 %v1393_v10 }
  0x43   : > { %751 = vmatprep.subr.bf16.mxu1 %v1374_v1 }
  0x45   : > { %557 = vmatpush2.bf16.msra.mxu0 %v1395_v11 }
  0x46   : > { %752 = vmatpush2.bf16.msra.mxu1 %v1372_v2  ;;  %558 = vmatprep.subr.bf16.mxu0 %v1399_v15 }
  0x47   : > { %753 = vmatprep.subr.bf16.mxu1 %v1380_v3  ;;  %v1018_v3 = vsub.s32 0, %v1499_v4 }
  0x49   : > { %559 = vmatpush2.bf16.msra.mxu0 %v1401_v16 }
  0x4a   : > { %754 = vmatpush2.bf16.msra.mxu1 %v1378_v5  ;;  %967 = vmatprep.subr.bf16.mxu0 %v1407_v19  ;;  %v1014_v5 = vld [vmem:[%s1817_s2] sm:$0x3] }
  0x4b   : > { %755 = vmatprep.subr.bf16.mxu1 %v1386_v6  ;;  %v1022_v6 = vsub.s32 1, %v1499_v4  ;;  %v1019_v10 = vrot.slane %v1014_v5, %v1018_v3 }
  0x4d   : > { %v1023_v15 = vrot.slane %v1014_v5, %v1022_v6 }
  0x4e   : > { %756 = vmatpush2.bf16.msra.mxu1 %v1384_v7 }
  0x4f   : > { %757 = vmatprep.subr.bf16.mxu1 %v1392_v8 }
  0x52   : > { %758 = vmatpush2.bf16.msra.mxu1 %v1390_v9 }
  0x53   : > { %759 = vmatprep.subr.bf16.mxu1 %v1398_v12 }
  0x56   : > { %760 = vmatpush2.bf16.msra.mxu1 %v1396_v14 }
  0x57   : > { %761 = vmatprep.subr.bf16.mxu1 %v1404_v17 }
  0x5a   : > { %762 = vmatpush2.bf16.msra.mxu1 %v1402_v18 }
  0x5d   : > { %764 = vmatmul.mubr.bf16.vlgmr.msra.gmra.mxu1 %v1516_v13  ;;  %v1408_v13 = vld [vmem:[%s1816_s1 + $0x260] ss:$8 sps:$4 sm:$0xff]  }
  0xd5   : > { %v244_v20 = vpop.f32.mrf.mxu1 }
  0xd7   : > { %v246_v21 = vpop.f32.mrf.mxu1 }
  0xd9   : > { %v248_v22 = vpop.f32.mrf.mxu1 }
  0xda   : > { %v253_v26 = vpack.c.bf16 %v248_v22, %v244_v20 }
  0xdb   : > { %v250_v23 = vpop.f32.mrf.mxu1 }
  0xdc   : > { %v254_v24 = vpack.c.bf16 %v250_v23, %v246_v21 }
  0xdd   : > { %v1712_v28 = vpop.f32.mrf.mxu1 }
  0xde   : > { %560 = vmatprep.mubr.bf16.mxu0 %v254_v24 }
  0xdf   : > { %561 = vmatmul.mubr.bf16.vlgmr.msra.gmra.mxu0 %v253_v26  ;;  %v294_v29 = vpop.f32.mrf.mxu1 }
  0xe0   : > { %968 = vmatpush1.bf16.msra.mxu0 %v1405_v25 }
  0xe1   : > { %969 = vmatprep.subr.bf16.mxu0 %v1410_v27  ;;  %v296_v31 = vpop.f32.mrf.mxu1 }
  0xe2   : > { %v301_v61 = vpack.c.bf16 %v296_v31, %v1712_v28 }
  0xe3   : > { %v298_v32 = vpop.f32.mrf.mxu1 }
  0xe4   : > { %970 = vmatpush1.bf16.msra.mxu0 %v1408_v13  ;;  %v302_v34 = vpack.c.bf16 %v298_v32, %v294_v29 }
  0xe5   : > { %971 = vmatprep.subr.bf16.mxu0 %v1413_v30 }
  0xe6   : > { %999 = vmatprep.mubr.bf16.mxu0 %v302_v34 }
  0xe8   : > { %972 = vmatpush1.bf16.msra.mxu0 %v1411_v33 }
  0xe9   : > { %973 = vmatprep.subr.bf16.mxu0 %v1416_v35 }
  0xec   : > { %974 = vmatpush1.bf16.msra.mxu0 %v1414_v36 }
  0xed   : > { %975 = vmatprep.subr.bf16.mxu0 %v1419_v37 }
  0xf0   : > { %976 = vmatpush1.bf16.msra.mxu0 %v1417_v38 }
  0xf1   : > { %977 = vmatprep.subr.bf16.mxu0 %v1422_v39 }
  0xf4   : > { %978 = vmatpush1.bf16.msra.mxu0 %v1420_v40 }
  0xf5   : > { %979 = vmatprep.subr.bf16.mxu0 %v1425_v41 }
  0xf8   : > { %980 = vmatpush1.bf16.msra.mxu0 %v1423_v42 }
  0xf9   : > { %981 = vmatprep.subr.bf16.mxu0 %v1428_v43 }
  0xfc   : > { %982 = vmatpush1.bf16.msra.mxu0 %v1426_v44 }
  0xfd   : > { %983 = vmatprep.subr.bf16.mxu0 %v1431_v45 }
 0x100   : > { %984 = vmatpush2.bf16.msra.mxu0 %v1429_v46 }
 0x101   : > { %985 = vmatprep.subr.bf16.mxu0 %v1434_v47 }
 0x104   : > { %986 = vmatpush2.bf16.msra.mxu0 %v1432_v48 }
 0x105   : > { %987 = vmatprep.subr.bf16.mxu0 %v1437_v49 }
 0x108   : > { %988 = vmatpush2.bf16.msra.mxu0 %v1435_v50 }
 0x109   : > { %989 = vmatprep.subr.bf16.mxu0 %v1440_v51 }
 0x10c   : > { %990 = vmatpush2.bf16.msra.mxu0 %v1438_v52 }
 0x10d   : > { %991 = vmatprep.subr.bf16.mxu0 %v1443_v53 }
 0x110   : > { %992 = vmatpush2.bf16.msra.mxu0 %v1441_v54 }
 0x111   : > { %993 = vmatprep.subr.bf16.mxu0 %v1446_v55 }
 0x114   : > { %994 = vmatpush2.bf16.msra.mxu0 %v1444_v56 }
 0x115   : > { %995 = vmatprep.subr.bf16.mxu0 %v1449_v57 }
 0x118   : > { %996 = vmatpush2.bf16.msra.mxu0 %v1447_v58 }
 0x119   : > { %997 = vmatprep.subr.bf16.mxu0 %v1452_v59 }
 0x11c   : > { %998 = vmatpush2.bf16.msra.mxu0 %v1450_v60 }
 0x11d   : > { %v765_v0 = vpop.f32.mrf.mxu1 }
 0x11f   : > { %1000 = vmatmul.mubr.bf16.vlgmr.msra.gmra.mxu0 %v301_v61  ;;  %v767_v2 = vpop.f32.mrf.mxu1 }
 0x121   : > { %v769_v9 = vpop.f32.mrf.mxu1 }
 0x123   : > { %v771_v18 = vpop.f32.mrf.mxu1 }
 0x19f   : > { %v562_v62 = vpop.f32.mrf.mxu0 }
 0x1a0   : > { %v766_v8 = vadd.f32 %v765_v0, %v562_v62 }
 0x1a1   : > { %v564_v63 = vpop.f32.mrf.mxu0 }
 0x1a2   : > { %v768_v12 = vadd.f32 %v767_v2, %v564_v63 }
 0x1a3   : > { %v566_v1 = vpop.f32.mrf.mxu0 }
 0x1a4   : > { %v770_v17 = vadd.f32 %v769_v9, %v566_v1 }
 0x1a5   : > { %v568_v7 = vpop.f32.mrf.mxu0 }
 0x1a6   : > { %v772_v25 = vadd.f32 %v771_v18, %v568_v7 }
 0x1df   : > { %v1001_v11 = vpop.f32.mrf.mxu0 }
 0x1e0   : > { %v1010_v14 = vadd.f32 %v1001_v11, %v766_v8 }
 0x1e1   : > { %v1003_v16 = vpop.f32.mrf.mxu0 }
 0x1e2   : > { %v1026_v19 = vadd.f32 %v1019_v10, %v1010_v14  ;;  %v1011_v20 = vadd.f32 %v1003_v16, %v768_v12 }
 0x1e3   : > { %v1005_v21 = vpop.f32.mrf.mxu0 }
 0x1e4   : > { %v1034_v22 = vmul.f32 0.2, %v1026_v19  ;;  %v1027_v23 = vadd.f32 %v1023_v15, %v1011_v20  ;;  %v1012_v24 = vadd.f32 %v1005_v21, %v770_v17  ;;  %vm1030_vm5 = vcmp.ge.f32.partialorder %v1026_v19, 0.0 }
 0x1e5   : > { %v1007_v4 = vpop.f32.mrf.mxu0 }
 0x1e6   : > { %vm1031_vm6 = vcmp.ge.f32.partialorder %v1027_v23, 0.0  ;;  %v1035_v26 = vmul.f32 0.2, %v1027_v23  ;;  %v1028_v27 = vadd.f32 %v1019_v10, %v1012_v24  ;;  %v1013_v28 = vadd.f32 %v1007_v4, %v772_v25 }
 0x1e7   : > { %v1038_v29 = vsel %vm1030_vm5, %v1026_v19, %v1034_v22 }
 0x1e8   : > { %v1039_v13 = vsel %vm1031_vm6, %v1027_v23, %v1035_v26  ;;  %v1036_v31 = vmul.f32 0.2, %v1028_v27  ;;  %v1029_v32 = vadd.f32 %v1023_v15, %v1013_v28  ;;  %vm1032_vm7 = vcmp.ge.f32.partialorder %v1028_v27, 0.0 }
 0x1e9   : > { %v1294_v30 = vpack.c.bf16 %v1039_v13, %v1038_v29 }
 0x1ea   : > { %vm1033_vm8 = vcmp.ge.f32.partialorder %v1029_v32, 0.0  ;;  %v1037_v33 = vmul.f32 0.2, %v1029_v32  ;;  %v1040_v34 = vsel %vm1032_vm7, %v1028_v27, %v1036_v31 }
 0x1eb   : > { %1054 = vst [vmem:[%s170_s22] sm:$0xff] %v1294_v30 }
 0x1ec   : > { %v1041_v35 = vsel %vm1033_vm8, %v1029_v32, %v1037_v33 }
 0x1ed   : > { %v1295_v36 = vpack.c.bf16 %v1041_v35, %v1040_v34 }
 0x1ef   : > { %1055 = vst [vmem:[%s170_s22 + $0x8] sm:$0xff] %v1295_v36 }
 0x1f0 PF: > { %s13_s12 = sadd.s32 1, %s1459_s12  }
 0x1f1   : > { %p10_p4 = scmp.ge.s32.totalorder %s13_s12, 4  }
 0x1f3   :  { %12 = sbr.rel (!%p10_p4) target bundleno = 1 (0x1), region = 64 }

// kernel: tile.53
= control target key start
LH: loop header
LB: loop body
LE: loop exit
PB: predicated region body
PF: predicated region fallthrough
CT: control target
= control target key end

     0   :  { %s28_s0 = inlined_call_operand.vmem [shape: f32[32], index: 0, kind: input, shape index: {}]   ;;  %s29_s1 = inlined_call_operand.vmem [shape: f32[16,32], index: 1, kind: output, shape index: {}]  }
   0x1   :  { %v4_v0 = vld [vmem:[%s28_s0] ss:$0 sm:$0xff] }
   0x2   :  { %5 = vst [vmem:[%s29_s1] sm:$0xff] %v4_v0  ;;  %8 = vst [vmem:[%s29_s1 + $0x8] sm:$0xff] %v4_v0 }

// kernel: tile.54
= control target key start
LH: loop header
LB: loop body
LE: loop exit
PB: predicated region body
PF: predicated region fallthrough
CT: control target
= control target key end

     0   :  { %s62_s8 = smov 96   ;;  %vm3_vm0 = vcmask 261120   ;;  %s64_s15 = smov 64   ;;  %vm9_vm1 = vcmask 1048320   ;;  %vm15_vm2 = vcmask 785920   ;;  %vm21_vm3 = vcmask 523520   ;;  %s99_s0 = inlined_call_operand.vmem [shape: f32[16,32], index: 0, kind: input, shape index: {}]   ;;  %s100_s1 = inlined_call_operand.vmem [shape: f32[1,512], index: 1, kind: output, shape index: {}]  }
   0x1   :  { %v53_v0 = vld [vmem:[%s99_s0 + $0x3] ss:$4 sm:$0xf]   ;;  %v54_v1 = vld [vmem:[%s99_s0 + $0x2] ss:$4 sm:$0xf]  }
   0x2   :  { %7 = vrot.lane.b32.xlu0 %v53_v0, %s62_s8  ;;  %v55_v2 = vld [vmem:[%s99_s0 + $0x1] ss:$4 sm:$0xf]   ;;  %v2_v3 = vld [vmem:[%s99_s0] ss:$4 sm:$0xf]  }
   0x3   :  { %s63_s0 = smov 32   ;;  %4 = vst.msk [vmem:[#allocation0] ss:$8 sm:$0xf] %vm3_vm0, %v2_v3  }
   0x4   :  { %19 = vrot.lane.b32.xlu1 %v55_v2, %s63_s0 }
   0x6   :  { %13 = vrot.lane.b32.xlu0 %v54_v1, %s64_s15 }
  0x74   :  { %v8_v4 = vpop.permute.xlu0 %7  }
  0x75   :  { %10 = vst.msk [vmem:[#allocation0] ss:$8 sm:$0xf] %vm9_vm1, %v8_v4  }
  0x76   :  { %v20_v5 = vpop.permute.xlu1 %19  }
  0x78   :  { %v14_v6 = vpop.permute.xlu0 %13  }
  0x79   :  { %16 = vst.msk [vmem:[#allocation0] ss:$8 sm:$0xf] %vm15_vm2, %v14_v6  }
  0x7a   :  { %22 = vst.msk [vmem:[#allocation0] ss:$8 sm:$0xf] %vm21_vm3, %v20_v5  }
  0x81   :  { %v27_v7 = vld [vmem:[#allocation0] sm:$0x1]  ;;  %v32_v8 = vld [vmem:[#allocation0 + $0x8] sm:$0x1]  ;;  %v38_v9 = vld [vmem:[#allocation0 + $0x10] sm:$0x1] }
  0x82   :  { %30 = vst [vmem:[%s100_s1] sm:$0x1] %v27_v7  ;;  %56 = vst [vmem:[%s100_s1 + $0x1] sm:$0x1] %v32_v8  ;;  %v45_v10 = vld [vmem:[#allocation0 + $0x18] sm:$0x1] }
  0x83   :  { %57 = vst [vmem:[%s100_s1 + $0x2] sm:$0x1] %v38_v9  ;;  %58 = vst [vmem:[%s100_s1 + $0x3] sm:$0x1] %v45_v10 }

// kernel: critic_forward.12
= control target key start
LH: loop header
LB: loop body
LE: loop exit
PB: predicated region body
PF: predicated region fallthrough
CT: control target
= control target key end

     0   :  { %s2540_s12 = smov 0   ;;  %s3167_s0 = inlined_call_operand.vmem [shape: bf16[2,16,256], index: 0, kind: input, shape index: {}]   ;;  %s3168_s1 = inlined_call_operand.vmem [shape: bf16[3,256,512], index: 1, kind: input, shape index: {}]   ;;  %s3169_s2 = inlined_call_operand.vmem [shape: f32[1,512], index: 2, kind: input, shape index: {}]   ;;  %s3170_s3 = inlined_call_operand.vmem [shape: bf16[2,16,512], index: 3, kind: output, shape index: {}]  }
   0x1 LB: > { %s1860_s13 = sadd.s32 4294967295, %s2516_s12   ;;  %p1864_p0 = scmp.ge.s32.totalorder %s2516_s12, 1  ;;  %s2516_s12 = sphi %s2540_s12, %s13_s12  }
   0x2   : > { %p137_p1 = scmp.lt.s32.totalorder %s2516_s12, 3 }
   0x4   : > { %p138_p2 = pnand %p1864_p0, %p137_p1 }
   0x5   : > { %p161_p3 = scmp.lt.s32.totalorder (!%p138_p2), %s1860_s13, 1 }
   0x6   : > { %141 = sbr.rel (%p138_p2) target bundleno = 561 (0x231), region = 32 }
   0xb   : > { %v174_v0 = vlaneseq  ;;  %v2518_v1 = vmov 0   ;;  %s3172_s13 = smov (!%p161_p3, %s1860_s13), 1  ;;  %v2224_v7 = vld [vmem:[%s3168_s1 + $0xe4] ss:$16 sps:$4 sm:$0xff]   ;;  %v2227_v8 = vld [vmem:[%s3168_s1 + $0xec] ss:$16 sps:$4 sm:$0xff]  }
   0xc   : > { %242 = vmatprep.mubr.bf16.mxu0 %v2518_v1  ;;  %290 = vmatprep.mubr.bf16.mxu1 %v2518_v1  ;;  %s2203_s14 = sshll.u32 %s3172_s13, 4  ;;  %v2519_v12 = vmov 0.0   ;;  %vm206_vm3 = vcmask 130048   ;;  %v2222_v18 = vld [vmem:[%s3168_s1 + $0xe0] ss:$16 sps:$4 sm:$0xff]   ;;  %s2204_s29 = sshll.u32 %s3172_s13, 5 }
   0xd   : > { %v2550_v2 = vshrl.u32 %v174_v0, 7  ;;  %v178_v3 = vand.u32 127, %v174_v0  ;;  %s165_s17 = scalar_lea.vmem %s3167_s0, %s2203_s14  ;;  %v2225_v19 = vld [vmem:[%s3168_s1 + $0xe8] ss:$16 sps:$4 sm:$0xff]   ;;  %v2230_v21 = vld [vmem:[%s3168_s1 + $0xc4] ss:$16 sps:$4 sm:$0xff]   ;;  %s170_s5 = scalar_lea.vmem %s3170_s3, %s2204_s29 }
   0xe   : > { %v2564_v9 = vld [vmem:[%s165_s17 + $0x4] ss:$8 sps:$4 sm:$0xff]   ;;  %v2567_v11 = vld [vmem:[%s165_s17] ss:$8 sps:$4 sm:$0xff]  }
   0xf   : > { %v176_v4 = vadd.s32 8, %v2550_v2  ;;  %v179_v5 = vadd.s32 1, %v178_v3  ;;  %v187_v6 = vadd.s32 1, %v2550_v2  ;;  %224 = vmatprep.subr.bf16.mxu0 %v2564_v9  ;;  %272 = vmatprep.subr.bf16.mxu1 %v2564_v9  ;;  %v2233_v22 = vld [vmem:[%s3168_s1 + $0xcc] ss:$16 sps:$4 sm:$0xff]  }
  0x10   : > { %225 = vmatpush1.bf16.msra.mxu0 %v2567_v11  ;;  %273 = vmatpush1.bf16.msra.mxu1 %v2567_v11  ;;  %v2228_v23 = vld [vmem:[%s3168_s1 + $0xc0] ss:$16 sps:$4 sm:$0xff]   ;;  %v2231_v24 = vld [vmem:[%s3168_s1 + $0xc8] ss:$16 sps:$4 sm:$0xff]   ;;  %v2236_v25 = vld [vmem:[%s3168_s1 + $0xa4] ss:$16 sps:$4 sm:$0xff]  }
  0x11   : > { %vm180_vm0 = vcmp.eq.s32.totalorder %v2550_v2, %v179_v5  ;;  %vm181_vm1 = vcmp.eq.s32.totalorder %v176_v4, %v179_v5  ;;  %v188_v10 = vadd.s32 1, %v176_v4  ;;  %vm189_vm2 = vcmp.eq.s32.totalorder %v178_v3, %v187_v6  ;;  %752 = vmatprep.subr.bf16.mxu0 %v2224_v7  ;;  %795 = vmatprep.subr.bf16.mxu1 %v2227_v8  ;;  %v2239_v26 = vld [vmem:[%s3168_s1 + $0xac] ss:$16 sps:$4 sm:$0xff]   ;;  %v2234_v27 = vld [vmem:[%s3168_s1 + $0xa0] ss:$16 sps:$4 sm:$0xff]  }
  0x12   : > { %v1869_v13 = vsel %vm180_vm0, 1.0, %v2519_v12  ;;  %v1870_v14 = vsel %vm181_vm1, 1.0, %v2519_v12  ;;  %v1871_v15 = vsel %vm189_vm2, 1.0, %v2519_v12  ;;  %v2237_v28 = vld [vmem:[%s3168_s1 + $0xa8] ss:$16 sps:$4 sm:$0xff]  }
  0x13   : > { %v186_v16 = vpack.c.bf16 %v1870_v14, %v1869_v13  ;;  %vm190_vm4 = vcmp.eq.s32.totalorder %v178_v3, %v188_v10  ;;  %v2242_v29 = vld [vmem:[%s3168_s1 + $0x84] ss:$16 sps:$4 sm:$0xff]   ;;  %v2245_v30 = vld [vmem:[%s3168_s1 + $0x8c] ss:$16 sps:$4 sm:$0xff]   ;;  %v2240_v31 = vld [vmem:[%s3168_s1 + $0x80] ss:$16 sps:$4 sm:$0xff]  }
  0x14   : > { %v1872_v17 = vsel %vm190_vm4, 1.0, %v2519_v12  ;;  %v2243_v32 = vld [vmem:[%s3168_s1 + $0x88] ss:$16 sps:$4 sm:$0xff]   ;;  %v2248_v33 = vld [vmem:[%s3168_s1 + $0x64] ss:$16 sps:$4 sm:$0xff]  }
  0x15   : > { %v195_v20 = vpack.c.bf16 %v1872_v17, %v1871_v15  ;;  %1875 = vmatmul.mubr.msk.bf16.vlgmr.msra.gmra.mxu0 %vm206_vm3, %v186_v16  ;;  %v2251_v34 = vld [vmem:[%s3168_s1 + $0x6c] ss:$16 sps:$4 sm:$0xff]   ;;  %v2246_v35 = vld [vmem:[%s3168_s1 + $0x60] ss:$16 sps:$4 sm:$0xff]   ;;  %v2249_v36 = vld [vmem:[%s3168_s1 + $0x68] ss:$16 sps:$4 sm:$0xff]  }
  0x16   : > { %753 = vmatpush1.bf16.msra.mxu0 %v2222_v18  ;;  %v2254_v37 = vld [vmem:[%s3168_s1 + $0x44] ss:$16 sps:$4 sm:$0xff]   ;;  %v2257_v38 = vld [vmem:[%s3168_s1 + $0x4c] ss:$16 sps:$4 sm:$0xff]   ;;  %v2252_v39 = vld [vmem:[%s3168_s1 + $0x40] ss:$16 sps:$4 sm:$0xff]  }
  0x17   : > { %1876 = vmatmul.mubr.msk.bf16.vlgmr.msra.gmra.mxu1 %vm206_vm3, %v195_v20  ;;  %754 = vmatprep.subr.bf16.mxu0 %v2230_v21  ;;  %v2255_v40 = vld [vmem:[%s3168_s1 + $0x48] ss:$16 sps:$4 sm:$0xff]   ;;  %v2260_v41 = vld [vmem:[%s3168_s1 + $0x24] ss:$16 sps:$4 sm:$0xff]   ;;  %v2263_v42 = vld [vmem:[%s3168_s1 + $0x2c] ss:$16 sps:$4 sm:$0xff]  }
  0x18   : > { %796 = vmatpush1.bf16.msra.mxu1 %v2225_v19  ;;  %v2258_v43 = vld [vmem:[%s3168_s1 + $0x20] ss:$16 sps:$4 sm:$0xff]   ;;  %v2261_v44 = vld [vmem:[%s3168_s1 + $0x28] ss:$16 sps:$4 sm:$0xff]   ;;  %v2266_v45 = vld [vmem:[%s3168_s1 + $0x4] ss:$16 sps:$4 sm:$0xff]  }
  0x19   : > { %797 = vmatprep.subr.bf16.mxu1 %v2233_v22  ;;  %v2269_v46 = vld [vmem:[%s3168_s1 + $0xc] ss:$16 sps:$4 sm:$0xff]   ;;  %v2264_v47 = vld [vmem:[%s3168_s1] ss:$16 sps:$4 sm:$0xff]   ;;  %v2267_v48 = vld [vmem:[%s3168_s1 + $0x8] ss:$16 sps:$4 sm:$0xff]  }
  0x1a   : > { %755 = vmatpush1.bf16.msra.mxu0 %v2228_v23  ;;  %v2272_v49 = vld [vmem:[%s3168_s1 + $0x1e4] ss:$16 sps:$4 sm:$0xff]   ;;  %v2275_v50 = vld [vmem:[%s3168_s1 + $0x1ec] ss:$16 sps:$4 sm:$0xff]   ;;  %v2270_v51 = vld [vmem:[%s3168_s1 + $0x1e0] ss:$16 sps:$4 sm:$0xff]  }
  0x1b   : > { %756 = vmatprep.subr.bf16.mxu0 %v2236_v25  ;;  %v2273_v52 = vld [vmem:[%s3168_s1 + $0x1e8] ss:$16 sps:$4 sm:$0xff]   ;;  %v2278_v53 = vld [vmem:[%s3168_s1 + $0x1c4] ss:$16 sps:$4 sm:$0xff]   ;;  %v2281_v54 = vld [vmem:[%s3168_s1 + $0x1cc] ss:$16 sps:$4 sm:$0xff]  }
  0x1c   : > { %798 = vmatpush1.bf16.msra.mxu1 %v2231_v24  ;;  %v2276_v55 = vld [vmem:[%s3168_s1 + $0x1c0] ss:$16 sps:$4 sm:$0xff]   ;;  %v2279_v56 = vld [vmem:[%s3168_s1 + $0x1c8] ss:$16 sps:$4 sm:$0xff]   ;;  %v2284_v57 = vld [vmem:[%s3168_s1 + $0x1a4] ss:$16 sps:$4 sm:$0xff]  }
  0x1d   : > { %799 = vmatprep.subr.bf16.mxu1 %v2239_v26  ;;  %v2287_v58 = vld [vmem:[%s3168_s1 + $0x1ac] ss:$16 sps:$4 sm:$0xff]   ;;  %v2282_v59 = vld [vmem:[%s3168_s1 + $0x1a0] ss:$16 sps:$4 sm:$0xff]   ;;  %v2285_v60 = vld [vmem:[%s3168_s1 + $0x1a8] ss:$16 sps:$4 sm:$0xff]  }
  0x1e   : > { %757 = vmatpush1.bf16.msra.mxu0 %v2234_v27  ;;  %v2290_v61 = vld [vmem:[%s3168_s1 + $0x184] ss:$16 sps:$4 sm:$0xff]   ;;  %v2293_v62 = vld [vmem:[%s3168_s1 + $0x18c] ss:$16 sps:$4 sm:$0xff]   ;;  %v2288_v63 = vld [vmem:[%s3168_s1 + $0x180] ss:$16 sps:$4 sm:$0xff]  }
  0x1f   : > { %758 = vmatprep.subr.bf16.mxu0 %v2242_v29  ;;  %v2291_v0 = vld [vmem:[%s3168_s1 + $0x188] ss:$16 sps:$4 sm:$0xff]   ;;  %v2296_v1 = vld [vmem:[%s3168_s1 + $0x164] ss:$16 sps:$4 sm:$0xff]   ;;  %v2299_v3 = vld [vmem:[%s3168_s1 + $0x16c] ss:$16 sps:$4 sm:$0xff]  }
  0x20   : > { %800 = vmatpush1.bf16.msra.mxu1 %v2237_v28  ;;  %v2294_v4 = vld [vmem:[%s3168_s1 + $0x160] ss:$16 sps:$4 sm:$0xff]   ;;  %v2297_v5 = vld [vmem:[%s3168_s1 + $0x168] ss:$16 sps:$4 sm:$0xff]   ;;  %v2302_v6 = vld [vmem:[%s3168_s1 + $0x144] ss:$16 sps:$4 sm:$0xff]  }
  0x21   : > { %801 = vmatprep.subr.bf16.mxu1 %v2245_v30  ;;  %v2305_v7 = vld [vmem:[%s3168_s1 + $0x14c] ss:$16 sps:$4 sm:$0xff]   ;;  %v2300_v8 = vld [vmem:[%s3168_s1 + $0x140] ss:$16 sps:$4 sm:$0xff]   ;;  %v2303_v10 = vld [vmem:[%s3168_s1 + $0x148] ss:$16 sps:$4 sm:$0xff]  }
  0x22   : > { %759 = vmatpush1.bf16.msra.mxu0 %v2240_v31  ;;  %v2308_v12 = vld [vmem:[%s3168_s1 + $0x124] ss:$16 sps:$4 sm:$0xff]   ;;  %v2311_v13 = vld [vmem:[%s3168_s1 + $0x12c] ss:$16 sps:$4 sm:$0xff]   ;;  %v2306_v14 = vld [vmem:[%s3168_s1 + $0x120] ss:$16 sps:$4 sm:$0xff]  }
  0x23   : > { %760 = vmatprep.subr.bf16.mxu0 %v2248_v33  ;;  %v2309_v15 = vld [vmem:[%s3168_s1 + $0x128] ss:$16 sps:$4 sm:$0xff]   ;;  %v2314_v16 = vld [vmem:[%s3168_s1 + $0x104] ss:$16 sps:$4 sm:$0xff]   ;;  %v2317_v17 = vld [vmem:[%s3168_s1 + $0x10c] ss:$16 sps:$4 sm:$0xff]  }
  0x24   : > { %802 = vmatpush1.bf16.msra.mxu1 %v2243_v32  ;;  %v2312_v18 = vld [vmem:[%s3168_s1 + $0x100] ss:$16 sps:$4 sm:$0xff]   ;;  %v2315_v19 = vld [vmem:[%s3168_s1 + $0x108] ss:$16 sps:$4 sm:$0xff]   ;;  %v2320_v20 = vld [vmem:[%s3168_s1 + $0x2e4] ss:$16 sps:$4 sm:$0xff]  }
  0x25   : > { %803 = vmatprep.subr.bf16.mxu1 %v2251_v34  ;;  %v2323_v21 = vld [vmem:[%s3168_s1 + $0x2ec] ss:$16 sps:$4 sm:$0xff]   ;;  %v2318_v27 = vld [vmem:[%s3168_s1 + $0x2e0] ss:$16 sps:$4 sm:$0xff]   ;;  %v2321_v28 = vld [vmem:[%s3168_s1 + $0x2e8] ss:$16 sps:$4 sm:$0xff]  }
  0x26   : > { %761 = vmatpush1.bf16.msra.mxu0 %v2246_v35  ;;  %v2326_v30 = vld [vmem:[%s3168_s1 + $0x2c4] ss:$16 sps:$4 sm:$0xff]   ;;  %v2329_v31 = vld [vmem:[%s3168_s1 + $0x2cc] ss:$16 sps:$4 sm:$0xff]   ;;  %v2324_v32 = vld [vmem:[%s3168_s1 + $0x2c0] ss:$16 sps:$4 sm:$0xff]  }
  0x27   : > { %762 = vmatprep.subr.bf16.mxu0 %v2254_v37  ;;  %v2327_v33 = vld [vmem:[%s3168_s1 + $0x2c8] ss:$16 sps:$4 sm:$0xff]   ;;  %v2332_v34 = vld [vmem:[%s3168_s1 + $0x2a4] ss:$16 sps:$4 sm:$0xff]   ;;  %v2335_v35 = vld [vmem:[%s3168_s1 + $0x2ac] ss:$16 sps:$4 sm:$0xff]  }
  0x28   : > { %804 = vmatpush1.bf16.msra.mxu1 %v2249_v36  ;;  %v2330_v36 = vld [vmem:[%s3168_s1 + $0x2a0] ss:$16 sps:$4 sm:$0xff]   ;;  %v2333_v37 = vld [vmem:[%s3168_s1 + $0x2a8] ss:$16 sps:$4 sm:$0xff]  }
  0x29   : > { %805 = vmatprep.subr.bf16.mxu1 %v2257_v38  ;;  %v2338_v38 = vld [vmem:[%s3168_s1 + $0x284] ss:$16 sps:$4 sm:$0xff]  }
  0x2a   : > { %763 = vmatpush1.bf16.msra.mxu0 %v2252_v39  ;;  %v2336_v39 = vld [vmem:[%s3168_s1 + $0x280] ss:$16 sps:$4 sm:$0xff]  }
  0x2b   : > { %764 = vmatprep.subr.bf16.mxu0 %v2260_v41  ;;  %v2344_v41 = vld [vmem:[%s3168_s1 + $0x264] ss:$16 sps:$4 sm:$0xff]  }
  0x2c   : > { %806 = vmatpush1.bf16.msra.mxu1 %v2255_v40  ;;  %v2339_v40 = vld [vmem:[%s3168_s1 + $0x288] ss:$16 sps:$4 sm:$0xff]  }
  0x2d   : > { %807 = vmatprep.subr.bf16.mxu1 %v2263_v42  ;;  %v2347_v42 = vld [vmem:[%s3168_s1 + $0x26c] ss:$16 sps:$4 sm:$0xff]  }
  0x2e   : > { %765 = vmatpush1.bf16.msra.mxu0 %v2258_v43  ;;  %v2342_v43 = vld [vmem:[%s3168_s1 + $0x260] ss:$16 sps:$4 sm:$0xff]  }
  0x2f   : > { %766 = vmatprep.subr.bf16.mxu0 %v2266_v45  ;;  %v2350_v45 = vld [vmem:[%s3168_s1 + $0x244] ss:$16 sps:$4 sm:$0xff]  }
  0x30   : > { %808 = vmatpush1.bf16.msra.mxu1 %v2261_v44  ;;  %v2345_v44 = vld [vmem:[%s3168_s1 + $0x268] ss:$16 sps:$4 sm:$0xff]  }
  0x31   : > { %809 = vmatprep.subr.bf16.mxu1 %v2269_v46  ;;  %v2353_v46 = vld [vmem:[%s3168_s1 + $0x24c] ss:$16 sps:$4 sm:$0xff]  }
  0x32   : > { %767 = vmatpush1.bf16.msra.mxu0 %v2264_v47  ;;  %v2348_v47 = vld [vmem:[%s3168_s1 + $0x240] ss:$16 sps:$4 sm:$0xff]  }
  0x33   : > { %768 = vmatprep.subr.bf16.mxu0 %v2272_v49  ;;  %v2356_v49 = vld [vmem:[%s3168_s1 + $0x224] ss:$16 sps:$4 sm:$0xff]  }
  0x34   : > { %810 = vmatpush1.bf16.msra.mxu1 %v2267_v48  ;;  %v2351_v48 = vld [vmem:[%s3168_s1 + $0x248] ss:$16 sps:$4 sm:$0xff]  }
  0x35   : > { %811 = vmatprep.subr.bf16.mxu1 %v2275_v50  ;;  %v2359_v50 = vld [vmem:[%s3168_s1 + $0x22c] ss:$16 sps:$4 sm:$0xff]  }
  0x36   : > { %769 = vmatpush2.bf16.msra.mxu0 %v2270_v51  ;;  %v2354_v51 = vld [vmem:[%s3168_s1 + $0x220] ss:$16 sps:$4 sm:$0xff]  }
  0x37   : > { %770 = vmatprep.subr.bf16.mxu0 %v2278_v53  ;;  %v2362_v53 = vld [vmem:[%s3168_s1 + $0x204] ss:$16 sps:$4 sm:$0xff]  }
  0x38   : > { %812 = vmatpush2.bf16.msra.mxu1 %v2273_v52  ;;  %v2357_v52 = vld [vmem:[%s3168_s1 + $0x228] ss:$16 sps:$4 sm:$0xff]  }
  0x39   : > { %813 = vmatprep.subr.bf16.mxu1 %v2281_v54  ;;  %v2365_v54 = vld [vmem:[%s3168_s1 + $0x20c] ss:$16 sps:$4 sm:$0xff]  }
  0x3a   : > { %771 = vmatpush2.bf16.msra.mxu0 %v2276_v55  ;;  %v2360_v55 = vld [vmem:[%s3168_s1 + $0x200] ss:$16 sps:$4 sm:$0xff]  }
  0x3b   : > { %772 = vmatprep.subr.bf16.mxu0 %v2284_v57  ;;  %v2368_v57 = vld [vmem:[%s3168_s1 + $0x3e4] ss:$16 sps:$4 sm:$0xff]  }
  0x3c   : > { %814 = vmatpush2.bf16.msra.mxu1 %v2279_v56  ;;  %v2363_v56 = vld [vmem:[%s3168_s1 + $0x208] ss:$16 sps:$4 sm:$0xff]  }
  0x3d   : > { %815 = vmatprep.subr.bf16.mxu1 %v2287_v58  ;;  %v2371_v58 = vld [vmem:[%s3168_s1 + $0x3ec] ss:$16 sps:$4 sm:$0xff]  }
  0x3e   : > { %773 = vmatpush2.bf16.msra.mxu0 %v2282_v59  ;;  %v2366_v59 = vld [vmem:[%s3168_s1 + $0x3e0] ss:$16 sps:$4 sm:$0xff]  }
  0x3f   : > { %774 = vmatprep.subr.bf16.mxu0 %v2290_v61  ;;  %v2374_v61 = vld [vmem:[%s3168_s1 + $0x3c4] ss:$16 sps:$4 sm:$0xff]  }
  0x40   : > { %816 = vmatpush2.bf16.msra.mxu1 %v2285_v60  ;;  %v2369_v60 = vld [vmem:[%s3168_s1 + $0x3e8] ss:$16 sps:$4 sm:$0xff]  }
  0x41   : > { %817 = vmatprep.subr.bf16.mxu1 %v2293_v62  ;;  %v2377_v62 = vld [vmem:[%s3168_s1 + $0x3cc] ss:$16 sps:$4 sm:$0xff]  }
  0x42   : > { %775 = vmatpush2.bf16.msra.mxu0 %v2288_v63  ;;  %v2372_v63 = vld [vmem:[%s3168_s1 + $0x3c0] ss:$16 sps:$4 sm:$0xff]  }
  0x43   : > { %776 = vmatprep.subr.bf16.mxu0 %v2296_v1  ;;  %v2380_v1 = vld [vmem:[%s3168_s1 + $0x3a4] ss:$16 sps:$4 sm:$0xff]  }
  0x44   : > { %818 = vmatpush2.bf16.msra.mxu1 %v2291_v0  ;;  %v2375_v0 = vld [vmem:[%s3168_s1 + $0x3c8] ss:$16 sps:$4 sm:$0xff]  }
  0x45   : > { %819 = vmatprep.subr.bf16.mxu1 %v2299_v3  ;;  %v2383_v3 = vld [vmem:[%s3168_s1 + $0x3ac] ss:$16 sps:$4 sm:$0xff]  }
  0x46   : > { %777 = vmatpush2.bf16.msra.mxu0 %v2294_v4  ;;  %v2378_v4 = vld [vmem:[%s3168_s1 + $0x3a0] ss:$16 sps:$4 sm:$0xff]  }
  0x47   : > { %778 = vmatprep.subr.bf16.mxu0 %v2302_v6  ;;  %v2386_v6 = vld [vmem:[%s3168_s1 + $0x384] ss:$16 sps:$4 sm:$0xff]  }
  0x48   : > { %820 = vmatpush2.bf16.msra.mxu1 %v2297_v5  ;;  %v2381_v5 = vld [vmem:[%s3168_s1 + $0x3a8] ss:$16 sps:$4 sm:$0xff]  }
  0x49   : > { %821 = vmatprep.subr.bf16.mxu1 %v2305_v7  ;;  %v2389_v7 = vld [vmem:[%s3168_s1 + $0x38c] ss:$16 sps:$4 sm:$0xff]  }
  0x4a   : > { %779 = vmatpush2.bf16.msra.mxu0 %v2300_v8  ;;  %v2384_v8 = vld [vmem:[%s3168_s1 + $0x380] ss:$16 sps:$4 sm:$0xff]  }
  0x4b   : > { %780 = vmatprep.subr.bf16.mxu0 %v2308_v12  ;;  %v2392_v12 = vld [vmem:[%s3168_s1 + $0x364] ss:$16 sps:$4 sm:$0xff]  }
  0x4c   : > { %822 = vmatpush2.bf16.msra.mxu1 %v2303_v10  ;;  %v2387_v10 = vld [vmem:[%s3168_s1 + $0x388] ss:$16 sps:$4 sm:$0xff]  }
  0x4d   : > { %823 = vmatprep.subr.bf16.mxu1 %v2311_v13  ;;  %v2395_v13 = vld [vmem:[%s3168_s1 + $0x36c] ss:$16 sps:$4 sm:$0xff]  }
  0x4e   : > { %781 = vmatpush2.bf16.msra.mxu0 %v2306_v14  ;;  %v2390_v14 = vld [vmem:[%s3168_s1 + $0x360] ss:$16 sps:$4 sm:$0xff]  }
  0x4f   : > { %782 = vmatprep.subr.bf16.mxu0 %v2314_v16  ;;  %v2398_v16 = vld [vmem:[%s3168_s1 + $0x344] ss:$16 sps:$4 sm:$0xff]  }
  0x50   : > { %824 = vmatpush2.bf16.msra.mxu1 %v2309_v15  ;;  %v2393_v15 = vld [vmem:[%s3168_s1 + $0x368] ss:$16 sps:$4 sm:$0xff]  }
  0x51   : > { %825 = vmatprep.subr.bf16.mxu1 %v2317_v17  ;;  %v2401_v17 = vld [vmem:[%s3168_s1 + $0x34c] ss:$16 sps:$4 sm:$0xff]  }
  0x52   : > { %783 = vmatpush2.bf16.msra.mxu0 %v2312_v18 }
  0x53   : > { %1158 = vmatprep.subr.bf16.mxu0 %v2320_v20  ;;  %v2399_v20 = vld [vmem:[%s3168_s1 + $0x348] ss:$16 sps:$4 sm:$0xff]  }
  0x54   : > { %826 = vmatpush2.bf16.msra.mxu1 %v2315_v19  ;;  %v2396_v19 = vld [vmem:[%s3168_s1 + $0x340] ss:$16 sps:$4 sm:$0xff]  }
  0x55   : > { %1201 = vmatprep.subr.bf16.mxu1 %v2323_v21  ;;  %v2404_v21 = vld [vmem:[%s3168_s1 + $0x324] ss:$16 sps:$4 sm:$0xff]  }
  0xd5   : > { %v244_v22 = vpop.f32.mrf.mxu0 }
  0xd7   : > { %v246_v23 = vpop.f32.mrf.mxu0  ;;  %v2923_v18 = vpop.f32.mrf.mxu1 }
  0xd9   : > { %v248_v24 = vpop.f32.mrf.mxu0 }
  0xda   : > { %v253_v29 = vpack.c.bf16 %v248_v24, %v244_v22  ;;  %v2407_v22 = vld [vmem:[%s3168_s1 + $0x32c] ss:$16 sps:$4 sm:$0xff]   ;;  %v2402_v24 = vld [vmem:[%s3168_s1 + $0x320] ss:$16 sps:$4 sm:$0xff]  }
  0xdb   : > { %v250_v25 = vpop.f32.mrf.mxu0 }
  0xdc   : > { %v254_v26 = vpack.c.bf16 %v250_v25, %v246_v23  ;;  %v294_v23 = vpop.f32.mrf.mxu1  ;;  %v2405_v25 = vld [vmem:[%s3168_s1 + $0x328] ss:$16 sps:$4 sm:$0xff]  }
  0xde   : > { %784 = vmatprep.mubr.bf16.mxu0 %v254_v26  ;;  %827 = vmatprep.mubr.bf16.mxu1 %v254_v26  ;;  %v2410_v26 = vld [vmem:[%s3168_s1 + $0x304] ss:$16 sps:$4 sm:$0xff]  }
  0xdf   : > { %785 = vmatmul.mubr.bf16.vlgmr.msra.gmra.mxu0 %v253_v29  ;;  %828 = vmatmul.mubr.bf16.vlgmr.msra.gmra.mxu1 %v253_v29  ;;  %v2408_v29 = vld [vmem:[%s3168_s1 + $0x300] ss:$16 sps:$4 sm:$0xff]  }
  0xe0   : > { %1159 = vmatpush1.bf16.msra.mxu0 %v2318_v27  ;;  %1202 = vmatpush1.bf16.msra.mxu1 %v2321_v28  ;;  %v2413_v27 = vld [vmem:[%s3168_s1 + $0x30c] ss:$16 sps:$4 sm:$0xff]   ;;  %v2949_v28 = vpop.f32.mrf.mxu1 }
  0xe1   : > { %1160 = vmatprep.subr.bf16.mxu0 %v2326_v30  ;;  %1203 = vmatprep.subr.bf16.mxu1 %v2329_v31  ;;  %v2411_v30 = vld [vmem:[%s3168_s1 + $0x308] ss:$16 sps:$4 sm:$0xff]   ;;  %v2416_v31 = vld [vmem:[%s3168_s1 + $0x4e4] ss:$16 sps:$4 sm:$0xff]  }
  0xe2   : > { %1190 = vmatprep.mubr.bf16.mxu0 %v2564_v9  ;;  %1233 = vmatprep.mubr.bf16.mxu1 %v2564_v9  ;;  %v2341_v9 = vld [vmem:[%s3168_s1 + $0x28c] ss:$16 sps:$4 sm:$0xff]  }
  0xe4   : > { %1161 = vmatpush1.bf16.msra.mxu0 %v2324_v32  ;;  %1204 = vmatpush1.bf16.msra.mxu1 %v2327_v33  ;;  %v2419_v32 = vld [vmem:[%s3168_s1 + $0x4ec] ss:$16 sps:$4 sm:$0xff]   ;;  %v298_v33 = vpop.f32.mrf.mxu1 }
  0xe5   : > { %1162 = vmatprep.subr.bf16.mxu0 %v2332_v34  ;;  %1205 = vmatprep.subr.bf16.mxu1 %v2335_v35  ;;  %v2414_v34 = vld [vmem:[%s3168_s1 + $0x4e0] ss:$16 sps:$4 sm:$0xff]   ;;  %v2417_v35 = vld [vmem:[%s3168_s1 + $0x4e8] ss:$16 sps:$4 sm:$0xff]  }
  0xe8   : > { %1163 = vmatpush1.bf16.msra.mxu0 %v2330_v36  ;;  %1206 = vmatpush1.bf16.msra.mxu1 %v2333_v37  ;;  %v2422_v36 = vld [vmem:[%s3168_s1 + $0x4c4] ss:$16 sps:$4 sm:$0xff]   ;;  %v2425_v37 = vld [vmem:[%s3168_s1 + $0x4cc] ss:$16 sps:$4 sm:$0xff]  }
  0xe9   : > { %1164 = vmatprep.subr.bf16.mxu0 %v2338_v38  ;;  %1207 = vmatprep.subr.bf16.mxu1 %v2341_v9  ;;  %v302_v38 = vpack.c.bf16 %v298_v33, %v294_v23  ;;  %v2420_v9 = vld [vmem:[%s3168_s1 + $0x4c0] ss:$16 sps:$4 sm:$0xff]   ;;  %v2494_v23 = vld [vmem:[%s3168_s1 + $0x544] ss:$16 sps:$4 sm:$0xff]   ;;  %v2509_v33 = vld [vmem:[%s3168_s1 + $0x50c] ss:$16 sps:$4 sm:$0xff]  }
  0xec   : > { %1165 = vmatpush1.bf16.msra.mxu0 %v2336_v39  ;;  %1208 = vmatpush1.bf16.msra.mxu1 %v2339_v40  ;;  %v2423_v39 = vld [vmem:[%s3168_s1 + $0x4c8] ss:$16 sps:$4 sm:$0xff]   ;;  %v2428_v40 = vld [vmem:[%s3168_s1 + $0x4a4] ss:$16 sps:$4 sm:$0xff]  }
  0xed   : > { %1166 = vmatprep.subr.bf16.mxu0 %v2344_v41  ;;  %1209 = vmatprep.subr.bf16.mxu1 %v2347_v42  ;;  %v2426_v41 = vld [vmem:[%s3168_s1 + $0x4a0] ss:$16 sps:$4 sm:$0xff]   ;;  %v2429_v42 = vld [vmem:[%s3168_s1 + $0x4a8] ss:$16 sps:$4 sm:$0xff]  }
  0xf0   : > { %1167 = vmatpush1.bf16.msra.mxu0 %v2342_v43  ;;  %1210 = vmatpush1.bf16.msra.mxu1 %v2345_v44  ;;  %v2434_v43 = vld [vmem:[%s3168_s1 + $0x484] ss:$16 sps:$4 sm:$0xff]   ;;  %v2437_v44 = vld [vmem:[%s3168_s1 + $0x48c] ss:$16 sps:$4 sm:$0xff]  }
  0xf1   : > { %1168 = vmatprep.subr.bf16.mxu0 %v2350_v45  ;;  %1211 = vmatprep.subr.bf16.mxu1 %v2353_v46  ;;  %v2432_v45 = vld [vmem:[%s3168_s1 + $0x480] ss:$16 sps:$4 sm:$0xff]   ;;  %v2435_v46 = vld [vmem:[%s3168_s1 + $0x488] ss:$16 sps:$4 sm:$0xff]  }
  0xf4   : > { %1169 = vmatpush1.bf16.msra.mxu0 %v2348_v47  ;;  %1212 = vmatpush1.bf16.msra.mxu1 %v2351_v48  ;;  %v2440_v47 = vld [vmem:[%s3168_s1 + $0x464] ss:$16 sps:$4 sm:$0xff]   ;;  %v2443_v48 = vld [vmem:[%s3168_s1 + $0x46c] ss:$16 sps:$4 sm:$0xff]  }
  0xf5   : > { %1170 = vmatprep.subr.bf16.mxu0 %v2356_v49  ;;  %1213 = vmatprep.subr.bf16.mxu1 %v2359_v50  ;;  %v2438_v49 = vld [vmem:[%s3168_s1 + $0x460] ss:$16 sps:$4 sm:$0xff]   ;;  %v2441_v50 = vld [vmem:[%s3168_s1 + $0x468] ss:$16 sps:$4 sm:$0xff]  }
  0xf8   : > { %1171 = vmatpush1.bf16.msra.mxu0 %v2354_v51  ;;  %1214 = vmatpush1.bf16.msra.mxu1 %v2357_v52  ;;  %v2446_v51 = vld [vmem:[%s3168_s1 + $0x444] ss:$16 sps:$4 sm:$0xff]   ;;  %v2449_v52 = vld [vmem:[%s3168_s1 + $0x44c] ss:$16 sps:$4 sm:$0xff]  }
  0xf9   : > { %1172 = vmatprep.subr.bf16.mxu0 %v2362_v53  ;;  %1215 = vmatprep.subr.bf16.mxu1 %v2365_v54  ;;  %v2444_v53 = vld [vmem:[%s3168_s1 + $0x440] ss:$16 sps:$4 sm:$0xff]   ;;  %v2447_v54 = vld [vmem:[%s3168_s1 + $0x448] ss:$16 sps:$4 sm:$0xff]  }
  0xfc   : > { %1173 = vmatpush1.bf16.msra.mxu0 %v2360_v55  ;;  %1216 = vmatpush1.bf16.msra.mxu1 %v2363_v56  ;;  %v2452_v55 = vld [vmem:[%s3168_s1 + $0x424] ss:$16 sps:$4 sm:$0xff]   ;;  %v2455_v56 = vld [vmem:[%s3168_s1 + $0x42c] ss:$16 sps:$4 sm:$0xff]  }
  0xfd   : > { %1174 = vmatprep.subr.bf16.mxu0 %v2368_v57  ;;  %1217 = vmatprep.subr.bf16.mxu1 %v2371_v58  ;;  %v2450_v57 = vld [vmem:[%s3168_s1 + $0x420] ss:$16 sps:$4 sm:$0xff]   ;;  %v2453_v58 = vld [vmem:[%s3168_s1 + $0x428] ss:$16 sps:$4 sm:$0xff]  }
 0x100   : > { %1175 = vmatpush2.bf16.msra.mxu0 %v2366_v59  ;;  %1218 = vmatpush2.bf16.msra.mxu1 %v2369_v60  ;;  %v2458_v59 = vld [vmem:[%s3168_s1 + $0x404] ss:$16 sps:$4 sm:$0xff]   ;;  %v2461_v60 = vld [vmem:[%s3168_s1 + $0x40c] ss:$16 sps:$4 sm:$0xff]  }
 0x101   : > { %1176 = vmatprep.subr.bf16.mxu0 %v2374_v61  ;;  %1219 = vmatprep.subr.bf16.mxu1 %v2377_v62  ;;  %v2456_v61 = vld [vmem:[%s3168_s1 + $0x400] ss:$16 sps:$4 sm:$0xff]   ;;  %v2459_v62 = vld [vmem:[%s3168_s1 + $0x408] ss:$16 sps:$4 sm:$0xff]  }
 0x104   : > { %1177 = vmatpush2.bf16.msra.mxu0 %v2372_v63  ;;  %1220 = vmatpush2.bf16.msra.mxu1 %v2375_v0  ;;  %v2464_v63 = vld [vmem:[%s3168_s1 + $0x5e4] ss:$16 sps:$4 sm:$0xff]   ;;  %v2467_v0 = vld [vmem:[%s3168_s1 + $0x5ec] ss:$16 sps:$4 sm:$0xff]  }
 0x105   : > { %1178 = vmatprep.subr.bf16.mxu0 %v2380_v1  ;;  %1221 = vmatprep.subr.bf16.mxu1 %v2383_v3  ;;  %v2462_v1 = vld [vmem:[%s3168_s1 + $0x5e0] ss:$16 sps:$4 sm:$0xff]   ;;  %v2465_v3 = vld [vmem:[%s3168_s1 + $0x5e8] ss:$16 sps:$4 sm:$0xff]  }
 0x108   : > { %1179 = vmatpush2.bf16.msra.mxu0 %v2378_v4  ;;  %1222 = vmatpush2.bf16.msra.mxu1 %v2381_v5  ;;  %v2470_v4 = vld [vmem:[%s3168_s1 + $0x5c4] ss:$16 sps:$4 sm:$0xff]   ;;  %v2473_v5 = vld [vmem:[%s3168_s1 + $0x5cc] ss:$16 sps:$4 sm:$0xff]  }
 0x109   : > { %1180 = vmatprep.subr.bf16.mxu0 %v2386_v6  ;;  %1223 = vmatprep.subr.bf16.mxu1 %v2389_v7  ;;  %v2468_v6 = vld [vmem:[%s3168_s1 + $0x5c0] ss:$16 sps:$4 sm:$0xff]   ;;  %v2471_v7 = vld [vmem:[%s3168_s1 + $0x5c8] ss:$16 sps:$4 sm:$0xff]  }
 0x10c   : > { %1181 = vmatpush2.bf16.msra.mxu0 %v2384_v8  ;;  %1224 = vmatpush2.bf16.msra.mxu1 %v2387_v10  ;;  %v2476_v8 = vld [vmem:[%s3168_s1 + $0x5a4] ss:$16 sps:$4 sm:$0xff]   ;;  %v2479_v10 = vld [vmem:[%s3168_s1 + $0x5ac] ss:$16 sps:$4 sm:$0xff]  }
 0x10d   : > { %1182 = vmatprep.subr.bf16.mxu0 %v2392_v12  ;;  %1225 = vmatprep.subr.bf16.mxu1 %v2395_v13  ;;  %v2474_v12 = vld [vmem:[%s3168_s1 + $0x5a0] ss:$16 sps:$4 sm:$0xff]   ;;  %v2477_v13 = vld [vmem:[%s3168_s1 + $0x5a8] ss:$16 sps:$4 sm:$0xff]  }
 0x110   : > { %1183 = vmatpush2.bf16.msra.mxu0 %v2390_v14  ;;  %1226 = vmatpush2.bf16.msra.mxu1 %v2393_v15  ;;  %v2482_v14 = vld [vmem:[%s3168_s1 + $0x584] ss:$16 sps:$4 sm:$0xff]   ;;  %v2485_v15 = vld [vmem:[%s3168_s1 + $0x58c] ss:$16 sps:$4 sm:$0xff]  }
 0x111   : > { %1184 = vmatprep.subr.bf16.mxu0 %v2398_v16  ;;  %1227 = vmatprep.subr.bf16.mxu1 %v2401_v17  ;;  %v2480_v16 = vld [vmem:[%s3168_s1 + $0x580] ss:$16 sps:$4 sm:$0xff]   ;;  %v2483_v17 = vld [vmem:[%s3168_s1 + $0x588] ss:$16 sps:$4 sm:$0xff]  }
 0x114   : > { %1185 = vmatpush2.bf16.msra.mxu0 %v2396_v19  ;;  %1228 = vmatpush2.bf16.msra.mxu1 %v2399_v20  ;;  %v2488_v19 = vld [vmem:[%s3168_s1 + $0x564] ss:$16 sps:$4 sm:$0xff]   ;;  %v2491_v20 = vld [vmem:[%s3168_s1 + $0x56c] ss:$16 sps:$4 sm:$0xff]  }
 0x115   : > { %1186 = vmatprep.subr.bf16.mxu0 %v2404_v21  ;;  %1229 = vmatprep.subr.bf16.mxu1 %v2407_v22  ;;  %v2486_v21 = vld [vmem:[%s3168_s1 + $0x560] ss:$16 sps:$4 sm:$0xff]   ;;  %v2489_v22 = vld [vmem:[%s3168_s1 + $0x568] ss:$16 sps:$4 sm:$0xff]  }
 0x118   : > { %1187 = vmatpush2.bf16.msra.mxu0 %v2402_v24  ;;  %1230 = vmatpush2.bf16.msra.mxu1 %v2405_v25  ;;  %v2497_v24 = vld [vmem:[%s3168_s1 + $0x54c] ss:$16 sps:$4 sm:$0xff]   ;;  %v2492_v25 = vld [vmem:[%s3168_s1 + $0x540] ss:$16 sps:$4 sm:$0xff]  }
 0x119   : > { %1188 = vmatprep.subr.bf16.mxu0 %v2410_v26  ;;  %1231 = vmatprep.subr.bf16.mxu1 %v2413_v27  ;;  %v2495_v26 = vld [vmem:[%s3168_s1 + $0x548] ss:$16 sps:$4 sm:$0xff]   ;;  %v2500_v27 = vld [vmem:[%s3168_s1 + $0x524] ss:$16 sps:$4 sm:$0xff]  }
 0x11c   : > { %1189 = vmatpush2.bf16.msra.mxu0 %v2408_v29  ;;  %1232 = vmatpush2.bf16.msra.mxu1 %v2411_v30  ;;  %v2503_v29 = vld [vmem:[%s3168_s1 + $0x52c] ss:$16 sps:$4 sm:$0xff]   ;;  %v2498_v30 = vld [vmem:[%s3168_s1 + $0x520] ss:$16 sps:$4 sm:$0xff]  }
 0x11d   : > { %1629 = vmatprep.subr.bf16.mxu0 %v2416_v31  ;;  %1672 = vmatprep.subr.bf16.mxu1 %v2419_v32  ;;  %v2501_v31 = vld [vmem:[%s3168_s1 + $0x528] ss:$16 sps:$4 sm:$0xff]   ;;  %v2506_v32 = vld [vmem:[%s3168_s1 + $0x504] ss:$16 sps:$4 sm:$0xff]  }
 0x11f   : > { %1191 = vmatmul.mubr.bf16.vlgmr.msra.gmra.mxu0 %v2567_v11  ;;  %1234 = vmatmul.mubr.bf16.vlgmr.msra.gmra.mxu1 %v2567_v11  ;;  %v2431_v11 = vld [vmem:[%s3168_s1 + $0x4ac] ss:$16 sps:$4 sm:$0xff]  }
 0x120   : > { %1630 = vmatpush1.bf16.msra.mxu0 %v2414_v34  ;;  %1673 = vmatpush1.bf16.msra.mxu1 %v2417_v35  ;;  %v2504_v34 = vld [vmem:[%s3168_s1 + $0x500] ss:$16 sps:$4 sm:$0xff]   ;;  %v2507_v35 = vld [vmem:[%s3168_s1 + $0x508] ss:$16 sps:$4 sm:$0xff]  }
 0x121   : > { %1631 = vmatprep.subr.bf16.mxu0 %v2422_v36  ;;  %1674 = vmatprep.subr.bf16.mxu1 %v2425_v37  ;;  %v301_v36 = vpack.c.bf16 %v2949_v28, %v2923_v18  ;;  %v1735_v18 = vsub.s32 2, %v2550_v2  ;;  %v1723_v28 = vld [vmem:[%s3169_s2] sm:$0xf] }
 0x122   : > { %1661 = vmatprep.mubr.bf16.mxu0 %v302_v38  ;;  %1704 = vmatprep.mubr.bf16.mxu1 %v302_v38 }
 0x124   : > { %1632 = vmatpush1.bf16.msra.mxu0 %v2420_v9  ;;  %1675 = vmatpush1.bf16.msra.mxu1 %v2423_v39 }
 0x125   : > { %1633 = vmatprep.subr.bf16.mxu0 %v2428_v40  ;;  %1676 = vmatprep.subr.bf16.mxu1 %v2431_v11 }
 0x128   : > { %1634 = vmatpush1.bf16.msra.mxu0 %v2426_v41  ;;  %1677 = vmatpush1.bf16.msra.mxu1 %v2429_v42 }
 0x129   : > { %1635 = vmatprep.subr.bf16.mxu0 %v2434_v43  ;;  %1678 = vmatprep.subr.bf16.mxu1 %v2437_v44 }
 0x12c   : > { %1636 = vmatpush1.bf16.msra.mxu0 %v2432_v45  ;;  %1679 = vmatpush1.bf16.msra.mxu1 %v2435_v46 }
 0x12d   : > { %1637 = vmatprep.subr.bf16.mxu0 %v2440_v47  ;;  %1680 = vmatprep.subr.bf16.mxu1 %v2443_v48 }
 0x130   : > { %1638 = vmatpush1.bf16.msra.mxu0 %v2438_v49  ;;  %1681 = vmatpush1.bf16.msra.mxu1 %v2441_v50  ;;  %v1727_v49 = vsub.s32 0, %v2550_v2 }
 0x131   : > { %1639 = vmatprep.subr.bf16.mxu0 %v2446_v51  ;;  %1682 = vmatprep.subr.bf16.mxu1 %v2449_v52  ;;  %v1731_v52 = vsub.s32 1, %v2550_v2 }
 0x134   : > { %1640 = vmatpush1.bf16.msra.mxu0 %v2444_v53  ;;  %1683 = vmatpush1.bf16.msra.mxu1 %v2447_v54  ;;  %v1739_v53 = vsub.s32 3, %v2550_v2 }
 0x135   : > { %1641 = vmatprep.subr.bf16.mxu0 %v2452_v55  ;;  %1684 = vmatprep.subr.bf16.mxu1 %v2455_v56  ;;  %v1728_v56 = vrot.slane %v1723_v28, %v1727_v49 }
 0x138   : > { %1642 = vmatpush1.bf16.msra.mxu0 %v2450_v57  ;;  %1685 = vmatpush1.bf16.msra.mxu1 %v2453_v58  ;;  %v1736_v57 = vrot.slane %v1723_v28, %v1735_v18 }
 0x139   : > { %1643 = vmatprep.subr.bf16.mxu0 %v2458_v59  ;;  %1686 = vmatprep.subr.bf16.mxu1 %v2461_v60 }
 0x13c   : > { %1644 = vmatpush1.bf16.msra.mxu0 %v2456_v61  ;;  %1687 = vmatpush1.bf16.msra.mxu1 %v2459_v62 }
 0x13d   : > { %1645 = vmatprep.subr.bf16.mxu0 %v2464_v63  ;;  %1688 = vmatprep.subr.bf16.mxu1 %v2467_v0 }
 0x140   : > { %1646 = vmatpush2.bf16.msra.mxu0 %v2462_v1  ;;  %1689 = vmatpush2.bf16.msra.mxu1 %v2465_v3  ;;  %v1732_v1 = vrot.slane %v1723_v28, %v1731_v52 }
 0x141   : > { %1647 = vmatprep.subr.bf16.mxu0 %v2470_v4  ;;  %1690 = vmatprep.subr.bf16.mxu1 %v2473_v5  ;;  %v1740_v4 = vrot.slane %v1723_v28, %v1739_v53 }
 0x144   : > { %1648 = vmatpush2.bf16.msra.mxu0 %v2468_v6  ;;  %1691 = vmatpush2.bf16.msra.mxu1 %v2471_v7 }
 0x145   : > { %1649 = vmatprep.subr.bf16.mxu0 %v2476_v8  ;;  %1692 = vmatprep.subr.bf16.mxu1 %v2479_v10 }
 0x148   : > { %1650 = vmatpush2.bf16.msra.mxu0 %v2474_v12  ;;  %1693 = vmatpush2.bf16.msra.mxu1 %v2477_v13 }
 0x149   : > { %1651 = vmatprep.subr.bf16.mxu0 %v2482_v14  ;;  %1694 = vmatprep.subr.bf16.mxu1 %v2485_v15 }
 0x14c   : > { %1652 = vmatpush2.bf16.msra.mxu0 %v2480_v16  ;;  %1695 = vmatpush2.bf16.msra.mxu1 %v2483_v17 }
 0x14d   : > { %1653 = vmatprep.subr.bf16.mxu0 %v2488_v19  ;;  %1696 = vmatprep.subr.bf16.mxu1 %v2491_v20 }
 0x150   : > { %1654 = vmatpush2.bf16.msra.mxu0 %v2486_v21  ;;  %1697 = vmatpush2.bf16.msra.mxu1 %v2489_v22 }
 0x151   : > { %1655 = vmatprep.subr.bf16.mxu0 %v2494_v23  ;;  %1698 = vmatprep.subr.bf16.mxu1 %v2497_v24 }
 0x154   : > { %1656 = vmatpush2.bf16.msra.mxu0 %v2492_v25  ;;  %1699 = vmatpush2.bf16.msra.mxu1 %v2495_v26 }
 0x155   : > { %1657 = vmatprep.subr.bf16.mxu0 %v2500_v27  ;;  %1700 = vmatprep.subr.bf16.mxu1 %v2503_v29 }
 0x158   : > { %1658 = vmatpush2.bf16.msra.mxu0 %v2498_v30  ;;  %1701 = vmatpush2.bf16.msra.mxu1 %v2501_v31 }
 0x159   : > { %1659 = vmatprep.subr.bf16.mxu0 %v2506_v32  ;;  %1702 = vmatprep.subr.bf16.mxu1 %v2509_v33 }
 0x15c   : > { %1660 = vmatpush2.bf16.msra.mxu0 %v2504_v34  ;;  %1703 = vmatpush2.bf16.msra.mxu1 %v2507_v35 }
 0x15f   : > { %1662 = vmatmul.mubr.bf16.vlgmr.msra.gmra.mxu0 %v301_v36  ;;  %1705 = vmatmul.mubr.bf16.vlgmr.msra.gmra.mxu1 %v301_v36 }
 0x19f   : > { %v786_v37 = vpop.f32.mrf.mxu0  ;;  %v829_v38 = vpop.f32.mrf.mxu1 }
 0x1a1   : > { %v788_v9 = vpop.f32.mrf.mxu0  ;;  %v831_v39 = vpop.f32.mrf.mxu1 }
 0x1a3   : > { %v790_v40 = vpop.f32.mrf.mxu0  ;;  %v833_v11 = vpop.f32.mrf.mxu1 }
 0x1a5   : > { %v792_v41 = vpop.f32.mrf.mxu0  ;;  %v835_v42 = vpop.f32.mrf.mxu1 }
 0x1df   : > { %v1192_v43 = vpop.f32.mrf.mxu0  ;;  %v1235_v44 = vpop.f32.mrf.mxu1 }
 0x1e0   : > { %v1193_v54 = vadd.f32 %v1192_v43, %v786_v37  ;;  %v1236_v55 = vadd.f32 %v1235_v44, %v829_v38 }
 0x1e1   : > { %v1194_v45 = vpop.f32.mrf.mxu0  ;;  %v1237_v46 = vpop.f32.mrf.mxu1 }
 0x1e2   : > { %v1195_v60 = vadd.f32 %v1194_v45, %v788_v9  ;;  %v1238_v61 = vadd.f32 %v1237_v46, %v831_v39 }
 0x1e3   : > { %v1196_v47 = vpop.f32.mrf.mxu0  ;;  %v1239_v48 = vpop.f32.mrf.mxu1 }
 0x1e4   : > { %v1197_v2 = vadd.f32 %v1196_v47, %v790_v40  ;;  %v1240_v10 = vadd.f32 %v1239_v48, %v833_v11 }
 0x1e5   : > { %v1198_v50 = vpop.f32.mrf.mxu0  ;;  %v1241_v51 = vpop.f32.mrf.mxu1 }
 0x1e6   : > { %v1199_v14 = vadd.f32 %v1198_v50, %v792_v41  ;;  %v1242_v15 = vadd.f32 %v1241_v51, %v835_v42 }
 0x21f   : > { %v1663_v58 = vpop.f32.mrf.mxu0  ;;  %v1706_v59 = vpop.f32.mrf.mxu1 }
 0x220   : > { %v1715_v62 = vadd.f32 %v1663_v58, %v1193_v54  ;;  %v1717_v63 = vadd.f32 %v1706_v59, %v1236_v55 }
 0x221   : > { %v1665_v0 = vpop.f32.mrf.mxu0  ;;  %v1708_v3 = vpop.f32.mrf.mxu1 }
 0x222   : > { %v1745_v5 = vadd.f32 %v1728_v56, %v1715_v62  ;;  %v1747_v6 = vadd.f32 %v1736_v57, %v1717_v63  ;;  %v1716_v7 = vadd.f32 %v1665_v0, %v1195_v60  ;;  %v1718_v8 = vadd.f32 %v1708_v3, %v1238_v61 }
 0x223   : > { %v1667_v12 = vpop.f32.mrf.mxu0  ;;  %v1710_v13 = vpop.f32.mrf.mxu1 }
 0x224   : > { %v1761_v16 = vmul.f32 0.2, %v1745_v5  ;;  %v1763_v17 = vmul.f32 0.2, %v1747_v6  ;;  %v1746_v19 = vadd.f32 %v1732_v1, %v1716_v7  ;;  %v1748_v20 = vadd.f32 %v1740_v4, %v1718_v8 }
 0x225   : > { %v1719_v21 = vadd.f32 %v1667_v12, %v1197_v2  ;;  %v1721_v22 = vadd.f32 %v1710_v13, %v1240_v10  ;;  %v1669_v23 = vpop.f32.mrf.mxu0  ;;  %v1712_v24 = vpop.f32.mrf.mxu1  ;;  %vm1753_vm5 = vcmp.ge.f32.partialorder %v1745_v5, 0.0  ;;  %vm1755_vm6 = vcmp.ge.f32.partialorder %v1747_v6, 0.0 }
 0x226   : > { %v1720_v25 = vadd.f32 %v1669_v23, %v1199_v14  ;;  %v1722_v26 = vadd.f32 %v1712_v24, %v1242_v15  ;;  %vm1754_vm7 = vcmp.ge.f32.partialorder %v1746_v19, 0.0  ;;  %v1762_v27 = vmul.f32 0.2, %v1746_v19 }
 0x227   : > { %vm1756_vm8 = vcmp.ge.f32.partialorder %v1748_v20, 0.0  ;;  %v1764_v29 = vmul.f32 0.2, %v1748_v20  ;;  %v1749_v30 = vadd.f32 %v1728_v56, %v1719_v21  ;;  %v1751_v31 = vadd.f32 %v1736_v57, %v1721_v22 }
 0x228   : > { %v1750_v32 = vadd.f32 %v1732_v1, %v1720_v25  ;;  %v1752_v33 = vadd.f32 %v1740_v4, %v1722_v26  ;;  %v1769_v34 = vsel %vm1753_vm5, %v1745_v5, %v1761_v16  ;;  %v1771_v35 = vsel %vm1755_vm6, %v1747_v6, %v1763_v17 }
 0x229   : > { %v1770_v36 = vsel %vm1754_vm7, %v1746_v19, %v1762_v27  ;;  %v1772_v37 = vsel %vm1756_vm8, %v1748_v20, %v1764_v29  ;;  %vm1757_vm9 = vcmp.ge.f32.partialorder %v1749_v30, 0.0  ;;  %v1765_v39 = vmul.f32 0.2, %v1749_v30 }
 0x22a   : > { %v2205_v38 = vpack.c.bf16 %v1770_v36, %v1769_v34  ;;  %v2206_v9 = vpack.c.bf16 %v1772_v37, %v1771_v35  ;;  %vm1759_vm10 = vcmp.ge.f32.partialorder %v1751_v31, 0.0  ;;  %v1767_v40 = vmul.f32 0.2, %v1751_v31 }
 0x22b   : > { %vm1758_vm11 = vcmp.ge.f32.partialorder %v1750_v32, 0.0  ;;  %v1766_v11 = vmul.f32 0.2, %v1750_v32  ;;  %vm1760_vm12 = vcmp.ge.f32.partialorder %v1752_v33, 0.0  ;;  %v1768_v41 = vmul.f32 0.2, %v1752_v33 }
 0x22c   : > { %1801 = vst [vmem:[%s170_s5] sm:$0xff] %v2205_v38  ;;  %1802 = vst [vmem:[%s170_s5 + $0x8] sm:$0xff] %v2206_v9  ;;  %v1773_v42 = vsel %vm1757_vm9, %v1749_v30, %v1765_v39  ;;  %v1775_v44 = vsel %vm1759_vm10, %v1751_v31, %v1767_v40 }
 0x22d   : > { %v1774_v43 = vsel %vm1758_vm11, %v1750_v32, %v1766_v11  ;;  %v1776_v46 = vsel %vm1760_vm12, %v1752_v33, %v1768_v41 }
 0x22e   : > { %v2207_v45 = vpack.c.bf16 %v1774_v43, %v1773_v42  ;;  %v2208_v47 = vpack.c.bf16 %v1776_v46, %v1775_v44 }
 0x230   : > { %1803 = vst [vmem:[%s170_s5 + $0x10] sm:$0xff] %v2207_v45  ;;  %1804 = vst [vmem:[%s170_s5 + $0x18] sm:$0xff] %v2208_v47 }
 0x231 PF: > { %s13_s12 = sadd.s32 1, %s2516_s12  }
 0x232   : > { %p10_p4 = scmp.ge.s32.totalorder %s13_s12, 4  }
 0x234   :  { %12 = sbr.rel (!%p10_p4) target bundleno = 1 (0x1), region = 64 }

// kernel: tile.58
= control target key start
LH: loop header
LB: loop body
LE: loop exit
PB: predicated region body
PF: predicated region fallthrough
CT: control target
= control target key end

     0   :  { %s22_s0 = inlined_call_operand.vmem [shape: f32[32], index: 0, kind: input, shape index: {}]   ;;  %s23_s1 = inlined_call_operand.vmem [shape: f32[8,32], index: 1, kind: output, shape index: {}]  }
   0x1   :  { %v4_v0 = vld [vmem:[%s22_s0] ss:$0 sm:$0xff] }
   0x2   :  { %5 = vst [vmem:[%s23_s1] sm:$0xff] %v4_v0 }

// kernel: tile.59
= control target key start
LH: loop header
LB: loop body
LE: loop exit
PB: predicated region body
PF: predicated region fallthrough
CT: control target
= control target key end

     0   :  { %s7_s6 = smov 3  ;;  %s14_s9 = smov 3  ;;  %vm4_vm0 = vcmask 261120   ;;  %vm11_vm1 = vcmask 1048320   ;;  %vm18_vm2 = vcmask 785920   ;;  %vm25_vm3 = vcmask 523520   ;;  %s79_s0 = inlined_call_operand.vmem [shape: f32[8,32], index: 0, kind: input, shape index: {}]   ;;  %s80_s1 = inlined_call_operand.vmem [shape: f32[1,256], index: 1, kind: output, shape index: {}]  }
   0x1   :  { %v41_v0 = vld [vmem:[%s79_s0 + $0x3] ss:$4 sm:%s7_s6]   ;;  %s48_s10 = smov 96   ;;  %s21_s11 = smov 3  ;;  %v42_v1 = vld [vmem:[%s79_s0 + $0x2] ss:$4 sm:%s14_s9]  }
   0x2   :  { %9 = vrot.lane.b32.xlu0 %v41_v0, %s48_s10  ;;  %v43_v2 = vld [vmem:[%s79_s0 + $0x1] ss:$4 sm:%s21_s11]   ;;  %s2_s16 = smov 3  ;;  %s49_s17 = smov 32  }
   0x3   :  { %23 = vrot.lane.b32.xlu1 %v43_v2, %s49_s17  ;;  %v3_v3 = vld [vmem:[%s79_s0] ss:$4 sm:%s2_s16]   ;;  %s50_s0 = smov 64  }
   0x4   :  { %5 = vst.msk [vmem:[#allocation0] ss:$8 sm:$0x3] %vm4_vm0, %v3_v3  }
   0x6   :  { %16 = vrot.lane.b32.xlu0 %v42_v1, %s50_s0 }
  0x74   :  { %v10_v4 = vpop.permute.xlu0 %9  }
  0x75   :  { %12 = vst.msk [vmem:[#allocation0] ss:$8 sm:$0x3] %vm11_vm1, %v10_v4   ;;  %v24_v5 = vpop.permute.xlu1 %23  }
  0x78   :  { %v17_v6 = vpop.permute.xlu0 %16  }
  0x79   :  { %19 = vst.msk [vmem:[#allocation0] ss:$8 sm:$0x3] %vm18_vm2, %v17_v6  }
  0x7a   :  { %26 = vst.msk [vmem:[#allocation0] ss:$8 sm:$0x3] %vm25_vm3, %v24_v5  }
  0x81   :  { %v31_v7 = vld [vmem:[#allocation0] sm:$0x1]  ;;  %v36_v8 = vld [vmem:[#allocation0 + $0x8] sm:$0x1] }
  0x82   :  { %34 = vst [vmem:[%s80_s1] sm:$0x1] %v31_v7  ;;  %44 = vst [vmem:[%s80_s1 + $0x1] sm:$0x1] %v36_v8 }

// kernel: critic_forward.13
= control target key start
LH: loop header
LB: loop body
LE: loop exit
PB: predicated region body
PF: predicated region fallthrough
CT: control target
= control target key end

     0   :  { %s1479_s21 = smov 0   ;;  %s1812_s0 = inlined_call_operand.vmem [shape: bf16[2,16,512], index: 0, kind: input, shape index: {}]   ;;  %s1813_s1 = inlined_call_operand.vmem [shape: bf16[2,16,256], index: 1, kind: input, shape index: {}]   ;;  %s1814_s2 = inlined_call_operand.vmem [shape: bf16[8,16], index: 2, kind: input, shape index: {}]   ;;  %s1815_s3 = inlined_call_operand.vmem [shape: bf16[512,256], index: 3, kind: input, shape index: {}]   ;;  %s1816_s4 = inlined_call_operand.vmem [shape: bf16[256,256], index: 4, kind: input, shape index: {}]   ;;  %s1817_s5 = inlined_call_operand.vmem [shape: f32[1,256], index: 5, kind: input, shape index: {}]   ;;  %s1818_s6 = inlined_call_operand.vmem [shape: bf16[2,8,256], index: 6, kind: output, shape index: {}]  }
   0x1 LB: > { %s1152_s22 = sadd.s32 4294967295, %s1441_s21   ;;  %p1156_p0 = scmp.ge.s32.totalorder %s1441_s21, 1  ;;  %s1441_s21 = sphi %s1479_s21, %s16_s21  }
   0x2   : > { %p222_p1 = scmp.lt.s32.totalorder %s1441_s21, 3 }
   0x4   : > { %p223_p2 = pnand %p1156_p0, %p222_p1 }
   0x5   : > { %p257_p3 = scmp.lt.s32.totalorder (!%p223_p2), %s1152_s22, 1 }
   0x6   : > { %226 = sbr.rel (%p223_p2) target bundleno = 549 (0x225), region = 44 }
   0xb   : > { %v1282_v0 = vld [vmem:[%s1816_s4 + $0x74] ss:$8 sps:$4 sm:$0xff]   ;;  %v1286_v2 = vld [vmem:[%s1816_s4 + $0x70] ss:$8 sps:$4 sm:$0xff]   ;;  %v1288_v4 = vld [vmem:[%s1816_s4 + $0x64] ss:$8 sps:$4 sm:$0xff]  }
   0xc   : > { %v1284_v1 = vld [vmem:[%s1815_s3 + $0x74] ss:$8 sps:$4 sm:$0xff]   ;;  %545 = vmatprep.subr.bf16.mxu0 %v1282_v0  ;;  %v1287_v3 = vld [vmem:[%s1815_s3 + $0x70] ss:$8 sps:$4 sm:$0xff]   ;;  %v1290_v5 = vld [vmem:[%s1815_s3 + $0x64] ss:$8 sps:$4 sm:$0xff]  }
   0xd   : > { %928 = vmatprep.subr.bf16.mxu1 %v1284_v1  ;;  %546 = vmatpush1.bf16.msra.mxu0 %v1286_v2  ;;  %v1292_v6 = vld [vmem:[%s1816_s4 + $0x60] ss:$8 sps:$4 sm:$0xff]   ;;  %v1294_v8 = vld [vmem:[%s1816_s4 + $0x54] ss:$8 sps:$4 sm:$0xff]   ;;  %v1298_v10 = vld [vmem:[%s1816_s4 + $0x50] ss:$8 sps:$4 sm:$0xff]  }
   0xe   : > { %929 = vmatpush1.bf16.msra.mxu1 %v1287_v3  ;;  %547 = vmatprep.subr.bf16.mxu0 %v1288_v4  ;;  %v1293_v7 = vld [vmem:[%s1815_s3 + $0x60] ss:$8 sps:$4 sm:$0xff]   ;;  %v1296_v9 = vld [vmem:[%s1815_s3 + $0x54] ss:$8 sps:$4 sm:$0xff]   ;;  %v1299_v11 = vld [vmem:[%s1815_s3 + $0x50] ss:$8 sps:$4 sm:$0xff]  }
   0xf   : > { %930 = vmatprep.subr.bf16.mxu1 %v1290_v5  ;;  %v1300_v12 = vld [vmem:[%s1816_s4 + $0x44] ss:$8 sps:$4 sm:$0xff]   ;;  %v1304_v14 = vld [vmem:[%s1816_s4 + $0x40] ss:$8 sps:$4 sm:$0xff]   ;;  %v1306_v16 = vld [vmem:[%s1816_s4 + $0x34] ss:$8 sps:$4 sm:$0xff]  }
  0x10   : > { %v1302_v13 = vld [vmem:[%s1815_s3 + $0x44] ss:$8 sps:$4 sm:$0xff]   ;;  %v1305_v15 = vld [vmem:[%s1815_s3 + $0x40] ss:$8 sps:$4 sm:$0xff]   ;;  %v1308_v17 = vld [vmem:[%s1815_s3 + $0x34] ss:$8 sps:$4 sm:$0xff]  }
  0x11   : > { %548 = vmatpush1.bf16.msra.mxu0 %v1292_v6  ;;  %v1310_v18 = vld [vmem:[%s1816_s4 + $0x30] ss:$8 sps:$4 sm:$0xff]   ;;  %v1312_v20 = vld [vmem:[%s1816_s4 + $0x24] ss:$8 sps:$4 sm:$0xff]   ;;  %v1316_v22 = vld [vmem:[%s1816_s4 + $0x20] ss:$8 sps:$4 sm:$0xff]  }
  0x12   : > { %931 = vmatpush1.bf16.msra.mxu1 %v1293_v7  ;;  %549 = vmatprep.subr.bf16.mxu0 %v1294_v8  ;;  %v1311_v19 = vld [vmem:[%s1815_s3 + $0x30] ss:$8 sps:$4 sm:$0xff]   ;;  %v1314_v21 = vld [vmem:[%s1815_s3 + $0x24] ss:$8 sps:$4 sm:$0xff]   ;;  %v1317_v23 = vld [vmem:[%s1815_s3 + $0x20] ss:$8 sps:$4 sm:$0xff]  }
  0x13   : > { %932 = vmatprep.subr.bf16.mxu1 %v1296_v9  ;;  %v1318_v24 = vld [vmem:[%s1816_s4 + $0x14] ss:$8 sps:$4 sm:$0xff]   ;;  %v1322_v26 = vld [vmem:[%s1816_s4 + $0x10] ss:$8 sps:$4 sm:$0xff]   ;;  %v1324_v28 = vld [vmem:[%s1816_s4 + $0x4] ss:$8 sps:$4 sm:$0xff]  }
  0x14   : > { %v1320_v25 = vld [vmem:[%s1815_s3 + $0x14] ss:$8 sps:$4 sm:$0xff]   ;;  %v1323_v27 = vld [vmem:[%s1815_s3 + $0x10] ss:$8 sps:$4 sm:$0xff]   ;;  %v1326_v29 = vld [vmem:[%s1815_s3 + $0x4] ss:$8 sps:$4 sm:$0xff]  }
  0x15   : > { %550 = vmatpush1.bf16.msra.mxu0 %v1298_v10  ;;  %v1328_v30 = vld [vmem:[%s1816_s4] ss:$8 sps:$4 sm:$0xff]   ;;  %v1330_v32 = vld [vmem:[%s1816_s4 + $0xf4] ss:$8 sps:$4 sm:$0xff]   ;;  %v1334_v34 = vld [vmem:[%s1816_s4 + $0xf0] ss:$8 sps:$4 sm:$0xff]  }
  0x16   : > { %933 = vmatpush1.bf16.msra.mxu1 %v1299_v11  ;;  %551 = vmatprep.subr.bf16.mxu0 %v1300_v12  ;;  %v1329_v31 = vld [vmem:[%s1815_s3] ss:$8 sps:$4 sm:$0xff]   ;;  %v1332_v33 = vld [vmem:[%s1815_s3 + $0xf4] ss:$8 sps:$4 sm:$0xff]   ;;  %v1335_v35 = vld [vmem:[%s1815_s3 + $0xf0] ss:$8 sps:$4 sm:$0xff]  }
  0x17   : > { %934 = vmatprep.subr.bf16.mxu1 %v1302_v13  ;;  %v1336_v36 = vld [vmem:[%s1816_s4 + $0xe4] ss:$8 sps:$4 sm:$0xff]   ;;  %s1820_s22 = smov (!%p257_p3, %s1152_s22), 1  ;;  %v1340_v38 = vld [vmem:[%s1816_s4 + $0xe0] ss:$8 sps:$4 sm:$0xff]   ;;  %vm1029_vm0 = vcmask 130048  }
  0x18   : > { %v1338_v37 = vld [vmem:[%s1815_s3 + $0xe4] ss:$8 sps:$4 sm:$0xff]   ;;  %v1341_v39 = vld [vmem:[%s1815_s3 + $0xe0] ss:$8 sps:$4 sm:$0xff]   ;;  %v1342_v40 = vld [vmem:[%s1816_s4 + $0xd4] ss:$8 sps:$4 sm:$0xff]  }
  0x19   : > { %552 = vmatpush1.bf16.msra.mxu0 %v1304_v14  ;;  %v1344_v41 = vld [vmem:[%s1815_s3 + $0xd4] ss:$8 sps:$4 sm:$0xff]   ;;  %s1270_s17 = sshll.u32 %s1820_s22, 4  ;;  %v1346_v42 = vld [vmem:[%s1816_s4 + $0xd0] ss:$8 sps:$4 sm:$0xff]   ;;  %s1269_s24 = sshll.u32 %s1820_s22, 5 }
  0x1a   : > { %935 = vmatpush1.bf16.msra.mxu1 %v1305_v15  ;;  %553 = vmatprep.subr.bf16.mxu0 %v1306_v16  ;;  %v1347_v43 = vld [vmem:[%s1815_s3 + $0xd0] ss:$8 sps:$4 sm:$0xff]   ;;  %v1348_v44 = vld [vmem:[%s1816_s4 + $0xc4] ss:$8 sps:$4 sm:$0xff]   ;;  %s1633_s29 = scalar_lea.vmem %s1813_s1, %s1270_s17  ;;  %v1352_v46 = vld [vmem:[%s1816_s4 + $0xc0] ss:$8 sps:$4 sm:$0xff]   ;;  %s1647_s14 = scalar_lea.vmem %s1812_s0, %s1269_s24 }
  0x1b   : > { %936 = vmatprep.subr.bf16.mxu1 %v1308_v17  ;;  %v1350_v45 = vld [vmem:[%s1815_s3 + $0xc4] ss:$8 sps:$4 sm:$0xff]   ;;  %v1353_v47 = vld [vmem:[%s1815_s3 + $0xc0] ss:$8 sps:$4 sm:$0xff]   ;;  %v1354_v48 = vld [vmem:[%s1816_s4 + $0xb4] ss:$8 sps:$4 sm:$0xff]  }
  0x1c   : > { %v1380_v49 = vld [vmem:[%s1633_s29 + $0x4] ss:$8 sps:$4 sm:$0xff]   ;;  %v1356_v50 = vld [vmem:[%s1815_s3 + $0xb4] ss:$8 sps:$4 sm:$0xff]   ;;  %v1358_v52 = vld [vmem:[%s1816_s4 + $0xb0] ss:$8 sps:$4 sm:$0xff]  }
  0x1d   : > { %554 = vmatpush1.bf16.msra.mxu0 %v1310_v18  ;;  %v1383_v51 = vld [vmem:[%s1647_s14 + $0x4] ss:$16 sps:$4 sm:$0xff]   ;;  %577 = vmatprep.mubr.bf16.mxu0 %v1380_v49  ;;  %v1359_v53 = vld [vmem:[%s1815_s3 + $0xb0] ss:$8 sps:$4 sm:$0xff]   ;;  %v1364_v56 = vld [vmem:[%s1816_s4 + $0xa0] ss:$8 sps:$4 sm:$0xff]  }
  0x1e   : > { %937 = vmatpush1.bf16.msra.mxu1 %v1311_v19  ;;  %555 = vmatprep.subr.bf16.mxu0 %v1312_v20  ;;  %v1360_v54 = vld [vmem:[%s1816_s4 + $0xa4] ss:$8 sps:$4 sm:$0xff]   ;;  %v1365_v57 = vld [vmem:[%s1815_s3 + $0xa0] ss:$8 sps:$4 sm:$0xff]   ;;  %v1366_v58 = vld [vmem:[%s1816_s4 + $0x94] ss:$8 sps:$4 sm:$0xff]  }
  0x1f   : > { %938 = vmatprep.subr.bf16.mxu1 %v1314_v21  ;;  %960 = vmatprep.mubr.bf16.mxu1 %v1383_v51  ;;  %v1362_v55 = vld [vmem:[%s1815_s3 + $0xa4] ss:$8 sps:$4 sm:$0xff]   ;;  %v1368_v59 = vld [vmem:[%s1815_s3 + $0x94] ss:$8 sps:$4 sm:$0xff]   ;;  %v1370_v60 = vld [vmem:[%s1816_s4 + $0x90] ss:$8 sps:$4 sm:$0xff]  }
  0x20   : > { %v1371_v61 = vld [vmem:[%s1815_s3 + $0x90] ss:$8 sps:$4 sm:$0xff]   ;;  %v1372_v62 = vld [vmem:[%s1816_s4 + $0x84] ss:$8 sps:$4 sm:$0xff]   ;;  %v1376_v0 = vld [vmem:[%s1816_s4 + $0x80] ss:$8 sps:$4 sm:$0xff]  }
  0x21   : > { %556 = vmatpush1.bf16.msra.mxu0 %v1316_v22  ;;  %v1374_v63 = vld [vmem:[%s1815_s3 + $0x84] ss:$8 sps:$4 sm:$0xff]   ;;  %v1377_v1 = vld [vmem:[%s1815_s3 + $0x80] ss:$8 sps:$4 sm:$0xff]   ;;  %v1386_v2 = vld [vmem:[%s1815_s3 + $0x174] ss:$8 sps:$4 sm:$0xff]  }
  0x22   : > { %939 = vmatpush1.bf16.msra.mxu1 %v1317_v23  ;;  %557 = vmatprep.subr.bf16.mxu0 %v1318_v24  ;;  %v1378_v3 = vld [vmem:[%s1633_s29] ss:$8 sps:$4 sm:$0xff]   ;;  %v1384_v5 = vld [vmem:[%s1815_s3 + $0x170] ss:$8 sps:$4 sm:$0xff]   ;;  %v1389_v6 = vld [vmem:[%s1815_s3 + $0x164] ss:$8 sps:$4 sm:$0xff]  }
  0x23   : > { %940 = vmatprep.subr.bf16.mxu1 %v1320_v25  ;;  %v1381_v4 = vld [vmem:[%s1647_s14] ss:$16 sps:$4 sm:$0xff]   ;;  %v1434_v7 = vld [vmem:[%s1647_s14 + $0xc] ss:$16 sps:$4 sm:$0xff]   ;;  %s1271_s10 = sshll.u32 %s1820_s22, 3 }
  0x24   : > { %v1387_v8 = vld [vmem:[%s1815_s3 + $0x160] ss:$8 sps:$4 sm:$0xff]   ;;  %v1392_v9 = vld [vmem:[%s1815_s3 + $0x154] ss:$8 sps:$4 sm:$0xff]   ;;  %v1390_v10 = vld [vmem:[%s1815_s3 + $0x150] ss:$8 sps:$4 sm:$0xff]   ;;  %s271_s13 = scalar_lea.vmem %s1818_s6, %s1271_s10 }
  0x25   : > { %558 = vmatpush1.bf16.msra.mxu0 %v1322_v26  ;;  %v1395_v11 = vld [vmem:[%s1815_s3 + $0x144] ss:$8 sps:$4 sm:$0xff]   ;;  %v1393_v12 = vld [vmem:[%s1815_s3 + $0x140] ss:$8 sps:$4 sm:$0xff]   ;;  %v1398_v13 = vld [vmem:[%s1815_s3 + $0x134] ss:$8 sps:$4 sm:$0xff]  }
  0x26   : > { %941 = vmatpush1.bf16.msra.mxu1 %v1323_v27  ;;  %559 = vmatprep.subr.bf16.mxu0 %v1324_v28  ;;  %v1396_v14 = vld [vmem:[%s1815_s3 + $0x130] ss:$8 sps:$4 sm:$0xff]   ;;  %v1401_v15 = vld [vmem:[%s1815_s3 + $0x124] ss:$8 sps:$4 sm:$0xff]   ;;  %v1399_v16 = vld [vmem:[%s1815_s3 + $0x120] ss:$8 sps:$4 sm:$0xff]  }
  0x27   : > { %942 = vmatprep.subr.bf16.mxu1 %v1326_v29  ;;  %v1404_v17 = vld [vmem:[%s1815_s3 + $0x114] ss:$8 sps:$4 sm:$0xff]   ;;  %v1402_v18 = vld [vmem:[%s1815_s3 + $0x110] ss:$8 sps:$4 sm:$0xff]   ;;  %v1407_v19 = vld [vmem:[%s1815_s3 + $0x104] ss:$8 sps:$4 sm:$0xff]  }
  0x28   : > { %v1405_v20 = vld [vmem:[%s1815_s3 + $0x100] ss:$8 sps:$4 sm:$0xff]   ;;  %v1410_v21 = vld [vmem:[%s1815_s3 + $0x1f4] ss:$8 sps:$4 sm:$0xff]   ;;  %v1408_v22 = vld [vmem:[%s1815_s3 + $0x1f0] ss:$8 sps:$4 sm:$0xff]  }
  0x29   : > { %560 = vmatpush1.bf16.msra.mxu0 %v1328_v30  ;;  %v1413_v23 = vld [vmem:[%s1815_s3 + $0x1e4] ss:$8 sps:$4 sm:$0xff]   ;;  %v1411_v24 = vld [vmem:[%s1815_s3 + $0x1e0] ss:$8 sps:$4 sm:$0xff]   ;;  %v1416_v25 = vld [vmem:[%s1815_s3 + $0x1d4] ss:$8 sps:$4 sm:$0xff]  }
  0x2a   : > { %943 = vmatpush1.bf16.msra.mxu1 %v1329_v31  ;;  %561 = vmatprep.subr.bf16.mxu0 %v1330_v32  ;;  %v1414_v26 = vld [vmem:[%s1815_s3 + $0x1d0] ss:$8 sps:$4 sm:$0xff]   ;;  %v1419_v27 = vld [vmem:[%s1815_s3 + $0x1c4] ss:$8 sps:$4 sm:$0xff]   ;;  %v1417_v28 = vld [vmem:[%s1815_s3 + $0x1c0] ss:$8 sps:$4 sm:$0xff]  }
  0x2b   : > { %944 = vmatprep.subr.bf16.mxu1 %v1332_v33  ;;  %v1422_v29 = vld [vmem:[%s1815_s3 + $0x1b4] ss:$8 sps:$4 sm:$0xff]   ;;  %v1420_v30 = vld [vmem:[%s1815_s3 + $0x1b0] ss:$8 sps:$4 sm:$0xff]   ;;  %v1425_v31 = vld [vmem:[%s1815_s3 + $0x1a4] ss:$8 sps:$4 sm:$0xff]  }
  0x2c   : > { %v1423_v32 = vld [vmem:[%s1815_s3 + $0x1a0] ss:$8 sps:$4 sm:$0xff]   ;;  %v1428_v33 = vld [vmem:[%s1815_s3 + $0x194] ss:$8 sps:$4 sm:$0xff]  }
  0x2d   : > { %562 = vmatpush2.bf16.msra.mxu0 %v1334_v34  ;;  %v1426_v34 = vld [vmem:[%s1815_s3 + $0x190] ss:$8 sps:$4 sm:$0xff]  }
  0x2e   : > { %945 = vmatpush2.bf16.msra.mxu1 %v1335_v35  ;;  %563 = vmatprep.subr.bf16.mxu0 %v1336_v36  ;;  %v1431_v35 = vld [vmem:[%s1815_s3 + $0x184] ss:$8 sps:$4 sm:$0xff]   ;;  %v1429_v36 = vld [vmem:[%s1815_s3 + $0x180] ss:$8 sps:$4 sm:$0xff]  }
  0x2f   : > { %946 = vmatprep.subr.bf16.mxu1 %v1338_v37  ;;  %v1432_v37 = vld [vmem:[%s1647_s14 + $0x8] ss:$16 sps:$4 sm:$0xff]  }
  0x31   : > { %564 = vmatpush2.bf16.msra.mxu0 %v1340_v38  ;;  %v1443_v38 = vmov 0  }
  0x32   : > { %947 = vmatpush2.bf16.msra.mxu1 %v1341_v39  ;;  %565 = vmatprep.subr.bf16.mxu0 %v1342_v40 }
  0x33   : > { %948 = vmatprep.subr.bf16.mxu1 %v1344_v41 }
  0x35   : > { %566 = vmatpush2.bf16.msra.mxu0 %v1346_v42 }
  0x36   : > { %949 = vmatpush2.bf16.msra.mxu1 %v1347_v43  ;;  %567 = vmatprep.subr.bf16.mxu0 %v1348_v44 }
  0x37   : > { %950 = vmatprep.subr.bf16.mxu1 %v1350_v45 }
  0x39   : > { %568 = vmatpush2.bf16.msra.mxu0 %v1352_v46 }
  0x3a   : > { %951 = vmatpush2.bf16.msra.mxu1 %v1353_v47  ;;  %569 = vmatprep.subr.bf16.mxu0 %v1354_v48 }
  0x3b   : > { %952 = vmatprep.subr.bf16.mxu1 %v1356_v50 }
  0x3d   : > { %570 = vmatpush2.bf16.msra.mxu0 %v1358_v52 }
  0x3e   : > { %953 = vmatpush2.bf16.msra.mxu1 %v1359_v53  ;;  %571 = vmatprep.subr.bf16.mxu0 %v1360_v54 }
  0x3f   : > { %954 = vmatprep.subr.bf16.mxu1 %v1362_v55 }
  0x41   : > { %572 = vmatpush2.bf16.msra.mxu0 %v1364_v56 }
  0x42   : > { %955 = vmatpush2.bf16.msra.mxu1 %v1365_v57  ;;  %573 = vmatprep.subr.bf16.mxu0 %v1366_v58 }
  0x43   : > { %956 = vmatprep.subr.bf16.mxu1 %v1368_v59 }
  0x45   : > { %574 = vmatpush2.bf16.msra.mxu0 %v1370_v60 }
  0x46   : > { %957 = vmatpush2.bf16.msra.mxu1 %v1371_v61  ;;  %575 = vmatprep.subr.bf16.mxu0 %v1372_v62  ;;  %v1014_v61 = vld [vmem:[%s1814_s2] sm:$0xf]  ;;  %v1019_v62 = vlaneseq }
  0x47   : > { %958 = vmatprep.subr.bf16.mxu1 %v1374_v63 }
  0x48   : > { %v1020_v63 = vshrl.u32 %v1019_v62, 7 }
  0x49   : > { %576 = vmatpush2.bf16.msra.mxu0 %v1376_v0 }
  0x4a   : > { %959 = vmatpush2.bf16.msra.mxu1 %v1377_v1  ;;  %971 = vmatprep.subr.bf16.mxu0 %v1386_v2  ;;  %v1021_v0 = vsub.s32 0, %v1020_v63  ;;  %v1017_v1 = vld [vmem:[%s1817_s5] sm:$0x3]  ;;  %v1025_v2 = vsub.s32 1, %v1020_v63 }
  0x4c   : > { %578 = vmatmul.mubr.bf16.vlgmr.msra.gmra.mxu0 %v1378_v3  ;;  %v1022_v3 = vrot.slane %v1017_v1, %v1021_v0 }
  0x4d   : > { %961 = vmatmul.mubr.bf16.vlgmr.msra.gmra.mxu1 %v1381_v4  ;;  %972 = vmatpush1.bf16.msra.mxu0 %v1384_v5  ;;  %v1026_v4 = vrot.slane %v1017_v1, %v1025_v2 }
  0x4e   : > { %973 = vmatprep.subr.bf16.mxu0 %v1389_v6  ;;  %1003 = vmatprep.mubr.bf16.mxu0 %v1434_v7 }
  0x4f   : > { %1065 = vmatprep.mubr.bf16.mxu1 %v1443_v38 }
  0x51   : > { %974 = vmatpush1.bf16.msra.mxu0 %v1387_v8 }
  0x52   : > { %975 = vmatprep.subr.bf16.mxu0 %v1392_v9 }
  0x55   : > { %976 = vmatpush1.bf16.msra.mxu0 %v1390_v10 }
  0x56   : > { %977 = vmatprep.subr.bf16.mxu0 %v1395_v11 }
  0x59   : > { %978 = vmatpush1.bf16.msra.mxu0 %v1393_v12 }
  0x5a   : > { %979 = vmatprep.subr.bf16.mxu0 %v1398_v13 }
  0x5d   : > { %980 = vmatpush1.bf16.msra.mxu0 %v1396_v14 }
  0x5e   : > { %981 = vmatprep.subr.bf16.mxu0 %v1401_v15 }
  0x61   : > { %982 = vmatpush1.bf16.msra.mxu0 %v1399_v16 }
  0x62   : > { %983 = vmatprep.subr.bf16.mxu0 %v1404_v17 }
  0x65   : > { %984 = vmatpush1.bf16.msra.mxu0 %v1402_v18 }
  0x66   : > { %985 = vmatprep.subr.bf16.mxu0 %v1407_v19 }
  0x69   : > { %986 = vmatpush1.bf16.msra.mxu0 %v1405_v20 }
  0x6a   : > { %987 = vmatprep.subr.bf16.mxu0 %v1410_v21 }
  0x6d   : > { %988 = vmatpush2.bf16.msra.mxu0 %v1408_v22 }
  0x6e   : > { %989 = vmatprep.subr.bf16.mxu0 %v1413_v23 }
  0x71   : > { %990 = vmatpush2.bf16.msra.mxu0 %v1411_v24 }
  0x72   : > { %991 = vmatprep.subr.bf16.mxu0 %v1416_v25 }
  0x75   : > { %992 = vmatpush2.bf16.msra.mxu0 %v1414_v26 }
  0x76   : > { %993 = vmatprep.subr.bf16.mxu0 %v1419_v27 }
  0x79   : > { %994 = vmatpush2.bf16.msra.mxu0 %v1417_v28 }
  0x7a   : > { %995 = vmatprep.subr.bf16.mxu0 %v1422_v29 }
  0x7d   : > { %996 = vmatpush2.bf16.msra.mxu0 %v1420_v30 }
  0x7e   : > { %997 = vmatprep.subr.bf16.mxu0 %v1425_v31 }
  0x81   : > { %998 = vmatpush2.bf16.msra.mxu0 %v1423_v32 }
  0x82   : > { %999 = vmatprep.subr.bf16.mxu0 %v1428_v33 }
  0x85   : > { %1000 = vmatpush2.bf16.msra.mxu0 %v1426_v34 }
  0x86   : > { %1001 = vmatprep.subr.bf16.mxu0 %v1431_v35 }
  0x89   : > { %1002 = vmatpush2.bf16.msra.mxu0 %v1429_v36 }
  0x8c   : > { %1004 = vmatmul.mubr.bf16.vlgmr.msra.gmra.mxu0 %v1432_v37 }
 0x10c   : > { %v579_v39 = vpop.f32.mrf.mxu0 }
 0x10d   : > { %v962_v40 = vpop.f32.mrf.mxu1 }
 0x10e   : > { %v581_v41 = vpop.f32.mrf.mxu0  ;;  %v963_v53 = vadd.f32 %v962_v40, %v579_v39 }
 0x10f   : > { %v964_v42 = vpop.f32.mrf.mxu1 }
 0x110   : > { %v583_v43 = vpop.f32.mrf.mxu0  ;;  %v965_v51 = vadd.f32 %v964_v42, %v581_v41 }
 0x111   : > { %v966_v44 = vpop.f32.mrf.mxu1 }
 0x112   : > { %v585_v45 = vpop.f32.mrf.mxu0  ;;  %v967_v49 = vadd.f32 %v966_v44, %v583_v43 }
 0x113   : > { %v968_v47 = vpop.f32.mrf.mxu1 }
 0x114   : > { %v969_v52 = vadd.f32 %v968_v47, %v585_v45 }
 0x14c   : > { %v1005_v46 = vpop.f32.mrf.mxu0 }
 0x14d   : > { %v1006_v58 = vadd.f32 %v1005_v46, %v963_v53 }
 0x14e   : > { %v1007_v48 = vpop.f32.mrf.mxu0 }
 0x14f   : > { %v1008_v56 = vadd.f32 %v1007_v48, %v965_v51 }
 0x150   : > { %v1009_v50 = vpop.f32.mrf.mxu0 }
 0x151   : > { %v1010_v54 = vadd.f32 %v1009_v50, %v967_v49 }
 0x152   : > { %v1011_v55 = vpop.f32.mrf.mxu0 }
 0x153   : > { %v1012_v57 = vadd.f32 %v1011_v55, %v969_v52  ;;  %v1015_v60 = vpack.c.bf16 %v1010_v54, %v1006_v58 }
 0x155   : > { %v1016_v59 = vpack.c.bf16 %v1012_v57, %v1008_v56 }
 0x157   : > { %1047 = vmatprep.subr.bf16.mxu1 %v1016_v59 }
 0x158   : > { %1048 = vmatpush1.bf16.msra.mxu1 %v1015_v60 }
 0x15b   : > { %1265 = vmatmul.mubr.msk.bf16.vlgmr.msra.gmra.mxu1 %vm1029_vm0, %v1014_v61 }
 0x21b   : > { %v1067_v5 = vpop.f32.mrf.mxu1 }
 0x21c   : > { %v1068_v6 = vadd.f32 %v1067_v5, %v1022_v3 }
 0x21d   : > { %v1069_v7 = vpop.f32.mrf.mxu1 }
 0x21e   : > { %v1070_v8 = vadd.f32 %v1069_v7, %v1026_v4  ;;  %v1074_v10 = vmul.f32 0.70710677, %v1068_v6 }
 0x21f   : > { %v1071_v9 = vpop.f32.mrf.mxu1 }
 0x220   : > { %v1075_v11 = vmul.f32 0.70710677, %v1070_v8 }
 0x221   : > { %v1072_v12 = vpop.f32.mrf.mxu1 }
 0x222   : > { %v1272_v13 = vpack.c.bf16 %v1075_v11, %v1074_v10 }
 0x224   : > { %1084 = vst [vmem:[%s271_s13] sm:$0xff] %v1272_v13 }
 0x225 PF: > { %s16_s21 = sadd.s32 1, %s1441_s21  }
 0x226   : > { %p13_p4 = scmp.ge.s32.totalorder %s16_s21, 4  }
 0x228   :  { %15 = sbr.rel (!%p13_p4) target bundleno = 1 (0x1), region = 77 }

// kernel: critic_forward.14
= control target key start
LH: loop header
LB: loop body
LE: loop exit
PB: predicated region body
PF: predicated region fallthrough
CT: control target
= control target key end

     0   :  { %s1450_s12 = smov 0   ;;  %s1784_s0 = inlined_call_operand.vmem [shape: bf16[2,8,256], index: 0, kind: input, shape index: {}]   ;;  %s1785_s1 = inlined_call_operand.vmem [shape: bf16[3,256,256], index: 1, kind: input, shape index: {}]   ;;  %s1786_s2 = inlined_call_operand.vmem [shape: f32[1,256], index: 2, kind: input, shape index: {}]   ;;  %s1787_s3 = inlined_call_operand.vmem [shape: bf16[2,8,256], index: 3, kind: output, shape index: {}]  }
   0x1 LB: > { %s1081_s13 = sadd.s32 4294967295, %s1426_s12   ;;  %p1085_p0 = scmp.ge.s32.totalorder %s1426_s12, 1  ;;  %s1426_s12 = sphi %s1450_s12, %s13_s12  }
   0x2   : > { %p137_p1 = scmp.lt.s32.totalorder %s1426_s12, 3 }
   0x4   : > { %p138_p2 = pnand %p1085_p0, %p137_p1 }
   0x5   : > { %p161_p3 = scmp.lt.s32.totalorder (!%p138_p2), %s1081_s13, 1 }
   0x6   : > { %141 = sbr.rel (%p138_p2) target bundleno = 488 (0x1e8), region = 32 }
   0xb   : > { %v173_v0 = vlaneseq  ;;  %v1428_v1 = vmov 0   ;;  %v1276_v2 = vld [vmem:[%s1785_s1 + $0x74] ss:$8 sps:$4 sm:$0xff]   ;;  %v1278_v3 = vld [vmem:[%s1785_s1 + $0x70] ss:$8 sps:$4 sm:$0xff]   ;;  %s1789_s13 = smov (!%p161_p3, %s1081_s13), 1 }
   0xc   : > { %235 = vmatprep.mubr.bf16.mxu1 %v1428_v1  ;;  %517 = vmatprep.subr.bf16.mxu0 %v1276_v2  ;;  %s1261_s18 = sshll.u32 %s1789_s13, 3  ;;  %v1282_v7 = vld [vmem:[%s1785_s1 + $0x64] ss:$8 sps:$4 sm:$0xff]   ;;  %v1284_v8 = vld [vmem:[%s1785_s1 + $0x60] ss:$8 sps:$4 sm:$0xff]   ;;  %vm196_vm0 = vcmask 1043456  }
   0xd   : > { %v1466_v4 = vshrl.u32 %v173_v0, 7  ;;  %v176_v5 = vand.u32 127, %v173_v0  ;;  %518 = vmatpush1.bf16.msra.mxu0 %v1278_v3  ;;  %s165_s23 = scalar_lea.vmem %s1784_s0, %s1261_s18  ;;  %v1429_v12 = vmov 0.0   ;;  %v1288_v15 = vld [vmem:[%s1785_s1 + $0x54] ss:$8 sps:$4 sm:$0xff]   ;;  %vm192_vm2 = vcmask 64512   ;;  %s170_s22 = scalar_lea.vmem %s1787_s3, %s1261_s18 }
   0xe   : > { %v172_v9 = vld [vmem:[%s165_s23] sm:$0xff]  ;;  %519 = vmatprep.subr.bf16.mxu0 %v1282_v7  ;;  %v1290_v16 = vld [vmem:[%s1785_s1 + $0x50] ss:$8 sps:$4 sm:$0xff]   ;;  %v1281_v20 = vld [vmem:[%s1785_s1 + $0x174] ss:$8 sps:$4 sm:$0xff]  }
   0xf   : > { %v177_v6 = vadd.s32 1, %v176_v5  ;;  %v1093_v10 = vcombine.high %v172_v9, %v172_v9  ;;  %v1481_v11 = vcombine.low %v172_v9, %v172_v9  ;;  %v182_v14 = vadd.s32 1, %v1466_v4  ;;  %v1294_v19 = vld [vmem:[%s1785_s1 + $0x44] ss:$8 sps:$4 sm:$0xff]   ;;  %v1296_v21 = vld [vmem:[%s1785_s1 + $0x40] ss:$8 sps:$4 sm:$0xff]  }
  0x10   : > { %v1300_v22 = vld [vmem:[%s1785_s1 + $0x34] ss:$8 sps:$4 sm:$0xff]   ;;  %v1302_v24 = vld [vmem:[%s1785_s1 + $0x30] ss:$8 sps:$4 sm:$0xff]   ;;  %v1306_v26 = vld [vmem:[%s1785_s1 + $0x24] ss:$8 sps:$4 sm:$0xff]  }
  0x11   : > { %vm178_vm1 = vcmp.eq.s32.totalorder %v1466_v4, %v177_v6  ;;  %520 = vmatpush1.bf16.msra.mxu0 %v1284_v8  ;;  %1094 = vmatprep.subr.msk.bf16.mxu1 %vm196_vm0, %v1093_v10  ;;  %v198_v17 = vsel %vm196_vm0, %v1481_v11, 0  ;;  %vm183_vm3 = vcmp.eq.s32.totalorder %v176_v5, %v182_v14  ;;  %v1279_v27 = vld [vmem:[%s1785_s1 + $0x170] ss:$8 sps:$4 sm:$0xff]   ;;  %v1287_v28 = vld [vmem:[%s1785_s1 + $0x164] ss:$8 sps:$4 sm:$0xff]  }
  0x12   : > { %v1090_v13 = vsel %vm178_vm1, 1.0, %v1429_v12  ;;  %521 = vmatprep.subr.bf16.mxu0 %v1288_v15  ;;  %218 = vmatpush1.bf16.msra.mxu1 %v198_v17  ;;  %v1091_v23 = vsel %vm183_vm3, 1.0, %v1429_v12  ;;  %v1308_v29 = vld [vmem:[%s1785_s1 + $0x20] ss:$8 sps:$4 sm:$0xff]   ;;  %v1312_v30 = vld [vmem:[%s1785_s1 + $0x14] ss:$8 sps:$4 sm:$0xff]  }
  0x13   : > { %v181_v18 = vpack.c.bf16 %v1090_v13, %v1090_v13  ;;  %1096 = vmatprep.subr.msk.bf16.mxu1 %vm196_vm0, %v1093_v10  ;;  %v186_v25 = vpack.c.bf16 %v1091_v23, %v1091_v23  ;;  %v1285_v31 = vld [vmem:[%s1785_s1 + $0x160] ss:$8 sps:$4 sm:$0xff]   ;;  %v1293_v32 = vld [vmem:[%s1785_s1 + $0x154] ss:$8 sps:$4 sm:$0xff]   ;;  %v1314_v33 = vld [vmem:[%s1785_s1 + $0x10] ss:$8 sps:$4 sm:$0xff]  }
  0x14   : > { %v1318_v34 = vld [vmem:[%s1785_s1 + $0x4] ss:$8 sps:$4 sm:$0xff]   ;;  %v1291_v35 = vld [vmem:[%s1785_s1 + $0x150] ss:$8 sps:$4 sm:$0xff]   ;;  %v1320_v37 = vld [vmem:[%s1785_s1] ss:$8 sps:$4 sm:$0xff]  }
  0x15   : > { %522 = vmatpush1.bf16.msra.mxu0 %v1290_v16  ;;  %1095 = vmatmul.mubr.msk.bf16.vlgmr.msra.gmra.mxu1 %vm192_vm2, %v181_v18  ;;  %v1299_v36 = vld [vmem:[%s1785_s1 + $0x144] ss:$8 sps:$4 sm:$0xff]   ;;  %v1324_v38 = vld [vmem:[%s1785_s1 + $0xf4] ss:$8 sps:$4 sm:$0xff]   ;;  %v1297_v39 = vld [vmem:[%s1785_s1 + $0x140] ss:$8 sps:$4 sm:$0xff]  }
  0x16   : > { %523 = vmatprep.subr.bf16.mxu0 %v1294_v19  ;;  %264 = vmatpush1.bf16.msra.mxu1 %v198_v17  ;;  %v1305_v40 = vld [vmem:[%s1785_s1 + $0x134] ss:$8 sps:$4 sm:$0xff]   ;;  %v1326_v41 = vld [vmem:[%s1785_s1 + $0xf0] ss:$8 sps:$4 sm:$0xff]   ;;  %v1330_v42 = vld [vmem:[%s1785_s1 + $0xe4] ss:$8 sps:$4 sm:$0xff]  }
  0x17   : > { %281 = vmatprep.mubr.bf16.mxu1 %v1428_v1  ;;  %720 = vmatprep.subr.bf16.mxu1 %v1281_v20  ;;  %v1303_v43 = vld [vmem:[%s1785_s1 + $0x130] ss:$8 sps:$4 sm:$0xff]   ;;  %v1311_v44 = vld [vmem:[%s1785_s1 + $0x124] ss:$8 sps:$4 sm:$0xff]   ;;  %v1332_v45 = vld [vmem:[%s1785_s1 + $0xe0] ss:$8 sps:$4 sm:$0xff]  }
  0x18   : > { %v1336_v46 = vld [vmem:[%s1785_s1 + $0xd4] ss:$8 sps:$4 sm:$0xff]   ;;  %v1309_v47 = vld [vmem:[%s1785_s1 + $0x120] ss:$8 sps:$4 sm:$0xff]   ;;  %v1315_v49 = vld [vmem:[%s1785_s1 + $0x110] ss:$8 sps:$4 sm:$0xff]  }
  0x19   : > { %524 = vmatpush1.bf16.msra.mxu0 %v1296_v21  ;;  %v1317_v48 = vld [vmem:[%s1785_s1 + $0x114] ss:$8 sps:$4 sm:$0xff]   ;;  %v1338_v50 = vld [vmem:[%s1785_s1 + $0xd0] ss:$8 sps:$4 sm:$0xff]   ;;  %v1323_v51 = vld [vmem:[%s1785_s1 + $0x104] ss:$8 sps:$4 sm:$0xff]  }
  0x1a   : > { %525 = vmatprep.subr.bf16.mxu0 %v1300_v22  ;;  %v1342_v52 = vld [vmem:[%s1785_s1 + $0xc4] ss:$8 sps:$4 sm:$0xff]   ;;  %v1344_v53 = vld [vmem:[%s1785_s1 + $0xc0] ss:$8 sps:$4 sm:$0xff]   ;;  %v1348_v54 = vld [vmem:[%s1785_s1 + $0xb4] ss:$8 sps:$4 sm:$0xff]  }
  0x1b   : > { %v1321_v55 = vld [vmem:[%s1785_s1 + $0x100] ss:$8 sps:$4 sm:$0xff]   ;;  %v1329_v56 = vld [vmem:[%s1785_s1 + $0x1f4] ss:$8 sps:$4 sm:$0xff]   ;;  %v1350_v57 = vld [vmem:[%s1785_s1 + $0xb0] ss:$8 sps:$4 sm:$0xff]  }
  0x1c   : > { %v1354_v58 = vld [vmem:[%s1785_s1 + $0xa4] ss:$8 sps:$4 sm:$0xff]   ;;  %v1327_v59 = vld [vmem:[%s1785_s1 + $0x1f0] ss:$8 sps:$4 sm:$0xff]   ;;  %v1356_v61 = vld [vmem:[%s1785_s1 + $0xa0] ss:$8 sps:$4 sm:$0xff]  }
  0x1d   : > { %526 = vmatpush1.bf16.msra.mxu0 %v1302_v24  ;;  %1097 = vmatmul.mubr.msk.bf16.vlgmr.msra.gmra.mxu1 %vm192_vm2, %v186_v25  ;;  %v1335_v60 = vld [vmem:[%s1785_s1 + $0x1e4] ss:$8 sps:$4 sm:$0xff]   ;;  %v1360_v62 = vld [vmem:[%s1785_s1 + $0x94] ss:$8 sps:$4 sm:$0xff]   ;;  %v1333_v63 = vld [vmem:[%s1785_s1 + $0x1e0] ss:$8 sps:$4 sm:$0xff]  }
  0x1e   : > { %527 = vmatprep.subr.bf16.mxu0 %v1306_v26  ;;  %721 = vmatpush1.bf16.msra.mxu1 %v1279_v27  ;;  %v1341_v0 = vld [vmem:[%s1785_s1 + $0x1d4] ss:$8 sps:$4 sm:$0xff]   ;;  %v1362_v1 = vld [vmem:[%s1785_s1 + $0x90] ss:$8 sps:$4 sm:$0xff]   ;;  %v1347_v3 = vld [vmem:[%s1785_s1 + $0x1c4] ss:$8 sps:$4 sm:$0xff]  }
  0x1f   : > { %752 = vmatprep.mubr.bf16.mxu1 %v1093_v10  ;;  %722 = vmatprep.subr.bf16.mxu1 %v1287_v28  ;;  %v1339_v2 = vld [vmem:[%s1785_s1 + $0x1d0] ss:$8 sps:$4 sm:$0xff]   ;;  %v1345_v5 = vld [vmem:[%s1785_s1 + $0x1c0] ss:$8 sps:$4 sm:$0xff]   ;;  %v1353_v6 = vld [vmem:[%s1785_s1 + $0x1b4] ss:$8 sps:$4 sm:$0xff]  }
  0x20   : > { %v1351_v7 = vld [vmem:[%s1785_s1 + $0x1b0] ss:$8 sps:$4 sm:$0xff]   ;;  %v1359_v8 = vld [vmem:[%s1785_s1 + $0x1a4] ss:$8 sps:$4 sm:$0xff]   ;;  %v1357_v9 = vld [vmem:[%s1785_s1 + $0x1a0] ss:$8 sps:$4 sm:$0xff]  }
  0x21   : > { %528 = vmatpush1.bf16.msra.mxu0 %v1308_v29  ;;  %v1365_v10 = vld [vmem:[%s1785_s1 + $0x194] ss:$8 sps:$4 sm:$0xff]   ;;  %v1363_v12 = vld [vmem:[%s1785_s1 + $0x190] ss:$8 sps:$4 sm:$0xff]   ;;  %v1366_v13 = vld [vmem:[%s1785_s1 + $0x84] ss:$8 sps:$4 sm:$0xff]  }
  0x22   : > { %529 = vmatprep.subr.bf16.mxu0 %v1312_v30  ;;  %723 = vmatpush1.bf16.msra.mxu1 %v1285_v31  ;;  %v1368_v14 = vld [vmem:[%s1785_s1 + $0x80] ss:$8 sps:$4 sm:$0xff]   ;;  %v1371_v15 = vld [vmem:[%s1785_s1 + $0x184] ss:$8 sps:$4 sm:$0xff]   ;;  %v1374_v17 = vld [vmem:[%s1785_s1 + $0x274] ss:$8 sps:$4 sm:$0xff]  }
  0x23   : > { %724 = vmatprep.subr.bf16.mxu1 %v1293_v32  ;;  %v1369_v16 = vld [vmem:[%s1785_s1 + $0x180] ss:$8 sps:$4 sm:$0xff]   ;;  %v1372_v21 = vld [vmem:[%s1785_s1 + $0x270] ss:$8 sps:$4 sm:$0xff]   ;;  %v1377_v24 = vld [vmem:[%s1785_s1 + $0x264] ss:$8 sps:$4 sm:$0xff]  }
  0x24   : > { %v1380_v26 = vld [vmem:[%s1785_s1 + $0x254] ss:$8 sps:$4 sm:$0xff]   ;;  %v1378_v29 = vld [vmem:[%s1785_s1 + $0x250] ss:$8 sps:$4 sm:$0xff]   ;;  %v1383_v31 = vld [vmem:[%s1785_s1 + $0x244] ss:$8 sps:$4 sm:$0xff]  }
  0x25   : > { %530 = vmatpush1.bf16.msra.mxu0 %v1314_v33 }
  0x26   : > { %531 = vmatprep.subr.bf16.mxu0 %v1318_v34  ;;  %725 = vmatpush1.bf16.msra.mxu1 %v1291_v35  ;;  %v1381_v34 = vld [vmem:[%s1785_s1 + $0x240] ss:$8 sps:$4 sm:$0xff]   ;;  %v1386_v35 = vld [vmem:[%s1785_s1 + $0x234] ss:$8 sps:$4 sm:$0xff]  }
  0x27   : > { %726 = vmatprep.subr.bf16.mxu1 %v1299_v36  ;;  %v1384_v36 = vld [vmem:[%s1785_s1 + $0x230] ss:$8 sps:$4 sm:$0xff]  }
  0x29   : > { %532 = vmatpush1.bf16.msra.mxu0 %v1320_v37  ;;  %v1389_v37 = vld [vmem:[%s1785_s1 + $0x224] ss:$8 sps:$4 sm:$0xff]  }
  0x2a   : > { %533 = vmatprep.subr.bf16.mxu0 %v1324_v38  ;;  %727 = vmatpush1.bf16.msra.mxu1 %v1297_v39  ;;  %v1387_v38 = vld [vmem:[%s1785_s1 + $0x220] ss:$8 sps:$4 sm:$0xff]   ;;  %v1392_v39 = vld [vmem:[%s1785_s1 + $0x214] ss:$8 sps:$4 sm:$0xff]  }
  0x2b   : > { %728 = vmatprep.subr.bf16.mxu1 %v1305_v40  ;;  %v1390_v40 = vld [vmem:[%s1785_s1 + $0x210] ss:$8 sps:$4 sm:$0xff]  }
  0x2d   : > { %534 = vmatpush2.bf16.msra.mxu0 %v1326_v41  ;;  %v1395_v41 = vld [vmem:[%s1785_s1 + $0x204] ss:$8 sps:$4 sm:$0xff]  }
  0x2e   : > { %535 = vmatprep.subr.bf16.mxu0 %v1330_v42  ;;  %729 = vmatpush1.bf16.msra.mxu1 %v1303_v43  ;;  %v1393_v42 = vld [vmem:[%s1785_s1 + $0x200] ss:$8 sps:$4 sm:$0xff]   ;;  %v1398_v43 = vld [vmem:[%s1785_s1 + $0x2f4] ss:$8 sps:$4 sm:$0xff]  }
  0x2f   : > { %730 = vmatprep.subr.bf16.mxu1 %v1311_v44  ;;  %v1396_v44 = vld [vmem:[%s1785_s1 + $0x2f0] ss:$8 sps:$4 sm:$0xff]  }
  0x31   : > { %536 = vmatpush2.bf16.msra.mxu0 %v1332_v45  ;;  %v1401_v45 = vld [vmem:[%s1785_s1 + $0x2e4] ss:$8 sps:$4 sm:$0xff]  }
  0x32   : > { %537 = vmatprep.subr.bf16.mxu0 %v1336_v46  ;;  %731 = vmatpush1.bf16.msra.mxu1 %v1309_v47  ;;  %v1399_v46 = vld [vmem:[%s1785_s1 + $0x2e0] ss:$8 sps:$4 sm:$0xff]   ;;  %v1404_v47 = vld [vmem:[%s1785_s1 + $0x2d4] ss:$8 sps:$4 sm:$0xff]  }
  0x33   : > { %732 = vmatprep.subr.bf16.mxu1 %v1317_v48  ;;  %v1402_v48 = vld [vmem:[%s1785_s1 + $0x2d0] ss:$8 sps:$4 sm:$0xff]  }
  0x35   : > { %538 = vmatpush2.bf16.msra.mxu0 %v1338_v50  ;;  %v1405_v50 = vld [vmem:[%s1785_s1 + $0x2c0] ss:$8 sps:$4 sm:$0xff]  }
  0x36   : > { %539 = vmatprep.subr.bf16.mxu0 %v1342_v52  ;;  %733 = vmatpush1.bf16.msra.mxu1 %v1315_v49  ;;  %v1407_v49 = vld [vmem:[%s1785_s1 + $0x2c4] ss:$8 sps:$4 sm:$0xff]   ;;  %v1408_v52 = vld [vmem:[%s1785_s1 + $0x2b0] ss:$8 sps:$4 sm:$0xff]  }
  0x37   : > { %734 = vmatprep.subr.bf16.mxu1 %v1323_v51  ;;  %v1410_v51 = vld [vmem:[%s1785_s1 + $0x2b4] ss:$8 sps:$4 sm:$0xff]  }
  0x39   : > { %540 = vmatpush2.bf16.msra.mxu0 %v1344_v53  ;;  %v1413_v53 = vld [vmem:[%s1785_s1 + $0x2a4] ss:$8 sps:$4 sm:$0xff]  }
  0x3a   : > { %541 = vmatprep.subr.bf16.mxu0 %v1348_v54  ;;  %735 = vmatpush1.bf16.msra.mxu1 %v1321_v55  ;;  %v1411_v54 = vld [vmem:[%s1785_s1 + $0x2a0] ss:$8 sps:$4 sm:$0xff]   ;;  %v1416_v55 = vld [vmem:[%s1785_s1 + $0x294] ss:$8 sps:$4 sm:$0xff]  }
  0x3b   : > { %736 = vmatprep.subr.bf16.mxu1 %v1329_v56  ;;  %v1414_v56 = vld [vmem:[%s1785_s1 + $0x290] ss:$8 sps:$4 sm:$0xff]  }
  0x3d   : > { %542 = vmatpush2.bf16.msra.mxu0 %v1350_v57  ;;  %v1419_v57 = vld [vmem:[%s1785_s1 + $0x284] ss:$8 sps:$4 sm:$0xff]  }
  0x3e   : > { %543 = vmatprep.subr.bf16.mxu0 %v1354_v58  ;;  %737 = vmatpush2.bf16.msra.mxu1 %v1327_v59  ;;  %v1417_v58 = vld [vmem:[%s1785_s1 + $0x280] ss:$8 sps:$4 sm:$0xff]  }
  0x3f   : > { %738 = vmatprep.subr.bf16.mxu1 %v1335_v60 }
  0x41   : > { %544 = vmatpush2.bf16.msra.mxu0 %v1356_v61 }
  0x42   : > { %545 = vmatprep.subr.bf16.mxu0 %v1360_v62  ;;  %739 = vmatpush2.bf16.msra.mxu1 %v1333_v63 }
  0x43   : > { %740 = vmatprep.subr.bf16.mxu1 %v1341_v0 }
  0x45   : > { %546 = vmatpush2.bf16.msra.mxu0 %v1362_v1 }
  0x46   : > { %741 = vmatpush2.bf16.msra.mxu1 %v1339_v2  ;;  %547 = vmatprep.subr.bf16.mxu0 %v1366_v13 }
  0x47   : > { %742 = vmatprep.subr.bf16.mxu1 %v1347_v3 }
  0x49   : > { %548 = vmatpush2.bf16.msra.mxu0 %v1368_v14 }
  0x4a   : > { %743 = vmatpush2.bf16.msra.mxu1 %v1345_v5  ;;  %954 = vmatprep.subr.bf16.mxu0 %v1374_v17  ;;  %v1001_v5 = vsub.s32 0, %v1466_v4 }
  0x4b   : > { %744 = vmatprep.subr.bf16.mxu1 %v1353_v6  ;;  %v997_v6 = vld [vmem:[%s1786_s2] sm:$0x3] }
  0x4e   : > { %745 = vmatpush2.bf16.msra.mxu1 %v1351_v7  ;;  %v1005_v7 = vsub.s32 1, %v1466_v4 }
  0x4f   : > { %746 = vmatprep.subr.bf16.mxu1 %v1359_v8 }
  0x50   : > { %v1006_v14 = vrot.slane %v997_v6, %v1005_v7 }
  0x52   : > { %747 = vmatpush2.bf16.msra.mxu1 %v1357_v9  ;;  %v1002_v9 = vrot.slane %v997_v6, %v1001_v5 }
  0x53   : > { %748 = vmatprep.subr.bf16.mxu1 %v1365_v10 }
  0x56   : > { %749 = vmatpush2.bf16.msra.mxu1 %v1363_v12 }
  0x57   : > { %750 = vmatprep.subr.bf16.mxu1 %v1371_v15 }
  0x5a   : > { %751 = vmatpush2.bf16.msra.mxu1 %v1369_v16 }
  0x5d   : > { %753 = vmatmul.mubr.bf16.vlgmr.msra.gmra.mxu1 %v1481_v11  ;;  %v1375_v11 = vld [vmem:[%s1785_s1 + $0x260] ss:$8 sps:$4 sm:$0xff]  }
  0xd5   : > { %v237_v18 = vpop.f32.mrf.mxu1 }
  0xd6   : > { %v244_v22 = vpack.c.bf16 %v237_v18, %v237_v18 }
  0xd7   : > { %v239_v19 = vpop.f32.mrf.mxu1 }
  0xd8   : > { %v245_v20 = vpack.c.bf16 %v239_v19, %v239_v19 }
  0xd9   : > { %v241_v23 = vpop.f32.mrf.mxu1 }
  0xda   : > { %549 = vmatprep.mubr.bf16.mxu0 %v245_v20 }
  0xdb   : > { %v242_v25 = vpop.f32.mrf.mxu1  ;;  %550 = vmatmul.mubr.bf16.vlgmr.msra.gmra.mxu0 %v244_v22 }
  0xdc   : > { %955 = vmatpush1.bf16.msra.mxu0 %v1372_v21 }
  0xdd   : > { %956 = vmatprep.subr.bf16.mxu0 %v1377_v24  ;;  %v1686_v27 = vpop.f32.mrf.mxu1 }
  0xde   : > { %v290_v59 = vpack.c.bf16 %v1686_v27, %v1686_v27 }
  0xdf   : > { %v285_v28 = vpop.f32.mrf.mxu1 }
  0xe0   : > { %957 = vmatpush1.bf16.msra.mxu0 %v1375_v11  ;;  %v291_v30 = vpack.c.bf16 %v285_v28, %v285_v28 }
  0xe1   : > { %958 = vmatprep.subr.bf16.mxu0 %v1380_v26  ;;  %v287_v32 = vpop.f32.mrf.mxu1 }
  0xe2   : > { %986 = vmatprep.mubr.bf16.mxu0 %v291_v30 }
  0xe3   : > { %v288_v33 = vpop.f32.mrf.mxu1 }
  0xe4   : > { %959 = vmatpush1.bf16.msra.mxu0 %v1378_v29 }
  0xe5   : > { %960 = vmatprep.subr.bf16.mxu0 %v1383_v31 }
  0xe8   : > { %961 = vmatpush1.bf16.msra.mxu0 %v1381_v34 }
  0xe9   : > { %962 = vmatprep.subr.bf16.mxu0 %v1386_v35 }
  0xec   : > { %963 = vmatpush1.bf16.msra.mxu0 %v1384_v36 }
  0xed   : > { %964 = vmatprep.subr.bf16.mxu0 %v1389_v37 }
  0xf0   : > { %965 = vmatpush1.bf16.msra.mxu0 %v1387_v38 }
  0xf1   : > { %966 = vmatprep.subr.bf16.mxu0 %v1392_v39 }
  0xf4   : > { %967 = vmatpush1.bf16.msra.mxu0 %v1390_v40 }
  0xf5   : > { %968 = vmatprep.subr.bf16.mxu0 %v1395_v41 }
  0xf8   : > { %969 = vmatpush1.bf16.msra.mxu0 %v1393_v42 }
  0xf9   : > { %970 = vmatprep.subr.bf16.mxu0 %v1398_v43 }
  0xfc   : > { %971 = vmatpush2.bf16.msra.mxu0 %v1396_v44 }
  0xfd   : > { %972 = vmatprep.subr.bf16.mxu0 %v1401_v45 }
 0x100   : > { %973 = vmatpush2.bf16.msra.mxu0 %v1399_v46 }
 0x101   : > { %974 = vmatprep.subr.bf16.mxu0 %v1404_v47 }
 0x104   : > { %975 = vmatpush2.bf16.msra.mxu0 %v1402_v48 }
 0x105   : > { %976 = vmatprep.subr.bf16.mxu0 %v1407_v49 }
 0x108   : > { %977 = vmatpush2.bf16.msra.mxu0 %v1405_v50 }
 0x109   : > { %978 = vmatprep.subr.bf16.mxu0 %v1410_v51 }
 0x10c   : > { %979 = vmatpush2.bf16.msra.mxu0 %v1408_v52 }
 0x10d   : > { %980 = vmatprep.subr.bf16.mxu0 %v1413_v53 }
 0x110   : > { %981 = vmatpush2.bf16.msra.mxu0 %v1411_v54 }
 0x111   : > { %982 = vmatprep.subr.bf16.mxu0 %v1416_v55 }
 0x114   : > { %983 = vmatpush2.bf16.msra.mxu0 %v1414_v56 }
 0x115   : > { %984 = vmatprep.subr.bf16.mxu0 %v1419_v57 }
 0x118   : > { %985 = vmatpush2.bf16.msra.mxu0 %v1417_v58 }
 0x11b   : > { %987 = vmatmul.mubr.bf16.vlgmr.msra.gmra.mxu0 %v290_v59 }
 0x11d   : > { %v754_v60 = vpop.f32.mrf.mxu1 }
 0x11f   : > { %v756_v61 = vpop.f32.mrf.mxu1 }
 0x121   : > { %v758_v62 = vpop.f32.mrf.mxu1 }
 0x123   : > { %v759_v63 = vpop.f32.mrf.mxu1 }
 0x19b   : > { %v551_v0 = vpop.f32.mrf.mxu0 }
 0x19c   : > { %v755_v8 = vadd.f32 %v754_v60, %v551_v0 }
 0x19d   : > { %v553_v1 = vpop.f32.mrf.mxu0 }
 0x19e   : > { %v757_v12 = vadd.f32 %v756_v61, %v553_v1 }
 0x19f   : > { %v555_v2 = vpop.f32.mrf.mxu0 }
 0x1a1   : > { %v556_v3 = vpop.f32.mrf.mxu0 }
 0x1db   : > { %v988_v10 = vpop.f32.mrf.mxu0 }
 0x1dc   : > { %v995_v13 = vadd.f32 %v988_v10, %v755_v8 }
 0x1dd   : > { %v990_v15 = vpop.f32.mrf.mxu0 }
 0x1de   : > { %v1009_v16 = vadd.f32 %v1002_v9, %v995_v13  ;;  %v996_v17 = vadd.f32 %v990_v15, %v757_v12 }
 0x1df   : > { %v992_v18 = vpop.f32.mrf.mxu0 }
 0x1e0   : > { %v1013_v19 = vmul.f32 0.2, %v1009_v16  ;;  %v1010_v20 = vadd.f32 %v1006_v14, %v996_v17  ;;  %vm1011_vm4 = vcmp.ge.f32.partialorder %v1009_v16, 0.0 }
 0x1e1   : > { %v993_v21 = vpop.f32.mrf.mxu0 }
 0x1e2   : > { %vm1012_vm5 = vcmp.ge.f32.partialorder %v1010_v20, 0.0  ;;  %v1014_v22 = vmul.f32 0.2, %v1010_v20  ;;  %v1015_v4 = vsel %vm1011_vm4, %v1009_v16, %v1013_v19 }
 0x1e4   : > { %v1016_v23 = vsel %vm1012_vm5, %v1010_v20, %v1014_v22 }
 0x1e5   : > { %v1263_v24 = vpack.c.bf16 %v1016_v23, %v1015_v4 }
 0x1e7   : > { %1025 = vst [vmem:[%s170_s22] sm:$0xff] %v1263_v24 }
 0x1e8 PF: > { %s13_s12 = sadd.s32 1, %s1426_s12  }
 0x1e9   : > { %p10_p4 = scmp.ge.s32.totalorder %s13_s12, 4  }
 0x1eb   :  { %12 = sbr.rel (!%p10_p4) target bundleno = 1 (0x1), region = 64 }

// kernel: tile.68
= control target key start
LH: loop header
LB: loop body
LE: loop exit
PB: predicated region body
PF: predicated region fallthrough
CT: control target
= control target key end

     0   :  { %s22_s0 = inlined_call_operand.vmem [shape: f32[64], index: 0, kind: input, shape index: {}]   ;;  %s23_s1 = inlined_call_operand.vmem [shape: f32[8,64], index: 1, kind: output, shape index: {}]  }
   0x1   :  { %v4_v0 = vld [vmem:[%s22_s0] ss:$0 sm:$0xff] }
   0x2   :  { %5 = vst [vmem:[%s23_s1] sm:$0xff] %v4_v0 }

// kernel: tile.69
= control target key start
LH: loop header
LB: loop body
LE: loop exit
PB: predicated region body
PF: predicated region fallthrough
CT: control target
= control target key end

     0   :  { %vm3_vm0 = vcmask 523264   ;;  %s46_s8 = smov 64   ;;  %vm9_vm1 = vcmask 1048064   ;;  %s75_s0 = inlined_call_operand.vmem [shape: f32[8,64], index: 0, kind: input, shape index: {}]   ;;  %s76_s1 = inlined_call_operand.vmem [shape: f32[1,512], index: 1, kind: output, shape index: {}]  }
   0x1   :  { %v41_v0 = vld [vmem:[%s75_s0 + $0x1] ss:$2 sm:$0xf]   ;;  %v2_v1 = vld [vmem:[%s75_s0] ss:$2 sm:$0xf]  }
   0x2   :  { %7 = vrot.lane.b32.xlu0 %v41_v0, %s46_s8  ;;  %4 = vst.msk [vmem:[#allocation0] ss:$8 sm:$0xf] %vm3_vm0, %v2_v1  }
  0x74   :  { %v8_v2 = vpop.permute.xlu0 %7  }
  0x75   :  { %10 = vst.msk [vmem:[#allocation0] ss:$8 sm:$0xf] %vm9_vm1, %v8_v2  }
  0x7c   :  { %v15_v3 = vld [vmem:[#allocation0] sm:$0x1]  ;;  %v20_v4 = vld [vmem:[#allocation0 + $0x8] sm:$0x1]  ;;  %v26_v5 = vld [vmem:[#allocation0 + $0x10] sm:$0x1] }
  0x7d   :  { %18 = vst [vmem:[%s76_s1] sm:$0x1] %v15_v3  ;;  %42 = vst [vmem:[%s76_s1 + $0x1] sm:$0x1] %v20_v4  ;;  %v33_v6 = vld [vmem:[#allocation0 + $0x18] sm:$0x1] }
  0x7e   :  { %43 = vst [vmem:[%s76_s1 + $0x2] sm:$0x1] %v26_v5  ;;  %44 = vst [vmem:[%s76_s1 + $0x3] sm:$0x1] %v33_v6 }

// kernel: critic_forward.15
= control target key start
LH: loop header
LB: loop body
LE: loop exit
PB: predicated region body
PF: predicated region fallthrough
CT: control target
= control target key end

     0   :  { %s2484_s12 = smov 0   ;;  %s3111_s0 = inlined_call_operand.vmem [shape: bf16[2,8,256], index: 0, kind: input, shape index: {}]   ;;  %s3112_s1 = inlined_call_operand.vmem [shape: bf16[3,256,512], index: 1, kind: input, shape index: {}]   ;;  %s3113_s2 = inlined_call_operand.vmem [shape: f32[1,512], index: 2, kind: input, shape index: {}]   ;;  %s3114_s3 = inlined_call_operand.vmem [shape: bf16[2,8,512], index: 3, kind: output, shape index: {}]  }
   0x1 LB: > { %s1809_s13 = sadd.s32 4294967295, %s2460_s12   ;;  %p1813_p0 = scmp.ge.s32.totalorder %s2460_s12, 1  ;;  %s2460_s12 = sphi %s2484_s12, %s13_s12  }
   0x2   : > { %p137_p1 = scmp.lt.s32.totalorder %s2460_s12, 3 }
   0x4   : > { %p138_p2 = pnand %p1813_p0, %p137_p1 }
   0x5   : > { %p161_p3 = scmp.lt.s32.totalorder (!%p138_p2), %s1809_s13, 1 }
   0x6   : > { %141 = sbr.rel (%p138_p2) target bundleno = 552 (0x228), region = 32 }
   0xb   : > { %v173_v0 = vlaneseq  ;;  %v2462_v1 = vmov 0   ;;  %s3116_s13 = smov (!%p161_p3, %s1809_s13), 1  ;;  %vm196_vm0 = vcmask 1043456   ;;  %v2168_v7 = vld [vmem:[%s3112_s1 + $0xe4] ss:$16 sps:$4 sm:$0xff]   ;;  %v2463_v10 = vmov 0.0  }
   0xc   : > { %235 = vmatprep.mubr.bf16.mxu0 %v2462_v1  ;;  %281 = vmatprep.mubr.bf16.mxu1 %v2462_v1  ;;  %s2150_s14 = sshll.u32 %s3116_s13, 3  ;;  %v2171_v13 = vld [vmem:[%s3112_s1 + $0xec] ss:$16 sps:$4 sm:$0xff]   ;;  %vm192_vm3 = vcmask 64512   ;;  %v2166_v17 = vld [vmem:[%s3112_s1 + $0xe0] ss:$16 sps:$4 sm:$0xff]  }
   0xd   : > { %v2494_v2 = vshrl.u32 %v173_v0, 7  ;;  %v176_v3 = vand.u32 127, %v173_v0  ;;  %s165_s17 = scalar_lea.vmem %s3111_s0, %s2150_s14  ;;  %v2169_v18 = vld [vmem:[%s3112_s1 + $0xe8] ss:$16 sps:$4 sm:$0xff]   ;;  %v2174_v19 = vld [vmem:[%s3112_s1 + $0xc4] ss:$16 sps:$4 sm:$0xff]  }
   0xe   : > { %v172_v6 = vld [vmem:[%s165_s17] sm:$0xff]  ;;  %v2177_v20 = vld [vmem:[%s3112_s1 + $0xcc] ss:$16 sps:$4 sm:$0xff]   ;;  %v2175_v22 = vld [vmem:[%s3112_s1 + $0xc8] ss:$16 sps:$4 sm:$0xff]   ;;  %s2151_s29 = sshll.u32 %s3116_s13, 4 }
   0xf   : > { %v177_v4 = vadd.s32 1, %v176_v3  ;;  %v182_v5 = vadd.s32 1, %v2494_v2  ;;  %v2505_v8 = vcombine.high %v172_v6, %v172_v6  ;;  %v2507_v9 = vcombine.low %v172_v6, %v172_v6  ;;  %v2172_v21 = vld [vmem:[%s3112_s1 + $0xc0] ss:$16 sps:$4 sm:$0xff]   ;;  %v2180_v23 = vld [vmem:[%s3112_s1 + $0xa4] ss:$16 sps:$4 sm:$0xff]   ;;  %s170_s5 = scalar_lea.vmem %s3114_s3, %s2151_s29 }
  0x10   : > { %v2183_v24 = vld [vmem:[%s3112_s1 + $0xac] ss:$16 sps:$4 sm:$0xff]   ;;  %v2178_v25 = vld [vmem:[%s3112_s1 + $0xa0] ss:$16 sps:$4 sm:$0xff]   ;;  %v2181_v26 = vld [vmem:[%s3112_s1 + $0xa8] ss:$16 sps:$4 sm:$0xff]  }
  0x11   : > { %vm178_vm1 = vcmp.eq.s32.totalorder %v2494_v2, %v177_v4  ;;  %vm183_vm2 = vcmp.eq.s32.totalorder %v176_v3, %v182_v5  ;;  %1822 = vmatprep.subr.msk.bf16.mxu0 %vm196_vm0, %v2505_v8  ;;  %v198_v14 = vsel %vm196_vm0, %v2507_v9, 0  ;;  %1824 = vmatprep.subr.msk.bf16.mxu1 %vm196_vm0, %v2505_v8  ;;  %v2186_v27 = vld [vmem:[%s3112_s1 + $0x84] ss:$16 sps:$4 sm:$0xff]   ;;  %v2189_v28 = vld [vmem:[%s3112_s1 + $0x8c] ss:$16 sps:$4 sm:$0xff]  }
  0x12   : > { %v1818_v11 = vsel %vm178_vm1, 1.0, %v2463_v10  ;;  %v1819_v12 = vsel %vm183_vm2, 1.0, %v2463_v10  ;;  %218 = vmatpush1.bf16.msra.mxu0 %v198_v14  ;;  %264 = vmatpush1.bf16.msra.mxu1 %v198_v14  ;;  %v2184_v29 = vld [vmem:[%s3112_s1 + $0x80] ss:$16 sps:$4 sm:$0xff]   ;;  %v2187_v30 = vld [vmem:[%s3112_s1 + $0x88] ss:$16 sps:$4 sm:$0xff]  }
  0x13   : > { %v181_v15 = vpack.c.bf16 %v1818_v11, %v1818_v11  ;;  %v186_v16 = vpack.c.bf16 %v1819_v12, %v1819_v12  ;;  %741 = vmatprep.subr.bf16.mxu0 %v2168_v7  ;;  %782 = vmatprep.subr.bf16.mxu1 %v2171_v13  ;;  %v2192_v31 = vld [vmem:[%s3112_s1 + $0x64] ss:$16 sps:$4 sm:$0xff]   ;;  %v2195_v32 = vld [vmem:[%s3112_s1 + $0x6c] ss:$16 sps:$4 sm:$0xff]   ;;  %v2190_v33 = vld [vmem:[%s3112_s1 + $0x60] ss:$16 sps:$4 sm:$0xff]  }
  0x14   : > { %v2193_v34 = vld [vmem:[%s3112_s1 + $0x68] ss:$16 sps:$4 sm:$0xff]   ;;  %v2198_v35 = vld [vmem:[%s3112_s1 + $0x44] ss:$16 sps:$4 sm:$0xff]   ;;  %v2201_v36 = vld [vmem:[%s3112_s1 + $0x4c] ss:$16 sps:$4 sm:$0xff]  }
  0x15   : > { %1823 = vmatmul.mubr.msk.bf16.vlgmr.msra.gmra.mxu0 %vm192_vm3, %v181_v15  ;;  %1825 = vmatmul.mubr.msk.bf16.vlgmr.msra.gmra.mxu1 %vm192_vm3, %v186_v16  ;;  %v2196_v37 = vld [vmem:[%s3112_s1 + $0x40] ss:$16 sps:$4 sm:$0xff]   ;;  %v2199_v38 = vld [vmem:[%s3112_s1 + $0x48] ss:$16 sps:$4 sm:$0xff]   ;;  %v2204_v39 = vld [vmem:[%s3112_s1 + $0x24] ss:$16 sps:$4 sm:$0xff]  }
  0x16   : > { %742 = vmatpush1.bf16.msra.mxu0 %v2166_v17  ;;  %783 = vmatpush1.bf16.msra.mxu1 %v2169_v18  ;;  %v2207_v40 = vld [vmem:[%s3112_s1 + $0x2c] ss:$16 sps:$4 sm:$0xff]   ;;  %v2202_v41 = vld [vmem:[%s3112_s1 + $0x20] ss:$16 sps:$4 sm:$0xff]   ;;  %v2205_v42 = vld [vmem:[%s3112_s1 + $0x28] ss:$16 sps:$4 sm:$0xff]  }
  0x17   : > { %743 = vmatprep.subr.bf16.mxu0 %v2174_v19  ;;  %784 = vmatprep.subr.bf16.mxu1 %v2177_v20  ;;  %v2210_v43 = vld [vmem:[%s3112_s1 + $0x4] ss:$16 sps:$4 sm:$0xff]   ;;  %v2213_v44 = vld [vmem:[%s3112_s1 + $0xc] ss:$16 sps:$4 sm:$0xff]   ;;  %v2208_v45 = vld [vmem:[%s3112_s1] ss:$16 sps:$4 sm:$0xff]  }
  0x18   : > { %v2211_v46 = vld [vmem:[%s3112_s1 + $0x8] ss:$16 sps:$4 sm:$0xff]   ;;  %v2216_v47 = vld [vmem:[%s3112_s1 + $0x1e4] ss:$16 sps:$4 sm:$0xff]   ;;  %v2219_v48 = vld [vmem:[%s3112_s1 + $0x1ec] ss:$16 sps:$4 sm:$0xff]  }
  0x19   : > { %v2214_v49 = vld [vmem:[%s3112_s1 + $0x1e0] ss:$16 sps:$4 sm:$0xff]   ;;  %v2217_v50 = vld [vmem:[%s3112_s1 + $0x1e8] ss:$16 sps:$4 sm:$0xff]   ;;  %v2222_v51 = vld [vmem:[%s3112_s1 + $0x1c4] ss:$16 sps:$4 sm:$0xff]  }
  0x1a   : > { %744 = vmatpush1.bf16.msra.mxu0 %v2172_v21  ;;  %785 = vmatpush1.bf16.msra.mxu1 %v2175_v22  ;;  %v2225_v52 = vld [vmem:[%s3112_s1 + $0x1cc] ss:$16 sps:$4 sm:$0xff]   ;;  %v2220_v53 = vld [vmem:[%s3112_s1 + $0x1c0] ss:$16 sps:$4 sm:$0xff]   ;;  %v2223_v54 = vld [vmem:[%s3112_s1 + $0x1c8] ss:$16 sps:$4 sm:$0xff]  }
  0x1b   : > { %745 = vmatprep.subr.bf16.mxu0 %v2180_v23  ;;  %786 = vmatprep.subr.bf16.mxu1 %v2183_v24  ;;  %v2228_v55 = vld [vmem:[%s3112_s1 + $0x1a4] ss:$16 sps:$4 sm:$0xff]   ;;  %v2231_v56 = vld [vmem:[%s3112_s1 + $0x1ac] ss:$16 sps:$4 sm:$0xff]   ;;  %v2226_v57 = vld [vmem:[%s3112_s1 + $0x1a0] ss:$16 sps:$4 sm:$0xff]  }
  0x1c   : > { %v2229_v58 = vld [vmem:[%s3112_s1 + $0x1a8] ss:$16 sps:$4 sm:$0xff]   ;;  %v2234_v59 = vld [vmem:[%s3112_s1 + $0x184] ss:$16 sps:$4 sm:$0xff]   ;;  %v2237_v60 = vld [vmem:[%s3112_s1 + $0x18c] ss:$16 sps:$4 sm:$0xff]  }
  0x1d   : > { %v2232_v61 = vld [vmem:[%s3112_s1 + $0x180] ss:$16 sps:$4 sm:$0xff]   ;;  %v2235_v62 = vld [vmem:[%s3112_s1 + $0x188] ss:$16 sps:$4 sm:$0xff]   ;;  %v2240_v63 = vld [vmem:[%s3112_s1 + $0x164] ss:$16 sps:$4 sm:$0xff]  }
  0x1e   : > { %746 = vmatpush1.bf16.msra.mxu0 %v2178_v25  ;;  %787 = vmatpush1.bf16.msra.mxu1 %v2181_v26  ;;  %v2243_v0 = vld [vmem:[%s3112_s1 + $0x16c] ss:$16 sps:$4 sm:$0xff]   ;;  %v2238_v1 = vld [vmem:[%s3112_s1 + $0x160] ss:$16 sps:$4 sm:$0xff]   ;;  %v2241_v3 = vld [vmem:[%s3112_s1 + $0x168] ss:$16 sps:$4 sm:$0xff]  }
  0x1f   : > { %747 = vmatprep.subr.bf16.mxu0 %v2186_v27  ;;  %788 = vmatprep.subr.bf16.mxu1 %v2189_v28  ;;  %v2246_v4 = vld [vmem:[%s3112_s1 + $0x144] ss:$16 sps:$4 sm:$0xff]   ;;  %v2249_v5 = vld [vmem:[%s3112_s1 + $0x14c] ss:$16 sps:$4 sm:$0xff]   ;;  %v2244_v6 = vld [vmem:[%s3112_s1 + $0x140] ss:$16 sps:$4 sm:$0xff]  }
  0x20   : > { %v2247_v7 = vld [vmem:[%s3112_s1 + $0x148] ss:$16 sps:$4 sm:$0xff]   ;;  %v2252_v10 = vld [vmem:[%s3112_s1 + $0x124] ss:$16 sps:$4 sm:$0xff]   ;;  %v2255_v11 = vld [vmem:[%s3112_s1 + $0x12c] ss:$16 sps:$4 sm:$0xff]  }
  0x21   : > { %v2250_v12 = vld [vmem:[%s3112_s1 + $0x120] ss:$16 sps:$4 sm:$0xff]   ;;  %v2253_v13 = vld [vmem:[%s3112_s1 + $0x128] ss:$16 sps:$4 sm:$0xff]   ;;  %v2258_v14 = vld [vmem:[%s3112_s1 + $0x104] ss:$16 sps:$4 sm:$0xff]  }
  0x22   : > { %748 = vmatpush1.bf16.msra.mxu0 %v2184_v29  ;;  %789 = vmatpush1.bf16.msra.mxu1 %v2187_v30  ;;  %v2261_v15 = vld [vmem:[%s3112_s1 + $0x10c] ss:$16 sps:$4 sm:$0xff]   ;;  %v2256_v16 = vld [vmem:[%s3112_s1 + $0x100] ss:$16 sps:$4 sm:$0xff]   ;;  %v2259_v17 = vld [vmem:[%s3112_s1 + $0x108] ss:$16 sps:$4 sm:$0xff]  }
  0x23   : > { %749 = vmatprep.subr.bf16.mxu0 %v2192_v31  ;;  %790 = vmatprep.subr.bf16.mxu1 %v2195_v32  ;;  %v2264_v18 = vld [vmem:[%s3112_s1 + $0x2e4] ss:$16 sps:$4 sm:$0xff]   ;;  %v2267_v19 = vld [vmem:[%s3112_s1 + $0x2ec] ss:$16 sps:$4 sm:$0xff]   ;;  %v2262_v25 = vld [vmem:[%s3112_s1 + $0x2e0] ss:$16 sps:$4 sm:$0xff]  }
  0x24   : > { %v2265_v26 = vld [vmem:[%s3112_s1 + $0x2e8] ss:$16 sps:$4 sm:$0xff]   ;;  %v2270_v29 = vld [vmem:[%s3112_s1 + $0x2c4] ss:$16 sps:$4 sm:$0xff]   ;;  %v2273_v30 = vld [vmem:[%s3112_s1 + $0x2cc] ss:$16 sps:$4 sm:$0xff]  }
  0x26   : > { %750 = vmatpush1.bf16.msra.mxu0 %v2190_v33  ;;  %791 = vmatpush1.bf16.msra.mxu1 %v2193_v34  ;;  %v2268_v34 = vld [vmem:[%s3112_s1 + $0x2c0] ss:$16 sps:$4 sm:$0xff]  }
  0x27   : > { %751 = vmatprep.subr.bf16.mxu0 %v2198_v35  ;;  %792 = vmatprep.subr.bf16.mxu1 %v2201_v36  ;;  %v2271_v35 = vld [vmem:[%s3112_s1 + $0x2c8] ss:$16 sps:$4 sm:$0xff]   ;;  %v2276_v36 = vld [vmem:[%s3112_s1 + $0x2a4] ss:$16 sps:$4 sm:$0xff]  }
  0x2a   : > { %752 = vmatpush1.bf16.msra.mxu0 %v2196_v37  ;;  %793 = vmatpush1.bf16.msra.mxu1 %v2199_v38  ;;  %v2279_v37 = vld [vmem:[%s3112_s1 + $0x2ac] ss:$16 sps:$4 sm:$0xff]   ;;  %v2274_v38 = vld [vmem:[%s3112_s1 + $0x2a0] ss:$16 sps:$4 sm:$0xff]  }
  0x2b   : > { %753 = vmatprep.subr.bf16.mxu0 %v2204_v39  ;;  %794 = vmatprep.subr.bf16.mxu1 %v2207_v40  ;;  %v2277_v39 = vld [vmem:[%s3112_s1 + $0x2a8] ss:$16 sps:$4 sm:$0xff]   ;;  %v2282_v40 = vld [vmem:[%s3112_s1 + $0x284] ss:$16 sps:$4 sm:$0xff]  }
  0x2e   : > { %754 = vmatpush1.bf16.msra.mxu0 %v2202_v41  ;;  %795 = vmatpush1.bf16.msra.mxu1 %v2205_v42  ;;  %v2280_v41 = vld [vmem:[%s3112_s1 + $0x280] ss:$16 sps:$4 sm:$0xff]   ;;  %v2283_v42 = vld [vmem:[%s3112_s1 + $0x288] ss:$16 sps:$4 sm:$0xff]  }
  0x2f   : > { %755 = vmatprep.subr.bf16.mxu0 %v2210_v43  ;;  %796 = vmatprep.subr.bf16.mxu1 %v2213_v44  ;;  %v2288_v43 = vld [vmem:[%s3112_s1 + $0x264] ss:$16 sps:$4 sm:$0xff]   ;;  %v2291_v44 = vld [vmem:[%s3112_s1 + $0x26c] ss:$16 sps:$4 sm:$0xff]  }
  0x32   : > { %756 = vmatpush1.bf16.msra.mxu0 %v2208_v45  ;;  %797 = vmatpush1.bf16.msra.mxu1 %v2211_v46  ;;  %v2286_v45 = vld [vmem:[%s3112_s1 + $0x260] ss:$16 sps:$4 sm:$0xff]   ;;  %v2289_v46 = vld [vmem:[%s3112_s1 + $0x268] ss:$16 sps:$4 sm:$0xff]  }
  0x33   : > { %757 = vmatprep.subr.bf16.mxu0 %v2216_v47  ;;  %798 = vmatprep.subr.bf16.mxu1 %v2219_v48  ;;  %v2294_v47 = vld [vmem:[%s3112_s1 + $0x244] ss:$16 sps:$4 sm:$0xff]   ;;  %v2297_v48 = vld [vmem:[%s3112_s1 + $0x24c] ss:$16 sps:$4 sm:$0xff]  }
  0x36   : > { %758 = vmatpush2.bf16.msra.mxu0 %v2214_v49  ;;  %799 = vmatpush2.bf16.msra.mxu1 %v2217_v50  ;;  %v2292_v49 = vld [vmem:[%s3112_s1 + $0x240] ss:$16 sps:$4 sm:$0xff]   ;;  %v2295_v50 = vld [vmem:[%s3112_s1 + $0x248] ss:$16 sps:$4 sm:$0xff]  }
  0x37   : > { %759 = vmatprep.subr.bf16.mxu0 %v2222_v51  ;;  %800 = vmatprep.subr.bf16.mxu1 %v2225_v52  ;;  %v2300_v51 = vld [vmem:[%s3112_s1 + $0x224] ss:$16 sps:$4 sm:$0xff]   ;;  %v2303_v52 = vld [vmem:[%s3112_s1 + $0x22c] ss:$16 sps:$4 sm:$0xff]  }
  0x3a   : > { %760 = vmatpush2.bf16.msra.mxu0 %v2220_v53  ;;  %801 = vmatpush2.bf16.msra.mxu1 %v2223_v54  ;;  %v2298_v53 = vld [vmem:[%s3112_s1 + $0x220] ss:$16 sps:$4 sm:$0xff]   ;;  %v2301_v54 = vld [vmem:[%s3112_s1 + $0x228] ss:$16 sps:$4 sm:$0xff]  }
  0x3b   : > { %761 = vmatprep.subr.bf16.mxu0 %v2228_v55  ;;  %802 = vmatprep.subr.bf16.mxu1 %v2231_v56  ;;  %v2306_v55 = vld [vmem:[%s3112_s1 + $0x204] ss:$16 sps:$4 sm:$0xff]   ;;  %v2309_v56 = vld [vmem:[%s3112_s1 + $0x20c] ss:$16 sps:$4 sm:$0xff]  }
  0x3e   : > { %762 = vmatpush2.bf16.msra.mxu0 %v2226_v57  ;;  %803 = vmatpush2.bf16.msra.mxu1 %v2229_v58  ;;  %v2304_v57 = vld [vmem:[%s3112_s1 + $0x200] ss:$16 sps:$4 sm:$0xff]   ;;  %v2307_v58 = vld [vmem:[%s3112_s1 + $0x208] ss:$16 sps:$4 sm:$0xff]  }
  0x3f   : > { %763 = vmatprep.subr.bf16.mxu0 %v2234_v59  ;;  %804 = vmatprep.subr.bf16.mxu1 %v2237_v60  ;;  %v2312_v59 = vld [vmem:[%s3112_s1 + $0x3e4] ss:$16 sps:$4 sm:$0xff]   ;;  %v2315_v60 = vld [vmem:[%s3112_s1 + $0x3ec] ss:$16 sps:$4 sm:$0xff]  }
  0x42   : > { %764 = vmatpush2.bf16.msra.mxu0 %v2232_v61  ;;  %805 = vmatpush2.bf16.msra.mxu1 %v2235_v62  ;;  %v2310_v61 = vld [vmem:[%s3112_s1 + $0x3e0] ss:$16 sps:$4 sm:$0xff]   ;;  %v2313_v62 = vld [vmem:[%s3112_s1 + $0x3e8] ss:$16 sps:$4 sm:$0xff]  }
  0x43   : > { %765 = vmatprep.subr.bf16.mxu0 %v2240_v63  ;;  %806 = vmatprep.subr.bf16.mxu1 %v2243_v0  ;;  %v2318_v63 = vld [vmem:[%s3112_s1 + $0x3c4] ss:$16 sps:$4 sm:$0xff]   ;;  %v2321_v0 = vld [vmem:[%s3112_s1 + $0x3cc] ss:$16 sps:$4 sm:$0xff]  }
  0x46   : > { %766 = vmatpush2.bf16.msra.mxu0 %v2238_v1  ;;  %807 = vmatpush2.bf16.msra.mxu1 %v2241_v3  ;;  %v2316_v1 = vld [vmem:[%s3112_s1 + $0x3c0] ss:$16 sps:$4 sm:$0xff]   ;;  %v2319_v3 = vld [vmem:[%s3112_s1 + $0x3c8] ss:$16 sps:$4 sm:$0xff]  }
  0x47   : > { %767 = vmatprep.subr.bf16.mxu0 %v2246_v4  ;;  %808 = vmatprep.subr.bf16.mxu1 %v2249_v5  ;;  %v2324_v4 = vld [vmem:[%s3112_s1 + $0x3a4] ss:$16 sps:$4 sm:$0xff]   ;;  %v2327_v5 = vld [vmem:[%s3112_s1 + $0x3ac] ss:$16 sps:$4 sm:$0xff]  }
  0x4a   : > { %768 = vmatpush2.bf16.msra.mxu0 %v2244_v6  ;;  %809 = vmatpush2.bf16.msra.mxu1 %v2247_v7  ;;  %v2322_v6 = vld [vmem:[%s3112_s1 + $0x3a0] ss:$16 sps:$4 sm:$0xff]   ;;  %v2325_v7 = vld [vmem:[%s3112_s1 + $0x3a8] ss:$16 sps:$4 sm:$0xff]  }
  0x4b   : > { %769 = vmatprep.subr.bf16.mxu0 %v2252_v10  ;;  %810 = vmatprep.subr.bf16.mxu1 %v2255_v11  ;;  %v2330_v10 = vld [vmem:[%s3112_s1 + $0x384] ss:$16 sps:$4 sm:$0xff]   ;;  %v2333_v11 = vld [vmem:[%s3112_s1 + $0x38c] ss:$16 sps:$4 sm:$0xff]  }
  0x4e   : > { %770 = vmatpush2.bf16.msra.mxu0 %v2250_v12  ;;  %811 = vmatpush2.bf16.msra.mxu1 %v2253_v13  ;;  %v2328_v12 = vld [vmem:[%s3112_s1 + $0x380] ss:$16 sps:$4 sm:$0xff]   ;;  %v2331_v13 = vld [vmem:[%s3112_s1 + $0x388] ss:$16 sps:$4 sm:$0xff]  }
  0x4f   : > { %771 = vmatprep.subr.bf16.mxu0 %v2258_v14  ;;  %812 = vmatprep.subr.bf16.mxu1 %v2261_v15  ;;  %v2336_v14 = vld [vmem:[%s3112_s1 + $0x364] ss:$16 sps:$4 sm:$0xff]   ;;  %v2339_v15 = vld [vmem:[%s3112_s1 + $0x36c] ss:$16 sps:$4 sm:$0xff]  }
  0x52   : > { %772 = vmatpush2.bf16.msra.mxu0 %v2256_v16  ;;  %813 = vmatpush2.bf16.msra.mxu1 %v2259_v17  ;;  %v2334_v16 = vld [vmem:[%s3112_s1 + $0x360] ss:$16 sps:$4 sm:$0xff]   ;;  %v2337_v17 = vld [vmem:[%s3112_s1 + $0x368] ss:$16 sps:$4 sm:$0xff]  }
  0x53   : > { %1145 = vmatprep.subr.bf16.mxu0 %v2264_v18  ;;  %1186 = vmatprep.subr.bf16.mxu1 %v2267_v19  ;;  %v2342_v18 = vld [vmem:[%s3112_s1 + $0x344] ss:$16 sps:$4 sm:$0xff]   ;;  %v2345_v19 = vld [vmem:[%s3112_s1 + $0x34c] ss:$16 sps:$4 sm:$0xff]  }
  0xd5   : > { %v237_v20 = vpop.f32.mrf.mxu0  ;;  %v2707_v21 = vpop.f32.mrf.mxu1 }
  0xd6   : > { %v244_v27 = vpack.c.bf16 %v237_v20, %v237_v20  ;;  %v2340_v20 = vld [vmem:[%s3112_s1 + $0x340] ss:$16 sps:$4 sm:$0xff]  }
  0xd7   : > { %v239_v22 = vpop.f32.mrf.mxu0  ;;  %v2709_v23 = vpop.f32.mrf.mxu1 }
  0xd8   : > { %v245_v24 = vpack.c.bf16 %v239_v22, %v239_v22  ;;  %v2343_v22 = vld [vmem:[%s3112_s1 + $0x348] ss:$16 sps:$4 sm:$0xff]  }
  0xd9   : > { %v241_v28 = vpop.f32.mrf.mxu0  ;;  %v287_v31 = vpop.f32.mrf.mxu1 }
  0xda   : > { %773 = vmatprep.mubr.bf16.mxu0 %v245_v24  ;;  %814 = vmatprep.mubr.bf16.mxu1 %v245_v24  ;;  %v2348_v24 = vld [vmem:[%s3112_s1 + $0x324] ss:$16 sps:$4 sm:$0xff]   ;;  %v2355_v31 = vld [vmem:[%s3112_s1 + $0x308] ss:$16 sps:$4 sm:$0xff]  }
  0xdb   : > { %v242_v32 = vpop.f32.mrf.mxu0  ;;  %774 = vmatmul.mubr.bf16.vlgmr.msra.gmra.mxu0 %v244_v27  ;;  %815 = vmatmul.mubr.bf16.vlgmr.msra.gmra.mxu1 %v244_v27  ;;  %v288_v33 = vpop.f32.mrf.mxu1  ;;  %v2349_v27 = vld [vmem:[%s3112_s1 + $0x328] ss:$16 sps:$4 sm:$0xff]   ;;  %v2354_v28 = vld [vmem:[%s3112_s1 + $0x304] ss:$16 sps:$4 sm:$0xff]  }
  0xdc   : > { %1146 = vmatpush1.bf16.msra.mxu0 %v2262_v25  ;;  %1187 = vmatpush1.bf16.msra.mxu1 %v2265_v26  ;;  %v2351_v25 = vld [vmem:[%s3112_s1 + $0x32c] ss:$16 sps:$4 sm:$0xff]   ;;  %v2346_v26 = vld [vmem:[%s3112_s1 + $0x320] ss:$16 sps:$4 sm:$0xff]   ;;  %v2360_v32 = vld [vmem:[%s3112_s1 + $0x4e4] ss:$16 sps:$4 sm:$0xff]  }
  0xdd   : > { %1147 = vmatprep.subr.bf16.mxu0 %v2270_v29  ;;  %1188 = vmatprep.subr.bf16.mxu1 %v2273_v30  ;;  %v2357_v29 = vld [vmem:[%s3112_s1 + $0x30c] ss:$16 sps:$4 sm:$0xff]   ;;  %v2352_v30 = vld [vmem:[%s3112_s1 + $0x300] ss:$16 sps:$4 sm:$0xff]  }
  0xde   : > { %1177 = vmatprep.mubr.bf16.mxu0 %v2505_v8  ;;  %1218 = vmatprep.mubr.bf16.mxu1 %v2505_v8  ;;  %v2285_v8 = vld [vmem:[%s3112_s1 + $0x28c] ss:$16 sps:$4 sm:$0xff]  }
  0xdf   : > { %v2363_v33 = vld [vmem:[%s3112_s1 + $0x4ec] ss:$16 sps:$4 sm:$0xff]  }
  0xe0   : > { %1148 = vmatpush1.bf16.msra.mxu0 %v2268_v34  ;;  %1189 = vmatpush1.bf16.msra.mxu1 %v2271_v35  ;;  %v2358_v34 = vld [vmem:[%s3112_s1 + $0x4e0] ss:$16 sps:$4 sm:$0xff]   ;;  %v2361_v35 = vld [vmem:[%s3112_s1 + $0x4e8] ss:$16 sps:$4 sm:$0xff]  }
  0xe1   : > { %1149 = vmatprep.subr.bf16.mxu0 %v2276_v36  ;;  %1190 = vmatprep.subr.bf16.mxu1 %v2279_v37  ;;  %v2366_v36 = vld [vmem:[%s3112_s1 + $0x4c4] ss:$16 sps:$4 sm:$0xff]   ;;  %v2369_v37 = vld [vmem:[%s3112_s1 + $0x4cc] ss:$16 sps:$4 sm:$0xff]  }
  0xe4   : > { %1150 = vmatpush1.bf16.msra.mxu0 %v2274_v38  ;;  %1191 = vmatpush1.bf16.msra.mxu1 %v2277_v39  ;;  %v291_v38 = vpack.c.bf16 %v2709_v23, %v2709_v23  ;;  %v2364_v39 = vld [vmem:[%s3112_s1 + $0x4c0] ss:$16 sps:$4 sm:$0xff]   ;;  %v2372_v23 = vld [vmem:[%s3112_s1 + $0x4a4] ss:$16 sps:$4 sm:$0xff]  }
  0xe5   : > { %1151 = vmatprep.subr.bf16.mxu0 %v2282_v40  ;;  %1192 = vmatprep.subr.bf16.mxu1 %v2285_v8  ;;  %v2367_v40 = vld [vmem:[%s3112_s1 + $0x4c8] ss:$16 sps:$4 sm:$0xff]   ;;  %v2370_v8 = vld [vmem:[%s3112_s1 + $0x4a0] ss:$16 sps:$4 sm:$0xff]  }
  0xe8   : > { %1152 = vmatpush1.bf16.msra.mxu0 %v2280_v41  ;;  %1193 = vmatpush1.bf16.msra.mxu1 %v2283_v42  ;;  %v2373_v41 = vld [vmem:[%s3112_s1 + $0x4a8] ss:$16 sps:$4 sm:$0xff]   ;;  %v2378_v42 = vld [vmem:[%s3112_s1 + $0x484] ss:$16 sps:$4 sm:$0xff]  }
  0xe9   : > { %1153 = vmatprep.subr.bf16.mxu0 %v2288_v43  ;;  %1194 = vmatprep.subr.bf16.mxu1 %v2291_v44  ;;  %v2381_v43 = vld [vmem:[%s3112_s1 + $0x48c] ss:$16 sps:$4 sm:$0xff]   ;;  %v2376_v44 = vld [vmem:[%s3112_s1 + $0x480] ss:$16 sps:$4 sm:$0xff]  }
  0xec   : > { %1154 = vmatpush1.bf16.msra.mxu0 %v2286_v45  ;;  %1195 = vmatpush1.bf16.msra.mxu1 %v2289_v46  ;;  %v2379_v45 = vld [vmem:[%s3112_s1 + $0x488] ss:$16 sps:$4 sm:$0xff]   ;;  %v2384_v46 = vld [vmem:[%s3112_s1 + $0x464] ss:$16 sps:$4 sm:$0xff]  }
  0xed   : > { %1155 = vmatprep.subr.bf16.mxu0 %v2294_v47  ;;  %1196 = vmatprep.subr.bf16.mxu1 %v2297_v48  ;;  %v2387_v47 = vld [vmem:[%s3112_s1 + $0x46c] ss:$16 sps:$4 sm:$0xff]   ;;  %v2382_v48 = vld [vmem:[%s3112_s1 + $0x460] ss:$16 sps:$4 sm:$0xff]  }
  0xf0   : > { %1156 = vmatpush1.bf16.msra.mxu0 %v2292_v49  ;;  %1197 = vmatpush1.bf16.msra.mxu1 %v2295_v50  ;;  %v2385_v49 = vld [vmem:[%s3112_s1 + $0x468] ss:$16 sps:$4 sm:$0xff]   ;;  %v2390_v50 = vld [vmem:[%s3112_s1 + $0x444] ss:$16 sps:$4 sm:$0xff]  }
  0xf1   : > { %1157 = vmatprep.subr.bf16.mxu0 %v2300_v51  ;;  %1198 = vmatprep.subr.bf16.mxu1 %v2303_v52  ;;  %v2393_v51 = vld [vmem:[%s3112_s1 + $0x44c] ss:$16 sps:$4 sm:$0xff]   ;;  %v2388_v52 = vld [vmem:[%s3112_s1 + $0x440] ss:$16 sps:$4 sm:$0xff]  }
  0xf4   : > { %1158 = vmatpush1.bf16.msra.mxu0 %v2298_v53  ;;  %1199 = vmatpush1.bf16.msra.mxu1 %v2301_v54  ;;  %v2391_v53 = vld [vmem:[%s3112_s1 + $0x448] ss:$16 sps:$4 sm:$0xff]   ;;  %v2396_v54 = vld [vmem:[%s3112_s1 + $0x424] ss:$16 sps:$4 sm:$0xff]  }
  0xf5   : > { %1159 = vmatprep.subr.bf16.mxu0 %v2306_v55  ;;  %1200 = vmatprep.subr.bf16.mxu1 %v2309_v56  ;;  %v2399_v55 = vld [vmem:[%s3112_s1 + $0x42c] ss:$16 sps:$4 sm:$0xff]   ;;  %v2394_v56 = vld [vmem:[%s3112_s1 + $0x420] ss:$16 sps:$4 sm:$0xff]  }
  0xf8   : > { %1160 = vmatpush1.bf16.msra.mxu0 %v2304_v57  ;;  %1201 = vmatpush1.bf16.msra.mxu1 %v2307_v58  ;;  %v2397_v57 = vld [vmem:[%s3112_s1 + $0x428] ss:$16 sps:$4 sm:$0xff]   ;;  %v2402_v58 = vld [vmem:[%s3112_s1 + $0x404] ss:$16 sps:$4 sm:$0xff]  }
  0xf9   : > { %1161 = vmatprep.subr.bf16.mxu0 %v2312_v59  ;;  %1202 = vmatprep.subr.bf16.mxu1 %v2315_v60  ;;  %v2405_v59 = vld [vmem:[%s3112_s1 + $0x40c] ss:$16 sps:$4 sm:$0xff]   ;;  %v2400_v60 = vld [vmem:[%s3112_s1 + $0x400] ss:$16 sps:$4 sm:$0xff]  }
  0xfc   : > { %1162 = vmatpush2.bf16.msra.mxu0 %v2310_v61  ;;  %1203 = vmatpush2.bf16.msra.mxu1 %v2313_v62  ;;  %v2403_v61 = vld [vmem:[%s3112_s1 + $0x408] ss:$16 sps:$4 sm:$0xff]   ;;  %v2408_v62 = vld [vmem:[%s3112_s1 + $0x5e4] ss:$16 sps:$4 sm:$0xff]  }
  0xfd   : > { %1163 = vmatprep.subr.bf16.mxu0 %v2318_v63  ;;  %1204 = vmatprep.subr.bf16.mxu1 %v2321_v0  ;;  %v2411_v63 = vld [vmem:[%s3112_s1 + $0x5ec] ss:$16 sps:$4 sm:$0xff]   ;;  %v2406_v0 = vld [vmem:[%s3112_s1 + $0x5e0] ss:$16 sps:$4 sm:$0xff]  }
 0x100   : > { %1164 = vmatpush2.bf16.msra.mxu0 %v2316_v1  ;;  %1205 = vmatpush2.bf16.msra.mxu1 %v2319_v3  ;;  %v2409_v1 = vld [vmem:[%s3112_s1 + $0x5e8] ss:$16 sps:$4 sm:$0xff]   ;;  %v2414_v3 = vld [vmem:[%s3112_s1 + $0x5c4] ss:$16 sps:$4 sm:$0xff]  }
 0x101   : > { %1165 = vmatprep.subr.bf16.mxu0 %v2324_v4  ;;  %1206 = vmatprep.subr.bf16.mxu1 %v2327_v5  ;;  %v2417_v4 = vld [vmem:[%s3112_s1 + $0x5cc] ss:$16 sps:$4 sm:$0xff]   ;;  %v2412_v5 = vld [vmem:[%s3112_s1 + $0x5c0] ss:$16 sps:$4 sm:$0xff]  }
 0x104   : > { %1166 = vmatpush2.bf16.msra.mxu0 %v2322_v6  ;;  %1207 = vmatpush2.bf16.msra.mxu1 %v2325_v7  ;;  %v2415_v6 = vld [vmem:[%s3112_s1 + $0x5c8] ss:$16 sps:$4 sm:$0xff]   ;;  %v2420_v7 = vld [vmem:[%s3112_s1 + $0x5a4] ss:$16 sps:$4 sm:$0xff]  }
 0x105   : > { %1167 = vmatprep.subr.bf16.mxu0 %v2330_v10  ;;  %1208 = vmatprep.subr.bf16.mxu1 %v2333_v11  ;;  %v2423_v10 = vld [vmem:[%s3112_s1 + $0x5ac] ss:$16 sps:$4 sm:$0xff]   ;;  %v2418_v11 = vld [vmem:[%s3112_s1 + $0x5a0] ss:$16 sps:$4 sm:$0xff]  }
 0x108   : > { %1168 = vmatpush2.bf16.msra.mxu0 %v2328_v12  ;;  %1209 = vmatpush2.bf16.msra.mxu1 %v2331_v13  ;;  %v2421_v12 = vld [vmem:[%s3112_s1 + $0x5a8] ss:$16 sps:$4 sm:$0xff]   ;;  %v2426_v13 = vld [vmem:[%s3112_s1 + $0x584] ss:$16 sps:$4 sm:$0xff]  }
 0x109   : > { %1169 = vmatprep.subr.bf16.mxu0 %v2336_v14  ;;  %1210 = vmatprep.subr.bf16.mxu1 %v2339_v15  ;;  %v2429_v14 = vld [vmem:[%s3112_s1 + $0x58c] ss:$16 sps:$4 sm:$0xff]   ;;  %v2424_v15 = vld [vmem:[%s3112_s1 + $0x580] ss:$16 sps:$4 sm:$0xff]  }
 0x10c   : > { %1170 = vmatpush2.bf16.msra.mxu0 %v2334_v16  ;;  %1211 = vmatpush2.bf16.msra.mxu1 %v2337_v17  ;;  %v2427_v16 = vld [vmem:[%s3112_s1 + $0x588] ss:$16 sps:$4 sm:$0xff]   ;;  %v2432_v17 = vld [vmem:[%s3112_s1 + $0x564] ss:$16 sps:$4 sm:$0xff]  }
 0x10d   : > { %1171 = vmatprep.subr.bf16.mxu0 %v2342_v18  ;;  %1212 = vmatprep.subr.bf16.mxu1 %v2345_v19  ;;  %v2435_v18 = vld [vmem:[%s3112_s1 + $0x56c] ss:$16 sps:$4 sm:$0xff]   ;;  %v2430_v19 = vld [vmem:[%s3112_s1 + $0x560] ss:$16 sps:$4 sm:$0xff]  }
 0x110   : > { %1172 = vmatpush2.bf16.msra.mxu0 %v2340_v20  ;;  %1213 = vmatpush2.bf16.msra.mxu1 %v2343_v22  ;;  %v2433_v20 = vld [vmem:[%s3112_s1 + $0x568] ss:$16 sps:$4 sm:$0xff]   ;;  %v2438_v22 = vld [vmem:[%s3112_s1 + $0x544] ss:$16 sps:$4 sm:$0xff]  }
 0x111   : > { %1173 = vmatprep.subr.bf16.mxu0 %v2348_v24  ;;  %1214 = vmatprep.subr.bf16.mxu1 %v2351_v25  ;;  %v2441_v24 = vld [vmem:[%s3112_s1 + $0x54c] ss:$16 sps:$4 sm:$0xff]   ;;  %v2436_v25 = vld [vmem:[%s3112_s1 + $0x540] ss:$16 sps:$4 sm:$0xff]  }
 0x114   : > { %1174 = vmatpush2.bf16.msra.mxu0 %v2346_v26  ;;  %1215 = vmatpush2.bf16.msra.mxu1 %v2349_v27  ;;  %v2439_v26 = vld [vmem:[%s3112_s1 + $0x548] ss:$16 sps:$4 sm:$0xff]   ;;  %v2444_v27 = vld [vmem:[%s3112_s1 + $0x524] ss:$16 sps:$4 sm:$0xff]  }
 0x115   : > { %1175 = vmatprep.subr.bf16.mxu0 %v2354_v28  ;;  %1216 = vmatprep.subr.bf16.mxu1 %v2357_v29  ;;  %v2447_v28 = vld [vmem:[%s3112_s1 + $0x52c] ss:$16 sps:$4 sm:$0xff]   ;;  %v2442_v29 = vld [vmem:[%s3112_s1 + $0x520] ss:$16 sps:$4 sm:$0xff]  }
 0x118   : > { %1176 = vmatpush2.bf16.msra.mxu0 %v2352_v30  ;;  %1217 = vmatpush2.bf16.msra.mxu1 %v2355_v31  ;;  %v2445_v30 = vld [vmem:[%s3112_s1 + $0x528] ss:$16 sps:$4 sm:$0xff]   ;;  %v2450_v31 = vld [vmem:[%s3112_s1 + $0x504] ss:$16 sps:$4 sm:$0xff]  }
 0x119   : > { %1612 = vmatprep.subr.bf16.mxu0 %v2360_v32  ;;  %1653 = vmatprep.subr.bf16.mxu1 %v2363_v33  ;;  %v2453_v32 = vld [vmem:[%s3112_s1 + $0x50c] ss:$16 sps:$4 sm:$0xff]   ;;  %v2448_v33 = vld [vmem:[%s3112_s1 + $0x500] ss:$16 sps:$4 sm:$0xff]  }
 0x11b   : > { %1178 = vmatmul.mubr.bf16.vlgmr.msra.gmra.mxu0 %v2507_v9  ;;  %1219 = vmatmul.mubr.bf16.vlgmr.msra.gmra.mxu1 %v2507_v9  ;;  %v2375_v9 = vld [vmem:[%s3112_s1 + $0x4ac] ss:$16 sps:$4 sm:$0xff]  }
 0x11c   : > { %1613 = vmatpush1.bf16.msra.mxu0 %v2358_v34  ;;  %1654 = vmatpush1.bf16.msra.mxu1 %v2361_v35  ;;  %v2451_v34 = vld [vmem:[%s3112_s1 + $0x508] ss:$16 sps:$4 sm:$0xff]   ;;  %v290_v35 = vpack.c.bf16 %v2707_v21, %v2707_v21 }
 0x11d   : > { %1614 = vmatprep.subr.bf16.mxu0 %v2366_v36  ;;  %1655 = vmatprep.subr.bf16.mxu1 %v2369_v37 }
 0x11e   : > { %1644 = vmatprep.mubr.bf16.mxu0 %v291_v38  ;;  %1685 = vmatprep.mubr.bf16.mxu1 %v291_v38 }
 0x120   : > { %1615 = vmatpush1.bf16.msra.mxu0 %v2364_v39  ;;  %1656 = vmatpush1.bf16.msra.mxu1 %v2367_v40 }
 0x121   : > { %1616 = vmatprep.subr.bf16.mxu0 %v2372_v23  ;;  %1657 = vmatprep.subr.bf16.mxu1 %v2375_v9 }
 0x124   : > { %1617 = vmatpush1.bf16.msra.mxu0 %v2370_v8  ;;  %1658 = vmatpush1.bf16.msra.mxu1 %v2373_v41 }
 0x125   : > { %1618 = vmatprep.subr.bf16.mxu0 %v2378_v42  ;;  %1659 = vmatprep.subr.bf16.mxu1 %v2381_v43 }
 0x128   : > { %1619 = vmatpush1.bf16.msra.mxu0 %v2376_v44  ;;  %1660 = vmatpush1.bf16.msra.mxu1 %v2379_v45 }
 0x129   : > { %1620 = vmatprep.subr.bf16.mxu0 %v2384_v46  ;;  %1661 = vmatprep.subr.bf16.mxu1 %v2387_v47 }
 0x12c   : > { %1621 = vmatpush1.bf16.msra.mxu0 %v2382_v48  ;;  %1662 = vmatpush1.bf16.msra.mxu1 %v2385_v49 }
 0x12d   : > { %1622 = vmatprep.subr.bf16.mxu0 %v2390_v50  ;;  %1663 = vmatprep.subr.bf16.mxu1 %v2393_v51  ;;  %v1702_v50 = vsub.s32 0, %v2494_v2  ;;  %v1710_v51 = vsub.s32 2, %v2494_v2 }
 0x130   : > { %1623 = vmatpush1.bf16.msra.mxu0 %v2388_v52  ;;  %1664 = vmatpush1.bf16.msra.mxu1 %v2391_v53  ;;  %v1698_v52 = vld [vmem:[%s3113_s2] sm:$0xf]  ;;  %v1706_v53 = vsub.s32 1, %v2494_v2 }
 0x131   : > { %1624 = vmatprep.subr.bf16.mxu0 %v2396_v54  ;;  %1665 = vmatprep.subr.bf16.mxu1 %v2399_v55  ;;  %v1714_v54 = vsub.s32 3, %v2494_v2  ;;  %v1703_v55 = vrot.slane %v1698_v52, %v1702_v50 }
 0x134   : > { %1625 = vmatpush1.bf16.msra.mxu0 %v2394_v56  ;;  %1666 = vmatpush1.bf16.msra.mxu1 %v2397_v57  ;;  %v1711_v56 = vrot.slane %v1698_v52, %v1710_v51 }
 0x135   : > { %1626 = vmatprep.subr.bf16.mxu0 %v2402_v58  ;;  %1667 = vmatprep.subr.bf16.mxu1 %v2405_v59 }
 0x138   : > { %1627 = vmatpush1.bf16.msra.mxu0 %v2400_v60  ;;  %1668 = vmatpush1.bf16.msra.mxu1 %v2403_v61 }
 0x139   : > { %1628 = vmatprep.subr.bf16.mxu0 %v2408_v62  ;;  %1669 = vmatprep.subr.bf16.mxu1 %v2411_v63 }
 0x13c   : > { %1629 = vmatpush2.bf16.msra.mxu0 %v2406_v0  ;;  %1670 = vmatpush2.bf16.msra.mxu1 %v2409_v1  ;;  %v1707_v0 = vrot.slane %v1698_v52, %v1706_v53 }
 0x13d   : > { %1630 = vmatprep.subr.bf16.mxu0 %v2414_v3  ;;  %1671 = vmatprep.subr.bf16.mxu1 %v2417_v4  ;;  %v1715_v3 = vrot.slane %v1698_v52, %v1714_v54 }
 0x140   : > { %1631 = vmatpush2.bf16.msra.mxu0 %v2412_v5  ;;  %1672 = vmatpush2.bf16.msra.mxu1 %v2415_v6 }
 0x141   : > { %1632 = vmatprep.subr.bf16.mxu0 %v2420_v7  ;;  %1673 = vmatprep.subr.bf16.mxu1 %v2423_v10 }
 0x144   : > { %1633 = vmatpush2.bf16.msra.mxu0 %v2418_v11  ;;  %1674 = vmatpush2.bf16.msra.mxu1 %v2421_v12 }
 0x145   : > { %1634 = vmatprep.subr.bf16.mxu0 %v2426_v13  ;;  %1675 = vmatprep.subr.bf16.mxu1 %v2429_v14 }
 0x148   : > { %1635 = vmatpush2.bf16.msra.mxu0 %v2424_v15  ;;  %1676 = vmatpush2.bf16.msra.mxu1 %v2427_v16 }
 0x149   : > { %1636 = vmatprep.subr.bf16.mxu0 %v2432_v17  ;;  %1677 = vmatprep.subr.bf16.mxu1 %v2435_v18 }
 0x14c   : > { %1637 = vmatpush2.bf16.msra.mxu0 %v2430_v19  ;;  %1678 = vmatpush2.bf16.msra.mxu1 %v2433_v20 }
 0x14d   : > { %1638 = vmatprep.subr.bf16.mxu0 %v2438_v22  ;;  %1679 = vmatprep.subr.bf16.mxu1 %v2441_v24 }
 0x150   : > { %1639 = vmatpush2.bf16.msra.mxu0 %v2436_v25  ;;  %1680 = vmatpush2.bf16.msra.mxu1 %v2439_v26 }
 0x151   : > { %1640 = vmatprep.subr.bf16.mxu0 %v2444_v27  ;;  %1681 = vmatprep.subr.bf16.mxu1 %v2447_v28 }
 0x154   : > { %1641 = vmatpush2.bf16.msra.mxu0 %v2442_v29  ;;  %1682 = vmatpush2.bf16.msra.mxu1 %v2445_v30 }
 0x155   : > { %1642 = vmatprep.subr.bf16.mxu0 %v2450_v31  ;;  %1683 = vmatprep.subr.bf16.mxu1 %v2453_v32 }
 0x158   : > { %1643 = vmatpush2.bf16.msra.mxu0 %v2448_v33  ;;  %1684 = vmatpush2.bf16.msra.mxu1 %v2451_v34 }
 0x15b   : > { %1645 = vmatmul.mubr.bf16.vlgmr.msra.gmra.mxu0 %v290_v35  ;;  %1686 = vmatmul.mubr.bf16.vlgmr.msra.gmra.mxu1 %v290_v35 }
 0x19b   : > { %v775_v36 = vpop.f32.mrf.mxu0  ;;  %v816_v37 = vpop.f32.mrf.mxu1 }
 0x19d   : > { %v777_v38 = vpop.f32.mrf.mxu0  ;;  %v818_v39 = vpop.f32.mrf.mxu1 }
 0x19f   : > { %v779_v40 = vpop.f32.mrf.mxu0  ;;  %v820_v23 = vpop.f32.mrf.mxu1 }
 0x1a1   : > { %v780_v9 = vpop.f32.mrf.mxu0  ;;  %v821_v8 = vpop.f32.mrf.mxu1 }
 0x1db   : > { %v1179_v41 = vpop.f32.mrf.mxu0  ;;  %v1220_v42 = vpop.f32.mrf.mxu1 }
 0x1dc   : > { %v1180_v43 = vadd.f32 %v1179_v41, %v775_v36  ;;  %v1221_v44 = vadd.f32 %v1220_v42, %v816_v37 }
 0x1dd   : > { %v1181_v45 = vpop.f32.mrf.mxu0  ;;  %v1222_v46 = vpop.f32.mrf.mxu1 }
 0x1de   : > { %v1182_v59 = vadd.f32 %v1181_v45, %v777_v38  ;;  %v1223_v60 = vadd.f32 %v1222_v46, %v818_v39 }
 0x1df   : > { %v1183_v47 = vpop.f32.mrf.mxu0  ;;  %v1224_v48 = vpop.f32.mrf.mxu1 }
 0x1e1   : > { %v1184_v49 = vpop.f32.mrf.mxu0  ;;  %v1225_v21 = vpop.f32.mrf.mxu1 }
 0x21b   : > { %v1646_v57 = vpop.f32.mrf.mxu0  ;;  %v1687_v58 = vpop.f32.mrf.mxu1 }
 0x21c   : > { %v1694_v61 = vadd.f32 %v1646_v57, %v1180_v43  ;;  %v1696_v62 = vadd.f32 %v1687_v58, %v1221_v44 }
 0x21d   : > { %v1648_v63 = vpop.f32.mrf.mxu0  ;;  %v1689_v1 = vpop.f32.mrf.mxu1 }
 0x21e   : > { %v1720_v4 = vadd.f32 %v1703_v55, %v1694_v61  ;;  %v1722_v5 = vadd.f32 %v1711_v56, %v1696_v62  ;;  %v1695_v6 = vadd.f32 %v1648_v63, %v1182_v59  ;;  %v1697_v7 = vadd.f32 %v1689_v1, %v1223_v60 }
 0x21f   : > { %v1650_v10 = vpop.f32.mrf.mxu0  ;;  %v1691_v11 = vpop.f32.mrf.mxu1 }
 0x220   : > { %v1728_v2 = vmul.f32 0.2, %v1720_v4  ;;  %v1730_v12 = vmul.f32 0.2, %v1722_v5  ;;  %v1721_v13 = vadd.f32 %v1707_v0, %v1695_v6  ;;  %v1723_v14 = vadd.f32 %v1715_v3, %v1697_v7 }
 0x221   : > { %v1651_v15 = vpop.f32.mrf.mxu0  ;;  %v1692_v16 = vpop.f32.mrf.mxu1  ;;  %vm1724_vm4 = vcmp.ge.f32.partialorder %v1720_v4, 0.0  ;;  %vm1726_vm5 = vcmp.ge.f32.partialorder %v1722_v5, 0.0 }
 0x222   : > { %vm1725_vm6 = vcmp.ge.f32.partialorder %v1721_v13, 0.0  ;;  %v1729_v17 = vmul.f32 0.2, %v1721_v13  ;;  %vm1727_vm7 = vcmp.ge.f32.partialorder %v1723_v14, 0.0  ;;  %v1731_v18 = vmul.f32 0.2, %v1723_v14 }
 0x223   : > { %v1732_v19 = vsel %vm1724_vm4, %v1720_v4, %v1728_v2  ;;  %v1734_v20 = vsel %vm1726_vm5, %v1722_v5, %v1730_v12 }
 0x224   : > { %v1733_v22 = vsel %vm1725_vm6, %v1721_v13, %v1729_v17  ;;  %v1735_v24 = vsel %vm1727_vm7, %v1723_v14, %v1731_v18 }
 0x225   : > { %v2152_v25 = vpack.c.bf16 %v1733_v22, %v1732_v19  ;;  %v2153_v26 = vpack.c.bf16 %v1735_v24, %v1734_v20 }
 0x227   : > { %1752 = vst [vmem:[%s170_s5] sm:$0xff] %v2152_v25  ;;  %1753 = vst [vmem:[%s170_s5 + $0x8] sm:$0xff] %v2153_v26 }
 0x228 PF: > { %s13_s12 = sadd.s32 1, %s2460_s12  }
 0x229   : > { %p10_p4 = scmp.ge.s32.totalorder %s13_s12, 4  }
 0x22b   :  { %12 = sbr.rel (!%p10_p4) target bundleno = 1 (0x1), region = 64 }

// kernel: tile.73
= control target key start
LH: loop header
LB: loop body
LE: loop exit
PB: predicated region body
PF: predicated region fallthrough
CT: control target
= control target key end

     0   :  { %s22_s0 = inlined_call_operand.vmem [shape: f32[64], index: 0, kind: input, shape index: {}]   ;;  %s23_s1 = inlined_call_operand.vmem [shape: f32[4,64], index: 1, kind: output, shape index: {}]  }
   0x1   :  { %v4_v0 = vld [vmem:[%s22_s0] ss:$0 sm:$0xff] }
   0x2   :  { %5 = vst [vmem:[%s23_s1] sm:$0xf] %v4_v0 }

// kernel: tile.74
= control target key start
LH: loop header
LB: loop body
LE: loop exit
PB: predicated region body
PF: predicated region fallthrough
CT: control target
= control target key end

     0   :  { %s7_s8 = smov 3  ;;  %vm9_vm0 = vcmask 523264   ;;  %s34_s9 = smov 64   ;;  %vm16_vm1 = vcmask 1048064   ;;  %s54_s0 = inlined_call_operand.vmem [shape: f32[4,64], index: 0, kind: input, shape index: {}]   ;;  %s55_s1 = inlined_call_operand.vmem [shape: f32[1,256], index: 1, kind: output, shape index: {}]  }
   0x1   :  { %v5_v0 = vld [vmem:[%s54_s0] sm:$0xf]  ;;  %s12_s0 = smov 3 }
   0x2   :  { %6 = vst [vmem:[#allocation1] sm:$0xf] %v5_v0 }
   0x9   :  { %v13_v1 = vld [vmem:[#allocation1 + $0x1] ss:$2 sm:%s12_s0]   ;;  %v8_v2 = vld [vmem:[#allocation1] ss:$2 sm:%s7_s8]  }
   0xa   :  { %14 = vrot.lane.b32.xlu0 %v13_v1, %s34_s9  ;;  %10 = vst.msk [vmem:[#allocation0] ss:$8 sm:$0x3] %vm9_vm0, %v8_v2  }
  0x7c   :  { %v15_v3 = vpop.permute.xlu0 %14  }
  0x7d   :  { %17 = vst.msk [vmem:[#allocation0] ss:$8 sm:$0x3] %vm16_vm1, %v15_v3  }
  0x84   :  { %v22_v4 = vld [vmem:[#allocation0] sm:$0x1]  ;;  %v27_v5 = vld [vmem:[#allocation0 + $0x8] sm:$0x1] }
  0x85   :  { %25 = vst [vmem:[%s55_s1] sm:$0x1] %v22_v4  ;;  %32 = vst [vmem:[%s55_s1 + $0x1] sm:$0x1] %v27_v5 }

// kernel: critic_forward.16
= control target key start
LH: loop header
LB: loop body
LE: loop exit
PB: predicated region body
PF: predicated region fallthrough
CT: control target
= control target key end

     0   :  { %s1471_s21 = smov 0   ;;  %s1804_s0 = inlined_call_operand.vmem [shape: bf16[2,8,512], index: 0, kind: input, shape index: {}]   ;;  %s1805_s1 = inlined_call_operand.vmem [shape: bf16[2,8,256], index: 1, kind: input, shape index: {}]   ;;  %s1806_s2 = inlined_call_operand.vmem [shape: bf16[4,8], index: 2, kind: input, shape index: {}]   ;;  %s1807_s3 = inlined_call_operand.vmem [shape: bf16[512,256], index: 3, kind: input, shape index: {}]   ;;  %s1808_s4 = inlined_call_operand.vmem [shape: bf16[256,256], index: 4, kind: input, shape index: {}]   ;;  %s1809_s5 = inlined_call_operand.vmem [shape: f32[1,256], index: 5, kind: input, shape index: {}]   ;;  %s1810_s6 = inlined_call_operand.vmem [shape: bf16[2,4,256], index: 6, kind: output, shape index: {}]  }
   0x1 LB: > { %s1146_s22 = sadd.s32 4294967295, %s1433_s21   ;;  %p1150_p0 = scmp.ge.s32.totalorder %s1433_s21, 1  ;;  %s1433_s21 = sphi %s1471_s21, %s16_s21  }
   0x2   : > { %p222_p1 = scmp.lt.s32.totalorder %s1433_s21, 3 }
   0x4   : > { %p223_p2 = pnand %p1150_p0, %p222_p1 }
   0x5   : > { %p257_p3 = scmp.lt.s32.totalorder (!%p223_p2), %s1146_s22, 1 }
   0x6   : > { %226 = sbr.rel (%p223_p2) target bundleno = 545 (0x221), region = 44 }
   0xb   : > { %v1277_v0 = vld [vmem:[%s1808_s4 + $0x74] ss:$8 sps:$4 sm:$0xff]   ;;  %v1281_v2 = vld [vmem:[%s1808_s4 + $0x70] ss:$8 sps:$4 sm:$0xff]   ;;  %v1283_v4 = vld [vmem:[%s1808_s4 + $0x64] ss:$8 sps:$4 sm:$0xff]  }
   0xc   : > { %v1279_v1 = vld [vmem:[%s1807_s3 + $0x74] ss:$8 sps:$4 sm:$0xff]   ;;  %539 = vmatprep.subr.bf16.mxu0 %v1277_v0  ;;  %v1282_v3 = vld [vmem:[%s1807_s3 + $0x70] ss:$8 sps:$4 sm:$0xff]   ;;  %v1285_v5 = vld [vmem:[%s1807_s3 + $0x64] ss:$8 sps:$4 sm:$0xff]  }
   0xd   : > { %914 = vmatprep.subr.bf16.mxu1 %v1279_v1  ;;  %540 = vmatpush1.bf16.msra.mxu0 %v1281_v2  ;;  %v1287_v6 = vld [vmem:[%s1808_s4 + $0x60] ss:$8 sps:$4 sm:$0xff]   ;;  %v1289_v8 = vld [vmem:[%s1808_s4 + $0x54] ss:$8 sps:$4 sm:$0xff]   ;;  %v1293_v10 = vld [vmem:[%s1808_s4 + $0x50] ss:$8 sps:$4 sm:$0xff]  }
   0xe   : > { %915 = vmatpush1.bf16.msra.mxu1 %v1282_v3  ;;  %541 = vmatprep.subr.bf16.mxu0 %v1283_v4  ;;  %v1288_v7 = vld [vmem:[%s1807_s3 + $0x60] ss:$8 sps:$4 sm:$0xff]   ;;  %v1291_v9 = vld [vmem:[%s1807_s3 + $0x54] ss:$8 sps:$4 sm:$0xff]   ;;  %v1294_v11 = vld [vmem:[%s1807_s3 + $0x50] ss:$8 sps:$4 sm:$0xff]  }
   0xf   : > { %916 = vmatprep.subr.bf16.mxu1 %v1285_v5  ;;  %v1295_v12 = vld [vmem:[%s1808_s4 + $0x44] ss:$8 sps:$4 sm:$0xff]   ;;  %v1299_v14 = vld [vmem:[%s1808_s4 + $0x40] ss:$8 sps:$4 sm:$0xff]   ;;  %v1301_v16 = vld [vmem:[%s1808_s4 + $0x34] ss:$8 sps:$4 sm:$0xff]  }
  0x10   : > { %v1297_v13 = vld [vmem:[%s1807_s3 + $0x44] ss:$8 sps:$4 sm:$0xff]   ;;  %v1300_v15 = vld [vmem:[%s1807_s3 + $0x40] ss:$8 sps:$4 sm:$0xff]   ;;  %v1303_v17 = vld [vmem:[%s1807_s3 + $0x34] ss:$8 sps:$4 sm:$0xff]  }
  0x11   : > { %542 = vmatpush1.bf16.msra.mxu0 %v1287_v6  ;;  %v1305_v18 = vld [vmem:[%s1808_s4 + $0x30] ss:$8 sps:$4 sm:$0xff]   ;;  %v1307_v20 = vld [vmem:[%s1808_s4 + $0x24] ss:$8 sps:$4 sm:$0xff]   ;;  %v1311_v22 = vld [vmem:[%s1808_s4 + $0x20] ss:$8 sps:$4 sm:$0xff]  }
  0x12   : > { %917 = vmatpush1.bf16.msra.mxu1 %v1288_v7  ;;  %543 = vmatprep.subr.bf16.mxu0 %v1289_v8  ;;  %v1306_v19 = vld [vmem:[%s1807_s3 + $0x30] ss:$8 sps:$4 sm:$0xff]   ;;  %v1309_v21 = vld [vmem:[%s1807_s3 + $0x24] ss:$8 sps:$4 sm:$0xff]   ;;  %v1312_v23 = vld [vmem:[%s1807_s3 + $0x20] ss:$8 sps:$4 sm:$0xff]  }
  0x13   : > { %918 = vmatprep.subr.bf16.mxu1 %v1291_v9  ;;  %v1313_v24 = vld [vmem:[%s1808_s4 + $0x14] ss:$8 sps:$4 sm:$0xff]   ;;  %v1317_v26 = vld [vmem:[%s1808_s4 + $0x10] ss:$8 sps:$4 sm:$0xff]   ;;  %v1319_v28 = vld [vmem:[%s1808_s4 + $0x4] ss:$8 sps:$4 sm:$0xff]  }
  0x14   : > { %v1315_v25 = vld [vmem:[%s1807_s3 + $0x14] ss:$8 sps:$4 sm:$0xff]   ;;  %v1318_v27 = vld [vmem:[%s1807_s3 + $0x10] ss:$8 sps:$4 sm:$0xff]   ;;  %v1321_v29 = vld [vmem:[%s1807_s3 + $0x4] ss:$8 sps:$4 sm:$0xff]  }
  0x15   : > { %544 = vmatpush1.bf16.msra.mxu0 %v1293_v10  ;;  %v1323_v30 = vld [vmem:[%s1808_s4] ss:$8 sps:$4 sm:$0xff]   ;;  %v1325_v32 = vld [vmem:[%s1808_s4 + $0xf4] ss:$8 sps:$4 sm:$0xff]   ;;  %v1329_v34 = vld [vmem:[%s1808_s4 + $0xf0] ss:$8 sps:$4 sm:$0xff]  }
  0x16   : > { %919 = vmatpush1.bf16.msra.mxu1 %v1294_v11  ;;  %545 = vmatprep.subr.bf16.mxu0 %v1295_v12  ;;  %v1324_v31 = vld [vmem:[%s1807_s3] ss:$8 sps:$4 sm:$0xff]   ;;  %v1327_v33 = vld [vmem:[%s1807_s3 + $0xf4] ss:$8 sps:$4 sm:$0xff]   ;;  %v1330_v35 = vld [vmem:[%s1807_s3 + $0xf0] ss:$8 sps:$4 sm:$0xff]  }
  0x17   : > { %920 = vmatprep.subr.bf16.mxu1 %v1297_v13  ;;  %v1331_v36 = vld [vmem:[%s1808_s4 + $0xe4] ss:$8 sps:$4 sm:$0xff]   ;;  %s1812_s22 = smov (!%p257_p3, %s1146_s22), 1  ;;  %v1335_v38 = vld [vmem:[%s1808_s4 + $0xe0] ss:$8 sps:$4 sm:$0xff]   ;;  %vm1015_vm0 = vcmask 1043456  }
  0x18   : > { %v1333_v37 = vld [vmem:[%s1807_s3 + $0xe4] ss:$8 sps:$4 sm:$0xff]   ;;  %v1336_v39 = vld [vmem:[%s1807_s3 + $0xe0] ss:$8 sps:$4 sm:$0xff]   ;;  %v1337_v40 = vld [vmem:[%s1808_s4 + $0xd4] ss:$8 sps:$4 sm:$0xff]  }
  0x19   : > { %546 = vmatpush1.bf16.msra.mxu0 %v1299_v14  ;;  %s1266_s15 = sshll.u32 %s1812_s22, 3  ;;  %v1339_v41 = vld [vmem:[%s1807_s3 + $0xd4] ss:$8 sps:$4 sm:$0xff]   ;;  %s1265_s18 = sshll.u32 %s1812_s22, 4  ;;  %v1341_v42 = vld [vmem:[%s1808_s4 + $0xd0] ss:$8 sps:$4 sm:$0xff]  }
  0x1a   : > { %921 = vmatpush1.bf16.msra.mxu1 %v1300_v15  ;;  %547 = vmatprep.subr.bf16.mxu0 %v1301_v16  ;;  %v1342_v43 = vld [vmem:[%s1807_s3 + $0xd0] ss:$8 sps:$4 sm:$0xff]   ;;  %s266_s27 = scalar_lea.vmem %s1805_s1, %s1266_s15  ;;  %v1343_v44 = vld [vmem:[%s1808_s4 + $0xc4] ss:$8 sps:$4 sm:$0xff]   ;;  %s1628_s8 = scalar_lea.vmem %s1804_s0, %s1265_s18  ;;  %v1347_v47 = vld [vmem:[%s1808_s4 + $0xc0] ss:$8 sps:$4 sm:$0xff]  }
  0x1b   : > { %922 = vmatprep.subr.bf16.mxu1 %v1303_v17  ;;  %v1345_v45 = vld [vmem:[%s1807_s3 + $0xc4] ss:$8 sps:$4 sm:$0xff]   ;;  %v1348_v50 = vld [vmem:[%s1807_s3 + $0xc0] ss:$8 sps:$4 sm:$0xff]   ;;  %v1349_v51 = vld [vmem:[%s1808_s4 + $0xb4] ss:$8 sps:$4 sm:$0xff]  }
  0x1c   : > { %v339_v46 = vld [vmem:[%s266_s27] sm:$0xff]  ;;  %v1351_v53 = vld [vmem:[%s1807_s3 + $0xb4] ss:$8 sps:$4 sm:$0xff]   ;;  %v1353_v54 = vld [vmem:[%s1808_s4 + $0xb0] ss:$8 sps:$4 sm:$0xff]   ;;  %vm1011_vm1 = vcmask 64512  }
  0x1d   : > { %548 = vmatpush1.bf16.msra.mxu0 %v1305_v18  ;;  %v1158_v48 = vcombine.high %v339_v46, %v339_v46  ;;  %v273_v49 = vld [vmem:[%s1628_s8] sm:$0xff]  ;;  %v1354_v55 = vld [vmem:[%s1807_s3 + $0xb0] ss:$8 sps:$4 sm:$0xff]   ;;  %v1361_v60 = vld [vmem:[%s1808_s4 + $0x94] ss:$8 sps:$4 sm:$0xff]   ;;  %v1157_v6 = vcombine.low %v339_v46, %v339_v46  ;;  %s1267_s30 = sshll.u32 %s1812_s22, 2 }
  0x1e   : > { %923 = vmatpush1.bf16.msra.mxu1 %v1306_v19  ;;  %549 = vmatprep.subr.bf16.mxu0 %v1307_v20  ;;  %v1192_v52 = vcombine.high %v273_v49, %v273_v49  ;;  %v1355_v56 = vld [vmem:[%s1808_s4 + $0xa4] ss:$8 sps:$4 sm:$0xff]   ;;  %v1359_v58 = vld [vmem:[%s1808_s4 + $0xa0] ss:$8 sps:$4 sm:$0xff]   ;;  %v1363_v61 = vld [vmem:[%s1807_s3 + $0x94] ss:$8 sps:$4 sm:$0xff]   ;;  %v1191_v7 = vcombine.low %v273_v49, %v273_v49  ;;  %s271_s9 = scalar_lea.vmem %s1810_s6, %s1267_s30 }
  0x1f   : > { %924 = vmatprep.subr.bf16.mxu1 %v1309_v21  ;;  %571 = vmatprep.mubr.bf16.mxu0 %v1158_v48  ;;  %v1357_v57 = vld [vmem:[%s1807_s3 + $0xa4] ss:$8 sps:$4 sm:$0xff]   ;;  %v1360_v59 = vld [vmem:[%s1807_s3 + $0xa0] ss:$8 sps:$4 sm:$0xff]   ;;  %v1365_v62 = vld [vmem:[%s1808_s4 + $0x90] ss:$8 sps:$4 sm:$0xff]  }
  0x20   : > { %946 = vmatprep.mubr.bf16.mxu1 %v1192_v52  ;;  %v1366_v63 = vld [vmem:[%s1807_s3 + $0x90] ss:$8 sps:$4 sm:$0xff]   ;;  %v1367_v0 = vld [vmem:[%s1808_s4 + $0x84] ss:$8 sps:$4 sm:$0xff]   ;;  %v1371_v2 = vld [vmem:[%s1808_s4 + $0x80] ss:$8 sps:$4 sm:$0xff]  }
  0x21   : > { %550 = vmatpush1.bf16.msra.mxu0 %v1311_v22  ;;  %v1369_v1 = vld [vmem:[%s1807_s3 + $0x84] ss:$8 sps:$4 sm:$0xff]   ;;  %v1372_v3 = vld [vmem:[%s1807_s3 + $0x80] ss:$8 sps:$4 sm:$0xff]   ;;  %v1380_v5 = vld [vmem:[%s1807_s3 + $0x174] ss:$8 sps:$4 sm:$0xff]  }
  0x22   : > { %925 = vmatpush1.bf16.msra.mxu1 %v1312_v23  ;;  %551 = vmatprep.subr.bf16.mxu0 %v1313_v24  ;;  %v1689_v4 = vld [vmem:[%s1628_s8 + $0x8] sm:$0xff]  ;;  %v1378_v8 = vld [vmem:[%s1807_s3 + $0x170] ss:$8 sps:$4 sm:$0xff]   ;;  %v1386_v12 = vld [vmem:[%s1807_s3 + $0x154] ss:$8 sps:$4 sm:$0xff]  }
  0x23   : > { %926 = vmatprep.subr.bf16.mxu1 %v1315_v25  ;;  %v1194_v9 = vcombine.high %v1689_v4, %v1689_v4  ;;  %v1383_v10 = vld [vmem:[%s1807_s3 + $0x164] ss:$8 sps:$4 sm:$0xff]   ;;  %v1381_v11 = vld [vmem:[%s1807_s3 + $0x160] ss:$8 sps:$4 sm:$0xff]   ;;  %v1384_v13 = vld [vmem:[%s1807_s3 + $0x150] ss:$8 sps:$4 sm:$0xff]  }
  0x24   : > { %v1389_v14 = vld [vmem:[%s1807_s3 + $0x144] ss:$8 sps:$4 sm:$0xff]   ;;  %v1387_v15 = vld [vmem:[%s1807_s3 + $0x140] ss:$8 sps:$4 sm:$0xff]   ;;  %v1392_v16 = vld [vmem:[%s1807_s3 + $0x134] ss:$8 sps:$4 sm:$0xff]  }
  0x25   : > { %552 = vmatpush1.bf16.msra.mxu0 %v1317_v26  ;;  %v1390_v17 = vld [vmem:[%s1807_s3 + $0x130] ss:$8 sps:$4 sm:$0xff]   ;;  %v1395_v18 = vld [vmem:[%s1807_s3 + $0x124] ss:$8 sps:$4 sm:$0xff]   ;;  %v1393_v19 = vld [vmem:[%s1807_s3 + $0x120] ss:$8 sps:$4 sm:$0xff]  }
  0x26   : > { %927 = vmatpush1.bf16.msra.mxu1 %v1318_v27  ;;  %553 = vmatprep.subr.bf16.mxu0 %v1319_v28  ;;  %v1398_v20 = vld [vmem:[%s1807_s3 + $0x114] ss:$8 sps:$4 sm:$0xff]   ;;  %v1396_v21 = vld [vmem:[%s1807_s3 + $0x110] ss:$8 sps:$4 sm:$0xff]   ;;  %v1401_v22 = vld [vmem:[%s1807_s3 + $0x104] ss:$8 sps:$4 sm:$0xff]  }
  0x27   : > { %928 = vmatprep.subr.bf16.mxu1 %v1321_v29  ;;  %v1399_v23 = vld [vmem:[%s1807_s3 + $0x100] ss:$8 sps:$4 sm:$0xff]   ;;  %v1404_v24 = vld [vmem:[%s1807_s3 + $0x1f4] ss:$8 sps:$4 sm:$0xff]   ;;  %v1402_v25 = vld [vmem:[%s1807_s3 + $0x1f0] ss:$8 sps:$4 sm:$0xff]  }
  0x28   : > { %v1407_v26 = vld [vmem:[%s1807_s3 + $0x1e4] ss:$8 sps:$4 sm:$0xff]   ;;  %v1405_v27 = vld [vmem:[%s1807_s3 + $0x1e0] ss:$8 sps:$4 sm:$0xff]   ;;  %v1410_v28 = vld [vmem:[%s1807_s3 + $0x1d4] ss:$8 sps:$4 sm:$0xff]  }
  0x29   : > { %554 = vmatpush1.bf16.msra.mxu0 %v1323_v30  ;;  %v1408_v29 = vld [vmem:[%s1807_s3 + $0x1d0] ss:$8 sps:$4 sm:$0xff]   ;;  %v1413_v30 = vld [vmem:[%s1807_s3 + $0x1c4] ss:$8 sps:$4 sm:$0xff]  }
  0x2a   : > { %929 = vmatpush1.bf16.msra.mxu1 %v1324_v31  ;;  %555 = vmatprep.subr.bf16.mxu0 %v1325_v32  ;;  %v1411_v31 = vld [vmem:[%s1807_s3 + $0x1c0] ss:$8 sps:$4 sm:$0xff]   ;;  %v1416_v32 = vld [vmem:[%s1807_s3 + $0x1b4] ss:$8 sps:$4 sm:$0xff]  }
  0x2b   : > { %930 = vmatprep.subr.bf16.mxu1 %v1327_v33  ;;  %v1414_v33 = vld [vmem:[%s1807_s3 + $0x1b0] ss:$8 sps:$4 sm:$0xff]  }
  0x2d   : > { %556 = vmatpush2.bf16.msra.mxu0 %v1329_v34  ;;  %v1419_v34 = vld [vmem:[%s1807_s3 + $0x1a4] ss:$8 sps:$4 sm:$0xff]  }
  0x2e   : > { %931 = vmatpush2.bf16.msra.mxu1 %v1330_v35  ;;  %557 = vmatprep.subr.bf16.mxu0 %v1331_v36  ;;  %v1417_v35 = vld [vmem:[%s1807_s3 + $0x1a0] ss:$8 sps:$4 sm:$0xff]   ;;  %v1422_v36 = vld [vmem:[%s1807_s3 + $0x194] ss:$8 sps:$4 sm:$0xff]  }
  0x2f   : > { %932 = vmatprep.subr.bf16.mxu1 %v1333_v37  ;;  %v1420_v37 = vld [vmem:[%s1807_s3 + $0x190] ss:$8 sps:$4 sm:$0xff]  }
  0x31   : > { %558 = vmatpush2.bf16.msra.mxu0 %v1335_v38  ;;  %v1425_v38 = vld [vmem:[%s1807_s3 + $0x184] ss:$8 sps:$4 sm:$0xff]  }
  0x32   : > { %933 = vmatpush2.bf16.msra.mxu1 %v1336_v39  ;;  %559 = vmatprep.subr.bf16.mxu0 %v1337_v40  ;;  %v1423_v39 = vld [vmem:[%s1807_s3 + $0x180] ss:$8 sps:$4 sm:$0xff]   ;;  %v1193_v40 = vcombine.low %v1689_v4, %v1689_v4 }
  0x33   : > { %934 = vmatprep.subr.bf16.mxu1 %v1339_v41  ;;  %v1435_v41 = vmov 0  }
  0x35   : > { %560 = vmatpush2.bf16.msra.mxu0 %v1341_v42 }
  0x36   : > { %935 = vmatpush2.bf16.msra.mxu1 %v1342_v43  ;;  %561 = vmatprep.subr.bf16.mxu0 %v1343_v44 }
  0x37   : > { %936 = vmatprep.subr.bf16.mxu1 %v1345_v45 }
  0x39   : > { %562 = vmatpush2.bf16.msra.mxu0 %v1347_v47 }
  0x3a   : > { %937 = vmatpush2.bf16.msra.mxu1 %v1348_v50  ;;  %563 = vmatprep.subr.bf16.mxu0 %v1349_v51 }
  0x3b   : > { %938 = vmatprep.subr.bf16.mxu1 %v1351_v53 }
  0x3d   : > { %564 = vmatpush2.bf16.msra.mxu0 %v1353_v54 }
  0x3e   : > { %939 = vmatpush2.bf16.msra.mxu1 %v1354_v55  ;;  %565 = vmatprep.subr.bf16.mxu0 %v1355_v56 }
  0x3f   : > { %940 = vmatprep.subr.bf16.mxu1 %v1357_v57 }
  0x41   : > { %566 = vmatpush2.bf16.msra.mxu0 %v1359_v58 }
  0x42   : > { %941 = vmatpush2.bf16.msra.mxu1 %v1360_v59  ;;  %567 = vmatprep.subr.bf16.mxu0 %v1361_v60 }
  0x43   : > { %942 = vmatprep.subr.bf16.mxu1 %v1363_v61  ;;  %v996_v61 = vld [vmem:[%s1806_s2] sm:$0x3] }
  0x45   : > { %568 = vmatpush2.bf16.msra.mxu0 %v1365_v62  ;;  %v1001_v62 = vlaneseq }
  0x46   : > { %943 = vmatpush2.bf16.msra.mxu1 %v1366_v63  ;;  %569 = vmatprep.subr.bf16.mxu0 %v1367_v0 }
  0x47   : > { %944 = vmatprep.subr.bf16.mxu1 %v1369_v1  ;;  %v1002_v63 = vshrl.u32 %v1001_v62, 7  ;;  %v999_v1 = vld [vmem:[%s1809_s5] sm:$0x3] }
  0x49   : > { %570 = vmatpush2.bf16.msra.mxu0 %v1371_v2  ;;  %v1003_v0 = vsub.s32 0, %v1002_v63  ;;  %v1007_v2 = vsub.s32 1, %v1002_v63 }
  0x4a   : > { %945 = vmatpush2.bf16.msra.mxu1 %v1372_v3  ;;  %955 = vmatprep.subr.bf16.mxu0 %v1380_v5 }
  0x4b   : > { %v1004_v3 = vrot.slane %v999_v1, %v1003_v0  ;;  %v1008_v4 = vrot.slane %v999_v1, %v1007_v2 }
  0x4c   : > { %572 = vmatmul.mubr.bf16.vlgmr.msra.gmra.mxu0 %v1157_v6 }
  0x4d   : > { %947 = vmatmul.mubr.bf16.vlgmr.msra.gmra.mxu1 %v1191_v7  ;;  %956 = vmatpush1.bf16.msra.mxu0 %v1378_v8 }
  0x4e   : > { %987 = vmatprep.mubr.bf16.mxu0 %v1194_v9  ;;  %957 = vmatprep.subr.bf16.mxu0 %v1383_v10 }
  0x4f   : > { %1054 = vmatprep.mubr.bf16.mxu1 %v1435_v41 }
  0x51   : > { %958 = vmatpush1.bf16.msra.mxu0 %v1381_v11 }
  0x52   : > { %959 = vmatprep.subr.bf16.mxu0 %v1386_v12 }
  0x55   : > { %960 = vmatpush1.bf16.msra.mxu0 %v1384_v13 }
  0x56   : > { %961 = vmatprep.subr.bf16.mxu0 %v1389_v14 }
  0x59   : > { %962 = vmatpush1.bf16.msra.mxu0 %v1387_v15 }
  0x5a   : > { %963 = vmatprep.subr.bf16.mxu0 %v1392_v16 }
  0x5d   : > { %964 = vmatpush1.bf16.msra.mxu0 %v1390_v17 }
  0x5e   : > { %965 = vmatprep.subr.bf16.mxu0 %v1395_v18 }
  0x61   : > { %966 = vmatpush1.bf16.msra.mxu0 %v1393_v19 }
  0x62   : > { %967 = vmatprep.subr.bf16.mxu0 %v1398_v20 }
  0x65   : > { %968 = vmatpush1.bf16.msra.mxu0 %v1396_v21 }
  0x66   : > { %969 = vmatprep.subr.bf16.mxu0 %v1401_v22 }
  0x69   : > { %970 = vmatpush1.bf16.msra.mxu0 %v1399_v23 }
  0x6a   : > { %971 = vmatprep.subr.bf16.mxu0 %v1404_v24 }
  0x6d   : > { %972 = vmatpush2.bf16.msra.mxu0 %v1402_v25 }
  0x6e   : > { %973 = vmatprep.subr.bf16.mxu0 %v1407_v26 }
  0x71   : > { %974 = vmatpush2.bf16.msra.mxu0 %v1405_v27 }
  0x72   : > { %975 = vmatprep.subr.bf16.mxu0 %v1410_v28 }
  0x75   : > { %976 = vmatpush2.bf16.msra.mxu0 %v1408_v29 }
  0x76   : > { %977 = vmatprep.subr.bf16.mxu0 %v1413_v30 }
  0x79   : > { %978 = vmatpush2.bf16.msra.mxu0 %v1411_v31 }
  0x7a   : > { %979 = vmatprep.subr.bf16.mxu0 %v1416_v32 }
  0x7d   : > { %980 = vmatpush2.bf16.msra.mxu0 %v1414_v33 }
  0x7e   : > { %981 = vmatprep.subr.bf16.mxu0 %v1419_v34 }
  0x81   : > { %982 = vmatpush2.bf16.msra.mxu0 %v1417_v35 }
  0x82   : > { %983 = vmatprep.subr.bf16.mxu0 %v1422_v36 }
  0x85   : > { %984 = vmatpush2.bf16.msra.mxu0 %v1420_v37 }
  0x86   : > { %985 = vmatprep.subr.bf16.mxu0 %v1425_v38 }
  0x89   : > { %986 = vmatpush2.bf16.msra.mxu0 %v1423_v39 }
  0x8c   : > { %988 = vmatmul.mubr.bf16.vlgmr.msra.gmra.mxu0 %v1193_v40 }
 0x10c   : > { %v573_v42 = vpop.f32.mrf.mxu0 }
 0x10d   : > { %v948_v43 = vpop.f32.mrf.mxu1 }
 0x10e   : > { %v949_v44 = vadd.f32 %v948_v43, %v573_v42  ;;  %v575_v45 = vpop.f32.mrf.mxu0 }
 0x10f   : > { %v950_v46 = vpop.f32.mrf.mxu1 }
 0x110   : > { %v577_v47 = vpop.f32.mrf.mxu0  ;;  %v951_v52 = vadd.f32 %v950_v46, %v575_v45 }
 0x111   : > { %v952_v48 = vpop.f32.mrf.mxu1 }
 0x112   : > { %v578_v49 = vpop.f32.mrf.mxu0 }
 0x113   : > { %v953_v50 = vpop.f32.mrf.mxu1 }
 0x14c   : > { %v989_v51 = vpop.f32.mrf.mxu0 }
 0x14d   : > { %v990_v53 = vadd.f32 %v989_v51, %v949_v44 }
 0x14e   : > { %v991_v54 = vpop.f32.mrf.mxu0 }
 0x14f   : > { %v997_v55 = vpack.c.bf16 %v990_v53, %v990_v53  ;;  %v992_v56 = vadd.f32 %v991_v54, %v951_v52 }
 0x150   : > { %v993_v57 = vpop.f32.mrf.mxu0 }
 0x151   : > { %v998_v58 = vpack.c.bf16 %v992_v56, %v992_v56  ;;  %v1017_v60 = vsel %vm1015_vm0, %v997_v55, 0 }
 0x152   : > { %v994_v59 = vpop.f32.mrf.mxu0 }
 0x153   : > { %1259 = vmatprep.subr.msk.bf16.mxu1 %vm1015_vm0, %v998_v58 }
 0x154   : > { %1037 = vmatpush1.bf16.msra.mxu1 %v1017_v60 }
 0x157   : > { %1260 = vmatmul.mubr.msk.bf16.vlgmr.msra.gmra.mxu1 %vm1011_vm1, %v996_v61 }
 0x217   : > { %v1056_v5 = vpop.f32.mrf.mxu1 }
 0x218   : > { %v1057_v6 = vadd.f32 %v1056_v5, %v1004_v3 }
 0x219   : > { %v1058_v7 = vpop.f32.mrf.mxu1 }
 0x21a   : > { %v1059_v8 = vadd.f32 %v1058_v7, %v1008_v4  ;;  %v1063_v10 = vmul.f32 0.70710677, %v1057_v6 }
 0x21b   : > { %v1060_v9 = vpop.f32.mrf.mxu1 }
 0x21c   : > { %v1064_v11 = vmul.f32 0.70710677, %v1059_v8 }
 0x21d   : > { %v1061_v12 = vpop.f32.mrf.mxu1 }
 0x21e   : > { %v1261_v13 = vpack.c.bf16 %v1064_v11, %v1063_v10 }
 0x220   : > { %1262 = vst.sshfl [vmem:[%s271_s9] sm:$0x33 pattern:$0x76325410] %v1261_v13 }
 0x221 PF: > { %s16_s21 = sadd.s32 1, %s1433_s21  }
 0x222   : > { %p13_p4 = scmp.ge.s32.totalorder %s16_s21, 4  }
 0x224   :  { %15 = sbr.rel (!%p13_p4) target bundleno = 1 (0x1), region = 77 }

// kernel: critic_forward.17
= control target key start
LH: loop header
LB: loop body
LE: loop exit
PB: predicated region body
PF: predicated region fallthrough
CT: control target
= control target key end

     0   :  { %v18_v1 = vlaneseq  ;;  %v399_v4 = vmov 1983009808   ;;  %s529_s0 = inlined_call_operand.vmem [shape: bf16[2,1024], index: 0, kind: input, shape index: {}]   ;;  %s530_s1 = inlined_call_operand.hbm [shape: f32[1,1], index: 1, kind: output, shape index: {}]  }
   0x1   :  { %v9_v0 = vld [vmem:[%s529_s0] sm:$0xff]  ;;  %v16_v5 = vunpack.c.l.s4 %v399_v4 }
   0x2   :  { %v414_v2 = vunpack.c.l.bf16 %v9_v0  ;;  %v416_v3 = vunpack.c.h.bf16 %v9_v0 }
   0x3   :  { %6 = vsyncpa [#allocation3], 0  ;;  %v19_v6 = vshrl.u32 %v18_v1, 7  ;;  %v17_v8 = vunpack.c.0.s8 %v16_v5  ;;  %vm56_vm0 = vcmask 1041408   ;;  %vm326_vm3 = vcmask 1040384   ;;  %s400_s9 = smov [#allocation2]  }
   0x4   :  { %v14_v7 = vcombine.high %v414_v2, %v414_v2  ;;  %v31_v9 = vcombine.high %v416_v3, %v416_v3 }
   0x5   :  { %v422_v10 = vsub.s32 %v17_v8, %v19_v6 }
   0x7   :  { %v21_v11 = vrot.slane %v414_v2, %v422_v10  ;;  %v28_v12 = vrot.slane %v14_v7, %v422_v10  ;;  %v38_v13 = vrot.slane %v416_v3, %v422_v10  ;;  %v45_v14 = vrot.slane %v31_v9, %v422_v10 }
   0x9   :  { %v29_v15 = vcombine.high %v21_v11, %v21_v11  ;;  %v30_v16 = vcombine.high %v28_v12, %v28_v12  ;;  %v46_v17 = vcombine.high %v38_v13, %v38_v13  ;;  %v47_v18 = vcombine.high %v45_v14, %v45_v14 }
   0xa   :  { %v57_v19 = vsel %vm56_vm0, %v21_v11, 0.0  ;;  %v71_v20 = vsel %vm56_vm0, %v28_v12, 0.0  ;;  %v85_v21 = vsel %vm56_vm0, %v38_v13, 0.0  ;;  %v99_v22 = vsel %vm56_vm0, %v45_v14, 0.0 }
   0xb   :  { %v58_v23 = vrot.slane %v57_v19, 4  ;;  %v64_v24 = vsel %vm56_vm0, %v29_v15, 0.0  ;;  %v72_v25 = vrot.slane %v71_v20, 4  ;;  %v78_v26 = vsel %vm56_vm0, %v30_v16, 0.0 }
   0xc   :  { %v65_v27 = vrot.slane %v64_v24, 4  ;;  %v79_v28 = vrot.slane %v78_v26, 4  ;;  %v86_v29 = vrot.slane %v85_v21, 4  ;;  %v92_v30 = vsel %vm56_vm0, %v46_v17, 0.0 }
   0xd   :  { %v59_v31 = vadd.f32 %v58_v23, %v57_v19  ;;  %v73_v32 = vadd.f32 %v72_v25, %v71_v20  ;;  %v93_v33 = vrot.slane %v92_v30, 4  ;;  %v100_v34 = vrot.slane %v99_v22, 4 }
   0xe   :  { %v66_v35 = vadd.f32 %v65_v27, %v64_v24  ;;  %v80_v36 = vadd.f32 %v79_v28, %v78_v26  ;;  %v87_v37 = vadd.f32 %v86_v29, %v85_v21  ;;  %v106_v38 = vsel %vm56_vm0, %v47_v18, 0.0 }
   0xf   :  { %v60_v39 = vrot.slane %v59_v31, 2  ;;  %v74_v40 = vrot.slane %v73_v32, 2  ;;  %v94_v41 = vadd.f32 %v93_v33, %v92_v30  ;;  %v101_v42 = vadd.f32 %v100_v34, %v99_v22 }
  0x10   :  { %v67_v43 = vrot.slane %v66_v35, 2  ;;  %v81_v44 = vrot.slane %v80_v36, 2  ;;  %v88_v45 = vrot.slane %v87_v37, 2  ;;  %v107_v46 = vrot.slane %v106_v38, 4 }
  0x11   :  { %v61_v47 = vadd.f32 %v60_v39, %v59_v31  ;;  %v75_v48 = vadd.f32 %v74_v40, %v73_v32  ;;  %v95_v49 = vrot.slane %v94_v41, 2  ;;  %v102_v50 = vrot.slane %v101_v42, 2 }
  0x12   :  { %v68_v51 = vadd.f32 %v67_v43, %v66_v35  ;;  %v82_v52 = vadd.f32 %v81_v44, %v80_v36  ;;  %v89_v53 = vadd.f32 %v88_v45, %v87_v37  ;;  %v108_v54 = vadd.f32 %v107_v46, %v106_v38 }
  0x13   :  { %v62_v55 = vrot.slane %v61_v47, 1  ;;  %v76_v56 = vrot.slane %v75_v48, 1  ;;  %v96_v57 = vadd.f32 %v95_v49, %v94_v41  ;;  %v103_v58 = vadd.f32 %v102_v50, %v101_v42 }
  0x14   :  { %v69_v59 = vrot.slane %v68_v51, 1  ;;  %v83_v60 = vrot.slane %v82_v52, 1  ;;  %v90_v61 = vrot.slane %v89_v53, 1  ;;  %v109_v62 = vrot.slane %v108_v54, 2 }
  0x15   :  { %v63_v63 = vadd.f32 %v62_v55, %v61_v47  ;;  %v77_v0 = vadd.f32 %v76_v56, %v75_v48  ;;  %v97_v1 = vrot.slane %v96_v57, 1  ;;  %v104_v4 = vrot.slane %v103_v58, 1 }
  0x16   :  { %v70_v5 = vadd.f32 %v69_v59, %v68_v51  ;;  %v84_v6 = vadd.f32 %v83_v60, %v82_v52  ;;  %v91_v7 = vadd.f32 %v90_v61, %v89_v53  ;;  %v110_v8 = vadd.f32 %v109_v62, %v108_v54 }
  0x17   :  { %v98_v9 = vadd.f32 %v97_v1, %v96_v57  ;;  %v105_v11 = vadd.f32 %v104_v4, %v103_v58  ;;  %v114_v12 = vmul.f32 0.5, %v63_v63  ;;  %v116_v13 = vmul.f32 0.5, %v77_v0 }
  0x18   :  { %v111_v14 = vrot.slane %v110_v8, 1  ;;  %v115_v15 = vmul.f32 0.5, %v70_v5  ;;  %v117_v16 = vmul.f32 0.5, %v84_v6  ;;  %v118_v17 = vmul.f32 0.5, %v91_v7 }
  0x19   :  { %v119_v18 = vmul.f32 0.5, %v98_v9  ;;  %v120_v20 = vmul.f32 0.5, %v105_v11 }
  0x1a   :  { %v112_v19 = vadd.f32 %v111_v14, %v110_v8  ;;  %v130_v21 = vcombine.low %v114_v12, %v115_v15  ;;  %v131_v22 = vcombine.low %v116_v13, %v117_v16 }
  0x1b   :  { %v147_v23 = vcombine.low %v118_v17, %v119_v18 }
  0x1c   :  { %v121_v24 = vmul.f32 0.5, %v112_v19  ;;  %v138_v25 = vrot.slane %v130_v21, %v422_v10  ;;  %v145_v26 = vrot.slane %v131_v22, %v422_v10 }
  0x1d   :  { %v155_v29 = vrot.slane %v147_v23, %v422_v10 }
  0x1e   :  { %v146_v27 = vcombine.low %v138_v25, %v145_v26  ;;  %v148_v28 = vcombine.low %v120_v20, %v121_v24 }
  0x20   :  { %v162_v30 = vrot.slane %v148_v28, %v422_v10  ;;  %v166_v31 = vsub.f32 %v414_v2, %v146_v27 }
  0x22   :  { %v163_v32 = vcombine.low %v155_v29, %v162_v30  ;;  %v168_v33 = vmul.f32 %v166_v31, %v166_v31 }
  0x24   :  { %v167_v34 = vsub.f32 %v416_v3, %v163_v32  ;;  %v172_v35 = vcombine.high %v168_v33, %v168_v33  ;;  %v179_v36 = vrot.slane %v168_v33, %v422_v10 }
  0x26   :  { %v169_v37 = vmul.f32 %v167_v34, %v167_v34  ;;  %v186_v38 = vrot.slane %v172_v35, %v422_v10  ;;  %v187_v39 = vcombine.high %v179_v36, %v179_v36  ;;  %v214_v40 = vsel %vm56_vm0, %v179_v36, 0.0 }
  0x27   :  { %v215_v41 = vrot.slane %v214_v40, 4 }
  0x28   :  { %v188_v42 = vcombine.high %v186_v38, %v186_v38  ;;  %v189_v43 = vcombine.high %v169_v37, %v169_v37  ;;  %v196_v44 = vrot.slane %v169_v37, %v422_v10  ;;  %v221_v2 = vsel %vm56_vm0, %v187_v39, 0.0 }
  0x29   :  { %v216_v45 = vadd.f32 %v215_v41, %v214_v40  ;;  %v222_v46 = vrot.slane %v221_v2, 4  ;;  %v228_v3 = vsel %vm56_vm0, %v186_v38, 0.0 }
  0x2a   :  { %v203_v47 = vrot.slane %v189_v43, %v422_v10  ;;  %v204_v48 = vcombine.high %v196_v44, %v196_v44  ;;  %v229_v49 = vrot.slane %v228_v3, 4  ;;  %v235_v50 = vsel %vm56_vm0, %v188_v42, 0.0 }
  0x2b   :  { %v217_v51 = vrot.slane %v216_v45, 2  ;;  %v223_v52 = vadd.f32 %v222_v46, %v221_v2  ;;  %v236_v53 = vrot.slane %v235_v50, 4  ;;  %v242_v54 = vsel %vm56_vm0, %v196_v44, 0.0 }
  0x2c   :  { %v205_v55 = vcombine.high %v203_v47, %v203_v47  ;;  %v230_v56 = vadd.f32 %v229_v49, %v228_v3  ;;  %v243_v57 = vrot.slane %v242_v54, 4  ;;  %v249_v58 = vsel %vm56_vm0, %v204_v48, 0.0 }
  0x2d   :  { %v218_v59 = vadd.f32 %v217_v51, %v216_v45  ;;  %v224_v60 = vrot.slane %v223_v52, 2  ;;  %v237_v61 = vadd.f32 %v236_v53, %v235_v50  ;;  %v250_v62 = vrot.slane %v249_v58, 4 }
  0x2e   :  { %v231_v63 = vrot.slane %v230_v56, 2  ;;  %v244_v10 = vadd.f32 %v243_v57, %v242_v54  ;;  %v256_v0 = vsel %vm56_vm0, %v203_v47, 0.0  ;;  %v263_v1 = vsel %vm56_vm0, %v205_v55, 0.0 }
  0x2f   :  { %v219_v4 = vrot.slane %v218_v59, 1  ;;  %v225_v5 = vadd.f32 %v224_v60, %v223_v52  ;;  %v238_v6 = vrot.slane %v237_v61, 2  ;;  %v251_v7 = vadd.f32 %v250_v62, %v249_v58 }
  0x30   :  { %v232_v8 = vadd.f32 %v231_v63, %v230_v56  ;;  %v245_v9 = vrot.slane %v244_v10, 2  ;;  %v257_v11 = vrot.slane %v256_v0, 4  ;;  %v264_v12 = vrot.slane %v263_v1, 4 }
  0x31   :  { %v220_v13 = vadd.f32 %v219_v4, %v218_v59  ;;  %v226_v14 = vrot.slane %v225_v5, 1  ;;  %v239_v15 = vadd.f32 %v238_v6, %v237_v61  ;;  %v252_v16 = vrot.slane %v251_v7, 2 }
  0x32   :  { %v233_v17 = vrot.slane %v232_v8, 1  ;;  %v246_v18 = vadd.f32 %v245_v9, %v244_v10  ;;  %v258_v19 = vadd.f32 %v257_v11, %v256_v0  ;;  %v265_v20 = vadd.f32 %v264_v12, %v263_v1 }
  0x33   :  { %v227_v21 = vadd.f32 %v226_v14, %v225_v5  ;;  %v240_v22 = vrot.slane %v239_v15, 1  ;;  %v253_v23 = vadd.f32 %v252_v16, %v251_v7  ;;  %373 = vrsqrt.f32 %v220_v13 }
  0x34   :  { %v234_v24 = vadd.f32 %v233_v17, %v232_v8  ;;  %v247_v25 = vrot.slane %v246_v18, 1  ;;  %v259_v26 = vrot.slane %v258_v19, 2  ;;  %v266_v27 = vrot.slane %v265_v20, 2 }
  0x35   :  { %v456_v28 = vadd.f32 %v240_v22, %v239_v15  ;;  %v254_v29 = vrot.slane %v253_v23, 1  ;;  %375 = vrsqrt.f32 %v227_v21  ;;  %vm272_vm1 = vcmp.eq.f32.partialorder %v220_v13, inf }
  0x36   :  { %v260_v30 = vadd.f32 %v259_v26, %v258_v19  ;;  %v267_v31 = vadd.f32 %v266_v27, %v265_v20  ;;  %v458_v32 = vadd.f32 %v247_v25, %v246_v18  ;;  %377 = vrsqrt.f32 %v234_v24 }
  0x37   :  { %v460_v33 = vadd.f32 %v254_v29, %v253_v23  ;;  %379 = vrsqrt.f32 %v456_v28  ;;  %v275_v39 = vand.u32 2147483648, %v220_v13  ;;  %vm274_vm2 = vcmp.eq.f32.partialorder %v220_v13, 0.0 }
  0x38   :  { %v261_v34 = vrot.slane %v260_v30, 1  ;;  %v268_v35 = vrot.slane %v267_v31, 1  ;;  %381 = vrsqrt.f32 %v458_v32  ;;  %vm279_vm4 = vcmp.eq.f32.partialorder %v227_v21, inf }
  0x39   :  { %383 = vrsqrt.f32 %v460_v33  ;;  %vm281_vm5 = vcmp.eq.f32.partialorder %v227_v21, 0.0  ;;  %v282_v41 = vand.u32 2147483648, %v227_v21  ;;  %vm286_vm6 = vcmp.eq.f32.partialorder %v234_v24, inf }
  0x3a   :  { %v463_v36 = vadd.f32 %v261_v34, %v260_v30  ;;  %v465_v37 = vadd.f32 %v268_v35, %v267_v31  ;;  %vm288_vm7 = vcmp.eq.f32.partialorder %v234_v24, 0.0  ;;  %v289_v43 = vand.u32 2147483648, %v234_v24 }
  0x3b   :  { %vm293_vm8 = vcmp.eq.f32.partialorder %v456_v28, inf  ;;  %vm295_vm9 = vcmp.eq.f32.partialorder %v456_v28, 0.0  ;;  %v296_v45 = vand.u32 2147483648, %v456_v28  ;;  %vm300_vm10 = vcmp.eq.f32.partialorder %v458_v32, inf }
  0x3c   :  { %385 = vrsqrt.f32 %v463_v36  ;;  %vm302_vm11 = vcmp.eq.f32.partialorder %v458_v32, 0.0  ;;  %v303_v47 = vand.u32 2147483648, %v458_v32  ;;  %vm307_vm12 = vcmp.eq.f32.partialorder %v460_v33, inf }
  0x3d   :  { %387 = vrsqrt.f32 %v465_v37  ;;  %vm309_vm13 = vcmp.eq.f32.partialorder %v460_v33, 0.0  ;;  %v310_v50 = vand.u32 2147483648, %v460_v33  ;;  %vm314_vm14 = vcmp.eq.f32.partialorder %v463_v36, inf }
  0x3e   :  { %vm316_vm15 = vcmp.eq.f32.partialorder %v463_v36, 0.0  ;;  %v317_v57 = vand.u32 2147483648, %v463_v36  ;;  %vm321_vm0 = vcmp.eq.f32.partialorder %v465_v37, inf  ;;  %v324_v8 = vand.u32 2147483648, %v465_v37 }
  0x40   :  { %v374_v38 = vpop.eup %373 }
  0x41   :  { %v271_v40 = vmul.f32 %v374_v38, %v220_v13 }
  0x42   :  { %v376_v44 = vpop.eup %375 }
  0x43   :  { %v273_v42 = vsel %vm272_vm1, %v220_v13, %v271_v40  ;;  %v378_v46 = vpop.eup %377  ;;  %v278_v3 = vmul.f32 %v376_v44, %v227_v21  ;;  %vm323_vm1 = vcmp.eq.f32.partialorder %v465_v37, 0.0 }
  0x44   :  { %v276_v2 = vsel %vm274_vm2, %v275_v39, %v273_v42  ;;  %v380_v48 = vpop.eup %379  ;;  %v285_v49 = vmul.f32 %v378_v46, %v234_v24 }
  0x45   :  { %v280_v51 = vsel %vm279_vm4, %v227_v21, %v278_v3  ;;  %v292_v52 = vmul.f32 %v380_v48, %v456_v28  ;;  %v327_v53 = vsel %vm326_vm3, %v276_v2, 0.0  ;;  %v382_v54 = vpop.eup %381 }
  0x46   :  { %v283_v55 = vsel %vm281_vm5, %v282_v41, %v280_v51  ;;  %v287_v56 = vsel %vm286_vm6, %v234_v24, %v285_v49  ;;  %v384_v58 = vpop.eup %383  ;;  %v299_v61 = vmul.f32 %v382_v54, %v458_v32 }
  0x47   :  { %v290_v59 = vsel %vm288_vm7, %v289_v43, %v287_v56  ;;  %v294_v60 = vsel %vm293_vm8, %v456_v28, %v292_v52  ;;  %v328_v62 = vsel %vm326_vm3, %v283_v55, 0.0  ;;  %v306_v0 = vmul.f32 %v384_v58, %v460_v33 }
  0x48   :  { %v297_v10 = vsel %vm295_vm9, %v296_v45, %v294_v60  ;;  %v329_v1 = vadd.f32 %v328_v62, %v327_v53  ;;  %v330_v4 = vsel %vm326_vm3, %v290_v59, 0.0  ;;  %v301_v6 = vsel %vm300_vm10, %v458_v32, %v299_v61 }
  0x49   :  { %v386_v63 = vpop.eup %385  ;;  %v332_v9 = vsel %vm326_vm3, %v297_v10, 0.0  ;;  %v304_v11 = vsel %vm302_vm11, %v303_v47, %v301_v6  ;;  %v308_v12 = vsel %vm307_vm12, %v460_v33, %v306_v0 }
  0x4a   :  { %v388_v5 = vpop.eup %387  ;;  %v313_v7 = vmul.f32 %v386_v63, %v463_v36  ;;  %v331_v14 = vadd.f32 %v330_v4, %v329_v1  ;;  %v311_v15 = vsel %vm309_vm13, %v310_v50, %v308_v12  ;;  %v334_v17 = vsel %vm326_vm3, %v304_v11, 0.0 }
  0x4b   :  { %v320_v13 = vmul.f32 %v388_v5, %v465_v37  ;;  %v336_v21 = vsel %vm326_vm3, %v311_v15, 0.0 }
  0x4c   :  { %v315_v16 = vsel %vm314_vm14, %v463_v36, %v313_v7  ;;  %v333_v20 = vadd.f32 %v332_v9, %v331_v14 }
  0x4d   :  { %v318_v18 = vsel %vm316_vm15, %v317_v57, %v315_v16  ;;  %v322_v19 = vsel %vm321_vm0, %v465_v37, %v320_v13 }
  0x4e   :  { %v325_v22 = vsel %vm323_vm1, %v324_v8, %v322_v19  ;;  %v335_v23 = vadd.f32 %v334_v17, %v333_v20  ;;  %v338_v24 = vsel %vm326_vm3, %v318_v18, 0.0 }
  0x4f   :  { %v340_v26 = vsel %vm326_vm3, %v325_v22, 0.0 }
  0x50   :  { %v337_v25 = vadd.f32 %v336_v21, %v335_v23 }
  0x52   :  { %v339_v27 = vadd.f32 %v338_v24, %v337_v25 }
  0x54   :  { %v341_v28 = vadd.f32 %v340_v26, %v339_v27 }
  0x56   :  { %342 = vadd.xlane.f32.xlu0 %v341_v28 }
  0xdf   :  { %v343_v29 = vpop.xlane.xlu0 %342 }
  0xe0   :  { %v344_v30 = vrot.slane %v343_v29, 4 }
  0xe2   :  { %v345_v31 = vadd.f32 %v344_v30, %v343_v29 }
  0xe4   :  { %v346_v32 = vrot.slane %v345_v31, 2 }
  0xe6   :  { %v347_v33 = vadd.f32 %v346_v32, %v345_v31 }
  0xe8   :  { %v348_v34 = vrot.slane %v347_v33, 1 }
  0xea   :  { %v349_v35 = vadd.f32 %v348_v34, %v347_v33 }
  0xec   :  { %369 = vpush %v349_v35 }
 0x11d   :  { %s370_s0 = spop %369 }
 0x11e   :  { %s353_s8 = smul.f32 0.0009765625, %s370_s0 }
 0x120   :  { %355 = sst [smem:[#allocation2]] %s353_s8 }
 0x121   :  { %363 = dma.smem_to_hbm %s400_s9, 16, %s530_s1, [#allocation3]  }
 0x122   :  { %397 = dma.done.wait [#allocation3], 16  }
 0x123   :  { %398 = vsyncadd [#allocation3], 4294967280 }
 0x124   :  { %367 = sfence }
 0x125   :  { %368 = vsyncpa [#allocation3], 1 }

// kernel: tile.78
= control target key start
LH: loop header
LB: loop body
LE: loop exit
PB: predicated region body
PF: predicated region fallthrough
CT: control target
= control target key end

     0   :  { %s22_s0 = inlined_call_operand.vmem [shape: f32[65], index: 0, kind: input, shape index: {}]   ;;  %s23_s1 = inlined_call_operand.vmem [shape: f32[4,65], index: 1, kind: output, shape index: {}]  }
   0x1   :  { %v4_v0 = vld [vmem:[%s22_s0] ss:$0 sm:$0xff] }
   0x2   :  { %5 = vst [vmem:[%s23_s1] sm:$0xf] %v4_v0 }

// kernel: tile.79
= control target key start
LH: loop header
LB: loop body
LE: loop exit
PB: predicated region body
PF: predicated region fallthrough
CT: control target
= control target key end

     0   :  { %vm14_vm0 = vcmask 498688   ;;  %vm28_vm1 = vcmask 515072   ;;  %vm8_vm2 = vcmask 531456   ;;  %s72_s8 = smov 2   ;;  %s73_s9 = smov 65   ;;  %vm18_vm3 = vcmask 31744   ;;  %s96_s0 = inlined_call_operand.vmem [shape: f32[4,65], index: 0, kind: input, shape index: {}]   ;;  %s97_s1 = inlined_call_operand.vmem [shape: f32[1,260], index: 1, kind: output, shape index: {}]  }
   0x1   :  { %v5_v0 = vld [vmem:[%s96_s0] sm:$0xf]  ;;  %s71_s0 = smov 67   ;;  %vm21_vm4 = vcmask 1048088   ;;  %vm32_vm5 = vcmask 15360   ;;  %vm35_vm6 = vcmask 1048072  }
   0x2   :  { %6 = vst [vmem:[#allocation1] sm:$0xf] %v5_v0  ;;  %vm41_vm7 = vcmask 547856  }
   0x9   :  { %v11_v1 = vld [vmem:[#allocation1 + $0x3] sm:$0x1]   ;;  %v25_v3 = vld [vmem:[#allocation1 + $0x1] sm:$0x1]   ;;  %v38_v6 = vld [vmem:[#allocation1 + $0x2] sm:$0x1]  }
   0xa   :  { %v13_v2 = vld [vmem:[#allocation1 + $0x3] sm:$0x1]   ;;  %v27_v5 = vld [vmem:[#allocation1 + $0x1] sm:$0x1]   ;;  %v7_v7 = vld [vmem:[#allocation1] sm:$0x1]   ;;  %39 = vrot.lane.b32.xlu1 %v38_v6, %s72_s8 }
   0xb   :  { %v15_v4 = vsel %vm14_vm0, %v13_v2, %v11_v1  ;;  %9 = vst.msk [vmem:[#allocation0] sm:$0x1] %vm8_vm2, %v7_v7   ;;  %v29_v8 = vsel %vm28_vm1, %v27_v5, %v25_v3 }
   0xc   :  { %16 = vrot.lane.b32.xlu0 %v15_v4, %s71_s0 }
  0x10   :  { %30 = vrot.lane.b32.xlu0 %v29_v8, %s73_s9 }
  0x7c   :  { %v40_v10 = vpop.permute.xlu1 %39  }
  0x7e   :  { %v17_v9 = vpop.permute.xlu0 %16  }
  0x7f   :  { %20 = vst.msk [vmem:[#allocation0 + $0x10] sm:$0x1] %vm18_vm3, %v17_v9  }
  0x80   :  { %23 = vst.msk [vmem:[#allocation0 + $0x8] sm:$0x1] %vm21_vm4, %v17_v9  }
  0x82   :  { %v31_v11 = vpop.permute.xlu0 %30  }
  0x83   :  { %34 = vst.msk [vmem:[#allocation0 + $0x8] sm:$0x1] %vm32_vm5, %v31_v11  }
  0x84   :  { %36 = vst.msk [vmem:[#allocation0] sm:$0x1] %vm35_vm6, %v31_v11  }
  0x85   :  { %43 = vst.msk [vmem:[#allocation0 + $0x8] sm:$0x1] %vm41_vm7, %v40_v10  }
  0x86   :  { %v59_v12 = vld [vmem:[#allocation0 + $0x10] sm:$0x1] }
  0x87   :  { %67 = vst [vmem:[%s97_s1 + $0x2] sm:$0x1] %v59_v12 }
  0x8b   :  { %v48_v13 = vld [vmem:[#allocation0] sm:$0x1] }
  0x8c   :  { %51 = vst [vmem:[%s97_s1] sm:$0x1] %v48_v13  ;;  %v53_v14 = vld [vmem:[#allocation0 + $0x8] sm:$0x1] }
  0x8d   :  { %66 = vst [vmem:[%s97_s1 + $0x1] sm:$0x1] %v53_v14 }

// kernel: critic_forward.18
= control target key start
LH: loop header
LB: loop body
LE: loop exit
PB: predicated region body
PF: predicated region fallthrough
CT: control target
= control target key end

     0   :  { %s2242_s15 = smov 0   ;;  %s2739_s0 = inlined_call_operand.vmem [shape: bf16[2,4,256], index: 0, kind: input, shape index: {}]   ;;  %s2740_s1 = inlined_call_operand.vmem [shape: bf16[3,256,260], index: 1, kind: input, shape index: {}]   ;;  %s2741_s2 = inlined_call_operand.vmem [shape: f32[1,260], index: 2, kind: input, shape index: {}]   ;;  %s2742_s3 = inlined_call_operand.vmem [shape: f32[4,260], index: 3, kind: input, shape index: {}]   ;;  %s2743_s4 = inlined_call_operand.vmem [shape: bf16[2,4,260], index: 4, kind: output, shape index: {}]  }
   0x1 LB: > { %s1644_s16 = sadd.s32 4294967295, %s2212_s15   ;;  %p1648_p0 = scmp.ge.s32.totalorder %s2212_s15, 1  ;;  %s2212_s15 = sphi %s2242_s15, %s14_s15  }
   0x2   : > { %p162_p1 = scmp.lt.s32.totalorder %s2212_s15, 3 }
   0x4   : > { %p163_p2 = pnand %p1648_p0, %p162_p1 }
   0x5   : > { %p188_p3 = scmp.lt.s32.totalorder (!%p163_p2), %s1644_s16, 1 }
   0x6   : > { %166 = sbr.rel (%p163_p2) target bundleno = 525 (0x20d), region = 36 }
   0xb   : > { %v2214_v0 = vmov 0   ;;  %v200_v1 = vlaneseq  ;;  %v2013_v2 = vld [vmem:[%s2740_s1 + $0xac] ss:$12 sps:$4 sm:$0xff]   ;;  %s2745_s16 = smov (!%p188_p3, %s1644_s16), 1  ;;  %v2015_v3 = vld [vmem:[%s2740_s1 + $0xa8] ss:$12 sps:$4 sm:$0xff]  }
   0xc   : > { %266 = vmatprep.mubr.bf16.mxu1 %v2214_v0  ;;  %708 = vmatprep.subr.bf16.mxu0 %v2013_v2  ;;  %v2016_v6 = vld [vmem:[%s2740_s1 + $0x94] ss:$12 sps:$4 sm:$0xff]   ;;  %s1934_s23 = sshll.u32 %s2745_s16, 2  ;;  %vm227_vm0 = vcmask 1041408   ;;  %v2018_v7 = vld [vmem:[%s2740_s1 + $0x90] ss:$12 sps:$4 sm:$0xff]  }
   0xd   : > { %v2258_v4 = vshrl.u32 %v200_v1, 7  ;;  %v203_v5 = vand.u32 127, %v200_v1  ;;  %709 = vmatpush1.bf16.msra.mxu0 %v2015_v3  ;;  %s192_s28 = scalar_lea.vmem %s2739_s0, %s1934_s23  ;;  %v2019_v10 = vld [vmem:[%s2740_s1 + $0x7c] ss:$12 sps:$4 sm:$0xff]   ;;  %v2215_v14 = vmov 0.0   ;;  %vm223_vm3 = vcmask 31744  }
   0xe   : > { %710 = vmatprep.subr.bf16.mxu0 %v2016_v6  ;;  %v2274_v11 = vld.sshfl [vmem:[%s192_s28] sm:$0x33 pattern:$0x76325410]  ;;  %v2021_v16 = vld [vmem:[%s2740_s1 + $0x78] ss:$12 sps:$4 sm:$0xff]  }
   0xf   : > { %v204_v8 = vadd.s32 1, %v203_v5  ;;  %v209_v9 = vadd.s32 1, %v2258_v4  ;;  %v2278_v12 = vcombine.high %v2274_v11, %v2274_v11  ;;  %v229_v13 = vsel %vm227_vm0, %v2274_v11, 0  ;;  %v2022_v18 = vld [vmem:[%s2740_s1 + $0x64] ss:$12 sps:$4 sm:$0xff]   ;;  %s2001_s27 = smul.u32 6, %s2745_s16 }
  0x10   : > { %v2024_v19 = vld [vmem:[%s2740_s1 + $0x60] ss:$12 sps:$4 sm:$0xff]   ;;  %v2039_v22 = vld [vmem:[%s2740_s1 + $0x170] ss:$12 sps:$4 sm:$0xff]   ;;  %v2027_v23 = vld [vmem:[%s2740_s1 + $0x48] ss:$12 sps:$4 sm:$0xff]  }
  0x11   : > { %vm205_vm1 = vcmp.eq.s32.totalorder %v2258_v4, %v204_v8  ;;  %711 = vmatpush1.bf16.msra.mxu0 %v2018_v7  ;;  %1655 = vmatprep.subr.msk.bf16.mxu1 %vm227_vm0, %v2278_v12  ;;  %vm210_vm2 = vcmp.eq.s32.totalorder %v203_v5, %v209_v9  ;;  %v2025_v21 = vld [vmem:[%s2740_s1 + $0x4c] ss:$12 sps:$4 sm:$0xff]   ;;  %v2028_v25 = vld [vmem:[%s2740_s1 + $0x34] ss:$12 sps:$4 sm:$0xff]   ;;  %v2041_v26 = vld [vmem:[%s2740_s1 + $0xb0] ss:$12 sps:$4 sm:$0xff]   ;;  %s197_s30 = scalar_lea.vmem %s2743_s4, %s2001_s27 }
  0x12   : > { %v1652_v15 = vsel %vm205_vm1, 1.0, %v2215_v14  ;;  %712 = vmatprep.subr.bf16.mxu0 %v2019_v10  ;;  %249 = vmatpush1.bf16.msra.mxu1 %v229_v13  ;;  %v1653_v20 = vsel %vm210_vm2, 1.0, %v2215_v14  ;;  %v2044_v27 = vld [vmem:[%s2740_s1 + $0x158] ss:$12 sps:$4 sm:$0xff]   ;;  %v2030_v28 = vld [vmem:[%s2740_s1 + $0x30] ss:$12 sps:$4 sm:$0xff]  }
  0x13   : > { %v208_v17 = vpack.c.bf16 %v1652_v15, %v1652_v15  ;;  %1657 = vmatprep.subr.msk.bf16.mxu1 %vm227_vm0, %v2278_v12  ;;  %v213_v24 = vpack.c.bf16 %v1653_v20, %v1653_v20  ;;  %v2031_v29 = vld [vmem:[%s2740_s1 + $0x1c] ss:$12 sps:$4 sm:$0xff]   ;;  %v2046_v30 = vld [vmem:[%s2740_s1 + $0x98] ss:$12 sps:$4 sm:$0xff]   ;;  %v2049_v31 = vld [vmem:[%s2740_s1 + $0x140] ss:$12 sps:$4 sm:$0xff]  }
  0x14   : > { %v2033_v32 = vld [vmem:[%s2740_s1 + $0x18] ss:$12 sps:$4 sm:$0xff]   ;;  %v2051_v34 = vld [vmem:[%s2740_s1 + $0x80] ss:$12 sps:$4 sm:$0xff]   ;;  %v2054_v35 = vld [vmem:[%s2740_s1 + $0x128] ss:$12 sps:$4 sm:$0xff]  }
  0x15   : > { %713 = vmatpush1.bf16.msra.mxu0 %v2021_v16  ;;  %1656 = vmatmul.mubr.msk.bf16.vlgmr.msra.gmra.mxu1 %vm223_vm3, %v208_v17  ;;  %v2034_v33 = vld [vmem:[%s2740_s1 + $0x4] ss:$12 sps:$4 sm:$0xff]   ;;  %v2036_v36 = vld [vmem:[%s2740_s1] ss:$12 sps:$4 sm:$0xff]   ;;  %v2056_v38 = vld [vmem:[%s2740_s1 + $0x68] ss:$12 sps:$4 sm:$0xff]  }
  0x16   : > { %714 = vmatprep.subr.bf16.mxu0 %v2022_v18  ;;  %295 = vmatpush1.bf16.msra.mxu1 %v229_v13  ;;  %v2037_v37 = vld [vmem:[%s2740_s1 + $0x16c] ss:$12 sps:$4 sm:$0xff]   ;;  %v2059_v39 = vld [vmem:[%s2740_s1 + $0x110] ss:$12 sps:$4 sm:$0xff]   ;;  %v2040_v40 = vld [vmem:[%s2740_s1 + $0x168] ss:$12 sps:$4 sm:$0xff]  }
  0x17   : > { %312 = vmatprep.mubr.bf16.mxu1 %v2214_v0  ;;  %1935 = vmatprep.subr.bf16.mxu1 %v2039_v22  ;;  %v2042_v41 = vld [vmem:[%s2740_s1 + $0x154] ss:$12 sps:$4 sm:$0xff]   ;;  %v2045_v42 = vld [vmem:[%s2740_s1 + $0x150] ss:$12 sps:$4 sm:$0xff]   ;;  %v2064_v45 = vld [vmem:[%s2740_s1 + $0xf8] ss:$12 sps:$4 sm:$0xff]  }
  0x18   : > { %v2061_v43 = vld [vmem:[%s2740_s1 + $0x50] ss:$12 sps:$4 sm:$0xff]   ;;  %v2066_v46 = vld [vmem:[%s2740_s1 + $0x38] ss:$12 sps:$4 sm:$0xff]   ;;  %v2069_v47 = vld [vmem:[%s2740_s1 + $0xe0] ss:$12 sps:$4 sm:$0xff]  }
  0x19   : > { %715 = vmatpush1.bf16.msra.mxu0 %v2024_v19  ;;  %v2047_v44 = vld [vmem:[%s2740_s1 + $0x13c] ss:$12 sps:$4 sm:$0xff]   ;;  %v2050_v48 = vld [vmem:[%s2740_s1 + $0x138] ss:$12 sps:$4 sm:$0xff]   ;;  %v2071_v50 = vld [vmem:[%s2740_s1 + $0x20] ss:$12 sps:$4 sm:$0xff]  }
  0x1a   : > { %716 = vmatprep.subr.bf16.mxu0 %v2025_v21  ;;  %v2052_v49 = vld [vmem:[%s2740_s1 + $0x124] ss:$12 sps:$4 sm:$0xff]   ;;  %v2055_v51 = vld [vmem:[%s2740_s1 + $0x120] ss:$12 sps:$4 sm:$0xff]   ;;  %v2060_v53 = vld [vmem:[%s2740_s1 + $0x108] ss:$12 sps:$4 sm:$0xff]  }
  0x1b   : > { %v2057_v52 = vld [vmem:[%s2740_s1 + $0x10c] ss:$12 sps:$4 sm:$0xff]   ;;  %v2062_v54 = vld [vmem:[%s2740_s1 + $0xf4] ss:$12 sps:$4 sm:$0xff]   ;;  %v2065_v55 = vld [vmem:[%s2740_s1 + $0xf0] ss:$12 sps:$4 sm:$0xff]  }
  0x1c   : > { %v2067_v56 = vld [vmem:[%s2740_s1 + $0xdc] ss:$12 sps:$4 sm:$0xff]   ;;  %v2070_v57 = vld [vmem:[%s2740_s1 + $0xd8] ss:$12 sps:$4 sm:$0xff]   ;;  %v2075_v60 = vld [vmem:[%s2740_s1 + $0xc0] ss:$12 sps:$4 sm:$0xff]  }
  0x1d   : > { %717 = vmatpush1.bf16.msra.mxu0 %v2027_v23  ;;  %1658 = vmatmul.mubr.msk.bf16.vlgmr.msra.gmra.mxu1 %vm223_vm3, %v213_v24  ;;  %v2072_v58 = vld [vmem:[%s2740_s1 + $0xc4] ss:$12 sps:$4 sm:$0xff]   ;;  %v2074_v59 = vld [vmem:[%s2740_s1 + $0xc8] ss:$12 sps:$4 sm:$0xff]   ;;  %v2079_v62 = vld [vmem:[%s2740_s1 + $0x22c] ss:$12 sps:$4 sm:$0xff]  }
  0x1e   : > { %718 = vmatprep.subr.bf16.mxu0 %v2028_v25  ;;  %1936 = vmatpush3.bf16.msra.mxu1 %v2041_v26  ;;  %v2076_v61 = vld [vmem:[%s2740_s1 + $0x8] ss:$12 sps:$4 sm:$0xff]   ;;  %v2080_v63 = vld [vmem:[%s2740_s1 + $0x2f0] ss:$12 sps:$4 sm:$0xff]   ;;  %v2085_v9 = vld [vmem:[%s2740_s1 + $0x2d8] ss:$12 sps:$4 sm:$0xff]  }
  0x1f   : > { %1937 = vmatprep.subr.bf16.mxu1 %v2044_v27  ;;  %v2077_v3 = vld [vmem:[%s2740_s1 + $0x228] ss:$12 sps:$4 sm:$0xff]   ;;  %v2081_v5 = vld [vmem:[%s2740_s1 + $0x230] ss:$12 sps:$4 sm:$0xff]   ;;  %v2086_v14 = vld [vmem:[%s2740_s1 + $0x218] ss:$12 sps:$4 sm:$0xff]  }
  0x20   : > { %v2084_v8 = vld [vmem:[%s2740_s1 + $0x214] ss:$12 sps:$4 sm:$0xff]   ;;  %v2082_v13 = vld [vmem:[%s2740_s1 + $0x210] ss:$12 sps:$4 sm:$0xff]   ;;  %v2087_v19 = vld [vmem:[%s2740_s1 + $0x1f8] ss:$12 sps:$4 sm:$0xff]  }
  0x21   : > { %719 = vmatpush1.bf16.msra.mxu0 %v2030_v28  ;;  %v2089_v15 = vld [vmem:[%s2740_s1 + $0x1fc] ss:$12 sps:$4 sm:$0xff]   ;;  %v2090_v16 = vld [vmem:[%s2740_s1 + $0x2c0] ss:$12 sps:$4 sm:$0xff]   ;;  %v2094_v21 = vld [vmem:[%s2740_s1 + $0x1e4] ss:$12 sps:$4 sm:$0xff]  }
  0x22   : > { %720 = vmatprep.subr.bf16.mxu0 %v2031_v29  ;;  %1938 = vmatpush3.bf16.msra.mxu1 %v2046_v30  ;;  %v2091_v20 = vld [vmem:[%s2740_s1 + $0x200] ss:$12 sps:$4 sm:$0xff]   ;;  %v2096_v25 = vld [vmem:[%s2740_s1 + $0x1e8] ss:$12 sps:$4 sm:$0xff]   ;;  %v2100_v27 = vld [vmem:[%s2740_s1 + $0x290] ss:$12 sps:$4 sm:$0xff]  }
  0x23   : > { %1939 = vmatprep.subr.bf16.mxu1 %v2049_v31  ;;  %v2092_v24 = vld [vmem:[%s2740_s1 + $0x1e0] ss:$12 sps:$4 sm:$0xff]   ;;  %v2097_v28 = vld [vmem:[%s2740_s1 + $0x1c8] ss:$12 sps:$4 sm:$0xff]   ;;  %v2101_v29 = vld [vmem:[%s2740_s1 + $0x1d0] ss:$12 sps:$4 sm:$0xff]  }
  0x24   : > { %v2099_v26 = vld [vmem:[%s2740_s1 + $0x1cc] ss:$12 sps:$4 sm:$0xff]   ;;  %v2104_v30 = vld [vmem:[%s2740_s1 + $0x1b4] ss:$12 sps:$4 sm:$0xff]   ;;  %vm1584_vm4 = vcmask 1043458   ;;  %vm1586_vm6 = vcmask 29700  }
  0x25   : > { %721 = vmatpush1.bf16.msra.mxu0 %v2033_v32  ;;  %v2105_v31 = vld [vmem:[%s2740_s1 + $0x278] ss:$12 sps:$4 sm:$0xff]   ;;  %v2102_v32 = vld [vmem:[%s2740_s1 + $0x1b0] ss:$12 sps:$4 sm:$0xff]   ;;  %vm1585_vm5 = vmor %vm1584_vm4, %vm227_vm0 }
  0x26   : > { %722 = vmatprep.subr.bf16.mxu0 %v2034_v33  ;;  %1940 = vmatpush3.bf16.msra.mxu1 %v2051_v34  ;;  %v2106_v33 = vld [vmem:[%s2740_s1 + $0x1b8] ss:$12 sps:$4 sm:$0xff]   ;;  %v2109_v34 = vld [vmem:[%s2740_s1 + $0x19c] ss:$12 sps:$4 sm:$0xff]   ;;  %vm1587_vm7 = vmor %vm1586_vm6, %vm1585_vm5 }
  0x27   : > { %1941 = vmatprep.subr.bf16.mxu1 %v2054_v35  ;;  %v2110_v35 = vld [vmem:[%s2740_s1 + $0x260] ss:$12 sps:$4 sm:$0xff]  }
  0x29   : > { %723 = vmatpush1.bf16.msra.mxu0 %v2036_v36  ;;  %v2107_v36 = vld [vmem:[%s2740_s1 + $0x198] ss:$12 sps:$4 sm:$0xff]  }
  0x2a   : > { %724 = vmatprep.subr.bf16.mxu0 %v2037_v37  ;;  %1942 = vmatpush3.bf16.msra.mxu1 %v2056_v38  ;;  %v2111_v37 = vld [vmem:[%s2740_s1 + $0x1a0] ss:$12 sps:$4 sm:$0xff]   ;;  %v2114_v38 = vld [vmem:[%s2740_s1 + $0x184] ss:$12 sps:$4 sm:$0xff]  }
  0x2b   : > { %1943 = vmatprep.subr.bf16.mxu1 %v2059_v39  ;;  %v2115_v39 = vld [vmem:[%s2740_s1 + $0x248] ss:$12 sps:$4 sm:$0xff]  }
  0x2d   : > { %725 = vmatpush2.bf16.msra.mxu0 %v2040_v40  ;;  %v2112_v40 = vld [vmem:[%s2740_s1 + $0x180] ss:$12 sps:$4 sm:$0xff]  }
  0x2e   : > { %726 = vmatprep.subr.bf16.mxu0 %v2042_v41  ;;  %1944 = vmatpush3.bf16.msra.mxu1 %v2061_v43  ;;  %v2116_v41 = vld [vmem:[%s2740_s1 + $0x188] ss:$12 sps:$4 sm:$0xff]   ;;  %v2122_v43 = vld [vmem:[%s2740_s1 + $0x3ac] ss:$12 sps:$4 sm:$0xff]  }
  0x2f   : > { %1945 = vmatprep.subr.bf16.mxu1 %v2064_v45  ;;  %v2120_v45 = vld [vmem:[%s2740_s1 + $0x3a8] ss:$12 sps:$4 sm:$0xff]  }
  0x31   : > { %727 = vmatpush2.bf16.msra.mxu0 %v2045_v42  ;;  %v2119_v42 = vld [vmem:[%s2740_s1 + $0x2ec] ss:$12 sps:$4 sm:$0xff]  }
  0x32   : > { %728 = vmatprep.subr.bf16.mxu0 %v2047_v44  ;;  %1946 = vmatpush3.bf16.msra.mxu1 %v2066_v46  ;;  %v2117_v44 = vld [vmem:[%s2740_s1 + $0x2e8] ss:$12 sps:$4 sm:$0xff]  }
  0x33   : > { %1947 = vmatprep.subr.bf16.mxu1 %v2069_v47  ;;  %v2125_v46 = vld [vmem:[%s2740_s1 + $0x2d4] ss:$12 sps:$4 sm:$0xff]  }
  0x34   : > { %v2128_v47 = vld [vmem:[%s2740_s1 + $0x394] ss:$12 sps:$4 sm:$0xff]  }
  0x35   : > { %729 = vmatpush2.bf16.msra.mxu0 %v2050_v48 }
  0x36   : > { %730 = vmatprep.subr.bf16.mxu0 %v2052_v49  ;;  %1948 = vmatpush3.bf16.msra.mxu1 %v2071_v50  ;;  %v2123_v49 = vld [vmem:[%s2740_s1 + $0x2d0] ss:$12 sps:$4 sm:$0xff]  }
  0x37   : > { %1949 = vmatprep.subr.bf16.mxu1 %v2074_v59  ;;  %v2126_v50 = vld [vmem:[%s2740_s1 + $0x390] ss:$12 sps:$4 sm:$0xff]   ;;  %v2143_v59 = vld [vmem:[%s2740_s1 + $0x28c] ss:$12 sps:$4 sm:$0xff]  }
  0x39   : > { %731 = vmatpush2.bf16.msra.mxu0 %v2055_v51  ;;  %v2131_v51 = vld [vmem:[%s2740_s1 + $0x2bc] ss:$12 sps:$4 sm:$0xff]  }
  0x3a   : > { %732 = vmatprep.subr.bf16.mxu0 %v2057_v52  ;;  %1950 = vmatpush3.bf16.msra.mxu1 %v2076_v61  ;;  %v2134_v52 = vld [vmem:[%s2740_s1 + $0x37c] ss:$12 sps:$4 sm:$0xff]  }
  0x3b   : > { %1047 = vmatprep.subr.bf16.mxu1 %v2079_v62  ;;  %v2141_v61 = vld [vmem:[%s2740_s1 + $0x288] ss:$12 sps:$4 sm:$0xff]  }
  0x3c   : > { %v2144_v62 = vld [vmem:[%s2740_s1 + $0x348] ss:$12 sps:$4 sm:$0xff]  }
  0x3d   : > { %733 = vmatpush2.bf16.msra.mxu0 %v2060_v53  ;;  %v2129_v53 = vld [vmem:[%s2740_s1 + $0x2b8] ss:$12 sps:$4 sm:$0xff]  }
  0x3e   : > { %734 = vmatprep.subr.bf16.mxu0 %v2062_v54  ;;  %v2132_v54 = vld [vmem:[%s2740_s1 + $0x378] ss:$12 sps:$4 sm:$0xff]  }
  0x41   : > { %735 = vmatpush2.bf16.msra.mxu0 %v2065_v55  ;;  %v2137_v55 = vld [vmem:[%s2740_s1 + $0x2a4] ss:$12 sps:$4 sm:$0xff]  }
  0x42   : > { %736 = vmatprep.subr.bf16.mxu0 %v2067_v56  ;;  %v2140_v56 = vld [vmem:[%s2740_s1 + $0x364] ss:$12 sps:$4 sm:$0xff]  }
  0x45   : > { %737 = vmatpush2.bf16.msra.mxu0 %v2070_v57  ;;  %v2135_v57 = vld [vmem:[%s2740_s1 + $0x2a0] ss:$12 sps:$4 sm:$0xff]  }
  0x46   : > { %738 = vmatprep.subr.bf16.mxu0 %v2072_v58  ;;  %v2138_v58 = vld [vmem:[%s2740_s1 + $0x360] ss:$12 sps:$4 sm:$0xff]  }
  0x49   : > { %739 = vmatpush2.bf16.msra.mxu0 %v2075_v60  ;;  %v2146_v60 = vld [vmem:[%s2740_s1 + $0x34c] ss:$12 sps:$4 sm:$0xff]  }
  0x4a   : > { %1957 = vmatprep.subr.bf16.mxu0 %v2080_v63  ;;  %v2149_v63 = vld [vmem:[%s2740_s1 + $0x274] ss:$12 sps:$4 sm:$0xff]  }
  0xd5   : > { %v268_v0 = vpop.f32.mrf.mxu1 }
  0xd6   : > { %v275_v6 = vpack.c.bf16 %v268_v0, %v268_v0  ;;  %v2152_v0 = vld [vmem:[%s2740_s1 + $0x334] ss:$12 sps:$4 sm:$0xff]  }
  0xd7   : > { %v270_v1 = vpop.f32.mrf.mxu1 }
  0xd8   : > { %v276_v2 = vpack.c.bf16 %v270_v1, %v270_v1  ;;  %v2147_v1 = vld [vmem:[%s2740_s1 + $0x270] ss:$12 sps:$4 sm:$0xff]  }
  0xd9   : > { %v272_v7 = vpop.f32.mrf.mxu1 }
  0xda   : > { %740 = vmatprep.mubr.bf16.mxu0 %v276_v2  ;;  %781 = vmatprep.mubr.bf16.mxu1 %v276_v2  ;;  %v2150_v2 = vld [vmem:[%s2740_s1 + $0x330] ss:$12 sps:$4 sm:$0xff]   ;;  %v2156_v7 = vld [vmem:[%s2740_s1 + $0x318] ss:$12 sps:$4 sm:$0xff]  }
  0xdb   : > { %v273_v10 = vpop.f32.mrf.mxu1  ;;  %741 = vmatmul.mubr.bf16.vlgmr.msra.gmra.mxu0 %v275_v6  ;;  %782 = vmatmul.mubr.bf16.vlgmr.msra.gmra.mxu1 %v275_v6  ;;  %v2153_v6 = vld [vmem:[%s2740_s1 + $0x258] ss:$12 sps:$4 sm:$0xff]  }
  0xdc   : > { %1048 = vmatpush1.bf16.msra.mxu1 %v2077_v3  ;;  %1958 = vmatpush3.bf16.msra.mxu0 %v2081_v5  ;;  %v2155_v3 = vld [vmem:[%s2740_s1 + $0x25c] ss:$12 sps:$4 sm:$0xff]   ;;  %v2159_v10 = vld [vmem:[%s2740_s1 + $0x240] ss:$12 sps:$4 sm:$0xff]  }
  0xdd   : > { %1049 = vmatprep.subr.bf16.mxu1 %v2084_v8  ;;  %1959 = vmatprep.subr.bf16.mxu0 %v2085_v9  ;;  %v2448_v17 = vpop.f32.mrf.mxu1  ;;  %v2158_v5 = vld [vmem:[%s2740_s1 + $0x31c] ss:$12 sps:$4 sm:$0xff]   ;;  %v2161_v8 = vld [vmem:[%s2740_s1 + $0x244] ss:$12 sps:$4 sm:$0xff]  }
  0xde   : > { %1120 = vmatprep.mubr.bf16.mxu0 %v2278_v12  ;;  %1079 = vmatprep.mubr.bf16.mxu1 %v2278_v12  ;;  %v2095_v12 = vld [vmem:[%s2740_s1 + $0x2a8] ss:$12 sps:$4 sm:$0xff]   ;;  %v2164_v9 = vld [vmem:[%s2740_s1 + $0x304] ss:$12 sps:$4 sm:$0xff]  }
  0xdf   : > { %v316_v18 = vpop.f32.mrf.mxu1 }
  0xe0   : > { %1050 = vmatpush1.bf16.msra.mxu1 %v2082_v13  ;;  %1960 = vmatpush3.bf16.msra.mxu0 %v2086_v14  ;;  %v2536_v48 = vpack.c.bf16 %v316_v18, %v316_v18  ;;  %v2162_v13 = vld [vmem:[%s2740_s1 + $0x300] ss:$12 sps:$4 sm:$0xff]   ;;  %v2169_v18 = vld [vmem:[%s2740_s1 + $0x3b0] ss:$12 sps:$4 sm:$0xff]  }
  0xe1   : > { %1051 = vmatprep.subr.bf16.mxu1 %v2089_v15  ;;  %1961 = vmatprep.subr.bf16.mxu0 %v2090_v16  ;;  %v318_v22 = vpop.f32.mrf.mxu1  ;;  %v2167_v14 = vld [vmem:[%s2740_s1 + $0x46c] ss:$12 sps:$4 sm:$0xff]   ;;  %v2168_v15 = vld [vmem:[%s2740_s1 + $0x470] ss:$12 sps:$4 sm:$0xff]   ;;  %v2165_v16 = vld [vmem:[%s2740_s1 + $0x468] ss:$12 sps:$4 sm:$0xff]  }
  0xe2   : > { %v2177_v22 = vld [vmem:[%s2740_s1 + $0x43c] ss:$12 sps:$4 sm:$0xff]  }
  0xe3   : > { %v319_v23 = vpop.f32.mrf.mxu1 }
  0xe4   : > { %1052 = vmatpush1.bf16.msra.mxu1 %v2087_v19  ;;  %1962 = vmatpush3.bf16.msra.mxu0 %v2091_v20  ;;  %v2172_v19 = vld [vmem:[%s2740_s1 + $0x454] ss:$12 sps:$4 sm:$0xff]   ;;  %v2173_v20 = vld [vmem:[%s2740_s1 + $0x458] ss:$12 sps:$4 sm:$0xff]  }
  0xe5   : > { %1053 = vmatprep.subr.bf16.mxu1 %v2094_v21  ;;  %1963 = vmatprep.subr.bf16.mxu0 %v2095_v12  ;;  %v2170_v21 = vld [vmem:[%s2740_s1 + $0x450] ss:$12 sps:$4 sm:$0xff]   ;;  %v2174_v12 = vld [vmem:[%s2740_s1 + $0x398] ss:$12 sps:$4 sm:$0xff]  }
  0xe6   : > { %v2175_v23 = vld [vmem:[%s2740_s1 + $0x438] ss:$12 sps:$4 sm:$0xff]  }
  0xe8   : > { %1054 = vmatpush1.bf16.msra.mxu1 %v2092_v24  ;;  %1964 = vmatpush3.bf16.msra.mxu0 %v2096_v25  ;;  %v2179_v24 = vld [vmem:[%s2740_s1 + $0x380] ss:$12 sps:$4 sm:$0xff]   ;;  %v2182_v25 = vld [vmem:[%s2740_s1 + $0x424] ss:$12 sps:$4 sm:$0xff]  }
  0xe9   : > { %1055 = vmatprep.subr.bf16.mxu1 %v2099_v26  ;;  %1965 = vmatprep.subr.bf16.mxu0 %v2100_v27  ;;  %v2183_v26 = vld [vmem:[%s2740_s1 + $0x428] ss:$12 sps:$4 sm:$0xff]   ;;  %v2180_v27 = vld [vmem:[%s2740_s1 + $0x420] ss:$12 sps:$4 sm:$0xff]  }
  0xec   : > { %1056 = vmatpush1.bf16.msra.mxu1 %v2097_v28  ;;  %1966 = vmatpush3.bf16.msra.mxu0 %v2101_v29  ;;  %v2184_v28 = vld [vmem:[%s2740_s1 + $0x368] ss:$12 sps:$4 sm:$0xff]   ;;  %v2187_v29 = vld [vmem:[%s2740_s1 + $0x40c] ss:$12 sps:$4 sm:$0xff]  }
  0xed   : > { %1057 = vmatprep.subr.bf16.mxu1 %v2104_v30  ;;  %1967 = vmatprep.subr.bf16.mxu0 %v2105_v31  ;;  %v2188_v30 = vld [vmem:[%s2740_s1 + $0x410] ss:$12 sps:$4 sm:$0xff]   ;;  %v2185_v31 = vld [vmem:[%s2740_s1 + $0x408] ss:$12 sps:$4 sm:$0xff]  }
  0xf0   : > { %1058 = vmatpush1.bf16.msra.mxu1 %v2102_v32  ;;  %1968 = vmatpush3.bf16.msra.mxu0 %v2106_v33  ;;  %v2189_v32 = vld [vmem:[%s2740_s1 + $0x350] ss:$12 sps:$4 sm:$0xff]   ;;  %v2192_v33 = vld [vmem:[%s2740_s1 + $0x3f4] ss:$12 sps:$4 sm:$0xff]  }
  0xf1   : > { %1059 = vmatprep.subr.bf16.mxu1 %v2109_v34  ;;  %1969 = vmatprep.subr.bf16.mxu0 %v2110_v35  ;;  %v2193_v34 = vld [vmem:[%s2740_s1 + $0x3f8] ss:$12 sps:$4 sm:$0xff]   ;;  %v2190_v35 = vld [vmem:[%s2740_s1 + $0x3f0] ss:$12 sps:$4 sm:$0xff]  }
  0xf4   : > { %1060 = vmatpush1.bf16.msra.mxu1 %v2107_v36  ;;  %1970 = vmatpush3.bf16.msra.mxu0 %v2111_v37  ;;  %v2194_v36 = vld [vmem:[%s2740_s1 + $0x338] ss:$12 sps:$4 sm:$0xff]   ;;  %v2197_v37 = vld [vmem:[%s2740_s1 + $0x3dc] ss:$12 sps:$4 sm:$0xff]  }
  0xf5   : > { %1061 = vmatprep.subr.bf16.mxu1 %v2114_v38  ;;  %1971 = vmatprep.subr.bf16.mxu0 %v2115_v39  ;;  %v2198_v38 = vld [vmem:[%s2740_s1 + $0x3e0] ss:$12 sps:$4 sm:$0xff]   ;;  %v2195_v39 = vld [vmem:[%s2740_s1 + $0x3d8] ss:$12 sps:$4 sm:$0xff]  }
  0xf8   : > { %1062 = vmatpush1.bf16.msra.mxu1 %v2112_v40  ;;  %1972 = vmatpush3.bf16.msra.mxu0 %v2116_v41  ;;  %v2199_v40 = vld [vmem:[%s2740_s1 + $0x320] ss:$12 sps:$4 sm:$0xff]   ;;  %v2202_v41 = vld [vmem:[%s2740_s1 + $0x3c4] ss:$12 sps:$4 sm:$0xff]  }
  0xf9   : > { %1063 = vmatprep.subr.bf16.mxu1 %v2119_v42  ;;  %1449 = vmatprep.subr.bf16.mxu0 %v2122_v43  ;;  %v2203_v42 = vld [vmem:[%s2740_s1 + $0x3c8] ss:$12 sps:$4 sm:$0xff]   ;;  %v2200_v43 = vld [vmem:[%s2740_s1 + $0x3c0] ss:$12 sps:$4 sm:$0xff]  }
  0xfb   : > { %1121 = vmatmul.mubr.bf16.vlgmr.msra.gmra.mxu0 %v2274_v11 }
  0xfc   : > { %1064 = vmatpush2.bf16.msra.mxu1 %v2117_v44  ;;  %1450 = vmatpush1.bf16.msra.mxu0 %v2120_v45  ;;  %v2204_v44 = vld [vmem:[%s2740_s1 + $0x308] ss:$12 sps:$4 sm:$0xff]   ;;  %v321_v45 = vpack.c.bf16 %v2448_v17, %v2448_v17 }
  0xfd   : > { %1065 = vmatprep.subr.bf16.mxu1 %v2125_v46  ;;  %1451 = vmatprep.subr.bf16.mxu0 %v2128_v47 }
  0xfe   : > { %1481 = vmatprep.mubr.bf16.mxu0 %v2536_v48 }
 0x100   : > { %1066 = vmatpush2.bf16.msra.mxu1 %v2123_v49  ;;  %1452 = vmatpush1.bf16.msra.mxu0 %v2126_v50 }
 0x101   : > { %1067 = vmatprep.subr.bf16.mxu1 %v2131_v51  ;;  %1453 = vmatprep.subr.bf16.mxu0 %v2134_v52 }
 0x104   : > { %1068 = vmatpush2.bf16.msra.mxu1 %v2129_v53  ;;  %1454 = vmatpush1.bf16.msra.mxu0 %v2132_v54 }
 0x105   : > { %1069 = vmatprep.subr.bf16.mxu1 %v2137_v55  ;;  %1455 = vmatprep.subr.bf16.mxu0 %v2140_v56 }
 0x108   : > { %1070 = vmatpush2.bf16.msra.mxu1 %v2135_v57  ;;  %1456 = vmatpush1.bf16.msra.mxu0 %v2138_v58 }
 0x109   : > { %1071 = vmatprep.subr.bf16.mxu1 %v2143_v59  ;;  %1457 = vmatprep.subr.bf16.mxu0 %v2146_v60 }
 0x10c   : > { %1072 = vmatpush2.bf16.msra.mxu1 %v2141_v61  ;;  %1458 = vmatpush1.bf16.msra.mxu0 %v2144_v62 }
 0x10d   : > { %1073 = vmatprep.subr.bf16.mxu1 %v2149_v63  ;;  %1459 = vmatprep.subr.bf16.mxu0 %v2152_v0  ;;  %v1537_v0 = vsub.s32 0, %v2258_v4 }
 0x110   : > { %1074 = vmatpush2.bf16.msra.mxu1 %v2147_v1  ;;  %1460 = vmatpush1.bf16.msra.mxu0 %v2150_v2  ;;  %v1533_v1 = vld [vmem:[%s2741_s2] sm:$0x7]  ;;  %v1541_v2 = vsub.s32 1, %v2258_v4 }
 0x111   : > { %1075 = vmatprep.subr.bf16.mxu1 %v2155_v3  ;;  %1461 = vmatprep.subr.bf16.mxu0 %v2158_v5  ;;  %v1538_v5 = vrot.slane %v1533_v1, %v1537_v0 }
 0x114   : > { %1076 = vmatpush2.bf16.msra.mxu1 %v2153_v6  ;;  %1462 = vmatpush1.bf16.msra.mxu0 %v2156_v7  ;;  %v1553_v6 = vld [vmem:[%s2742_s3] sm:$0xff]  ;;  %v1545_v7 = vsub.s32 2, %v2258_v4 }
 0x115   : > { %1077 = vmatprep.subr.bf16.mxu1 %v2161_v8  ;;  %1463 = vmatprep.subr.bf16.mxu0 %v2164_v9 }
 0x118   : > { %1078 = vmatpush2.bf16.msra.mxu1 %v2159_v10  ;;  %1464 = vmatpush1.bf16.msra.mxu0 %v2162_v13 }
 0x119   : > { %1465 = vmatprep.subr.bf16.mxu0 %v2167_v14  ;;  %1979 = vmatprep.subr.bf16.mxu1 %v2168_v15  ;;  %v1542_v14 = vrot.slane %v1533_v1, %v1541_v2  ;;  %v2216_v15 = vmov 1983009808  }
 0x11b   : > { %1080 = vmatmul.mubr.bf16.vlgmr.msra.gmra.mxu1 %v2274_v11  ;;  %v2178_v11 = vld [vmem:[%s2740_s1 + $0x440] ss:$12 sps:$4 sm:$0xff]  }
 0x11c   : > { %1466 = vmatpush2.bf16.msra.mxu0 %v2165_v16  ;;  %1980 = vmatpush3.bf16.msra.mxu1 %v2169_v18  ;;  %v1569_v16 = vunpack.c.l.s4 %v2216_v15 }
 0x11d   : > { %1467 = vmatprep.subr.bf16.mxu0 %v2172_v19  ;;  %1981 = vmatprep.subr.bf16.mxu1 %v2173_v20  ;;  %v1556_v19 = vcombine.high %v1553_v6, %v1553_v6 }
 0x11e   : > { %1522 = vmatprep.mubr.bf16.mxu1 %v2536_v48 }
 0x120   : > { %1468 = vmatpush2.bf16.msra.mxu0 %v2170_v21  ;;  %1982 = vmatpush3.bf16.msra.mxu1 %v2174_v12 }
 0x121   : > { %1469 = vmatprep.subr.bf16.mxu0 %v2177_v22  ;;  %1983 = vmatprep.subr.bf16.mxu1 %v2178_v11  ;;  %v1546_v11 = vrot.slane %v1533_v1, %v1545_v7 }
 0x124   : > { %1470 = vmatpush2.bf16.msra.mxu0 %v2175_v23  ;;  %1984 = vmatpush3.bf16.msra.mxu1 %v2179_v24 }
 0x125   : > { %1471 = vmatprep.subr.bf16.mxu0 %v2182_v25  ;;  %1985 = vmatprep.subr.bf16.mxu1 %v2183_v26  ;;  %v1570_v26 = vunpack.c.0.s8 %v1569_v16 }
 0x128   : > { %1472 = vmatpush2.bf16.msra.mxu0 %v2180_v27  ;;  %1986 = vmatpush3.bf16.msra.mxu1 %v2184_v28  ;;  %v1554_v28 = vld [vmem:[%s2742_s3 + $0x8] sm:$0xf] }
 0x129   : > { %1473 = vmatprep.subr.bf16.mxu0 %v2187_v29  ;;  %1987 = vmatprep.subr.bf16.mxu1 %v2188_v30 }
 0x12c   : > { %1474 = vmatpush2.bf16.msra.mxu0 %v2185_v31  ;;  %1988 = vmatpush3.bf16.msra.mxu1 %v2189_v32 }
 0x12d   : > { %1475 = vmatprep.subr.bf16.mxu0 %v2192_v33  ;;  %1989 = vmatprep.subr.bf16.mxu1 %v2193_v34 }
 0x130   : > { %1476 = vmatpush2.bf16.msra.mxu0 %v2190_v35  ;;  %1990 = vmatpush3.bf16.msra.mxu1 %v2194_v36  ;;  %v1573_v35 = vsub.s32 %v1570_v26, %v2258_v4 }
 0x131   : > { %1477 = vmatprep.subr.bf16.mxu0 %v2197_v37  ;;  %1991 = vmatprep.subr.bf16.mxu1 %v2198_v38 }
 0x134   : > { %1478 = vmatpush2.bf16.msra.mxu0 %v2195_v39  ;;  %1992 = vmatpush3.bf16.msra.mxu1 %v2199_v40 }
 0x135   : > { %1479 = vmatprep.subr.bf16.mxu0 %v2202_v41  ;;  %1993 = vmatprep.subr.bf16.mxu1 %v2203_v42 }
 0x138   : > { %1480 = vmatpush2.bf16.msra.mxu0 %v2200_v43  ;;  %1994 = vmatpush3.bf16.msra.mxu1 %v2204_v44 }
 0x13b   : > { %1482 = vmatmul.mubr.bf16.vlgmr.msra.gmra.mxu0 %v321_v45  ;;  %1523 = vmatmul.mubr.bf16.vlgmr.msra.gmra.mxu1 %v321_v45 }
 0x19b   : > { %v742_v46 = vpop.f32.mrf.mxu0  ;;  %v1951_v47 = vpop.f32.mrf.mxu1 }
 0x19d   : > { %v744_v48 = vpop.f32.mrf.mxu0  ;;  %v1952_v49 = vpop.f32.mrf.mxu1 }
 0x19e   : > { %v1953_v50 = vadd.f32 %v1952_v49, %v1951_v47 }
 0x19f   : > { %v746_v51 = vpop.f32.mrf.mxu0  ;;  %v1954_v52 = vpop.f32.mrf.mxu1 }
 0x1a1   : > { %v747_v53 = vpop.f32.mrf.mxu0  ;;  %v1955_v54 = vpop.f32.mrf.mxu1 }
 0x1bb   : > { %v1973_v55 = vpop.f32.mrf.mxu0 }
 0x1bd   : > { %v1974_v56 = vpop.f32.mrf.mxu0 }
 0x1be   : > { %v1975_v57 = vadd.f32 %v1974_v56, %v1973_v55 }
 0x1bf   : > { %v1976_v58 = vpop.f32.mrf.mxu0 }
 0x1c0   : > { %v1123_v59 = vadd.f32 %v1975_v57, %v1953_v50 }
 0x1c1   : > { %v1977_v60 = vpop.f32.mrf.mxu0 }
 0x1db   : > { %v1081_v61 = vpop.f32.mrf.mxu1 }
 0x1dc   : > { %v1082_v3 = vadd.f32 %v1081_v61, %v742_v46 }
 0x1dd   : > { %v1083_v62 = vpop.f32.mrf.mxu1 }
 0x1de   : > { %v1084_v10 = vadd.f32 %v1083_v62, %v744_v48 }
 0x1df   : > { %v1085_v17 = vpop.f32.mrf.mxu1 }
 0x1e1   : > { %v1086_v63 = vpop.f32.mrf.mxu1 }
 0x1fb   : > { %v1483_v8 = vpop.f32.mrf.mxu0  ;;  %v1995_v9 = vpop.f32.mrf.mxu1 }
 0x1fc   : > { %v1530_v13 = vadd.f32 %v1483_v8, %v1082_v3 }
 0x1fd   : > { %v1485_v18 = vpop.f32.mrf.mxu0  ;;  %v1996_v20 = vpop.f32.mrf.mxu1 }
 0x1fe   : > { %v1550_v21 = vadd.f32 %v1538_v5, %v1530_v13  ;;  %v1531_v12 = vadd.f32 %v1485_v18, %v1084_v10  ;;  %v1997_v22 = vadd.f32 %v1996_v20, %v1995_v9 }
 0x1ff   : > { %v1487_v23 = vpop.f32.mrf.mxu0  ;;  %v1998_v24 = vpop.f32.mrf.mxu1 }
 0x200   : > { %v1551_v25 = vadd.f32 %v1542_v14, %v1531_v12  ;;  %v1532_v27 = vadd.f32 %v1997_v22, %v1123_v59  ;;  %v1558_v31 = vadd.f32 %v1553_v6, %v1550_v21 }
 0x201   : > { %v1488_v29 = vpop.f32.mrf.mxu0  ;;  %v1999_v30 = vpop.f32.mrf.mxu1 }
 0x202   : > { %v1559_v32 = vadd.f32 %v1556_v19, %v1551_v25  ;;  %v1552_v33 = vadd.f32 %v1546_v11, %v1532_v27 }
 0x204   : > { %v1931_v34 = vpack.c.bf16 %v1559_v32, %v1558_v31  ;;  %v1560_v36 = vadd.f32 %v1554_v28, %v1552_v33 }
 0x206   : > { %v1563_v37 = vpack.c.bf16 %v1560_v36, %v1560_v36  ;;  %v1574_v38 = vrot.slane %v1931_v34, %v1573_v35 }
 0x208   : > { %v1581_v39 = vrot.slane %v1563_v37, %v1573_v35 }
 0x20a   : > { %v1582_v40 = vcombine.low %v1574_v38, %v1581_v39 }
 0x20c   : > { %1588 = vst.msk [vmem:[%s197_s30] sm:$0x3f] %vm1587_vm7, %v1582_v40 }
 0x20d PF: > { %s14_s15 = sadd.s32 1, %s2212_s15  }
 0x20e   : > { %p11_p4 = scmp.ge.s32.totalorder %s14_s15, 4  }
 0x210   :  { %13 = sbr.rel (!%p11_p4) target bundleno = 1 (0x1), region = 68 }

// kernel: critic_forward.19
= control target key start
LH: loop header
LB: loop body
LE: loop exit
PB: predicated region body
PF: predicated region fallthrough
CT: control target
= control target key end

     0   :  { %vm1039_vm0 = vmmov 0   ;;  %vm580_vm1 = vcmask 130048   ;;  %vm784_vm2 = vcmask 7168   ;;  %s1276_s1 = inlined_call_operand.vmem [shape: bf16[1040,1], index: 1, kind: input, shape index: {}]   ;;  %s1277_s0 = inlined_call_operand.vmem [shape: bf16[8,1040], index: 0, kind: input, shape index: {}]   ;;  %s1278_s2 = inlined_call_operand.<no memory space> [shape: f32[1,1], index: 2, kind: input, shape index: {}]   ;;  %s1279_s3 = inlined_call_operand.vmem [shape: f32[8,1], index: 3, kind: output, shape index: {}]  }
   0x1   :  { %v964_v0 = vld [vmem:[%s1276_s1 + $0x78] sm:$0xff]   ;;  %v968_v4 = vld [vmem:[%s1276_s1 + $0x70] sm:$0xff]   ;;  %v972_v8 = vld [vmem:[%s1276_s1 + $0x68] sm:$0xff]  }
   0x2   :  { %v965_v1 = vld [vmem:[%s1276_s1 + $0xf8] sm:$0xff]   ;;  %866 = vmatprep.subr.bf16.mxu0 %v964_v0  ;;  %v969_v5 = vld [vmem:[%s1276_s1 + $0xf0] sm:$0xff]   ;;  %v973_v9 = vld [vmem:[%s1276_s1 + $0xe8] sm:$0xff]  }
   0x3   :  { %v966_v2 = vld [vmem:[%s1276_s1 + $0x38] sm:$0xff]   ;;  %888 = vmatprep.subr.bf16.mxu1 %v965_v1  ;;  %v970_v6 = vld [vmem:[%s1276_s1 + $0x30] sm:$0xff]   ;;  %v974_v10 = vld [vmem:[%s1276_s1 + $0x28] sm:$0xff]  }
   0x4   :  { %v967_v3 = vld [vmem:[%s1276_s1 + $0xb8] sm:$0xff]   ;;  %867 = vmatpush3.bf16.msra.mxu0 %v966_v2  ;;  %v971_v7 = vld [vmem:[%s1276_s1 + $0xb0] sm:$0xff]   ;;  %v975_v11 = vld [vmem:[%s1276_s1 + $0xa8] sm:$0xff]  }
   0x5   :  { %889 = vmatpush3.bf16.msra.mxu1 %v967_v3  ;;  %868 = vmatprep.subr.bf16.mxu0 %v968_v4  ;;  %v976_v12 = vld [vmem:[%s1276_s1 + $0x60] sm:$0xff]   ;;  %v980_v16 = vld [vmem:[%s1276_s1 + $0x58] sm:$0xff]   ;;  %v984_v20 = vld [vmem:[%s1276_s1 + $0x50] sm:$0xff]  }
   0x6   :  { %890 = vmatprep.subr.bf16.mxu1 %v969_v5  ;;  %v977_v13 = vld [vmem:[%s1276_s1 + $0xe0] sm:$0xff]   ;;  %v981_v17 = vld [vmem:[%s1276_s1 + $0xd8] sm:$0xff]   ;;  %v985_v21 = vld [vmem:[%s1276_s1 + $0xd0] sm:$0xff]  }
   0x7   :  { %v978_v14 = vld [vmem:[%s1276_s1 + $0x20] sm:$0xff]   ;;  %v982_v18 = vld [vmem:[%s1276_s1 + $0x18] sm:$0xff]   ;;  %v986_v22 = vld [vmem:[%s1276_s1 + $0x10] sm:$0xff]  }
   0x8   :  { %869 = vmatpush3.bf16.msra.mxu0 %v970_v6  ;;  %v979_v15 = vld [vmem:[%s1276_s1 + $0xa0] sm:$0xff]   ;;  %v983_v19 = vld [vmem:[%s1276_s1 + $0x98] sm:$0xff]   ;;  %v987_v23 = vld [vmem:[%s1276_s1 + $0x90] sm:$0xff]  }
   0x9   :  { %891 = vmatpush3.bf16.msra.mxu1 %v971_v7  ;;  %870 = vmatprep.subr.bf16.mxu0 %v972_v8  ;;  %v988_v24 = vld [vmem:[%s1276_s1 + $0x48] sm:$0xff]   ;;  %v992_v28 = vld [vmem:[%s1276_s1 + $0x40] sm:$0xff]   ;;  %v1000_v38 = vld [vmem:[%s1276_s1 + $0x178] sm:$0xff]  }
   0xa   :  { %892 = vmatprep.subr.bf16.mxu1 %v973_v9  ;;  %v989_v25 = vld [vmem:[%s1276_s1 + $0xc8] sm:$0xff]   ;;  %v993_v29 = vld [vmem:[%s1276_s1 + $0xc0] sm:$0xff]   ;;  %v1001_v39 = vld [vmem:[%s1276_s1 + $0x1f8] sm:$0xff]  }
   0xb   :  { %v990_v26 = vld [vmem:[%s1276_s1 + $0x8] sm:$0xff]   ;;  %v994_v30 = vld [vmem:[%s1276_s1] sm:$0xff]   ;;  %v1002_v40 = vld [vmem:[%s1276_s1 + $0x138] sm:$0xff]  }
   0xc   :  { %871 = vmatpush3.bf16.msra.mxu0 %v974_v10  ;;  %v991_v27 = vld [vmem:[%s1276_s1 + $0x88] sm:$0xff]   ;;  %v995_v31 = vld [vmem:[%s1276_s1 + $0x80] sm:$0xff]   ;;  %v1003_v41 = vld [vmem:[%s1276_s1 + $0x1b8] sm:$0xff]  }
   0xd   :  { %893 = vmatpush3.bf16.msra.mxu1 %v975_v11  ;;  %872 = vmatprep.subr.bf16.mxu0 %v976_v12  ;;  %v17_v32 = vld [vmem:[%s1277_s0] sm:$0xff]  ;;  %v18_v33 = vld [vmem:[%s1277_s0 + $0x8] sm:$0xff]  ;;  %v1004_v42 = vld [vmem:[%s1276_s1 + $0x170] sm:$0xff]  }
   0xe   :  { %894 = vmatprep.subr.bf16.mxu1 %v977_v13  ;;  %v791_v34 = vcombine.low %v17_v32, %v17_v32  ;;  %v792_v35 = vcombine.high %v17_v32, %v17_v32  ;;  %v793_v36 = vcombine.low %v18_v33, %v18_v33  ;;  %v794_v37 = vcombine.high %v18_v33, %v18_v33  ;;  %v1005_v43 = vld [vmem:[%s1276_s1 + $0x1f0] sm:$0xff]   ;;  %v1008_v46 = vld [vmem:[%s1276_s1 + $0x168] sm:$0xff]   ;;  %v1012_v50 = vld [vmem:[%s1276_s1 + $0x160] sm:$0xff]  }
   0xf   :  { %v1006_v44 = vld [vmem:[%s1276_s1 + $0x130] sm:$0xff]   ;;  %v1009_v47 = vld [vmem:[%s1276_s1 + $0x1e8] sm:$0xff]   ;;  %v1013_v51 = vld [vmem:[%s1276_s1 + $0x1e0] sm:$0xff]   ;;  %v1038_v13 = vmov 0.0  }
  0x10   :  { %873 = vmatpush3.bf16.msra.mxu0 %v978_v14  ;;  %616 = vmatprep.mubr.bf16.mxu0 %v792_v35  ;;  %v1007_v45 = vld [vmem:[%s1276_s1 + $0x1b0] sm:$0xff]   ;;  %v1010_v48 = vld [vmem:[%s1276_s1 + $0x128] sm:$0xff]   ;;  %v1014_v52 = vld [vmem:[%s1276_s1 + $0x120] sm:$0xff]  }
  0x11   :  { %895 = vmatpush3.bf16.msra.mxu1 %v979_v15  ;;  %874 = vmatprep.subr.bf16.mxu0 %v980_v16  ;;  %v1011_v49 = vld [vmem:[%s1276_s1 + $0x1a8] sm:$0xff]   ;;  %v1015_v53 = vld [vmem:[%s1276_s1 + $0x1a0] sm:$0xff]   ;;  %v1016_v54 = vld [vmem:[%s1276_s1 + $0x158] sm:$0xff]   ;;  %v8_v15 = vstv %s1278_s2 }
  0x12   :  { %896 = vmatprep.subr.bf16.mxu1 %v981_v17  ;;  %656 = vmatprep.mubr.bf16.mxu1 %v794_v37  ;;  %v1017_v55 = vld [vmem:[%s1276_s1 + $0x1d8] sm:$0xff]   ;;  %v1020_v58 = vld [vmem:[%s1276_s1 + $0x150] sm:$0xff]   ;;  %v1024_v62 = vld [vmem:[%s1276_s1 + $0x148] sm:$0xff]   ;;  %9 = vst [vmem:[#allocation2] sm:$0x1] %v8_v15 }
  0x13   :  { %v1018_v56 = vld [vmem:[%s1276_s1 + $0x118] sm:$0xff]   ;;  %v1021_v59 = vld [vmem:[%s1276_s1 + $0x1d0] sm:$0xff]   ;;  %v1025_v63 = vld [vmem:[%s1276_s1 + $0x1c8] sm:$0xff]  }
  0x14   :  { %875 = vmatpush3.bf16.msra.mxu0 %v982_v18  ;;  %v1019_v57 = vld [vmem:[%s1276_s1 + $0x198] sm:$0xff]   ;;  %v1022_v60 = vld [vmem:[%s1276_s1 + $0x110] sm:$0xff]   ;;  %v1026_v0 = vld [vmem:[%s1276_s1 + $0x108] sm:$0xff]  }
  0x15   :  { %897 = vmatpush3.bf16.msra.mxu1 %v983_v19  ;;  %876 = vmatprep.subr.bf16.mxu0 %v984_v20  ;;  %v1023_v61 = vld [vmem:[%s1276_s1 + $0x190] sm:$0xff]   ;;  %v1027_v1 = vld [vmem:[%s1276_s1 + $0x188] sm:$0xff]   ;;  %v1028_v2 = vld [vmem:[%s1276_s1 + $0x140] sm:$0xff]  }
  0x16   :  { %898 = vmatprep.subr.bf16.mxu1 %v985_v21  ;;  %v1029_v3 = vld [vmem:[%s1276_s1 + $0x1c0] sm:$0xff]   ;;  %v19_v6 = vld [vmem:[%s1277_s0 + $0x10] sm:$0xff]  ;;  %v20_v9 = vld [vmem:[%s1277_s0 + $0x18] sm:$0xff] }
  0x17   :  { %v1030_v4 = vld [vmem:[%s1276_s1 + $0x100] sm:$0xff]   ;;  %v795_v7 = vcombine.low %v19_v6, %v19_v6  ;;  %v796_v8 = vcombine.high %v19_v6, %v19_v6  ;;  %v797_v10 = vcombine.low %v20_v9, %v20_v9  ;;  %v798_v11 = vcombine.high %v20_v9, %v20_v9 }
  0x18   :  { %877 = vmatpush3.bf16.msra.mxu0 %v986_v22  ;;  %v1031_v5 = vld [vmem:[%s1276_s1 + $0x180] sm:$0xff]  }
  0x19   :  { %899 = vmatpush3.bf16.msra.mxu1 %v987_v23  ;;  %878 = vmatprep.subr.bf16.mxu0 %v988_v24  ;;  %v1036_v12 = vld [vmem:[%s1276_s1 + $0x200] sm:$0xff]  }
  0x1a   :  { %900 = vmatprep.subr.bf16.mxu1 %v989_v25  ;;  %v1037_v14 = vld [vmem:[%s1277_s0 + $0x20] ss:$0 sps:$4 sm:$0xff]  }
  0x1b   :  { %v790_v25 = vld [vmem:[#allocation2] ss:$0 sm:$0xff] }
  0x1c   :  { %879 = vmatpush3.bf16.msra.mxu0 %v990_v26 }
  0x1d   :  { %901 = vmatpush3.bf16.msra.mxu1 %v991_v27  ;;  %880 = vmatprep.subr.bf16.mxu0 %v992_v28 }
  0x1e   :  { %902 = vmatprep.subr.bf16.mxu1 %v993_v29 }
  0x20   :  { %881 = vmatpush3.bf16.msra.mxu0 %v994_v30 }
  0x21   :  { %903 = vmatpush3.bf16.msra.mxu1 %v995_v31  ;;  %910 = vmatprep.subr.bf16.mxu0 %v1000_v38 }
  0x22   :  { %932 = vmatprep.subr.bf16.mxu1 %v1001_v39 }
  0x23   :  { %617 = vmatmul.mubr.bf16.vlgmr.msra.gmra.mxu0 %v791_v34 }
  0x24   :  { %657 = vmatmul.mubr.bf16.vlgmr.msra.gmra.mxu1 %v793_v36  ;;  %911 = vmatpush3.bf16.msra.mxu0 %v1002_v40 }
  0x25   :  { %933 = vmatpush3.bf16.msra.mxu1 %v1003_v41  ;;  %912 = vmatprep.subr.bf16.mxu0 %v1004_v42 }
  0x26   :  { %934 = vmatprep.subr.bf16.mxu1 %v1005_v43  ;;  %696 = vmatprep.mubr.bf16.mxu0 %v796_v8 }
  0x27   :  { %736 = vmatprep.mubr.bf16.mxu1 %v798_v11 }
  0x28   :  { %913 = vmatpush3.bf16.msra.mxu0 %v1006_v44 }
  0x29   :  { %935 = vmatpush3.bf16.msra.mxu1 %v1007_v45  ;;  %914 = vmatprep.subr.bf16.mxu0 %v1008_v46 }
  0x2a   :  { %936 = vmatprep.subr.bf16.mxu1 %v1009_v47 }
  0x2c   :  { %915 = vmatpush3.bf16.msra.mxu0 %v1010_v48 }
  0x2d   :  { %937 = vmatpush3.bf16.msra.mxu1 %v1011_v49  ;;  %916 = vmatprep.subr.bf16.mxu0 %v1012_v50 }
  0x2e   :  { %938 = vmatprep.subr.bf16.mxu1 %v1013_v51 }
  0x30   :  { %917 = vmatpush3.bf16.msra.mxu0 %v1014_v52 }
  0x31   :  { %939 = vmatpush3.bf16.msra.mxu1 %v1015_v53  ;;  %918 = vmatprep.subr.bf16.mxu0 %v1016_v54 }
  0x32   :  { %940 = vmatprep.subr.bf16.mxu1 %v1017_v55 }
  0x34   :  { %919 = vmatpush3.bf16.msra.mxu0 %v1018_v56 }
  0x35   :  { %941 = vmatpush3.bf16.msra.mxu1 %v1019_v57  ;;  %920 = vmatprep.subr.bf16.mxu0 %v1020_v58 }
  0x36   :  { %942 = vmatprep.subr.bf16.mxu1 %v1021_v59 }
  0x38   :  { %921 = vmatpush3.bf16.msra.mxu0 %v1022_v60 }
  0x39   :  { %943 = vmatpush3.bf16.msra.mxu1 %v1023_v61  ;;  %922 = vmatprep.subr.bf16.mxu0 %v1024_v62 }
  0x3a   :  { %944 = vmatprep.subr.bf16.mxu1 %v1025_v63 }
  0x3c   :  { %923 = vmatpush3.bf16.msra.mxu0 %v1026_v0 }
  0x3d   :  { %945 = vmatpush3.bf16.msra.mxu1 %v1027_v1  ;;  %924 = vmatprep.subr.bf16.mxu0 %v1028_v2 }
  0x3e   :  { %946 = vmatprep.subr.bf16.mxu1 %v1029_v3 }
  0x40   :  { %925 = vmatpush3.bf16.msra.mxu0 %v1030_v4 }
  0x41   :  { %947 = vmatpush3.bf16.msra.mxu1 %v1031_v5  ;;  %956 = vmatprep.subr.bf16.mxu0 %v1038_v13 }
  0x43   :  { %697 = vmatmul.mubr.bf16.vlgmr.msra.gmra.mxu0 %v795_v7 }
  0x44   :  { %737 = vmatmul.mubr.bf16.vlgmr.msra.gmra.mxu1 %v797_v10  ;;  %957 = vmatpush3.bf16.msra.mxu0 %v1036_v12 }
  0x45   :  { %958 = vmatprep.mubr.msk.bf16.mxu0 %vm1039_vm0, %v1038_v13 }
  0x4b   :  { %959 = vmatmul.mubr.msk.bf16.vlgmr.msra.gmra.mxu0 %vm580_vm1, %v1037_v14 }
  0xe3   :  { %v882_v16 = vpop.f32.mrf.mxu0 }
  0xe4   :  { %v904_v17 = vpop.f32.mrf.mxu1 }
  0xe5   :  { %v883_v18 = vpop.f32.mrf.mxu0 }
  0xe6   :  { %v905_v19 = vpop.f32.mrf.mxu1  ;;  %v884_v24 = vadd.f32 %v883_v18, %v882_v16 }
  0xe7   :  { %v885_v20 = vpop.f32.mrf.mxu0  ;;  %v906_v27 = vadd.f32 %v905_v19, %v904_v17 }
  0xe8   :  { %v907_v21 = vpop.f32.mrf.mxu1  ;;  %v619_v26 = vadd.f32 %v884_v24, %v790_v25 }
  0xe9   :  { %v886_v22 = vpop.f32.mrf.mxu0 }
  0xea   :  { %v908_v23 = vpop.f32.mrf.mxu1  ;;  %v659_v32 = vadd.f32 %v906_v27, %v619_v26 }
 0x103   :  { %v926_v28 = vpop.f32.mrf.mxu0 }
 0x104   :  { %v948_v29 = vpop.f32.mrf.mxu1 }
 0x105   :  { %v927_v30 = vpop.f32.mrf.mxu0 }
 0x106   :  { %v949_v31 = vpop.f32.mrf.mxu1  ;;  %v928_v33 = vadd.f32 %v927_v30, %v926_v28 }
 0x107   :  { %v950_v34 = vadd.f32 %v949_v31, %v948_v29  ;;  %v929_v35 = vpop.f32.mrf.mxu0 }
 0x108   :  { %v951_v36 = vpop.f32.mrf.mxu1  ;;  %v699_v37 = vadd.f32 %v928_v33, %v659_v32 }
 0x109   :  { %v930_v38 = vpop.f32.mrf.mxu0 }
 0x10a   :  { %v952_v39 = vpop.f32.mrf.mxu1  ;;  %v739_v40 = vadd.f32 %v950_v34, %v699_v37 }
 0x10b   :  { %v778_v41 = vpop.f32.mrf.mxu0 }
 0x10c   :  { %v779_v42 = vadd.f32 %v778_v41, %v739_v40 }
 0x10d   :  { %v960_v43 = vpop.f32.mrf.mxu0 }
 0x10e   :  { %785 = vst.msk [vmem:[%s1279_s3] sm:$0xff] %vm784_vm2, %v779_v42 }
 0x10f   :  { %v781_v44 = vpop.f32.mrf.mxu0 }
 0x111   :  { %v961_v45 = vpop.f32.mrf.mxu0 }

</bundles_post_ra>
